<compile_context>
chip_gen: v6e
topology: v6e:2x2x1
jax: 0.10.0
libtpu: 0.0.40
codegen_flags: <defaults>
</compile_context>

<pallas_src>
import functools

import jax
import jax.numpy as jnp
from jax import lax
from jax.experimental import pallas as pl
from jax.experimental.pallas import tpu as pltpu

# 512-row tiles sit near the HBM roofline on v5e/v6e while keeping
# double-buffered blocks comfortably inside v7x's 64 MiB VMEM.  The VMEM limit
# is raised above the 16/32 MiB scoped defaults but stays below v7x physical.
_BLOCK_ROWS = 512
_VMEM_LIMIT_BYTES = 48 * 1024 * 1024


def _pick_block(hw, target=_BLOCK_ROWS):
    blk = min(target, hw)
    while hw % blk != 0:
        blk //= 2
    assert blk >= 8 and hw % blk == 0, (hw, blk)
    return blk


# ----------------------------- Pallas kernels ------------------------------

def _qkv_proj_kernel(x_ref, w_ref, b_ref, v_ref, q_ref, k_ref, *, c, c8):
    # x_ref: (bm, C) bf16; w_ref: (C, C + 2*C8) bf16 with columns [ v | q | k ];
    # b_ref: (1, C + 2*C8) f32.  One lane-dense MXU matmul for all projections.
    y = jnp.dot(x_ref[...], w_ref[...], preferred_element_type=jnp.float32)
    y = y + b_ref[...]
    v_ref[...] = y[:, :c].astype(v_ref.dtype)
    q_ref[...] = y[:, c:c + c8].astype(q_ref.dtype)
    k_ref[...] = y[:, c + c8:c + 2 * c8].astype(k_ref.dtype)


def _flash_attn_kernel(x_ref, q_ref, k_ref, v_ref, gamma_ref, o_ref,
                       m_sc, l_sc, acc_sc):
    kv = pl.program_id(2)

    @pl.when(kv == 0)
    def _():
        m_sc[...] = jnp.full_like(m_sc, -jnp.inf)
        l_sc[...] = jnp.zeros_like(l_sc)
        acc_sc[...] = jnp.zeros_like(acc_sc)

    # s[i, j] = <q_i, k_j>; contract last dims directly (no explicit k.T copy).
    s = lax.dot_general(q_ref[...], k_ref[...],
                        (((1,), (1,)), ((), ())),
                        preferred_element_type=jnp.float32)
    m_prev = m_sc[...]
    m_new = jnp.maximum(m_prev, jnp.max(s, axis=-1, keepdims=True))
    alpha = jnp.exp(m_prev - m_new)
    p = jnp.exp(s - m_new)
    l_sc[...] = alpha * l_sc[...] + jnp.sum(p, axis=-1, keepdims=True)
    acc_sc[...] = alpha * acc_sc[...] + jnp.dot(
        p.astype(v_ref.dtype), v_ref[...], preferred_element_type=jnp.float32)
    m_sc[...] = m_new

    @pl.when(kv == pl.num_programs(2) - 1)
    def _():
        attn = acc_sc[...] * pl.reciprocal(l_sc[...], approx=True)
        o_ref[...] = (gamma_ref[0] * attn + x_ref[...]).astype(o_ref.dtype)


# ------------------------------ kernel wrappers -----------------------------

def _qkv_projection(x_flat, w_fused, b_fused, c, c8):
    B, HW, _ = x_flat.shape
    bm = _pick_block(HW)
    kernel = functools.partial(_qkv_proj_kernel, c=c, c8=c8)
    v, q, k = pl.pallas_call(
        kernel,
        out_shape=(
            jax.ShapeDtypeStruct((B, HW, c), jnp.bfloat16),
            jax.ShapeDtypeStruct((B, HW, c8), jnp.bfloat16),
            jax.ShapeDtypeStruct((B, HW, c8), jnp.bfloat16),
        ),
        grid=(B, HW // bm),
        in_specs=[
            pl.BlockSpec((None, bm, c), lambda b, i: (b, i, 0)),
            pl.BlockSpec((c, c + 2 * c8), lambda b, i: (0, 0)),
            pl.BlockSpec((1, c + 2 * c8), lambda b, i: (0, 0)),
        ],
        out_specs=(
            pl.BlockSpec((None, bm, c), lambda b, i: (b, i, 0)),
            pl.BlockSpec((None, bm, c8), lambda b, i: (b, i, 0)),
            pl.BlockSpec((None, bm, c8), lambda b, i: (b, i, 0)),
        ),
        compiler_params=pltpu.CompilerParams(
            dimension_semantics=("parallel", "parallel"),
            vmem_limit_bytes=_VMEM_LIMIT_BYTES),
    )(x_flat.astype(jnp.bfloat16), w_fused, b_fused)
    return q, k, v


def _flash_attention(x_flat, q, k, v, gamma):
    B, HW, C = x_flat.shape
    C8 = q.shape[-1]
    bq = _pick_block(HW)
    bkv = _pick_block(HW)
    return pl.pallas_call(
        _flash_attn_kernel,
        out_shape=jax.ShapeDtypeStruct((B, HW, C), jnp.float32),
        grid=(B, HW // bq, HW // bkv),
        in_specs=[
            pl.BlockSpec((None, bq, C), lambda b, i, j: (b, i, 0)),    # x (residual)
            pl.BlockSpec((None, bq, C8), lambda b, i, j: (b, i, 0)),   # q
            pl.BlockSpec((None, bkv, C8), lambda b, i, j: (b, j, 0)),  # k
            pl.BlockSpec((None, bkv, C), lambda b, i, j: (b, j, 0)),   # v
            pl.BlockSpec((1,), lambda b, i, j: (0,),
                         memory_space=pltpu.MemorySpace.SMEM),         # gamma
        ],
        out_specs=pl.BlockSpec((None, bq, C), lambda b, i, j: (b, i, 0)),
        scratch_shapes=[
            pltpu.VMEM((bq, 1), jnp.float32),   # running row-max
            pltpu.VMEM((bq, 1), jnp.float32),   # running row-sum
            pltpu.VMEM((bq, C), jnp.float32),   # f32 output accumulator
        ],
        compiler_params=pltpu.CompilerParams(
            dimension_semantics=("parallel", "parallel", "arbitrary"),
            vmem_limit_bytes=_VMEM_LIMIT_BYTES),
    )(x_flat, q, k, v, gamma)


# ------------------------------ forward pass ---------------------------------

def self_attention_forward(params, x_nchw):
    B, C, H, W = x_nchw.shape
    C8 = params["wq"].shape[1]
    HW = H * W
    x_flat = jnp.transpose(x_nchw, (0, 2, 3, 1)).reshape(B, HW, C)
    x_flat = x_flat.astype(jnp.float32)

    # Fused [v | q | k] projection weights (bf16 for the MXU), f32 bias.
    w_fused = jnp.concatenate(
        [params["wv"], params["wq"], params["wk"]], axis=1).astype(jnp.bfloat16)
    b_fused = jnp.concatenate(
        [params["bv"], params["bq"], params["bk"]], axis=0).reshape(1, C + 2 * C8)

    q, k, v = _qkv_projection(x_flat, w_fused, b_fused, C, C8)
    out_flat = _flash_attention(x_flat, q, k, v, params["gamma"])
    return jnp.transpose(out_flat.reshape(B, H, W, C), (0, 3, 1, 2))


# --------------------------- pure-JAX reference ------------------------------

def self_attention_reference(params, x_nchw):
    B, C, H, W = x_nchw.shape
    xf = jnp.transpose(x_nchw, (0, 2, 3, 1)).reshape(B, H * W, C)
    q = xf @ params["wq"] + params["bq"]
    k = xf @ params["wk"] + params["bk"]
    v = xf @ params["wv"] + params["bv"]
    att = jax.nn.softmax(jnp.einsum("bic,bjc->bij", q, k), axis=-1)
    out = jnp.einsum("bij,bjc->bic", att, v)
    out = params["gamma"][0] * out + xf
    return jnp.transpose(out.reshape(B, H, W, C), (0, 3, 1, 2))


# --------------------------------- main --------------------------------------

if __name__ == "__main__":
    key = jax.random.PRNGKey(0)
    kx, kq, kk, kv_, kbq, kbk, kbv = jax.random.split(key, 7)

    B, C, H, W = 2, 128, 32, 32          # small, tile-aligned demo (HW = 1024)
    C8 = C // 8
    scale = 1.0 / (C ** 0.5)

    params = {
        "wq": jax.random.normal(kq, (C, C8), jnp.float32) * scale,
        "wk": jax.random.normal(kk, (C, C8), jnp.float32) * scale,
        "wv": jax.random.normal(kv_, (C, C), jnp.float32) * scale,
        "bq": jax.random.normal(kbq, (C8,), jnp.float32) * scale,
        "bk": jax.random.normal(kbk, (C8,), jnp.float32) * scale,
        "bv": jax.random.normal(kbv, (C,), jnp.float32) * scale,
        # PyTorch initializes gamma to 0 (attention disabled at init); use a
        # nonzero value so the attention path is exercised and verified.
        "gamma": jnp.full((1,), 0.5, jnp.float32),
    }
    x = jax.random.normal(kx, (B, C, H, W), jnp.float32)

    fwd = jax.jit(self_attention_forward)
    out = fwd(params, x)
    jax.block_until_ready(out)

    assert out.shape == (B, C, H, W), out.shape
    assert out.dtype == jnp.float32
    assert bool(jnp.all(jnp.isfinite(out)))

    ref = self_attention_reference(params, x)
    max_err = float(jnp.max(jnp.abs(out - ref)))
    assert bool(jnp.allclose(out, ref, atol=5e-2, rtol=5e-2)), max_err

    print("KERNEL_OK")
</pallas_src>

<mosaic_0001>
module attributes {stable_mosaic.version = 11 : i64} {
  func.func @_qkv_proj_kernel(%arg0: i32, %arg1: i32, %arg2: memref<1x512x128xbf16, #tpu.memory_space<vmem>>, %arg3: memref<128x160xbf16, #tpu.memory_space<vmem>>, %arg4: memref<1x160xf32, #tpu.memory_space<vmem>>, %arg5: memref<1x512x128xbf16, #tpu.memory_space<vmem>>, %arg6: memref<1x512x16xbf16, #tpu.memory_space<vmem>>, %arg7: memref<1x512x16xbf16, #tpu.memory_space<vmem>>) attributes {dimension_semantics = [#tpu.dimension_semantics<parallel>, #tpu.dimension_semantics<parallel>], iteration_bounds = array<i64: 2, 2>, scalar_prefetch = 0 : i64, scratch_operands = 0 : i64, tpu.core_type = #tpu.core_type<tc>, window_params = [{transform_indices = @transform_0, window_bounds = array<i64: 1, 512, 128>}, {pipeline_mode = #tpu.pipeline_mode<synchronous>, transform_indices = @transform_1, window_bounds = array<i64: 128, 160>}, {pipeline_mode = #tpu.pipeline_mode<synchronous>, transform_indices = @transform_2, window_bounds = array<i64: 1, 160>}, {transform_indices = @transform_3, window_bounds = array<i64: 1, 512, 128>}, {transform_indices = @transform_4, window_bounds = array<i64: 1, 512, 16>}, {transform_indices = @transform_5, window_bounds = array<i64: 1, 512, 16>}]} {
    %c0 = arith.constant 0 : index
    %c0_0 = arith.constant 0 : index
    %c0_1 = arith.constant 0 : index
    %0 = vector.load %arg2[%c0, %c0_0, %c0_1] : memref<1x512x128xbf16, #tpu.memory_space<vmem>>, vector<1x512x128xbf16>
    %1 = vector.shape_cast %0 : vector<1x512x128xbf16> to vector<512x128xbf16>
    %c0_2 = arith.constant 0 : index
    %c0_3 = arith.constant 0 : index
    %2 = vector.load %arg3[%c0_2, %c0_3] : memref<128x160xbf16, #tpu.memory_space<vmem>>, vector<128x160xbf16>
    %cst = arith.constant dense<0.000000e+00> : vector<512x160xf32>
    %3 = tpu.matmul %1, %2, %cst {dimension_numbers = #tpu.dot_dimension_numbers<[1], [0], [0], [1], [0, 0, 1, 1], [], []>} : vector<512x128xbf16>, vector<128x160xbf16>, vector<512x160xf32> -> vector<512x160xf32>
    %c0_4 = arith.constant 0 : index
    %c0_5 = arith.constant 0 : index
    %4 = vector.load %arg4[%c0_4, %c0_5] : memref<1x160xf32, #tpu.memory_space<vmem>>, vector<1x160xf32>
    %5 = vector.broadcast %4 : vector<1x160xf32> to vector<512x160xf32>
    %6 = arith.addf %3, %5 : vector<512x160xf32>
    %7 = vector.extract_strided_slice %6 {offsets = [0, 0], sizes = [512, 128], strides = [1, 1]} : vector<512x160xf32> to vector<512x128xf32>
    %8 = arith.truncf %7 : vector<512x128xf32> to vector<512x128xbf16>
    %c0_6 = arith.constant 0 : index
    %c0_7 = arith.constant 0 : index
    %c0_8 = arith.constant 0 : index
    %9 = vector.load %arg5[%c0_6, %c0_7, %c0_8] : memref<1x512x128xbf16, #tpu.memory_space<vmem>>, vector<1x512x128xbf16>
    %10 = vector.shape_cast %9 : vector<1x512x128xbf16> to vector<512x128xbf16>
    %11 = vector.shape_cast %8 : vector<512x128xbf16> to vector<1x512x128xbf16>
    tpu.vector_store %arg5[%c0_6, %c0_7, %c0_8], %11 {strides = array<i32>} : memref<1x512x128xbf16, #tpu.memory_space<vmem>>, vector<1x512x128xbf16>,
    %12 = vector.extract_strided_slice %6 {offsets = [0, 128], sizes = [512, 16], strides = [1, 1]} : vector<512x160xf32> to vector<512x16xf32>
    %13 = arith.truncf %12 : vector<512x16xf32> to vector<512x16xbf16>
    %c0_9 = arith.constant 0 : index
    %c0_10 = arith.constant 0 : index
    %c0_11 = arith.constant 0 : index
    %14 = vector.load %arg6[%c0_9, %c0_10, %c0_11] : memref<1x512x16xbf16, #tpu.memory_space<vmem>>, vector<1x512x16xbf16>
    %15 = vector.shape_cast %14 : vector<1x512x16xbf16> to vector<512x16xbf16>
    %16 = vector.shape_cast %13 : vector<512x16xbf16> to vector<1x512x16xbf16>
    tpu.vector_store %arg6[%c0_9, %c0_10, %c0_11], %16 {strides = array<i32>} : memref<1x512x16xbf16, #tpu.memory_space<vmem>>, vector<1x512x16xbf16>,
    %17 = vector.extract_strided_slice %6 {offsets = [0, 144], sizes = [512, 16], strides = [1, 1]} : vector<512x160xf32> to vector<512x16xf32>
    %18 = arith.truncf %17 : vector<512x16xf32> to vector<512x16xbf16>
    %c0_12 = arith.constant 0 : index
    %c0_13 = arith.constant 0 : index
    %c0_14 = arith.constant 0 : index
    %19 = vector.load %arg7[%c0_12, %c0_13, %c0_14] : memref<1x512x16xbf16, #tpu.memory_space<vmem>>, vector<1x512x16xbf16>
    %20 = vector.shape_cast %19 : vector<1x512x16xbf16> to vector<512x16xbf16>
    %21 = vector.shape_cast %18 : vector<512x16xbf16> to vector<1x512x16xbf16>
    tpu.vector_store %arg7[%c0_12, %c0_13, %c0_14], %21 {strides = array<i32>} : memref<1x512x16xbf16, #tpu.memory_space<vmem>>, vector<1x512x16xbf16>,
    return
  }
  func.func @transform_0(%arg0: i32, %arg1: i32) -> (i32, i32, i32) {
    %c0_i32 = arith.constant 0 : i32
    %c0_i32_0 = arith.constant 0 : i32
    return %arg0, %arg1, %c0_i32 : i32, i32, i32
  }
  func.func @transform_1(%arg0: i32, %arg1: i32) -> (i32, i32) {
    %c0_i32 = arith.constant 0 : i32
    %c0_i32_0 = arith.constant 0 : i32
    %c0_i32_1 = arith.constant 0 : i32
    return %c0_i32, %c0_i32_0 : i32, i32
  }
  func.func @transform_2(%arg0: i32, %arg1: i32) -> (i32, i32) {
    %c0_i32 = arith.constant 0 : i32
    %c0_i32_0 = arith.constant 0 : i32
    %c0_i32_1 = arith.constant 0 : i32
    return %c0_i32, %c0_i32_0 : i32, i32
  }
  func.func @transform_3(%arg0: i32, %arg1: i32) -> (i32, i32, i32) {
    %c0_i32 = arith.constant 0 : i32
    %c0_i32_0 = arith.constant 0 : i32
    return %arg0, %arg1, %c0_i32 : i32, i32, i32
  }
  func.func @transform_4(%arg0: i32, %arg1: i32) -> (i32, i32, i32) {
    %c0_i32 = arith.constant 0 : i32
    %c0_i32_0 = arith.constant 0 : i32
    return %arg0, %arg1, %c0_i32 : i32, i32, i32
  }
  func.func @transform_5(%arg0: i32, %arg1: i32) -> (i32, i32, i32) {
    %c0_i32 = arith.constant 0 : i32
    %c0_i32_0 = arith.constant 0 : i32
    return %arg0, %arg1, %c0_i32 : i32, i32, i32
  }
}

module attributes {stable_mosaic.version = 11 : i64} {
  func.func @_flash_attn_kernel(%arg0: i32, %arg1: i32, %arg2: i32, %arg3: memref<1x512x128xf32, #tpu.memory_space<vmem>>, %arg4: memref<1x512x16xbf16, #tpu.memory_space<vmem>>, %arg5: memref<1x512x16xbf16, #tpu.memory_space<vmem>>, %arg6: memref<1x512x128xbf16, #tpu.memory_space<vmem>>, %arg7: memref<1xf32, #tpu.memory_space<smem>>, %arg8: memref<1x512x128xf32, #tpu.memory_space<vmem>>, %arg9: memref<512x1xf32, #tpu.memory_space<vmem>>, %arg10: memref<512x1xf32, #tpu.memory_space<vmem>>, %arg11: memref<512x128xf32, #tpu.memory_space<vmem>>) attributes {dimension_semantics = [#tpu.dimension_semantics<parallel>, #tpu.dimension_semantics<parallel>, #tpu.dimension_semantics<arbitrary>], iteration_bounds = array<i64: 2, 2, 2>, scalar_prefetch = 0 : i64, scratch_operands = 3 : i64, tpu.core_type = #tpu.core_type<tc>, window_params = [{transform_indices = @transform_0, window_bounds = array<i64: 1, 512, 128>}, {transform_indices = @transform_1, window_bounds = array<i64: 1, 512, 16>}, {transform_indices = @transform_2, window_bounds = array<i64: 1, 512, 16>}, {transform_indices = @transform_3, window_bounds = array<i64: 1, 512, 128>}, {transform_indices = @transform_4, window_bounds = array<i64: 1>}, {transform_indices = @transform_5, window_bounds = array<i64: 1, 512, 128>}]} {
    %c0_i32 = arith.constant 0 : i32
    %0 = arith.cmpi eq, %arg2, %c0_i32 : i32
    %1 = arith.extui %0 : i1 to i32
    %c0_i32_0 = arith.constant 0 : i32
    %2 = arith.cmpi ne, %1, %c0_i32_0 : i32
    scf.if %2 {
      %cst_25 = arith.constant 0xFF800000 : f32
      %36 = vector.broadcast %cst_25 : f32 to vector<512x1xf32>
      %c0_26 = arith.constant 0 : index
      %c0_27 = arith.constant 0 : index
      %37 = vector.load %arg9[%c0_26, %c0_27] : memref<512x1xf32, #tpu.memory_space<vmem>>, vector<512x1xf32>
      tpu.vector_store %arg9[%c0_26, %c0_27], %36 {strides = array<i32>} : memref<512x1xf32, #tpu.memory_space<vmem>>, vector<512x1xf32>,
      %cst_28 = arith.constant 0.000000e+00 : f32
      %38 = vector.broadcast %cst_28 : f32 to vector<512x1xf32>
      %c0_29 = arith.constant 0 : index
      %c0_30 = arith.constant 0 : index
      %39 = vector.load %arg10[%c0_29, %c0_30] : memref<512x1xf32, #tpu.memory_space<vmem>>, vector<512x1xf32>
      tpu.vector_store %arg10[%c0_29, %c0_30], %38 {strides = array<i32>} : memref<512x1xf32, #tpu.memory_space<vmem>>, vector<512x1xf32>,
      %cst_31 = arith.constant 0.000000e+00 : f32
      %40 = vector.broadcast %cst_31 : f32 to vector<512x128xf32>
      %c0_32 = arith.constant 0 : index
      %c0_33 = arith.constant 0 : index
      %41 = vector.load %arg11[%c0_32, %c0_33] : memref<512x128xf32, #tpu.memory_space<vmem>>, vector<512x128xf32>
      tpu.vector_store %arg11[%c0_32, %c0_33], %40 {strides = array<i32>} : memref<512x128xf32, #tpu.memory_space<vmem>>, vector<512x128xf32>,
    } else {
    }
    %c0 = arith.constant 0 : index
    %c0_1 = arith.constant 0 : index
    %c0_2 = arith.constant 0 : index
    %3 = vector.load %arg4[%c0, %c0_1, %c0_2] : memref<1x512x16xbf16, #tpu.memory_space<vmem>>, vector<1x512x16xbf16>
    %4 = vector.shape_cast %3 : vector<1x512x16xbf16> to vector<512x16xbf16>
    %c0_3 = arith.constant 0 : index
    %c0_4 = arith.constant 0 : index
    %c0_5 = arith.constant 0 : index
    %5 = vector.load %arg5[%c0_3, %c0_4, %c0_5] : memref<1x512x16xbf16, #tpu.memory_space<vmem>>, vector<1x512x16xbf16>
    %6 = vector.shape_cast %5 : vector<1x512x16xbf16> to vector<512x16xbf16>
    %cst = arith.constant dense<0.000000e+00> : vector<512x512xf32>
    %7 = tpu.matmul %4, %6, %cst {dimension_numbers = #tpu.dot_dimension_numbers<[1], [1], [0], [0], [0, 0, 1, 0], [], []>} : vector<512x16xbf16>, vector<512x16xbf16>, vector<512x512xf32> -> vector<512x512xf32>
    %c0_6 = arith.constant 0 : index
    %c0_7 = arith.constant 0 : index
    %8 = vector.load %arg9[%c0_6, %c0_7] : memref<512x1xf32, #tpu.memory_space<vmem>>, vector<512x1xf32>
    %cst_8 = arith.constant dense<0xFF800000> : vector<512xf32>
    %9 = vector.multi_reduction <maximumf>, %7, %cst_8 [1] : vector<512x512xf32> to vector<512xf32>
    %10 = vector.shape_cast %9 : vector<512xf32> to vector<512x1xf32>
    %11 = arith.maximumf %8, %10 : vector<512x1xf32>
    %12 = arith.subf %8, %11 : vector<512x1xf32>
    %13 = math.exp %12 : vector<512x1xf32>
    %14 = vector.broadcast %11 : vector<512x1xf32> to vector<512x512xf32>
    %15 = arith.subf %7, %14 : vector<512x512xf32>
    %16 = math.exp %15 : vector<512x512xf32>
    %c0_9 = arith.constant 0 : index
    %c0_10 = arith.constant 0 : index
    %17 = vector.load %arg10[%c0_9, %c0_10] : memref<512x1xf32, #tpu.memory_space<vmem>>, vector<512x1xf32>
    %18 = arith.mulf %13, %17 : vector<512x1xf32>
    %cst_11 = arith.constant dense<0.000000e+00> : vector<512xf32>
    %19 = vector.multi_reduction <add>, %16, %cst_11 [1] : vector<512x512xf32> to vector<512xf32>
    %20 = vector.shape_cast %19 : vector<512xf32> to vector<512x1xf32>
    %21 = arith.addf %18, %20 : vector<512x1xf32>
    %c0_12 = arith.constant 0 : index
    %c0_13 = arith.constant 0 : index
    %22 = vector.load %arg10[%c0_12, %c0_13] : memref<512x1xf32, #tpu.memory_space<vmem>>, vector<512x1xf32>
    tpu.vector_store %arg10[%c0_12, %c0_13], %21 {strides = array<i32>} : memref<512x1xf32, #tpu.memory_space<vmem>>, vector<512x1xf32>,
    %c0_14 = arith.constant 0 : index
    %c0_15 = arith.constant 0 : index
    %23 = vector.load %arg11[%c0_14, %c0_15] : memref<512x128xf32, #tpu.memory_space<vmem>>, vector<512x128xf32>
    %24 = vector.broadcast %13 : vector<512x1xf32> to vector<512x128xf32>
    %25 = arith.mulf %24, %23 : vector<512x128xf32>
    %26 = arith.truncf %16 : vector<512x512xf32> to vector<512x512xbf16>
    %c0_16 = arith.constant 0 : index
    %c0_17 = arith.constant 0 : index
    %c0_18 = arith.constant 0 : index
    %27 = vector.load %arg6[%c0_16, %c0_17, %c0_18] : memref<1x512x128xbf16, #tpu.memory_space<vmem>>, vector<1x512x128xbf16>
    %28 = vector.shape_cast %27 : vector<1x512x128xbf16> to vector<512x128xbf16>
    %cst_19 = arith.constant dense<0.000000e+00> : vector<512x128xf32>
    %29 = tpu.matmul %26, %28, %cst_19 {dimension_numbers = #tpu.dot_dimension_numbers<[1], [0], [0], [1], [0, 0, 1, 1], [], []>} : vector<512x512xbf16>, vector<512x128xbf16>, vector<512x128xf32> -> vector<512x128xf32>
    %30 = arith.addf %25, %29 : vector<512x128xf32>
    %c0_20 = arith.constant 0 : index
    %c0_21 = arith.constant 0 : index
    %31 = vector.load %arg11[%c0_20, %c0_21] : memref<512x128xf32, #tpu.memory_space<vmem>>, vector<512x128xf32>
    tpu.vector_store %arg11[%c0_20, %c0_21], %30 {strides = array<i32>} : memref<512x128xf32, #tpu.memory_space<vmem>>, vector<512x128xf32>,
    %c0_22 = arith.constant 0 : index
    %c0_23 = arith.constant 0 : index
    %32 = vector.load %arg9[%c0_22, %c0_23] : memref<512x1xf32, #tpu.memory_space<vmem>>, vector<512x1xf32>
    tpu.vector_store %arg9[%c0_22, %c0_23], %11 {strides = array<i32>} : memref<512x1xf32, #tpu.memory_space<vmem>>, vector<512x1xf32>,
    %c1_i32 = arith.constant 1 : i32
    %33 = arith.cmpi eq, %arg2, %c1_i32 : i32
    %34 = arith.extui %33 : i1 to i32
    %c0_i32_24 = arith.constant 0 : i32
    %35 = arith.cmpi ne, %34, %c0_i32_24 : i32
    scf.if %35 {
      %c0_25 = arith.constant 0 : index
      %c0_26 = arith.constant 0 : index
      %36 = vector.load %arg11[%c0_25, %c0_26] : memref<512x128xf32, #tpu.memory_space<vmem>>, vector<512x128xf32>
      %c0_27 = arith.constant 0 : index
      %c0_28 = arith.constant 0 : index
      %37 = vector.load %arg10[%c0_27, %c0_28] : memref<512x1xf32, #tpu.memory_space<vmem>>, vector<512x1xf32>
      %38 = tpu.reciprocal %37 {approx = true} : vector<512x1xf32> -> vector<512x1xf32>
      %39 = vector.broadcast %38 : vector<512x1xf32> to vector<512x128xf32>
      %40 = arith.mulf %36, %39 : vector<512x128xf32>
      %c0_29 = arith.constant 0 : index
      %41 = memref.load %arg7[%c0_29] : memref<1xf32, #tpu.memory_space<smem>>
      %42 = vector.broadcast %41 : f32 to vector<512x128xf32>
      %43 = arith.mulf %42, %40 : vector<512x128xf32>
      %c0_30 = arith.constant 0 : index
      %c0_31 = arith.constant 0 : index
      %c0_32 = arith.constant 0 : index
      %44 = vector.load %arg3[%c0_30, %c0_31, %c0_32] : memref<1x512x128xf32, #tpu.memory_space<vmem>>, vector<1x512x128xf32>
      %45 = vector.shape_cast %44 : vector<1x512x128xf32> to vector<512x128xf32>
      %46 = arith.addf %43, %45 : vector<512x128xf32>
      %c0_33 = arith.constant 0 : index
      %c0_34 = arith.constant 0 : index
      %c0_35 = arith.constant 0 : index
      %47 = vector.load %arg8[%c0_33, %c0_34, %c0_35] : memref<1x512x128xf32, #tpu.memory_space<vmem>>, vector<1x512x128xf32>
      %48 = vector.shape_cast %47 : vector<1x512x128xf32> to vector<512x128xf32>
      %49 = vector.shape_cast %46 : vector<512x128xf32> to vector<1x512x128xf32>
      tpu.vector_store %arg8[%c0_33, %c0_34, %c0_35], %49 {strides = array<i32>} : memref<1x512x128xf32, #tpu.memory_space<vmem>>, vector<1x512x128xf32>,
    } else {
    }
    return
  }
  func.func @transform_0(%arg0: i32, %arg1: i32, %arg2: i32) -> (i32, i32, i32) {
    %c0_i32 = arith.constant 0 : i32
    %c0_i32_0 = arith.constant 0 : i32
    return %arg0, %arg1, %c0_i32 : i32, i32, i32
  }
  func.func @transform_1(%arg0: i32, %arg1: i32, %arg2: i32) -> (i32, i32, i32) {
    %c0_i32 = arith.constant 0 : i32
    %c0_i32_0 = arith.constant 0 : i32
    return %arg0, %arg1, %c0_i32 : i32, i32, i32
  }
  func.func @transform_2(%arg0: i32, %arg1: i32, %arg2: i32) -> (i32, i32, i32) {
    %c0_i32 = arith.constant 0 : i32
    %c0_i32_0 = arith.constant 0 : i32
    return %arg0, %arg2, %c0_i32 : i32, i32, i32
  }
  func.func @transform_3(%arg0: i32, %arg1: i32, %arg2: i32) -> (i32, i32, i32) {
    %c0_i32 = arith.constant 0 : i32
    %c0_i32_0 = arith.constant 0 : i32
    return %arg0, %arg2, %c0_i32 : i32, i32, i32
  }
  func.func @transform_4(%arg0: i32, %arg1: i32, %arg2: i32) -> i32 {
    %c0_i32 = arith.constant 0 : i32
    %c0_i32_0 = arith.constant 0 : i32
    return %c0_i32 : i32
  }
  func.func @transform_5(%arg0: i32, %arg1: i32, %arg2: i32) -> (i32, i32, i32) {
    %c0_i32 = arith.constant 0 : i32
    %c0_i32_0 = arith.constant 0 : i32
    return %arg0, %arg1, %c0_i32 : i32, i32, i32
  }
}

</mosaic_0001>

<bundles_post_ra>
// kernel: self_attention_forward.2
= control target key start
LH: loop header
LB: loop body
LE: loop exit
PB: predicated region body
PF: predicated region fallthrough
CT: control target
= control target key end

     0   :  { %s2816_s18 = smov 0   ;;  %s2818_s19 = smov 0   ;;  %s3489_s0 = inlined_call_operand.vmem [shape: bf16[2,1024,128], index: 0, kind: input, shape index: {}]   ;;  %s3490_s1 = inlined_call_operand.vmem [shape: bf16[128,160], index: 1, kind: input, shape index: {}]   ;;  %s3491_s2 = inlined_call_operand.vmem [shape: f32[1,160], index: 2, kind: input, shape index: {}]   ;;  %s3492_s3 = inlined_call_operand.vmem [shape: bf16[2,1024,128], index: 3, kind: output, shape index: {0}]   ;;  %s3493_s4 = inlined_call_operand.vmem [shape: bf16[2,1024,16], index: 4, kind: output, shape index: {1}]   ;;  %s3494_s5 = inlined_call_operand.vmem [shape: bf16[2,1024,16], index: 5, kind: output, shape index: {2}]  }
   0x1   :  { %s2820_s20 = smov 0   ;;  %s2822_s21 = smov 0  }
   0x2   :  { %s2824_s22 = smov 0  }
   0x3 LB: > { %s25_s23 = sadd.s32 1, %s2774_s20  ;;  %s28_s24 = sadd.s32 1, %s2778_s21  ;;  %s2782_s22 = sphi %s2824_s22, %s16_s22   ;;  %s2778_s21 = sphi %s2822_s21, %s3498_s21   ;;  %s2774_s20 = sphi %s2820_s20, %s3497_s20   ;;  %s2770_s19 = sphi %s2818_s19, %s3496_s19   ;;  %s2766_s18 = sphi %s2816_s18, %s3495_s18  }
   0x4   : > { %p26_p0 = scmp.ge.s32.totalorder %s25_s23, 2  ;;  %p2120_p1 = scmp.ge.s32.totalorder %s2782_s22, 1 }
   0x5   : > { %p217_p2 = scmp.lt.s32.totalorder %s2782_s22, 5 }
   0x6   : > { %s3500_s23 = smov (%p26_p0, %s25_s23), 0  ;;  %s3502_s24 = smov (!%p26_p0, %s28_s24), %s2778_s21 }
   0x7   : > { %p218_p3 = pnand %p2120_p1, %p217_p2  ;;  %p30_p4 = scmp.ge.s32.totalorder %s3502_s24, 2 }
   0x8   : > { %s2121_s27 = sshll.u32 (!%p218_p3), %s2766_s18, 6  ;;  %p272_p5 = scmp.lt.s32.totalorder (!%p218_p3), %s2770_s19, 1 }
   0x9   : > { %s3504_s24 = smov (%p30_p4, %s3502_s24), 0  ;;  %221 = sbr.rel (%p218_p3) target bundleno = 492 (0x1ec), region = 32 }
   0xa   : > { %p274_p6 = scmp.lt.s32.totalorder (!%p218_p3), %s2121_s27, 127  ;;  %s2785_s8 = smov (!%p218_p3), 112  }
   0xe   : > { %v2688_v0 = vld [vmem:[%s3490_s1 + $0x74] ss:$8 sps:$4 sm:$0xff]   ;;  %v2690_v1 = vld [vmem:[%s3490_s1 + $0x70] ss:$8 sps:$4 sm:$0xff]   ;;  %v2784_v2 = vmov 0   ;;  %s3506_s19 = smov (!%p272_p5, %s2770_s19), 1  ;;  %v394_v49 = vlaneseq }
   0xf   : > { %708 = vmatprep.mubr.bf16.mxu0 %v2784_v2  ;;  %868 = vmatprep.mubr.bf16.mxu1 %v2784_v2  ;;  %v2691_v3 = vld [vmem:[%s3490_s1 + $0x64] ss:$8 sps:$4 sm:$0xff]   ;;  %v2693_v4 = vld [vmem:[%s3490_s1 + $0x60] ss:$8 sps:$4 sm:$0xff]   ;;  %v2694_v5 = vld [vmem:[%s3490_s1 + $0x54] ss:$8 sps:$4 sm:$0xff]  }
  0x10   : > { %676 = vmatprep.subr.bf16.mxu0 %v2688_v0  ;;  %2630 = vmatprep.subr.bf16.mxu1 %v2688_v0  ;;  %s3508_s27 = smov (!%p274_p6, %s2121_s27), 127  ;;  %s2122_s11 = sshll.u32 %s3506_s19, 7  ;;  %v2696_v6 = vld [vmem:[%s3490_s1 + $0x50] ss:$8 sps:$4 sm:$0xff]   ;;  %v2697_v7 = vld [vmem:[%s3490_s1 + $0x44] ss:$8 sps:$4 sm:$0xff]  }
  0x11   : > { %677 = vmatpush1.bf16.msra.mxu0 %v2690_v1  ;;  %2638 = vmatpush1.bf16.msra.mxu1 %v2690_v1  ;;  %s277_s12 = sadd.s32 %s2122_s11, %s3508_s27  ;;  %v2699_v8 = vld [vmem:[%s3490_s1 + $0x40] ss:$8 sps:$4 sm:$0xff]   ;;  %v2700_v9 = vld [vmem:[%s3490_s1 + $0x34] ss:$8 sps:$4 sm:$0xff]   ;;  %v2702_v10 = vld [vmem:[%s3490_s1 + $0x30] ss:$8 sps:$4 sm:$0xff]  }
  0x12   : > { %678 = vmatprep.subr.bf16.mxu0 %v2691_v3  ;;  %2631 = vmatprep.subr.bf16.mxu1 %v2691_v3  ;;  %s2869_s15 = sshll.u32 %s277_s12, 2  ;;  %v2703_v11 = vld [vmem:[%s3490_s1 + $0x24] ss:$8 sps:$4 sm:$0xff]   ;;  %v2705_v12 = vld [vmem:[%s3490_s1 + $0x20] ss:$8 sps:$4 sm:$0xff]   ;;  %v395_v50 = vshrl.u32 %v394_v49, 7 }
  0x13   : > { %s2878_s19 = scalar_lea.vmem %s3489_s0, %s2869_s15  ;;  %v2706_v13 = vld [vmem:[%s3490_s1 + $0x14] ss:$8 sps:$4 sm:$0xff]   ;;  %v2708_v14 = vld [vmem:[%s3490_s1 + $0x10] ss:$8 sps:$4 sm:$0xff]   ;;  %v2709_v15 = vld [vmem:[%s3490_s1 + $0x4] ss:$8 sps:$4 sm:$0xff]   ;;  %s2984_s29 = scalar_lea.vmem %s3493_s4, %s2869_s15 }
  0x14   : > { %v2711_v16 = vld [vmem:[%s3490_s1] ss:$8 sps:$4 sm:$0xff]   ;;  %v2716_v21 = vld [vmem:[%s2878_s19 + $0x10] sm:$0xff]   ;;  %v2718_v23 = vld [vmem:[%s2878_s19 + $0x18] sm:$0xff]   ;;  %v400_v51 = vsub.s32 1, %v395_v50  ;;  %v396_v52 = vsub.s32 0, %v395_v50  ;;  %s2992_s7 = scalar_lea.vmem %s3492_s3, %s2869_s15  ;;  %s3312_s11 = scalar_lea.vmem %s3494_s5, %s2869_s15 }
  0x15   : > { %679 = vmatpush1.bf16.msra.mxu0 %v2693_v4  ;;  %2639 = vmatpush1.bf16.msra.mxu1 %v2693_v4  ;;  %v2712_v17 = vld [vmem:[%s2878_s19] sm:$0xff]   ;;  %v2714_v19 = vld [vmem:[%s2878_s19 + $0x8] sm:$0xff]   ;;  %v2717_v22 = vld [vmem:[%s2878_s19 + $0x90] sm:$0xff]   ;;  %vm1605_vm0 = vcmask 125952  }
  0x16   : > { %680 = vmatprep.subr.bf16.mxu0 %v2694_v5  ;;  %2632 = vmatprep.subr.bf16.mxu1 %v2694_v5  ;;  %v2713_v18 = vld [vmem:[%s2878_s19 + $0x80] sm:$0xff]   ;;  %v2715_v20 = vld [vmem:[%s2878_s19 + $0x88] sm:$0xff]   ;;  %v2719_v24 = vld [vmem:[%s2878_s19 + $0x98] sm:$0xff]  }
  0x17   : > { %v2720_v25 = vld [vmem:[%s2878_s19 + $0x20] sm:$0xff]   ;;  %v2722_v27 = vld [vmem:[%s2878_s19 + $0x28] sm:$0xff]   ;;  %v2724_v29 = vld [vmem:[%s2878_s19 + $0x30] sm:$0xff]  }
  0x18   : > { %v2721_v26 = vld [vmem:[%s2878_s19 + $0xa0] sm:$0xff]   ;;  %v2723_v28 = vld [vmem:[%s2878_s19 + $0xa8] sm:$0xff]   ;;  %v2725_v30 = vld [vmem:[%s2878_s19 + $0xb0] sm:$0xff]  }
  0x19   : > { %681 = vmatpush1.bf16.msra.mxu0 %v2696_v6  ;;  %2640 = vmatpush1.bf16.msra.mxu1 %v2696_v6  ;;  %v2726_v31 = vld [vmem:[%s2878_s19 + $0x38] sm:$0xff]   ;;  %v2728_v33 = vld [vmem:[%s2878_s19 + $0x40] sm:$0xff]   ;;  %v2730_v35 = vld [vmem:[%s2878_s19 + $0x48] sm:$0xff]  }
  0x1a   : > { %682 = vmatprep.subr.bf16.mxu0 %v2697_v7  ;;  %2633 = vmatprep.subr.bf16.mxu1 %v2697_v7  ;;  %v2727_v32 = vld [vmem:[%s2878_s19 + $0xb8] sm:$0xff]   ;;  %v2729_v34 = vld [vmem:[%s2878_s19 + $0xc0] sm:$0xff]   ;;  %v2731_v36 = vld [vmem:[%s2878_s19 + $0xc8] sm:$0xff]  }
  0x1b   : > { %v2732_v37 = vld [vmem:[%s2878_s19 + $0x50] sm:$0xff]   ;;  %v2734_v39 = vld [vmem:[%s2878_s19 + $0x58] sm:$0xff]   ;;  %v2736_v41 = vld [vmem:[%s2878_s19 + $0x60] sm:$0xff]  }
  0x1c   : > { %v2733_v38 = vld [vmem:[%s2878_s19 + $0xd0] sm:$0xff]   ;;  %v2735_v40 = vld [vmem:[%s2878_s19 + $0xd8] sm:$0xff]   ;;  %v2737_v42 = vld [vmem:[%s2878_s19 + $0xe0] sm:$0xff]  }
  0x1d   : > { %683 = vmatpush1.bf16.msra.mxu0 %v2699_v8  ;;  %2641 = vmatpush1.bf16.msra.mxu1 %v2699_v8  ;;  %v2738_v43 = vld [vmem:[%s2878_s19 + $0x68] sm:$0xff]   ;;  %v2740_v45 = vld [vmem:[%s2878_s19 + $0x70] sm:$0xff]   ;;  %v2742_v47 = vld [vmem:[%s2878_s19 + $0x78] sm:$0xff]  }
  0x1e   : > { %684 = vmatprep.subr.bf16.mxu0 %v2700_v9  ;;  %2634 = vmatprep.subr.bf16.mxu1 %v2700_v9  ;;  %v2739_v44 = vld [vmem:[%s2878_s19 + $0xe8] sm:$0xff]   ;;  %v2741_v46 = vld [vmem:[%s2878_s19 + $0xf0] sm:$0xff]   ;;  %v2743_v48 = vld [vmem:[%s2878_s19 + $0xf8] sm:$0xff]  }
  0x1f   : > { %v392_v53 = vld [vmem:[%s3491_s2] sm:$0x3] }
  0x20   : > { %v2972_v54 = vrot.slane %v392_v53, %v400_v51  ;;  %v2974_v55 = vrot.slane %v392_v53, %v396_v52 }
  0x21   : > { %685 = vmatpush1.bf16.msra.mxu0 %v2702_v10  ;;  %2642 = vmatpush1.bf16.msra.mxu1 %v2702_v10 }
  0x22   : > { %686 = vmatprep.subr.bf16.mxu0 %v2703_v11  ;;  %2635 = vmatprep.subr.bf16.mxu1 %v2703_v11 }
  0x25   : > { %687 = vmatpush1.bf16.msra.mxu0 %v2705_v12  ;;  %2643 = vmatpush1.bf16.msra.mxu1 %v2705_v12 }
  0x26   : > { %688 = vmatprep.subr.bf16.mxu0 %v2706_v13  ;;  %2636 = vmatprep.subr.bf16.mxu1 %v2706_v13 }
  0x29   : > { %689 = vmatpush1.bf16.msra.mxu0 %v2708_v14  ;;  %2644 = vmatpush1.bf16.msra.mxu1 %v2708_v14 }
  0x2a   : > { %690 = vmatprep.subr.bf16.mxu0 %v2709_v15  ;;  %2637 = vmatprep.subr.bf16.mxu1 %v2709_v15 }
  0x2d   : > { %691 = vmatpush1.bf16.msra.mxu0 %v2711_v16  ;;  %2645 = vmatpush1.bf16.msra.mxu1 %v2711_v16 }
  0x30   : > { %709 = vmatmul.mubr.bf16.vlgmr.msra.gmra.mxu0 %v2712_v17  ;;  %869 = vmatmul.mubr.bf16.vlgmr.msra.gmra.mxu1 %v2713_v18 }
  0x31   : > { %718 = vmatprep.mubr.bf16.mxu0 %v2784_v2  ;;  %878 = vmatprep.mubr.bf16.mxu1 %v2784_v2 }
  0x38   : > { %719 = vmatmul.mubr.bf16.gmra.mxu0 %v2714_v19  ;;  %879 = vmatmul.mubr.bf16.gmra.mxu1 %v2715_v20 }
  0x39   : > { %728 = vmatprep.mubr.bf16.mxu0 %v2784_v2  ;;  %888 = vmatprep.mubr.bf16.mxu1 %v2784_v2 }
  0x40   : > { %729 = vmatmul.mubr.bf16.gmra.mxu0 %v2716_v21  ;;  %889 = vmatmul.mubr.bf16.gmra.mxu1 %v2717_v22 }
  0x41   : > { %738 = vmatprep.mubr.bf16.mxu0 %v2784_v2  ;;  %898 = vmatprep.mubr.bf16.mxu1 %v2784_v2 }
  0x48   : > { %739 = vmatmul.mubr.bf16.gmra.mxu0 %v2718_v23  ;;  %899 = vmatmul.mubr.bf16.gmra.mxu1 %v2719_v24 }
  0x49   : > { %748 = vmatprep.mubr.bf16.mxu0 %v2784_v2  ;;  %908 = vmatprep.mubr.bf16.mxu1 %v2784_v2 }
  0x50   : > { %749 = vmatmul.mubr.bf16.gmra.mxu0 %v2720_v25  ;;  %909 = vmatmul.mubr.bf16.gmra.mxu1 %v2721_v26 }
  0x51   : > { %758 = vmatprep.mubr.bf16.mxu0 %v2784_v2  ;;  %918 = vmatprep.mubr.bf16.mxu1 %v2784_v2 }
  0x58   : > { %759 = vmatmul.mubr.bf16.gmra.mxu0 %v2722_v27  ;;  %919 = vmatmul.mubr.bf16.gmra.mxu1 %v2723_v28 }
  0x59   : > { %768 = vmatprep.mubr.bf16.mxu0 %v2784_v2  ;;  %928 = vmatprep.mubr.bf16.mxu1 %v2784_v2 }
  0x60   : > { %769 = vmatmul.mubr.bf16.gmra.mxu0 %v2724_v29  ;;  %929 = vmatmul.mubr.bf16.gmra.mxu1 %v2725_v30 }
  0x61   : > { %778 = vmatprep.mubr.bf16.mxu0 %v2784_v2  ;;  %938 = vmatprep.mubr.bf16.mxu1 %v2784_v2 }
  0x68   : > { %779 = vmatmul.mubr.bf16.gmra.mxu0 %v2726_v31  ;;  %939 = vmatmul.mubr.bf16.gmra.mxu1 %v2727_v32 }
  0x69   : > { %788 = vmatprep.mubr.bf16.mxu0 %v2784_v2  ;;  %948 = vmatprep.mubr.bf16.mxu1 %v2784_v2 }
  0x70   : > { %789 = vmatmul.mubr.bf16.gmra.mxu0 %v2728_v33  ;;  %949 = vmatmul.mubr.bf16.gmra.mxu1 %v2729_v34 }
  0x71   : > { %798 = vmatprep.mubr.bf16.mxu0 %v2784_v2  ;;  %958 = vmatprep.mubr.bf16.mxu1 %v2784_v2 }
  0x78   : > { %799 = vmatmul.mubr.bf16.gmra.mxu0 %v2730_v35  ;;  %959 = vmatmul.mubr.bf16.gmra.mxu1 %v2731_v36 }
  0x79   : > { %808 = vmatprep.mubr.bf16.mxu0 %v2784_v2  ;;  %968 = vmatprep.mubr.bf16.mxu1 %v2784_v2 }
  0x80   : > { %809 = vmatmul.mubr.bf16.gmra.mxu0 %v2732_v37  ;;  %969 = vmatmul.mubr.bf16.gmra.mxu1 %v2733_v38 }
  0x81   : > { %818 = vmatprep.mubr.bf16.mxu0 %v2784_v2  ;;  %978 = vmatprep.mubr.bf16.mxu1 %v2784_v2 }
  0x88   : > { %819 = vmatmul.mubr.bf16.gmra.mxu0 %v2734_v39  ;;  %979 = vmatmul.mubr.bf16.gmra.mxu1 %v2735_v40 }
  0x89   : > { %828 = vmatprep.mubr.bf16.mxu0 %v2784_v2  ;;  %988 = vmatprep.mubr.bf16.mxu1 %v2784_v2 }
  0x90   : > { %829 = vmatmul.mubr.bf16.gmra.mxu0 %v2736_v41  ;;  %989 = vmatmul.mubr.bf16.gmra.mxu1 %v2737_v42 }
  0x91   : > { %838 = vmatprep.mubr.bf16.mxu0 %v2784_v2  ;;  %998 = vmatprep.mubr.bf16.mxu1 %v2784_v2 }
  0x98   : > { %839 = vmatmul.mubr.bf16.gmra.mxu0 %v2738_v43  ;;  %999 = vmatmul.mubr.bf16.gmra.mxu1 %v2739_v44 }
  0x99   : > { %848 = vmatprep.mubr.bf16.mxu0 %v2784_v2  ;;  %1008 = vmatprep.mubr.bf16.mxu1 %v2784_v2 }
  0xa0   : > { %849 = vmatmul.mubr.bf16.gmra.mxu0 %v2740_v45  ;;  %1009 = vmatmul.mubr.bf16.gmra.mxu1 %v2741_v46 }
  0xa1   : > { %858 = vmatprep.mubr.bf16.mxu0 %v2784_v2  ;;  %1018 = vmatprep.mubr.bf16.mxu1 %v2784_v2 }
  0xa8   : > { %859 = vmatmul.mubr.bf16.gmra.mxu0 %v2742_v47  ;;  %1019 = vmatmul.mubr.bf16.gmra.mxu1 %v2743_v48 }
  0xf0   : > { %v710_v56 = vpop.f32.mrf.mxu0  ;;  %v870_v57 = vpop.f32.mrf.mxu1 }
  0xf1   : > { %v711_v62 = vadd.f32 %v710_v56, %v2974_v55  ;;  %v871_v63 = vadd.f32 %v870_v57, %v2974_v55 }
  0xf2   : > { %v712_v58 = vpop.f32.mrf.mxu0  ;;  %v872_v59 = vpop.f32.mrf.mxu1 }
  0xf3   : > { %v713_v60 = vadd.f32 %v712_v58, %v2972_v54  ;;  %v873_v61 = vadd.f32 %v872_v59, %v2972_v54 }
  0xf4   : > { %v714_v0 = vpop.f32.mrf.mxu0  ;;  %v874_v1 = vpop.f32.mrf.mxu1 }
  0xf5   : > { %v2375_v2 = vpack.c.bf16 %v713_v60, %v713_v60  ;;  %v2407_v3 = vpack.c.bf16 %v873_v61, %v873_v61  ;;  %v715_v4 = vadd.f32 %v714_v0, %v2974_v55  ;;  %v875_v5 = vadd.f32 %v874_v1, %v2974_v55 }
  0xf6   : > { %v716_v6 = vpop.f32.mrf.mxu0  ;;  %v876_v7 = vpop.f32.mrf.mxu1 }
  0xf7   : > { %1606 = vst.msk [vmem:[%s2984_s29] sm:$0xf] %vm1605_vm0, %v2375_v2  ;;  %1638 = vst.msk [vmem:[%s2984_s29 + $0x80] sm:$0xf] %vm1605_vm0, %v2407_v3  ;;  %v2442_v8 = vpack.c.bf16 %v715_v4, %v711_v62  ;;  %v2522_v9 = vpack.c.bf16 %v875_v5, %v871_v63  ;;  %v717_v10 = vadd.f32 %v716_v6, %v2972_v54  ;;  %1670 = vrot.lane.b32.xlu0 %v2375_v2, %s2785_s8 }
  0xf8   : > { %v877_v11 = vadd.f32 %v876_v7, %v2972_v54  ;;  %v720_v12 = vpop.f32.mrf.mxu0  ;;  %v880_v13 = vpop.f32.mrf.mxu1 }
  0xf9   : > { %2443 = vst [vmem:[%s2992_s7] sm:$0xff] %v2442_v8   ;;  %2614 = vst [vmem:[%s2992_s7 + $0x80] sm:$0xff] %v2522_v9   ;;  %v2376_v14 = vpack.c.bf16 %v717_v10, %v717_v10  ;;  %v881_v18 = vadd.f32 %v880_v13, %v2974_v55  ;;  %v721_v21 = vadd.f32 %v720_v12, %v2974_v55 }
  0xfa   : > { %v2408_v15 = vpack.c.bf16 %v877_v11, %v877_v11  ;;  %v722_v16 = vpop.f32.mrf.mxu0  ;;  %v882_v17 = vpop.f32.mrf.mxu1 }
  0xfb   : > { %1607 = vst.msk [vmem:[%s2984_s29 + $0x4] sm:$0xf] %vm1605_vm0, %v2376_v14  ;;  %v723_v19 = vadd.f32 %v722_v16, %v2972_v54  ;;  %v883_v20 = vadd.f32 %v882_v17, %v2972_v54  ;;  %1734 = vrot.lane.b32.xlu0 %v2407_v3, %s2785_s8 }
  0xfc   : > { %1639 = vst.msk [vmem:[%s2984_s29 + $0x84] sm:$0xf] %vm1605_vm0, %v2408_v15  ;;  %1736 = vrot.lane.b32.xlu1 %v2408_v15, %s2785_s8  ;;  %v724_v22 = vpop.f32.mrf.mxu0  ;;  %v884_v23 = vpop.f32.mrf.mxu1 }
  0xfd   : > { %v2377_v24 = vpack.c.bf16 %v723_v19, %v723_v19  ;;  %v2409_v25 = vpack.c.bf16 %v883_v20, %v883_v20  ;;  %v725_v26 = vadd.f32 %v724_v22, %v2974_v55  ;;  %v885_v27 = vadd.f32 %v884_v23, %v2974_v55 }
  0xfe   : > { %v726_v28 = vpop.f32.mrf.mxu0  ;;  %v886_v29 = vpop.f32.mrf.mxu1 }
  0xff   : > { %1608 = vst.msk [vmem:[%s2984_s29 + $0x8] sm:$0xf] %vm1605_vm0, %v2377_v24  ;;  %1640 = vst.msk [vmem:[%s2984_s29 + $0x88] sm:$0xf] %vm1605_vm0, %v2409_v25  ;;  %v2447_v30 = vpack.c.bf16 %v725_v26, %v721_v21  ;;  %v2527_v31 = vpack.c.bf16 %v885_v27, %v881_v18  ;;  %v727_v32 = vadd.f32 %v726_v28, %v2972_v54  ;;  %1672 = vrot.lane.b32.xlu0 %v2376_v14, %s2785_s8 }
 0x100   : > { %v887_v33 = vadd.f32 %v886_v29, %v2972_v54  ;;  %1674 = vrot.lane.b32.xlu1 %v2377_v24, %s2785_s8  ;;  %v730_v34 = vpop.f32.mrf.mxu0  ;;  %v890_v35 = vpop.f32.mrf.mxu1 }
 0x101   : > { %2599 = vst [vmem:[%s2992_s7 + $0x8] sm:$0xff] %v2447_v30   ;;  %2615 = vst [vmem:[%s2992_s7 + $0x88] sm:$0xff] %v2527_v31   ;;  %v2378_v36 = vpack.c.bf16 %v727_v32, %v727_v32  ;;  %v891_v40 = vadd.f32 %v890_v35, %v2974_v55  ;;  %v731_v43 = vadd.f32 %v730_v34, %v2974_v55 }
 0x102   : > { %v2410_v37 = vpack.c.bf16 %v887_v33, %v887_v33  ;;  %v732_v38 = vpop.f32.mrf.mxu0  ;;  %v892_v39 = vpop.f32.mrf.mxu1 }
 0x103   : > { %1609 = vst.msk [vmem:[%s2984_s29 + $0xc] sm:$0xf] %vm1605_vm0, %v2378_v36  ;;  %v733_v41 = vadd.f32 %v732_v38, %v2972_v54  ;;  %v893_v42 = vadd.f32 %v892_v39, %v2972_v54  ;;  %1738 = vrot.lane.b32.xlu0 %v2409_v25, %s2785_s8 }
 0x104   : > { %1641 = vst.msk [vmem:[%s2984_s29 + $0x8c] sm:$0xf] %vm1605_vm0, %v2410_v37  ;;  %1676 = vrot.lane.b32.xlu1 %v2378_v36, %s2785_s8  ;;  %v734_v44 = vpop.f32.mrf.mxu0  ;;  %v894_v45 = vpop.f32.mrf.mxu1 }
 0x105   : > { %v2379_v46 = vpack.c.bf16 %v733_v41, %v733_v41  ;;  %v2411_v47 = vpack.c.bf16 %v893_v42, %v893_v42  ;;  %v735_v48 = vadd.f32 %v734_v44, %v2974_v55  ;;  %v895_v49 = vadd.f32 %v894_v45, %v2974_v55 }
 0x106   : > { %v736_v50 = vpop.f32.mrf.mxu0  ;;  %v896_v51 = vpop.f32.mrf.mxu1 }
 0x107   : > { %1610 = vst.msk [vmem:[%s2984_s29 + $0x10] sm:$0xf] %vm1605_vm0, %v2379_v46  ;;  %1642 = vst.msk [vmem:[%s2984_s29 + $0x90] sm:$0xf] %vm1605_vm0, %v2411_v47  ;;  %v2452_v52 = vpack.c.bf16 %v735_v48, %v731_v43  ;;  %v2532_v53 = vpack.c.bf16 %v895_v49, %v891_v40  ;;  %v737_v56 = vadd.f32 %v736_v50, %v2972_v54  ;;  %1678 = vrot.lane.b32.xlu0 %v2379_v46, %s2785_s8 }
 0x108   : > { %v897_v57 = vadd.f32 %v896_v51, %v2972_v54  ;;  %1740 = vrot.lane.b32.xlu1 %v2410_v37, %s2785_s8  ;;  %v740_v58 = vpop.f32.mrf.mxu0  ;;  %v900_v59 = vpop.f32.mrf.mxu1 }
 0x109   : > { %2600 = vst [vmem:[%s2992_s7 + $0x10] sm:$0xff] %v2452_v52   ;;  %2616 = vst [vmem:[%s2992_s7 + $0x90] sm:$0xff] %v2532_v53   ;;  %v2380_v60 = vpack.c.bf16 %v737_v56, %v737_v56  ;;  %v901_v0 = vadd.f32 %v900_v59, %v2974_v55  ;;  %v741_v3 = vadd.f32 %v740_v58, %v2974_v55 }
 0x10a   : > { %v2412_v61 = vpack.c.bf16 %v897_v57, %v897_v57  ;;  %v742_v62 = vpop.f32.mrf.mxu0  ;;  %v902_v63 = vpop.f32.mrf.mxu1 }
 0x10b   : > { %1611 = vst.msk [vmem:[%s2984_s29 + $0x14] sm:$0xf] %vm1605_vm0, %v2380_v60  ;;  %v743_v1 = vadd.f32 %v742_v62, %v2972_v54  ;;  %v903_v2 = vadd.f32 %v902_v63, %v2972_v54  ;;  %1742 = vrot.lane.b32.xlu0 %v2411_v47, %s2785_s8 }
 0x10c   : > { %1643 = vst.msk [vmem:[%s2984_s29 + $0x94] sm:$0xf] %vm1605_vm0, %v2412_v61  ;;  %1680 = vrot.lane.b32.xlu1 %v2380_v60, %s2785_s8  ;;  %v744_v4 = vpop.f32.mrf.mxu0  ;;  %v904_v5 = vpop.f32.mrf.mxu1 }
 0x10d   : > { %v2381_v6 = vpack.c.bf16 %v743_v1, %v743_v1  ;;  %v2413_v7 = vpack.c.bf16 %v903_v2, %v903_v2  ;;  %v745_v8 = vadd.f32 %v744_v4, %v2974_v55  ;;  %v905_v9 = vadd.f32 %v904_v5, %v2974_v55 }
 0x10e   : > { %v746_v10 = vpop.f32.mrf.mxu0  ;;  %v906_v11 = vpop.f32.mrf.mxu1 }
 0x10f   : > { %1612 = vst.msk [vmem:[%s2984_s29 + $0x18] sm:$0xf] %vm1605_vm0, %v2381_v6  ;;  %1644 = vst.msk [vmem:[%s2984_s29 + $0x98] sm:$0xf] %vm1605_vm0, %v2413_v7  ;;  %v2457_v12 = vpack.c.bf16 %v745_v8, %v741_v3  ;;  %v2537_v13 = vpack.c.bf16 %v905_v9, %v901_v0  ;;  %v747_v14 = vadd.f32 %v746_v10, %v2972_v54  ;;  %1682 = vrot.lane.b32.xlu0 %v2381_v6, %s2785_s8 }
 0x110   : > { %v907_v15 = vadd.f32 %v906_v11, %v2972_v54  ;;  %1744 = vrot.lane.b32.xlu1 %v2412_v61, %s2785_s8  ;;  %v750_v16 = vpop.f32.mrf.mxu0  ;;  %v910_v17 = vpop.f32.mrf.mxu1 }
 0x111   : > { %2601 = vst [vmem:[%s2992_s7 + $0x18] sm:$0xff] %v2457_v12   ;;  %2617 = vst [vmem:[%s2992_s7 + $0x98] sm:$0xff] %v2537_v13   ;;  %v2382_v18 = vpack.c.bf16 %v747_v14, %v747_v14  ;;  %v911_v22 = vadd.f32 %v910_v17, %v2974_v55  ;;  %v751_v25 = vadd.f32 %v750_v16, %v2974_v55 }
 0x112   : > { %v2414_v19 = vpack.c.bf16 %v907_v15, %v907_v15  ;;  %v752_v20 = vpop.f32.mrf.mxu0  ;;  %v912_v21 = vpop.f32.mrf.mxu1 }
 0x113   : > { %1613 = vst.msk [vmem:[%s2984_s29 + $0x1c] sm:$0xf] %vm1605_vm0, %v2382_v18  ;;  %v753_v23 = vadd.f32 %v752_v20, %v2972_v54  ;;  %v913_v24 = vadd.f32 %v912_v21, %v2972_v54  ;;  %1746 = vrot.lane.b32.xlu0 %v2413_v7, %s2785_s8 }
 0x114   : > { %1645 = vst.msk [vmem:[%s2984_s29 + $0x9c] sm:$0xf] %vm1605_vm0, %v2414_v19  ;;  %1684 = vrot.lane.b32.xlu1 %v2382_v18, %s2785_s8  ;;  %v754_v26 = vpop.f32.mrf.mxu0  ;;  %v914_v27 = vpop.f32.mrf.mxu1 }
 0x115   : > { %v2383_v28 = vpack.c.bf16 %v753_v23, %v753_v23  ;;  %v2415_v29 = vpack.c.bf16 %v913_v24, %v913_v24  ;;  %v755_v30 = vadd.f32 %v754_v26, %v2974_v55  ;;  %v915_v31 = vadd.f32 %v914_v27, %v2974_v55 }
 0x116   : > { %v756_v32 = vpop.f32.mrf.mxu0  ;;  %v916_v33 = vpop.f32.mrf.mxu1 }
 0x117   : > { %1614 = vst.msk [vmem:[%s2984_s29 + $0x20] sm:$0xf] %vm1605_vm0, %v2383_v28  ;;  %1646 = vst.msk [vmem:[%s2984_s29 + $0xa0] sm:$0xf] %vm1605_vm0, %v2415_v29  ;;  %v2462_v34 = vpack.c.bf16 %v755_v30, %v751_v25  ;;  %v2542_v35 = vpack.c.bf16 %v915_v31, %v911_v22  ;;  %v757_v36 = vadd.f32 %v756_v32, %v2972_v54  ;;  %1686 = vrot.lane.b32.xlu0 %v2383_v28, %s2785_s8 }
 0x118   : > { %v917_v37 = vadd.f32 %v916_v33, %v2972_v54  ;;  %1748 = vrot.lane.b32.xlu1 %v2414_v19, %s2785_s8  ;;  %v760_v38 = vpop.f32.mrf.mxu0  ;;  %v920_v39 = vpop.f32.mrf.mxu1 }
 0x119   : > { %2602 = vst [vmem:[%s2992_s7 + $0x20] sm:$0xff] %v2462_v34   ;;  %2618 = vst [vmem:[%s2992_s7 + $0xa0] sm:$0xff] %v2542_v35   ;;  %v2384_v40 = vpack.c.bf16 %v757_v36, %v757_v36  ;;  %v921_v44 = vadd.f32 %v920_v39, %v2974_v55  ;;  %v761_v47 = vadd.f32 %v760_v38, %v2974_v55 }
 0x11a   : > { %v2416_v41 = vpack.c.bf16 %v917_v37, %v917_v37  ;;  %v762_v42 = vpop.f32.mrf.mxu0  ;;  %v922_v43 = vpop.f32.mrf.mxu1 }
 0x11b   : > { %1615 = vst.msk [vmem:[%s2984_s29 + $0x24] sm:$0xf] %vm1605_vm0, %v2384_v40  ;;  %v763_v45 = vadd.f32 %v762_v42, %v2972_v54  ;;  %v923_v46 = vadd.f32 %v922_v43, %v2972_v54  ;;  %1750 = vrot.lane.b32.xlu0 %v2415_v29, %s2785_s8 }
 0x11c   : > { %1647 = vst.msk [vmem:[%s2984_s29 + $0xa4] sm:$0xf] %vm1605_vm0, %v2416_v41  ;;  %1688 = vrot.lane.b32.xlu1 %v2384_v40, %s2785_s8  ;;  %v764_v48 = vpop.f32.mrf.mxu0  ;;  %v924_v49 = vpop.f32.mrf.mxu1 }
 0x11d   : > { %v2385_v50 = vpack.c.bf16 %v763_v45, %v763_v45  ;;  %v2417_v51 = vpack.c.bf16 %v923_v46, %v923_v46  ;;  %v765_v52 = vadd.f32 %v764_v48, %v2974_v55  ;;  %v925_v53 = vadd.f32 %v924_v49, %v2974_v55 }
 0x11e   : > { %v766_v56 = vpop.f32.mrf.mxu0  ;;  %v926_v57 = vpop.f32.mrf.mxu1 }
 0x11f   : > { %1616 = vst.msk [vmem:[%s2984_s29 + $0x28] sm:$0xf] %vm1605_vm0, %v2385_v50  ;;  %1648 = vst.msk [vmem:[%s2984_s29 + $0xa8] sm:$0xf] %vm1605_vm0, %v2417_v51  ;;  %v2467_v58 = vpack.c.bf16 %v765_v52, %v761_v47  ;;  %v2547_v59 = vpack.c.bf16 %v925_v53, %v921_v44  ;;  %v767_v60 = vadd.f32 %v766_v56, %v2972_v54  ;;  %1690 = vrot.lane.b32.xlu0 %v2385_v50, %s2785_s8 }
 0x120   : > { %v927_v61 = vadd.f32 %v926_v57, %v2972_v54  ;;  %1752 = vrot.lane.b32.xlu1 %v2416_v41, %s2785_s8  ;;  %v770_v62 = vpop.f32.mrf.mxu0  ;;  %v930_v63 = vpop.f32.mrf.mxu1 }
 0x121   : > { %2603 = vst [vmem:[%s2992_s7 + $0x28] sm:$0xff] %v2467_v58   ;;  %2619 = vst [vmem:[%s2992_s7 + $0xa8] sm:$0xff] %v2547_v59   ;;  %v2386_v0 = vpack.c.bf16 %v767_v60, %v767_v60  ;;  %v931_v4 = vadd.f32 %v930_v63, %v2974_v55  ;;  %v771_v7 = vadd.f32 %v770_v62, %v2974_v55 }
 0x122   : > { %v2418_v1 = vpack.c.bf16 %v927_v61, %v927_v61  ;;  %v772_v2 = vpop.f32.mrf.mxu0  ;;  %v932_v3 = vpop.f32.mrf.mxu1 }
 0x123   : > { %1617 = vst.msk [vmem:[%s2984_s29 + $0x2c] sm:$0xf] %vm1605_vm0, %v2386_v0  ;;  %v773_v5 = vadd.f32 %v772_v2, %v2972_v54  ;;  %v933_v6 = vadd.f32 %v932_v3, %v2972_v54  ;;  %1754 = vrot.lane.b32.xlu0 %v2417_v51, %s2785_s8 }
 0x124   : > { %1649 = vst.msk [vmem:[%s2984_s29 + $0xac] sm:$0xf] %vm1605_vm0, %v2418_v1  ;;  %1692 = vrot.lane.b32.xlu1 %v2386_v0, %s2785_s8  ;;  %v774_v8 = vpop.f32.mrf.mxu0  ;;  %v934_v9 = vpop.f32.mrf.mxu1 }
 0x125   : > { %v2387_v10 = vpack.c.bf16 %v773_v5, %v773_v5  ;;  %v2419_v11 = vpack.c.bf16 %v933_v6, %v933_v6  ;;  %v775_v12 = vadd.f32 %v774_v8, %v2974_v55  ;;  %v935_v13 = vadd.f32 %v934_v9, %v2974_v55 }
 0x126   : > { %v776_v14 = vpop.f32.mrf.mxu0  ;;  %v936_v15 = vpop.f32.mrf.mxu1 }
 0x127   : > { %1618 = vst.msk [vmem:[%s2984_s29 + $0x30] sm:$0xf] %vm1605_vm0, %v2387_v10  ;;  %1650 = vst.msk [vmem:[%s2984_s29 + $0xb0] sm:$0xf] %vm1605_vm0, %v2419_v11  ;;  %v2472_v16 = vpack.c.bf16 %v775_v12, %v771_v7  ;;  %v2552_v17 = vpack.c.bf16 %v935_v13, %v931_v4  ;;  %v777_v18 = vadd.f32 %v776_v14, %v2972_v54  ;;  %1694 = vrot.lane.b32.xlu0 %v2387_v10, %s2785_s8 }
 0x128   : > { %v937_v19 = vadd.f32 %v936_v15, %v2972_v54  ;;  %1756 = vrot.lane.b32.xlu1 %v2418_v1, %s2785_s8  ;;  %v780_v20 = vpop.f32.mrf.mxu0  ;;  %v940_v21 = vpop.f32.mrf.mxu1 }
 0x129   : > { %2604 = vst [vmem:[%s2992_s7 + $0x30] sm:$0xff] %v2472_v16   ;;  %2620 = vst [vmem:[%s2992_s7 + $0xb0] sm:$0xff] %v2552_v17   ;;  %v2388_v22 = vpack.c.bf16 %v777_v18, %v777_v18  ;;  %v941_v26 = vadd.f32 %v940_v21, %v2974_v55  ;;  %v781_v29 = vadd.f32 %v780_v20, %v2974_v55 }
 0x12a   : > { %v2420_v23 = vpack.c.bf16 %v937_v19, %v937_v19  ;;  %v782_v24 = vpop.f32.mrf.mxu0  ;;  %v942_v25 = vpop.f32.mrf.mxu1 }
 0x12b   : > { %1619 = vst.msk [vmem:[%s2984_s29 + $0x34] sm:$0xf] %vm1605_vm0, %v2388_v22  ;;  %v783_v27 = vadd.f32 %v782_v24, %v2972_v54  ;;  %v943_v28 = vadd.f32 %v942_v25, %v2972_v54  ;;  %1758 = vrot.lane.b32.xlu0 %v2419_v11, %s2785_s8 }
 0x12c   : > { %1651 = vst.msk [vmem:[%s2984_s29 + $0xb4] sm:$0xf] %vm1605_vm0, %v2420_v23  ;;  %1696 = vrot.lane.b32.xlu1 %v2388_v22, %s2785_s8  ;;  %v784_v30 = vpop.f32.mrf.mxu0  ;;  %v944_v31 = vpop.f32.mrf.mxu1 }
 0x12d   : > { %v2389_v32 = vpack.c.bf16 %v783_v27, %v783_v27  ;;  %v2421_v33 = vpack.c.bf16 %v943_v28, %v943_v28  ;;  %v785_v34 = vadd.f32 %v784_v30, %v2974_v55  ;;  %v945_v35 = vadd.f32 %v944_v31, %v2974_v55 }
 0x12e   : > { %v786_v36 = vpop.f32.mrf.mxu0  ;;  %v946_v37 = vpop.f32.mrf.mxu1 }
 0x12f   : > { %1620 = vst.msk [vmem:[%s2984_s29 + $0x38] sm:$0xf] %vm1605_vm0, %v2389_v32  ;;  %1652 = vst.msk [vmem:[%s2984_s29 + $0xb8] sm:$0xf] %vm1605_vm0, %v2421_v33  ;;  %v2477_v38 = vpack.c.bf16 %v785_v34, %v781_v29  ;;  %v2557_v39 = vpack.c.bf16 %v945_v35, %v941_v26  ;;  %v787_v40 = vadd.f32 %v786_v36, %v2972_v54  ;;  %1698 = vrot.lane.b32.xlu0 %v2389_v32, %s2785_s8 }
 0x130   : > { %v947_v41 = vadd.f32 %v946_v37, %v2972_v54  ;;  %1760 = vrot.lane.b32.xlu1 %v2420_v23, %s2785_s8  ;;  %v790_v42 = vpop.f32.mrf.mxu0  ;;  %v950_v43 = vpop.f32.mrf.mxu1 }
 0x131   : > { %2605 = vst [vmem:[%s2992_s7 + $0x38] sm:$0xff] %v2477_v38   ;;  %2621 = vst [vmem:[%s2992_s7 + $0xb8] sm:$0xff] %v2557_v39   ;;  %v2390_v44 = vpack.c.bf16 %v787_v40, %v787_v40  ;;  %v951_v48 = vadd.f32 %v950_v43, %v2974_v55  ;;  %v791_v51 = vadd.f32 %v790_v42, %v2974_v55 }
 0x132   : > { %v2422_v45 = vpack.c.bf16 %v947_v41, %v947_v41  ;;  %v792_v46 = vpop.f32.mrf.mxu0  ;;  %v952_v47 = vpop.f32.mrf.mxu1 }
 0x133   : > { %1621 = vst.msk [vmem:[%s2984_s29 + $0x3c] sm:$0xf] %vm1605_vm0, %v2390_v44  ;;  %v793_v49 = vadd.f32 %v792_v46, %v2972_v54  ;;  %v953_v50 = vadd.f32 %v952_v47, %v2972_v54  ;;  %1762 = vrot.lane.b32.xlu0 %v2421_v33, %s2785_s8 }
 0x134   : > { %1653 = vst.msk [vmem:[%s2984_s29 + $0xbc] sm:$0xf] %vm1605_vm0, %v2422_v45  ;;  %1700 = vrot.lane.b32.xlu1 %v2390_v44, %s2785_s8  ;;  %v794_v52 = vpop.f32.mrf.mxu0  ;;  %v954_v53 = vpop.f32.mrf.mxu1 }
 0x135   : > { %v2391_v56 = vpack.c.bf16 %v793_v49, %v793_v49  ;;  %v2423_v57 = vpack.c.bf16 %v953_v50, %v953_v50  ;;  %v795_v58 = vadd.f32 %v794_v52, %v2974_v55  ;;  %v955_v59 = vadd.f32 %v954_v53, %v2974_v55 }
 0x136   : > { %v796_v60 = vpop.f32.mrf.mxu0  ;;  %v956_v61 = vpop.f32.mrf.mxu1 }
 0x137   : > { %1622 = vst.msk [vmem:[%s2984_s29 + $0x40] sm:$0xf] %vm1605_vm0, %v2391_v56  ;;  %1654 = vst.msk [vmem:[%s2984_s29 + $0xc0] sm:$0xf] %vm1605_vm0, %v2423_v57  ;;  %v2482_v62 = vpack.c.bf16 %v795_v58, %v791_v51  ;;  %v2562_v63 = vpack.c.bf16 %v955_v59, %v951_v48  ;;  %v797_v0 = vadd.f32 %v796_v60, %v2972_v54  ;;  %1702 = vrot.lane.b32.xlu0 %v2391_v56, %s2785_s8 }
 0x138   : > { %v957_v1 = vadd.f32 %v956_v61, %v2972_v54  ;;  %1764 = vrot.lane.b32.xlu1 %v2422_v45, %s2785_s8  ;;  %v800_v2 = vpop.f32.mrf.mxu0  ;;  %v960_v3 = vpop.f32.mrf.mxu1 }
 0x139   : > { %2606 = vst [vmem:[%s2992_s7 + $0x40] sm:$0xff] %v2482_v62   ;;  %2622 = vst [vmem:[%s2992_s7 + $0xc0] sm:$0xff] %v2562_v63   ;;  %v2392_v4 = vpack.c.bf16 %v797_v0, %v797_v0  ;;  %v961_v8 = vadd.f32 %v960_v3, %v2974_v55  ;;  %v801_v11 = vadd.f32 %v800_v2, %v2974_v55 }
 0x13a   : > { %v2424_v5 = vpack.c.bf16 %v957_v1, %v957_v1  ;;  %v802_v6 = vpop.f32.mrf.mxu0  ;;  %v962_v7 = vpop.f32.mrf.mxu1 }
 0x13b   : > { %1623 = vst.msk [vmem:[%s2984_s29 + $0x44] sm:$0xf] %vm1605_vm0, %v2392_v4  ;;  %v803_v9 = vadd.f32 %v802_v6, %v2972_v54  ;;  %v963_v10 = vadd.f32 %v962_v7, %v2972_v54  ;;  %1766 = vrot.lane.b32.xlu0 %v2423_v57, %s2785_s8 }
 0x13c   : > { %1655 = vst.msk [vmem:[%s2984_s29 + $0xc4] sm:$0xf] %vm1605_vm0, %v2424_v5  ;;  %1704 = vrot.lane.b32.xlu1 %v2392_v4, %s2785_s8  ;;  %v804_v12 = vpop.f32.mrf.mxu0  ;;  %v964_v13 = vpop.f32.mrf.mxu1 }
 0x13d   : > { %v2393_v14 = vpack.c.bf16 %v803_v9, %v803_v9  ;;  %v2425_v15 = vpack.c.bf16 %v963_v10, %v963_v10  ;;  %v805_v16 = vadd.f32 %v804_v12, %v2974_v55  ;;  %v965_v17 = vadd.f32 %v964_v13, %v2974_v55 }
 0x13e   : > { %v806_v18 = vpop.f32.mrf.mxu0  ;;  %v966_v19 = vpop.f32.mrf.mxu1 }
 0x13f   : > { %1624 = vst.msk [vmem:[%s2984_s29 + $0x48] sm:$0xf] %vm1605_vm0, %v2393_v14  ;;  %1656 = vst.msk [vmem:[%s2984_s29 + $0xc8] sm:$0xf] %vm1605_vm0, %v2425_v15  ;;  %v2487_v20 = vpack.c.bf16 %v805_v16, %v801_v11  ;;  %v2567_v21 = vpack.c.bf16 %v965_v17, %v961_v8  ;;  %v807_v22 = vadd.f32 %v806_v18, %v2972_v54  ;;  %1706 = vrot.lane.b32.xlu0 %v2393_v14, %s2785_s8 }
 0x140   : > { %v967_v23 = vadd.f32 %v966_v19, %v2972_v54  ;;  %1768 = vrot.lane.b32.xlu1 %v2424_v5, %s2785_s8  ;;  %v810_v24 = vpop.f32.mrf.mxu0  ;;  %v970_v25 = vpop.f32.mrf.mxu1 }
 0x141   : > { %2607 = vst [vmem:[%s2992_s7 + $0x48] sm:$0xff] %v2487_v20   ;;  %2623 = vst [vmem:[%s2992_s7 + $0xc8] sm:$0xff] %v2567_v21   ;;  %v2394_v26 = vpack.c.bf16 %v807_v22, %v807_v22  ;;  %v971_v30 = vadd.f32 %v970_v25, %v2974_v55  ;;  %v811_v33 = vadd.f32 %v810_v24, %v2974_v55 }
 0x142   : > { %v2426_v27 = vpack.c.bf16 %v967_v23, %v967_v23  ;;  %v812_v28 = vpop.f32.mrf.mxu0  ;;  %v972_v29 = vpop.f32.mrf.mxu1 }
 0x143   : > { %1625 = vst.msk [vmem:[%s2984_s29 + $0x4c] sm:$0xf] %vm1605_vm0, %v2394_v26  ;;  %v813_v31 = vadd.f32 %v812_v28, %v2972_v54  ;;  %v973_v32 = vadd.f32 %v972_v29, %v2972_v54  ;;  %1770 = vrot.lane.b32.xlu0 %v2425_v15, %s2785_s8 }
 0x144   : > { %1657 = vst.msk [vmem:[%s2984_s29 + $0xcc] sm:$0xf] %vm1605_vm0, %v2426_v27  ;;  %1708 = vrot.lane.b32.xlu1 %v2394_v26, %s2785_s8  ;;  %v814_v34 = vpop.f32.mrf.mxu0  ;;  %v974_v35 = vpop.f32.mrf.mxu1 }
 0x145   : > { %v2395_v36 = vpack.c.bf16 %v813_v31, %v813_v31  ;;  %v2427_v37 = vpack.c.bf16 %v973_v32, %v973_v32  ;;  %v815_v38 = vadd.f32 %v814_v34, %v2974_v55  ;;  %v975_v39 = vadd.f32 %v974_v35, %v2974_v55 }
 0x146   : > { %v816_v40 = vpop.f32.mrf.mxu0  ;;  %v976_v41 = vpop.f32.mrf.mxu1 }
 0x147   : > { %1626 = vst.msk [vmem:[%s2984_s29 + $0x50] sm:$0xf] %vm1605_vm0, %v2395_v36  ;;  %1658 = vst.msk [vmem:[%s2984_s29 + $0xd0] sm:$0xf] %vm1605_vm0, %v2427_v37  ;;  %v2492_v42 = vpack.c.bf16 %v815_v38, %v811_v33  ;;  %v2572_v43 = vpack.c.bf16 %v975_v39, %v971_v30  ;;  %v817_v44 = vadd.f32 %v816_v40, %v2972_v54  ;;  %1710 = vrot.lane.b32.xlu0 %v2395_v36, %s2785_s8 }
 0x148   : > { %v977_v45 = vadd.f32 %v976_v41, %v2972_v54  ;;  %1772 = vrot.lane.b32.xlu1 %v2426_v27, %s2785_s8  ;;  %v820_v46 = vpop.f32.mrf.mxu0  ;;  %v980_v47 = vpop.f32.mrf.mxu1 }
 0x149   : > { %2608 = vst [vmem:[%s2992_s7 + $0x50] sm:$0xff] %v2492_v42   ;;  %2624 = vst [vmem:[%s2992_s7 + $0xd0] sm:$0xff] %v2572_v43   ;;  %v2396_v48 = vpack.c.bf16 %v817_v44, %v817_v44  ;;  %v981_v52 = vadd.f32 %v980_v47, %v2974_v55  ;;  %v821_v57 = vadd.f32 %v820_v46, %v2974_v55 }
 0x14a   : > { %v2428_v49 = vpack.c.bf16 %v977_v45, %v977_v45  ;;  %v822_v50 = vpop.f32.mrf.mxu0  ;;  %v982_v51 = vpop.f32.mrf.mxu1 }
 0x14b   : > { %1627 = vst.msk [vmem:[%s2984_s29 + $0x54] sm:$0xf] %vm1605_vm0, %v2396_v48  ;;  %v823_v53 = vadd.f32 %v822_v50, %v2972_v54  ;;  %v983_v56 = vadd.f32 %v982_v51, %v2972_v54  ;;  %1774 = vrot.lane.b32.xlu0 %v2427_v37, %s2785_s8 }
 0x14c   : > { %1659 = vst.msk [vmem:[%s2984_s29 + $0xd4] sm:$0xf] %vm1605_vm0, %v2428_v49  ;;  %1712 = vrot.lane.b32.xlu1 %v2396_v48, %s2785_s8  ;;  %v824_v58 = vpop.f32.mrf.mxu0  ;;  %v984_v59 = vpop.f32.mrf.mxu1 }
 0x14d   : > { %v2397_v60 = vpack.c.bf16 %v823_v53, %v823_v53  ;;  %v2429_v61 = vpack.c.bf16 %v983_v56, %v983_v56  ;;  %v825_v62 = vadd.f32 %v824_v58, %v2974_v55  ;;  %v985_v63 = vadd.f32 %v984_v59, %v2974_v55 }
 0x14e   : > { %v826_v0 = vpop.f32.mrf.mxu0  ;;  %v986_v1 = vpop.f32.mrf.mxu1 }
 0x14f   : > { %1628 = vst.msk [vmem:[%s2984_s29 + $0x58] sm:$0xf] %vm1605_vm0, %v2397_v60  ;;  %1660 = vst.msk [vmem:[%s2984_s29 + $0xd8] sm:$0xf] %vm1605_vm0, %v2429_v61  ;;  %v2497_v2 = vpack.c.bf16 %v825_v62, %v821_v57  ;;  %v2577_v3 = vpack.c.bf16 %v985_v63, %v981_v52  ;;  %v827_v4 = vadd.f32 %v826_v0, %v2972_v54  ;;  %1714 = vrot.lane.b32.xlu0 %v2397_v60, %s2785_s8 }
 0x150   : > { %v987_v5 = vadd.f32 %v986_v1, %v2972_v54  ;;  %1776 = vrot.lane.b32.xlu1 %v2428_v49, %s2785_s8  ;;  %v830_v6 = vpop.f32.mrf.mxu0  ;;  %v990_v7 = vpop.f32.mrf.mxu1 }
 0x151   : > { %2609 = vst [vmem:[%s2992_s7 + $0x58] sm:$0xff] %v2497_v2   ;;  %2625 = vst [vmem:[%s2992_s7 + $0xd8] sm:$0xff] %v2577_v3   ;;  %v2398_v8 = vpack.c.bf16 %v827_v4, %v827_v4  ;;  %v991_v12 = vadd.f32 %v990_v7, %v2974_v55  ;;  %v831_v15 = vadd.f32 %v830_v6, %v2974_v55 }
 0x152   : > { %v2430_v9 = vpack.c.bf16 %v987_v5, %v987_v5  ;;  %v832_v10 = vpop.f32.mrf.mxu0  ;;  %v992_v11 = vpop.f32.mrf.mxu1 }
 0x153   : > { %1629 = vst.msk [vmem:[%s2984_s29 + $0x5c] sm:$0xf] %vm1605_vm0, %v2398_v8  ;;  %v833_v13 = vadd.f32 %v832_v10, %v2972_v54  ;;  %v993_v14 = vadd.f32 %v992_v11, %v2972_v54  ;;  %1778 = vrot.lane.b32.xlu0 %v2429_v61, %s2785_s8 }
 0x154   : > { %1661 = vst.msk [vmem:[%s2984_s29 + $0xdc] sm:$0xf] %vm1605_vm0, %v2430_v9  ;;  %1716 = vrot.lane.b32.xlu1 %v2398_v8, %s2785_s8  ;;  %v834_v16 = vpop.f32.mrf.mxu0  ;;  %v994_v17 = vpop.f32.mrf.mxu1 }
 0x155   : > { %v2399_v18 = vpack.c.bf16 %v833_v13, %v833_v13  ;;  %v2431_v19 = vpack.c.bf16 %v993_v14, %v993_v14  ;;  %v835_v20 = vadd.f32 %v834_v16, %v2974_v55  ;;  %v995_v21 = vadd.f32 %v994_v17, %v2974_v55 }
 0x156   : > { %v836_v22 = vpop.f32.mrf.mxu0  ;;  %v996_v23 = vpop.f32.mrf.mxu1 }
 0x157   : > { %1630 = vst.msk [vmem:[%s2984_s29 + $0x60] sm:$0xf] %vm1605_vm0, %v2399_v18  ;;  %1662 = vst.msk [vmem:[%s2984_s29 + $0xe0] sm:$0xf] %vm1605_vm0, %v2431_v19  ;;  %v2502_v24 = vpack.c.bf16 %v835_v20, %v831_v15  ;;  %v2582_v25 = vpack.c.bf16 %v995_v21, %v991_v12  ;;  %v837_v26 = vadd.f32 %v836_v22, %v2972_v54  ;;  %1718 = vrot.lane.b32.xlu0 %v2399_v18, %s2785_s8 }
 0x158   : > { %v997_v27 = vadd.f32 %v996_v23, %v2972_v54  ;;  %1780 = vrot.lane.b32.xlu1 %v2430_v9, %s2785_s8  ;;  %v840_v28 = vpop.f32.mrf.mxu0  ;;  %v1000_v29 = vpop.f32.mrf.mxu1 }
 0x159   : > { %2610 = vst [vmem:[%s2992_s7 + $0x60] sm:$0xff] %v2502_v24   ;;  %2626 = vst [vmem:[%s2992_s7 + $0xe0] sm:$0xff] %v2582_v25   ;;  %v2400_v30 = vpack.c.bf16 %v837_v26, %v837_v26  ;;  %v1001_v34 = vadd.f32 %v1000_v29, %v2974_v55  ;;  %v841_v37 = vadd.f32 %v840_v28, %v2974_v55 }
 0x15a   : > { %v2432_v31 = vpack.c.bf16 %v997_v27, %v997_v27  ;;  %v842_v32 = vpop.f32.mrf.mxu0  ;;  %v1002_v33 = vpop.f32.mrf.mxu1 }
 0x15b   : > { %1631 = vst.msk [vmem:[%s2984_s29 + $0x64] sm:$0xf] %vm1605_vm0, %v2400_v30  ;;  %v843_v35 = vadd.f32 %v842_v32, %v2972_v54  ;;  %v1003_v36 = vadd.f32 %v1002_v33, %v2972_v54  ;;  %1782 = vrot.lane.b32.xlu0 %v2431_v19, %s2785_s8 }
 0x15c   : > { %1663 = vst.msk [vmem:[%s2984_s29 + $0xe4] sm:$0xf] %vm1605_vm0, %v2432_v31  ;;  %1720 = vrot.lane.b32.xlu1 %v2400_v30, %s2785_s8  ;;  %v844_v38 = vpop.f32.mrf.mxu0  ;;  %v1004_v39 = vpop.f32.mrf.mxu1 }
 0x15d   : > { %v2401_v40 = vpack.c.bf16 %v843_v35, %v843_v35  ;;  %v2433_v41 = vpack.c.bf16 %v1003_v36, %v1003_v36  ;;  %v845_v42 = vadd.f32 %v844_v38, %v2974_v55  ;;  %v1005_v43 = vadd.f32 %v1004_v39, %v2974_v55 }
 0x15e   : > { %v846_v44 = vpop.f32.mrf.mxu0  ;;  %v1006_v45 = vpop.f32.mrf.mxu1 }
 0x15f   : > { %1632 = vst.msk [vmem:[%s2984_s29 + $0x68] sm:$0xf] %vm1605_vm0, %v2401_v40  ;;  %1664 = vst.msk [vmem:[%s2984_s29 + $0xe8] sm:$0xf] %vm1605_vm0, %v2433_v41  ;;  %v2507_v46 = vpack.c.bf16 %v845_v42, %v841_v37  ;;  %v2587_v47 = vpack.c.bf16 %v1005_v43, %v1001_v34  ;;  %v847_v48 = vadd.f32 %v846_v44, %v2972_v54  ;;  %1722 = vrot.lane.b32.xlu0 %v2401_v40, %s2785_s8 }
 0x160   : > { %v1007_v49 = vadd.f32 %v1006_v45, %v2972_v54  ;;  %1784 = vrot.lane.b32.xlu1 %v2432_v31, %s2785_s8  ;;  %v850_v50 = vpop.f32.mrf.mxu0  ;;  %v1010_v51 = vpop.f32.mrf.mxu1 }
 0x161   : > { %2611 = vst [vmem:[%s2992_s7 + $0x68] sm:$0xff] %v2507_v46   ;;  %2627 = vst [vmem:[%s2992_s7 + $0xe8] sm:$0xff] %v2587_v47   ;;  %v2402_v52 = vpack.c.bf16 %v847_v48, %v847_v48  ;;  %v1011_v58 = vadd.f32 %v1010_v51, %v2974_v55  ;;  %v851_v61 = vadd.f32 %v850_v50, %v2974_v55 }
 0x162   : > { %v2434_v53 = vpack.c.bf16 %v1007_v49, %v1007_v49  ;;  %v852_v56 = vpop.f32.mrf.mxu0  ;;  %v1012_v57 = vpop.f32.mrf.mxu1 }
 0x163   : > { %1633 = vst.msk [vmem:[%s2984_s29 + $0x6c] sm:$0xf] %vm1605_vm0, %v2402_v52  ;;  %v853_v59 = vadd.f32 %v852_v56, %v2972_v54  ;;  %v1013_v60 = vadd.f32 %v1012_v57, %v2972_v54  ;;  %1786 = vrot.lane.b32.xlu0 %v2433_v41, %s2785_s8 }
 0x164   : > { %1665 = vst.msk [vmem:[%s2984_s29 + $0xec] sm:$0xf] %vm1605_vm0, %v2434_v53  ;;  %1724 = vrot.lane.b32.xlu1 %v2402_v52, %s2785_s8  ;;  %v854_v62 = vpop.f32.mrf.mxu0  ;;  %v1014_v63 = vpop.f32.mrf.mxu1 }
 0x165   : > { %v2403_v0 = vpack.c.bf16 %v853_v59, %v853_v59  ;;  %v2435_v1 = vpack.c.bf16 %v1013_v60, %v1013_v60  ;;  %v855_v2 = vadd.f32 %v854_v62, %v2974_v55  ;;  %v1015_v3 = vadd.f32 %v1014_v63, %v2974_v55 }
 0x166   : > { %v856_v4 = vpop.f32.mrf.mxu0  ;;  %v1016_v5 = vpop.f32.mrf.mxu1 }
 0x167   : > { %1634 = vst.msk [vmem:[%s2984_s29 + $0x70] sm:$0xf] %vm1605_vm0, %v2403_v0  ;;  %1666 = vst.msk [vmem:[%s2984_s29 + $0xf0] sm:$0xf] %vm1605_vm0, %v2435_v1  ;;  %v2512_v6 = vpack.c.bf16 %v855_v2, %v851_v61  ;;  %v2592_v7 = vpack.c.bf16 %v1015_v3, %v1011_v58  ;;  %v857_v8 = vadd.f32 %v856_v4, %v2972_v54  ;;  %1726 = vrot.lane.b32.xlu0 %v2403_v0, %s2785_s8 }
 0x168   : > { %v1017_v9 = vadd.f32 %v1016_v5, %v2972_v54  ;;  %1788 = vrot.lane.b32.xlu1 %v2434_v53, %s2785_s8  ;;  %v860_v10 = vpop.f32.mrf.mxu0  ;;  %v1020_v11 = vpop.f32.mrf.mxu1 }
 0x169   : > { %2612 = vst [vmem:[%s2992_s7 + $0x70] sm:$0xff] %v2512_v6   ;;  %2628 = vst [vmem:[%s2992_s7 + $0xf0] sm:$0xff] %v2592_v7   ;;  %v2404_v12 = vpack.c.bf16 %v857_v8, %v857_v8  ;;  %v1671_v14 = vpop.permute.xlu0 %1670  ;;  %v1021_v17 = vadd.f32 %v1020_v11, %v2974_v55  ;;  %v861_v20 = vadd.f32 %v860_v10, %v2974_v55 }
 0x16a   : > { %v2436_v13 = vpack.c.bf16 %v1017_v9, %v1017_v9  ;;  %1862 = vst.msk [vmem:[%s3312_s11] sm:$0xf] %vm1605_vm0, %v1671_v14  ;;  %v862_v15 = vpop.f32.mrf.mxu0  ;;  %v1022_v16 = vpop.f32.mrf.mxu1 }
 0x16b   : > { %1635 = vst.msk [vmem:[%s2984_s29 + $0x74] sm:$0xf] %vm1605_vm0, %v2404_v12  ;;  %v863_v18 = vadd.f32 %v862_v15, %v2972_v54  ;;  %v1023_v19 = vadd.f32 %v1022_v16, %v2972_v54  ;;  %1790 = vrot.lane.b32.xlu0 %v2435_v1, %s2785_s8 }
 0x16c   : > { %1667 = vst.msk [vmem:[%s2984_s29 + $0xf4] sm:$0xf] %vm1605_vm0, %v2436_v13  ;;  %1728 = vrot.lane.b32.xlu1 %v2404_v12, %s2785_s8  ;;  %v864_v21 = vpop.f32.mrf.mxu0  ;;  %v1024_v22 = vpop.f32.mrf.mxu1 }
 0x16d   : > { %v2405_v23 = vpack.c.bf16 %v863_v18, %v863_v18  ;;  %v2437_v24 = vpack.c.bf16 %v1023_v19, %v1023_v19  ;;  %v865_v25 = vadd.f32 %v864_v21, %v2974_v55  ;;  %v1025_v26 = vadd.f32 %v1024_v22, %v2974_v55  ;;  %v1735_v28 = vpop.permute.xlu0 %1734 }
 0x16e   : > { %v1737_v27 = vpop.permute.xlu1 %1736  ;;  %1894 = vst.msk [vmem:[%s3312_s11 + $0x80] sm:$0xf] %vm1605_vm0, %v1735_v28  ;;  %v866_v29 = vpop.f32.mrf.mxu0 }
 0x16f   : > { %1895 = vst.msk [vmem:[%s3312_s11 + $0x84] sm:$0xf] %vm1605_vm0, %v1737_v27  ;;  %v1026_v30 = vpop.f32.mrf.mxu1  ;;  %1636 = vst.msk [vmem:[%s2984_s29 + $0x78] sm:$0xf] %vm1605_vm0, %v2405_v23  ;;  %v2517_v31 = vpack.c.bf16 %v865_v25, %v861_v20  ;;  %v2597_v32 = vpack.c.bf16 %v1025_v26, %v1021_v17  ;;  %v867_v55 = vadd.f32 %v866_v29, %v2972_v54  ;;  %1730 = vrot.lane.b32.xlu0 %v2405_v23, %s2785_s8 }
 0x170   : > { %1668 = vst.msk [vmem:[%s2984_s29 + $0xf8] sm:$0xf] %vm1605_vm0, %v2437_v24  ;;  %v1027_v33 = vadd.f32 %v1026_v30, %v2972_v54  ;;  %1792 = vrot.lane.b32.xlu1 %v2436_v13, %s2785_s8 }
 0x171   : > { %2613 = vst [vmem:[%s2992_s7 + $0x78] sm:$0xff] %v2517_v31   ;;  %2629 = vst [vmem:[%s2992_s7 + $0xf8] sm:$0xff] %v2597_v32   ;;  %v2406_v34 = vpack.c.bf16 %v867_v55, %v867_v55  ;;  %v1673_v37 = vpop.permute.xlu0 %1672 }
 0x172   : > { %v2438_v35 = vpack.c.bf16 %v1027_v33, %v1027_v33  ;;  %v1675_v36 = vpop.permute.xlu1 %1674  ;;  %1863 = vst.msk [vmem:[%s3312_s11 + $0x4] sm:$0xf] %vm1605_vm0, %v1673_v37 }
 0x173   : > { %1864 = vst.msk [vmem:[%s3312_s11 + $0x8] sm:$0xf] %vm1605_vm0, %v1675_v36  ;;  %1637 = vst.msk [vmem:[%s2984_s29 + $0x7c] sm:$0xf] %vm1605_vm0, %v2406_v34  ;;  %1794 = vrot.lane.b32.xlu0 %v2437_v24, %s2785_s8 }
 0x174   : > { %1669 = vst.msk [vmem:[%s2984_s29 + $0xfc] sm:$0xf] %vm1605_vm0, %v2438_v35  ;;  %1732 = vrot.lane.b32.xlu1 %v2406_v34, %s2785_s8 }
 0x175   : > { %v1739_v38 = vpop.permute.xlu0 %1738 }
 0x176   : > { %v1677_v54 = vpop.permute.xlu1 %1676  ;;  %1896 = vst.msk [vmem:[%s3312_s11 + $0x88] sm:$0xf] %vm1605_vm0, %v1739_v38 }
 0x177   : > { %1865 = vst.msk [vmem:[%s3312_s11 + $0xc] sm:$0xf] %vm1605_vm0, %v1677_v54 }
 0x178   : > { %1796 = vrot.lane.b32.xlu1 %v2438_v35, %s2785_s8 }
 0x179   : > { %v1679_v40 = vpop.permute.xlu0 %1678 }
 0x17a   : > { %v1741_v39 = vpop.permute.xlu1 %1740  ;;  %1866 = vst.msk [vmem:[%s3312_s11 + $0x10] sm:$0xf] %vm1605_vm0, %v1679_v40 }
 0x17b   : > { %1897 = vst.msk [vmem:[%s3312_s11 + $0x8c] sm:$0xf] %vm1605_vm0, %v1741_v39 }
 0x17d   : > { %v1743_v42 = vpop.permute.xlu0 %1742 }
 0x17e   : > { %v1681_v41 = vpop.permute.xlu1 %1680  ;;  %1898 = vst.msk [vmem:[%s3312_s11 + $0x90] sm:$0xf] %vm1605_vm0, %v1743_v42 }
 0x17f   : > { %1867 = vst.msk [vmem:[%s3312_s11 + $0x14] sm:$0xf] %vm1605_vm0, %v1681_v41 }
 0x181   : > { %v1683_v44 = vpop.permute.xlu0 %1682 }
 0x182   : > { %v1745_v43 = vpop.permute.xlu1 %1744  ;;  %1868 = vst.msk [vmem:[%s3312_s11 + $0x18] sm:$0xf] %vm1605_vm0, %v1683_v44 }
 0x183   : > { %1899 = vst.msk [vmem:[%s3312_s11 + $0x94] sm:$0xf] %vm1605_vm0, %v1745_v43 }
 0x185   : > { %v1747_v46 = vpop.permute.xlu0 %1746 }
 0x186   : > { %v1685_v45 = vpop.permute.xlu1 %1684  ;;  %1900 = vst.msk [vmem:[%s3312_s11 + $0x98] sm:$0xf] %vm1605_vm0, %v1747_v46 }
 0x187   : > { %1869 = vst.msk [vmem:[%s3312_s11 + $0x1c] sm:$0xf] %vm1605_vm0, %v1685_v45 }
 0x189   : > { %v1687_v48 = vpop.permute.xlu0 %1686 }
 0x18a   : > { %v1749_v47 = vpop.permute.xlu1 %1748  ;;  %1870 = vst.msk [vmem:[%s3312_s11 + $0x20] sm:$0xf] %vm1605_vm0, %v1687_v48 }
 0x18b   : > { %1901 = vst.msk [vmem:[%s3312_s11 + $0x9c] sm:$0xf] %vm1605_vm0, %v1749_v47 }
 0x18d   : > { %v1751_v50 = vpop.permute.xlu0 %1750 }
 0x18e   : > { %v1689_v49 = vpop.permute.xlu1 %1688  ;;  %1902 = vst.msk [vmem:[%s3312_s11 + $0xa0] sm:$0xf] %vm1605_vm0, %v1751_v50 }
 0x18f   : > { %1871 = vst.msk [vmem:[%s3312_s11 + $0x24] sm:$0xf] %vm1605_vm0, %v1689_v49 }
 0x191   : > { %v1691_v52 = vpop.permute.xlu0 %1690 }
 0x192   : > { %v1753_v51 = vpop.permute.xlu1 %1752  ;;  %1872 = vst.msk [vmem:[%s3312_s11 + $0x28] sm:$0xf] %vm1605_vm0, %v1691_v52 }
 0x193   : > { %1903 = vst.msk [vmem:[%s3312_s11 + $0xa4] sm:$0xf] %vm1605_vm0, %v1753_v51 }
 0x195   : > { %v1755_v56 = vpop.permute.xlu0 %1754 }
 0x196   : > { %v1693_v53 = vpop.permute.xlu1 %1692  ;;  %1904 = vst.msk [vmem:[%s3312_s11 + $0xa8] sm:$0xf] %vm1605_vm0, %v1755_v56 }
 0x197   : > { %1873 = vst.msk [vmem:[%s3312_s11 + $0x2c] sm:$0xf] %vm1605_vm0, %v1693_v53 }
 0x199   : > { %v1695_v58 = vpop.permute.xlu0 %1694 }
 0x19a   : > { %v1757_v57 = vpop.permute.xlu1 %1756  ;;  %1874 = vst.msk [vmem:[%s3312_s11 + $0x30] sm:$0xf] %vm1605_vm0, %v1695_v58 }
 0x19b   : > { %1905 = vst.msk [vmem:[%s3312_s11 + $0xac] sm:$0xf] %vm1605_vm0, %v1757_v57 }
 0x19d   : > { %v1759_v60 = vpop.permute.xlu0 %1758 }
 0x19e   : > { %v1697_v59 = vpop.permute.xlu1 %1696  ;;  %1906 = vst.msk [vmem:[%s3312_s11 + $0xb0] sm:$0xf] %vm1605_vm0, %v1759_v60 }
 0x19f   : > { %1875 = vst.msk [vmem:[%s3312_s11 + $0x34] sm:$0xf] %vm1605_vm0, %v1697_v59 }
 0x1a1   : > { %v1699_v62 = vpop.permute.xlu0 %1698 }
 0x1a2   : > { %v1761_v61 = vpop.permute.xlu1 %1760  ;;  %1876 = vst.msk [vmem:[%s3312_s11 + $0x38] sm:$0xf] %vm1605_vm0, %v1699_v62 }
 0x1a3   : > { %1907 = vst.msk [vmem:[%s3312_s11 + $0xb4] sm:$0xf] %vm1605_vm0, %v1761_v61 }
 0x1a5   : > { %v1763_v0 = vpop.permute.xlu0 %1762 }
 0x1a6   : > { %v1701_v63 = vpop.permute.xlu1 %1700  ;;  %1908 = vst.msk [vmem:[%s3312_s11 + $0xb8] sm:$0xf] %vm1605_vm0, %v1763_v0 }
 0x1a7   : > { %1877 = vst.msk [vmem:[%s3312_s11 + $0x3c] sm:$0xf] %vm1605_vm0, %v1701_v63 }
 0x1a9   : > { %v1703_v2 = vpop.permute.xlu0 %1702 }
 0x1aa   : > { %v1765_v1 = vpop.permute.xlu1 %1764  ;;  %1878 = vst.msk [vmem:[%s3312_s11 + $0x40] sm:$0xf] %vm1605_vm0, %v1703_v2 }
 0x1ab   : > { %1909 = vst.msk [vmem:[%s3312_s11 + $0xbc] sm:$0xf] %vm1605_vm0, %v1765_v1 }
 0x1ad   : > { %v1767_v4 = vpop.permute.xlu0 %1766 }
 0x1ae   : > { %v1705_v3 = vpop.permute.xlu1 %1704  ;;  %1910 = vst.msk [vmem:[%s3312_s11 + $0xc0] sm:$0xf] %vm1605_vm0, %v1767_v4 }
 0x1af   : > { %1879 = vst.msk [vmem:[%s3312_s11 + $0x44] sm:$0xf] %vm1605_vm0, %v1705_v3 }
 0x1b1   : > { %v1707_v6 = vpop.permute.xlu0 %1706 }
 0x1b2   : > { %v1769_v5 = vpop.permute.xlu1 %1768  ;;  %1880 = vst.msk [vmem:[%s3312_s11 + $0x48] sm:$0xf] %vm1605_vm0, %v1707_v6 }
 0x1b3   : > { %1911 = vst.msk [vmem:[%s3312_s11 + $0xc4] sm:$0xf] %vm1605_vm0, %v1769_v5 }
 0x1b5   : > { %v1771_v8 = vpop.permute.xlu0 %1770 }
 0x1b6   : > { %v1709_v7 = vpop.permute.xlu1 %1708  ;;  %1912 = vst.msk [vmem:[%s3312_s11 + $0xc8] sm:$0xf] %vm1605_vm0, %v1771_v8 }
 0x1b7   : > { %1881 = vst.msk [vmem:[%s3312_s11 + $0x4c] sm:$0xf] %vm1605_vm0, %v1709_v7 }
 0x1b9   : > { %v1711_v10 = vpop.permute.xlu0 %1710 }
 0x1ba   : > { %v1773_v9 = vpop.permute.xlu1 %1772  ;;  %1882 = vst.msk [vmem:[%s3312_s11 + $0x50] sm:$0xf] %vm1605_vm0, %v1711_v10 }
 0x1bb   : > { %1913 = vst.msk [vmem:[%s3312_s11 + $0xcc] sm:$0xf] %vm1605_vm0, %v1773_v9 }
 0x1bd   : > { %v1775_v12 = vpop.permute.xlu0 %1774 }
 0x1be   : > { %v1713_v11 = vpop.permute.xlu1 %1712  ;;  %1914 = vst.msk [vmem:[%s3312_s11 + $0xd0] sm:$0xf] %vm1605_vm0, %v1775_v12 }
 0x1bf   : > { %1883 = vst.msk [vmem:[%s3312_s11 + $0x54] sm:$0xf] %vm1605_vm0, %v1713_v11 }
 0x1c1   : > { %v1715_v14 = vpop.permute.xlu0 %1714 }
 0x1c2   : > { %v1777_v13 = vpop.permute.xlu1 %1776  ;;  %1884 = vst.msk [vmem:[%s3312_s11 + $0x58] sm:$0xf] %vm1605_vm0, %v1715_v14 }
 0x1c3   : > { %1915 = vst.msk [vmem:[%s3312_s11 + $0xd4] sm:$0xf] %vm1605_vm0, %v1777_v13 }
 0x1c5   : > { %v1779_v16 = vpop.permute.xlu0 %1778 }
 0x1c6   : > { %v1717_v15 = vpop.permute.xlu1 %1716  ;;  %1916 = vst.msk [vmem:[%s3312_s11 + $0xd8] sm:$0xf] %vm1605_vm0, %v1779_v16 }
 0x1c7   : > { %1885 = vst.msk [vmem:[%s3312_s11 + $0x5c] sm:$0xf] %vm1605_vm0, %v1717_v15 }
 0x1c9   : > { %v1719_v18 = vpop.permute.xlu0 %1718 }
 0x1ca   : > { %v1781_v17 = vpop.permute.xlu1 %1780  ;;  %1886 = vst.msk [vmem:[%s3312_s11 + $0x60] sm:$0xf] %vm1605_vm0, %v1719_v18 }
 0x1cb   : > { %1917 = vst.msk [vmem:[%s3312_s11 + $0xdc] sm:$0xf] %vm1605_vm0, %v1781_v17 }
 0x1cd   : > { %v1783_v20 = vpop.permute.xlu0 %1782 }
 0x1ce   : > { %v1721_v19 = vpop.permute.xlu1 %1720  ;;  %1918 = vst.msk [vmem:[%s3312_s11 + $0xe0] sm:$0xf] %vm1605_vm0, %v1783_v20 }
 0x1cf   : > { %1887 = vst.msk [vmem:[%s3312_s11 + $0x64] sm:$0xf] %vm1605_vm0, %v1721_v19 }
 0x1d1   : > { %v1723_v22 = vpop.permute.xlu0 %1722 }
 0x1d2   : > { %v1785_v21 = vpop.permute.xlu1 %1784  ;;  %1888 = vst.msk [vmem:[%s3312_s11 + $0x68] sm:$0xf] %vm1605_vm0, %v1723_v22 }
 0x1d3   : > { %1919 = vst.msk [vmem:[%s3312_s11 + $0xe4] sm:$0xf] %vm1605_vm0, %v1785_v21 }
 0x1d5   : > { %v1787_v24 = vpop.permute.xlu0 %1786 }
 0x1d6   : > { %v1725_v23 = vpop.permute.xlu1 %1724  ;;  %1920 = vst.msk [vmem:[%s3312_s11 + $0xe8] sm:$0xf] %vm1605_vm0, %v1787_v24 }
 0x1d7   : > { %1889 = vst.msk [vmem:[%s3312_s11 + $0x6c] sm:$0xf] %vm1605_vm0, %v1725_v23 }
 0x1d9   : > { %v1727_v26 = vpop.permute.xlu0 %1726 }
 0x1da   : > { %v1789_v25 = vpop.permute.xlu1 %1788  ;;  %1890 = vst.msk [vmem:[%s3312_s11 + $0x70] sm:$0xf] %vm1605_vm0, %v1727_v26 }
 0x1db   : > { %1921 = vst.msk [vmem:[%s3312_s11 + $0xec] sm:$0xf] %vm1605_vm0, %v1789_v25 }
 0x1dd   : > { %v1791_v28 = vpop.permute.xlu0 %1790 }
 0x1de   : > { %v1729_v27 = vpop.permute.xlu1 %1728  ;;  %1922 = vst.msk [vmem:[%s3312_s11 + $0xf0] sm:$0xf] %vm1605_vm0, %v1791_v28 }
 0x1df   : > { %1891 = vst.msk [vmem:[%s3312_s11 + $0x74] sm:$0xf] %vm1605_vm0, %v1729_v27 }
 0x1e1   : > { %v1731_v30 = vpop.permute.xlu0 %1730 }
 0x1e2   : > { %v1793_v29 = vpop.permute.xlu1 %1792  ;;  %1892 = vst.msk [vmem:[%s3312_s11 + $0x78] sm:$0xf] %vm1605_vm0, %v1731_v30 }
 0x1e3   : > { %1923 = vst.msk [vmem:[%s3312_s11 + $0xf4] sm:$0xf] %vm1605_vm0, %v1793_v29 }
 0x1e5   : > { %v1795_v32 = vpop.permute.xlu0 %1794 }
 0x1e6   : > { %v1733_v31 = vpop.permute.xlu1 %1732  ;;  %1924 = vst.msk [vmem:[%s3312_s11 + $0xf8] sm:$0xf] %vm1605_vm0, %v1795_v32 }
 0x1e7   : > { %1893 = vst.msk [vmem:[%s3312_s11 + $0x7c] sm:$0xf] %vm1605_vm0, %v1733_v31 }
 0x1ea   : > { %v1797_v55 = vpop.permute.xlu1 %1796 }
 0x1eb   : > { %1925 = vst.msk [vmem:[%s3312_s11 + $0xfc] sm:$0xf] %vm1605_vm0, %v1797_v55 }
 0x1ec PF: > { %s16_s22 = sadd.s32 1, %s2782_s22   ;;  %s3495_s18 = smov %s2774_s20 }
 0x1ed   : > { %p13_p7 = scmp.ge.s32.totalorder %s16_s22, 6   ;;  %s3496_s19 = smov %s2778_s21 }
 0x1ee   : > { %s3497_s20 = smov %s3500_s23  ;;  %s3498_s21 = smov %s3504_s24 }
 0x1ef   :  { %15 = sbr.rel (!%p13_p7) target bundleno = 3 (0x3), region = 86 }

// kernel: self_attention_forward.3
= control target key start
LH: loop header
LB: loop body
LE: loop exit
PB: predicated region body
PF: predicated region fallthrough
CT: control target
= control target key end

     0   :  { %s12117_s0 = inlined_call_operand.vmem [shape: f32[2,1024,128], index: 0, kind: input, shape index: {}]   ;;  %s12118_s1 = inlined_call_operand.vmem [shape: bf16[2,1024,16], index: 1, kind: input, shape index: {}]   ;;  %s12119_s2 = inlined_call_operand.vmem [shape: bf16[2,1024,16], index: 2, kind: input, shape index: {}]   ;;  %s12120_s3 = inlined_call_operand.vmem [shape: bf16[2,1024,128], index: 3, kind: input, shape index: {}]   ;;  %s12121_s4 = inlined_call_operand.<no memory space> [shape: f32[1], index: 4, kind: input, shape index: {}]   ;;  %s12122_s5 = inlined_call_operand.hbm [shape: f32[2,1024,128], index: 5, kind: output, shape index: {}]  }
   0x1   :  { %10 = sst [smem:[#allocation5]] %s12121_s4 }
   0x2   :  { %11 = vsyncpa [#allocation7], 0 }
   0x3   :  { %13 = vsyncpa [#allocation7 + $0x1], 0  ;;  %s8291_s20 = smov 0   ;;  %s8293_s21 = smov 0  }
   0x4   :  { %s8295_s22 = smov 0   ;;  %s8297_s23 = smov 0  }
   0x5   :  { %s8299_s24 = smov 0   ;;  %s8301_s25 = smov 0  }
   0x6   :  { %s8303_s26 = smov 0   ;;  %s8305_s27 = smov 0  }
   0x7   :  { %s8307_s28 = smov 0   ;;  %s8309_s4 = smov 0  }
   0x8 LB: > { %12587 = sst [smem:[#allocation9_spill]] %s8221_s22  ;;  %s6818_s29 = sadd.s32 4294967295, %s8249_s4   ;;  %s8249_s4 = sphi %s8309_s4, %s19_s4   ;;  %s8245_s28 = sphi %s8307_s28, %s13513_s28   ;;  %s8241_s27 = sphi %s8305_s27, %s13509_s27   ;;  %s8237_s26 = sphi %s8303_s26, %s13508_s26   ;;  %s8233_s25 = sphi %s8301_s25, %s13507_s25   ;;  %s8229_s24 = sphi %s8299_s24, %s13506_s24   ;;  %s8225_s23 = sphi %s8297_s23, %s13505_s23   ;;  %s8221_s22 = sphi %s8295_s22, %s13504_s22   ;;  %s8217_s21 = sphi %s8293_s21, %s13512_s21   ;;  %s8213_s20 = sphi %s8291_s20, %s13511_s20  }
   0x9   : > { %12588 = sst [smem:[#allocation10_spill]] %s8237_s26  ;;  %s6819_s30 = sadd.s32 4294967294, %s8249_s4  }
   0xa   : > { %12589 = sst [smem:[#allocation11_spill]] %s8241_s27  ;;  %s31_s6 = sadd.s32 1, %s8237_s26 }
   0xb   : > { %12590 = sst [smem:[#allocation12_spill]] %s8245_s28  ;;  %p32_p0 = scmp.ge.s32.totalorder %s31_s6, 2 }
   0xc   : > { %s34_s7 = sadd.s32 1, %s8241_s27  ;;  %s38_s8 = sadd.s32 1, %s8245_s28 }
   0xd   : > { %p190_p1 = scmp.ne.s32.totalorder %s8221_s22, %s8217_s21  ;;  %s13515_s6 = smov (%p32_p0, %s31_s6), 0 }
   0xe   : > { %12591 = sst [smem:[#allocation13_spill]] %s13515_s6  ;;  %s13517_s7 = smov (!%p32_p0, %s34_s7), %s8241_s27 }
   0xf   : > { %p191_p2 = scmp.eq.s32.totalorder %s6818_s29, 7  ;;  %p196_p3 = scmp.ne.s32.totalorder %s8217_s21, %s8213_s20 }
  0x10   : > { %p36_p4 = scmp.ge.s32.totalorder %s13517_s7, 2  ;;  %p197_p5 = scmp.eq.s32.totalorder %s6819_s30, 7 }
  0x11   : > { %p8353_p6 = por %p191_p2, %p190_p1  ;;  %p6822_p8 = scmp.ge.s32.totalorder %s8249_s4, 1 }
  0x12   : > { %s13519_s7 = smov (%p36_p4, %s13517_s7), 0  ;;  %s13521_s8 = smov (!%p36_p4, %s38_s8), %s8245_s28 }
  0x13   : > { %12593 = sst [smem:[#allocation14_spill]] %s13519_s7  ;;  %p8360_p7 = por %p197_p5, %p196_p3 }
  0x14   : > { %p40_p9 = scmp.ge.s32.totalorder %s13521_s8, 2  ;;  %p270_p10 = scmp.lt.s32.totalorder %s8249_s4, 9 }
  0x15   : > { %s12594_s10 = scalar_select %p8360_p7, 1, 0 }
  0x16   : > { %s176_s11 = ssub.s32 %s8241_s27, %s13519_s7  ;;  %s13523_s8 = smov (%p40_p9, %s13521_s8), 0 }
  0x17   : > { %12595 = sst [smem:[#allocation15_spill]] %s12594_s10  ;;  %p271_p11 = pnand %p6822_p8, %p270_p10 }
  0x18   : > { %12596 = sst [smem:[#allocation16_spill]] %s13523_s8  ;;  %s175_s12 = ssub.s32 %s8245_s28, %s13523_s8 }
  0x19   : > { %s177_s13 = sor.u32 %s176_s11, %s175_s12  ;;  %s180_s14 = sadd.s32 1, %s8221_s22 }
  0x1a   : > { %p178_p12 = scmp.eq.s32.totalorder %s177_s13, 0  ;;  %274 = sbr.rel (%p271_p11) target bundleno = 2750 (0xabe), region = 40 }
  0x1c   : > { %s8374_s15 = scalar_select %p178_p12, %s8221_s22, %s180_s14  }
  0x1e   : > { %12597 = sst [smem:[#allocation17_spill]] %s8374_s15 }
  0x1f   : > { %s12127_s16 = sand.u32 1, %s8217_s21   ;;  %s8378_s17 = sshll.u32 %s8229_s24, 6 }
  0x20   : > { %s6823_s18 = sshll.u32 %s12127_s16, 9  ;;  %p330_p13 = scmp.lt.s32.totalorder %s8233_s25, 1 }
  0x21   : > { %p332_p0 = scmp.lt.s32.totalorder %s8378_s17, 127  ;;  %s6830_s11 = sshll.u32 %s8225_s23, 6 }
  0x22   : > { %s331_s19 = scalar_select %p330_p13, %s8233_s25, 1 }
  0x23   : > { %s333_s29 = scalar_select %p332_p0, %s8378_s17, 127 }
  0x24   : > { %s6825_s30 = sshll.u32 %s331_s19, 7  ;;  %p352_p1 = scmp.lt.s32.totalorder %s6830_s11, 127 }
  0x25   : > { %s335_s12 = sadd.s32 %s6825_s30, %s333_s29  ;;  %s8407_s7 = scalar_lea.vmem [#allocation6], %s6823_s18 }
  0x26   : > { %s6826_s13 = sshll.u32 %s335_s12, 3  ;;  %s6829_s14 = sshll.u32 %s335_s12, 2 }
  0x27   : > { %s8390_s6 = scalar_lea.vmem %s12117_s0, %s6826_s13  ;;  %s8395_s27 = scalar_lea.vmem %s12118_s1, %s6829_s14 }
  0x28   : > { %s13525_s11 = smov (!%p352_p1, %s6830_s11), 127  ;;  %p6836_p2 = scmp.ne.s32.totalorder %s8225_s23, 0 }
  0x29   : > { %s355_s16 = sadd.s32 %s6825_s30, %s13525_s11 }
  0x2a   : > { %s6832_s26 = sshll.u32 %s355_s16, 2  ;;  %374 = sbr.rel (%p6836_p2) target bundleno = 144 (0x90), region = 44 }
  0x2b   : > { %s8400_s29 = scalar_lea.vmem %s12119_s2, %s6832_s26  ;;  %s8405_s10 = scalar_lea.vmem %s12120_s3, %s6832_s26 }
  0x2f   : > { %vm375_vm0 = vcmask 7168   ;;  %v8251_v0 = vmov -inf   ;;  %v8252_v1 = vmov 0.0  }
  0x30   : > { %376 = vst.msk [vmem:[#allocation2] sm:$0xff] %vm375_vm0, %v8251_v0  ;;  %377 = vst.msk [vmem:[#allocation2 + $0x8] sm:$0xff] %vm375_vm0, %v8251_v0 }
  0x31   : > { %378 = vst.msk [vmem:[#allocation2 + $0x10] sm:$0xff] %vm375_vm0, %v8251_v0  ;;  %379 = vst.msk [vmem:[#allocation2 + $0x18] sm:$0xff] %vm375_vm0, %v8251_v0 }
  0x32   : > { %380 = vst.msk [vmem:[#allocation2 + $0x20] sm:$0xff] %vm375_vm0, %v8251_v0  ;;  %381 = vst.msk [vmem:[#allocation2 + $0x28] sm:$0xff] %vm375_vm0, %v8251_v0 }
  0x33   : > { %382 = vst.msk [vmem:[#allocation2 + $0x30] sm:$0xff] %vm375_vm0, %v8251_v0  ;;  %383 = vst.msk [vmem:[#allocation2 + $0x38] sm:$0xff] %vm375_vm0, %v8251_v0 }
  0x34   : > { %384 = vst.msk [vmem:[#allocation2 + $0x40] sm:$0xff] %vm375_vm0, %v8251_v0  ;;  %385 = vst.msk [vmem:[#allocation2 + $0x48] sm:$0xff] %vm375_vm0, %v8251_v0 }
  0x35   : > { %386 = vst.msk [vmem:[#allocation2 + $0x50] sm:$0xff] %vm375_vm0, %v8251_v0  ;;  %387 = vst.msk [vmem:[#allocation2 + $0x58] sm:$0xff] %vm375_vm0, %v8251_v0 }
  0x36   : > { %388 = vst.msk [vmem:[#allocation2 + $0x60] sm:$0xff] %vm375_vm0, %v8251_v0  ;;  %389 = vst.msk [vmem:[#allocation2 + $0x68] sm:$0xff] %vm375_vm0, %v8251_v0 }
  0x37   : > { %390 = vst.msk [vmem:[#allocation2 + $0x70] sm:$0xff] %vm375_vm0, %v8251_v0  ;;  %391 = vst.msk [vmem:[#allocation2 + $0x78] sm:$0xff] %vm375_vm0, %v8251_v0 }
  0x38   : > { %392 = vst.msk [vmem:[#allocation2 + $0x80] sm:$0xff] %vm375_vm0, %v8251_v0  ;;  %393 = vst.msk [vmem:[#allocation2 + $0x88] sm:$0xff] %vm375_vm0, %v8251_v0 }
  0x39   : > { %394 = vst.msk [vmem:[#allocation2 + $0x90] sm:$0xff] %vm375_vm0, %v8251_v0  ;;  %395 = vst.msk [vmem:[#allocation2 + $0x98] sm:$0xff] %vm375_vm0, %v8251_v0 }
  0x3a   : > { %396 = vst.msk [vmem:[#allocation2 + $0xa0] sm:$0xff] %vm375_vm0, %v8251_v0  ;;  %397 = vst.msk [vmem:[#allocation2 + $0xa8] sm:$0xff] %vm375_vm0, %v8251_v0 }
  0x3b   : > { %398 = vst.msk [vmem:[#allocation2 + $0xb0] sm:$0xff] %vm375_vm0, %v8251_v0  ;;  %399 = vst.msk [vmem:[#allocation2 + $0xb8] sm:$0xff] %vm375_vm0, %v8251_v0 }
  0x3c   : > { %400 = vst.msk [vmem:[#allocation2 + $0xc0] sm:$0xff] %vm375_vm0, %v8251_v0  ;;  %401 = vst.msk [vmem:[#allocation2 + $0xc8] sm:$0xff] %vm375_vm0, %v8251_v0 }
  0x3d   : > { %402 = vst.msk [vmem:[#allocation2 + $0xd0] sm:$0xff] %vm375_vm0, %v8251_v0  ;;  %403 = vst.msk [vmem:[#allocation2 + $0xd8] sm:$0xff] %vm375_vm0, %v8251_v0 }
  0x3e   : > { %404 = vst.msk [vmem:[#allocation2 + $0xe0] sm:$0xff] %vm375_vm0, %v8251_v0  ;;  %405 = vst.msk [vmem:[#allocation2 + $0xe8] sm:$0xff] %vm375_vm0, %v8251_v0 }
  0x3f   : > { %406 = vst.msk [vmem:[#allocation2 + $0xf0] sm:$0xff] %vm375_vm0, %v8251_v0  ;;  %407 = vst.msk [vmem:[#allocation2 + $0xf8] sm:$0xff] %vm375_vm0, %v8251_v0 }
  0x40   : > { %408 = vst.msk [vmem:[#allocation2 + $0x100] sm:$0xff] %vm375_vm0, %v8251_v0  ;;  %409 = vst.msk [vmem:[#allocation2 + $0x108] sm:$0xff] %vm375_vm0, %v8251_v0 }
  0x41   : > { %410 = vst.msk [vmem:[#allocation2 + $0x110] sm:$0xff] %vm375_vm0, %v8251_v0  ;;  %411 = vst.msk [vmem:[#allocation2 + $0x118] sm:$0xff] %vm375_vm0, %v8251_v0 }
  0x42   : > { %412 = vst.msk [vmem:[#allocation2 + $0x120] sm:$0xff] %vm375_vm0, %v8251_v0  ;;  %413 = vst.msk [vmem:[#allocation2 + $0x128] sm:$0xff] %vm375_vm0, %v8251_v0 }
  0x43   : > { %414 = vst.msk [vmem:[#allocation2 + $0x130] sm:$0xff] %vm375_vm0, %v8251_v0  ;;  %415 = vst.msk [vmem:[#allocation2 + $0x138] sm:$0xff] %vm375_vm0, %v8251_v0 }
  0x44   : > { %416 = vst.msk [vmem:[#allocation2 + $0x140] sm:$0xff] %vm375_vm0, %v8251_v0  ;;  %417 = vst.msk [vmem:[#allocation2 + $0x148] sm:$0xff] %vm375_vm0, %v8251_v0 }
  0x45   : > { %418 = vst.msk [vmem:[#allocation2 + $0x150] sm:$0xff] %vm375_vm0, %v8251_v0  ;;  %419 = vst.msk [vmem:[#allocation2 + $0x158] sm:$0xff] %vm375_vm0, %v8251_v0 }
  0x46   : > { %420 = vst.msk [vmem:[#allocation2 + $0x160] sm:$0xff] %vm375_vm0, %v8251_v0  ;;  %421 = vst.msk [vmem:[#allocation2 + $0x168] sm:$0xff] %vm375_vm0, %v8251_v0 }
  0x47   : > { %422 = vst.msk [vmem:[#allocation2 + $0x170] sm:$0xff] %vm375_vm0, %v8251_v0  ;;  %423 = vst.msk [vmem:[#allocation2 + $0x178] sm:$0xff] %vm375_vm0, %v8251_v0 }
  0x48   : > { %424 = vst.msk [vmem:[#allocation2 + $0x180] sm:$0xff] %vm375_vm0, %v8251_v0  ;;  %425 = vst.msk [vmem:[#allocation2 + $0x188] sm:$0xff] %vm375_vm0, %v8251_v0 }
  0x49   : > { %426 = vst.msk [vmem:[#allocation2 + $0x190] sm:$0xff] %vm375_vm0, %v8251_v0  ;;  %427 = vst.msk [vmem:[#allocation2 + $0x198] sm:$0xff] %vm375_vm0, %v8251_v0 }
  0x4a   : > { %428 = vst.msk [vmem:[#allocation2 + $0x1a0] sm:$0xff] %vm375_vm0, %v8251_v0  ;;  %429 = vst.msk [vmem:[#allocation2 + $0x1a8] sm:$0xff] %vm375_vm0, %v8251_v0 }
  0x4b   : > { %430 = vst.msk [vmem:[#allocation2 + $0x1b0] sm:$0xff] %vm375_vm0, %v8251_v0  ;;  %431 = vst.msk [vmem:[#allocation2 + $0x1b8] sm:$0xff] %vm375_vm0, %v8251_v0 }
  0x4c   : > { %432 = vst.msk [vmem:[#allocation2 + $0x1c0] sm:$0xff] %vm375_vm0, %v8251_v0  ;;  %433 = vst.msk [vmem:[#allocation2 + $0x1c8] sm:$0xff] %vm375_vm0, %v8251_v0 }
  0x4d   : > { %434 = vst.msk [vmem:[#allocation2 + $0x1d0] sm:$0xff] %vm375_vm0, %v8251_v0  ;;  %435 = vst.msk [vmem:[#allocation2 + $0x1d8] sm:$0xff] %vm375_vm0, %v8251_v0 }
  0x4e   : > { %436 = vst.msk [vmem:[#allocation2 + $0x1e0] sm:$0xff] %vm375_vm0, %v8251_v0  ;;  %437 = vst.msk [vmem:[#allocation2 + $0x1e8] sm:$0xff] %vm375_vm0, %v8251_v0 }
  0x4f   : > { %438 = vst.msk [vmem:[#allocation2 + $0x1f0] sm:$0xff] %vm375_vm0, %v8251_v0  ;;  %439 = vst.msk [vmem:[#allocation2 + $0x1f8] sm:$0xff] %vm375_vm0, %v8251_v0 }
  0x50   : > { %440 = vst.msk [vmem:[#allocation3] sm:$0xff] %vm375_vm0, %v8252_v1  ;;  %441 = vst.msk [vmem:[#allocation3 + $0x8] sm:$0xff] %vm375_vm0, %v8252_v1 }
  0x51   : > { %442 = vst.msk [vmem:[#allocation3 + $0x10] sm:$0xff] %vm375_vm0, %v8252_v1  ;;  %443 = vst.msk [vmem:[#allocation3 + $0x18] sm:$0xff] %vm375_vm0, %v8252_v1 }
  0x52   : > { %444 = vst.msk [vmem:[#allocation3 + $0x20] sm:$0xff] %vm375_vm0, %v8252_v1  ;;  %445 = vst.msk [vmem:[#allocation3 + $0x28] sm:$0xff] %vm375_vm0, %v8252_v1 }
  0x53   : > { %446 = vst.msk [vmem:[#allocation3 + $0x30] sm:$0xff] %vm375_vm0, %v8252_v1  ;;  %447 = vst.msk [vmem:[#allocation3 + $0x38] sm:$0xff] %vm375_vm0, %v8252_v1 }
  0x54   : > { %448 = vst.msk [vmem:[#allocation3 + $0x40] sm:$0xff] %vm375_vm0, %v8252_v1  ;;  %449 = vst.msk [vmem:[#allocation3 + $0x48] sm:$0xff] %vm375_vm0, %v8252_v1 }
  0x55   : > { %450 = vst.msk [vmem:[#allocation3 + $0x50] sm:$0xff] %vm375_vm0, %v8252_v1  ;;  %451 = vst.msk [vmem:[#allocation3 + $0x58] sm:$0xff] %vm375_vm0, %v8252_v1 }
  0x56   : > { %452 = vst.msk [vmem:[#allocation3 + $0x60] sm:$0xff] %vm375_vm0, %v8252_v1  ;;  %453 = vst.msk [vmem:[#allocation3 + $0x68] sm:$0xff] %vm375_vm0, %v8252_v1 }
  0x57   : > { %454 = vst.msk [vmem:[#allocation3 + $0x70] sm:$0xff] %vm375_vm0, %v8252_v1  ;;  %455 = vst.msk [vmem:[#allocation3 + $0x78] sm:$0xff] %vm375_vm0, %v8252_v1 }
  0x58   : > { %456 = vst.msk [vmem:[#allocation3 + $0x80] sm:$0xff] %vm375_vm0, %v8252_v1  ;;  %457 = vst.msk [vmem:[#allocation3 + $0x88] sm:$0xff] %vm375_vm0, %v8252_v1 }
  0x59   : > { %458 = vst.msk [vmem:[#allocation3 + $0x90] sm:$0xff] %vm375_vm0, %v8252_v1  ;;  %459 = vst.msk [vmem:[#allocation3 + $0x98] sm:$0xff] %vm375_vm0, %v8252_v1 }
  0x5a   : > { %460 = vst.msk [vmem:[#allocation3 + $0xa0] sm:$0xff] %vm375_vm0, %v8252_v1  ;;  %461 = vst.msk [vmem:[#allocation3 + $0xa8] sm:$0xff] %vm375_vm0, %v8252_v1 }
  0x5b   : > { %462 = vst.msk [vmem:[#allocation3 + $0xb0] sm:$0xff] %vm375_vm0, %v8252_v1  ;;  %463 = vst.msk [vmem:[#allocation3 + $0xb8] sm:$0xff] %vm375_vm0, %v8252_v1 }
  0x5c   : > { %464 = vst.msk [vmem:[#allocation3 + $0xc0] sm:$0xff] %vm375_vm0, %v8252_v1  ;;  %465 = vst.msk [vmem:[#allocation3 + $0xc8] sm:$0xff] %vm375_vm0, %v8252_v1 }
  0x5d   : > { %466 = vst.msk [vmem:[#allocation3 + $0xd0] sm:$0xff] %vm375_vm0, %v8252_v1  ;;  %467 = vst.msk [vmem:[#allocation3 + $0xd8] sm:$0xff] %vm375_vm0, %v8252_v1 }
  0x5e   : > { %468 = vst.msk [vmem:[#allocation3 + $0xe0] sm:$0xff] %vm375_vm0, %v8252_v1  ;;  %469 = vst.msk [vmem:[#allocation3 + $0xe8] sm:$0xff] %vm375_vm0, %v8252_v1 }
  0x5f   : > { %470 = vst.msk [vmem:[#allocation3 + $0xf0] sm:$0xff] %vm375_vm0, %v8252_v1  ;;  %471 = vst.msk [vmem:[#allocation3 + $0xf8] sm:$0xff] %vm375_vm0, %v8252_v1 }
  0x60   : > { %472 = vst.msk [vmem:[#allocation3 + $0x100] sm:$0xff] %vm375_vm0, %v8252_v1  ;;  %473 = vst.msk [vmem:[#allocation3 + $0x108] sm:$0xff] %vm375_vm0, %v8252_v1 }
  0x61   : > { %474 = vst.msk [vmem:[#allocation3 + $0x110] sm:$0xff] %vm375_vm0, %v8252_v1  ;;  %475 = vst.msk [vmem:[#allocation3 + $0x118] sm:$0xff] %vm375_vm0, %v8252_v1 }
  0x62   : > { %476 = vst.msk [vmem:[#allocation3 + $0x120] sm:$0xff] %vm375_vm0, %v8252_v1  ;;  %477 = vst.msk [vmem:[#allocation3 + $0x128] sm:$0xff] %vm375_vm0, %v8252_v1 }
  0x63   : > { %478 = vst.msk [vmem:[#allocation3 + $0x130] sm:$0xff] %vm375_vm0, %v8252_v1  ;;  %479 = vst.msk [vmem:[#allocation3 + $0x138] sm:$0xff] %vm375_vm0, %v8252_v1 }
  0x64   : > { %480 = vst.msk [vmem:[#allocation3 + $0x140] sm:$0xff] %vm375_vm0, %v8252_v1  ;;  %481 = vst.msk [vmem:[#allocation3 + $0x148] sm:$0xff] %vm375_vm0, %v8252_v1 }
  0x65   : > { %482 = vst.msk [vmem:[#allocation3 + $0x150] sm:$0xff] %vm375_vm0, %v8252_v1  ;;  %483 = vst.msk [vmem:[#allocation3 + $0x158] sm:$0xff] %vm375_vm0, %v8252_v1 }
  0x66   : > { %484 = vst.msk [vmem:[#allocation3 + $0x160] sm:$0xff] %vm375_vm0, %v8252_v1  ;;  %485 = vst.msk [vmem:[#allocation3 + $0x168] sm:$0xff] %vm375_vm0, %v8252_v1 }
  0x67   : > { %486 = vst.msk [vmem:[#allocation3 + $0x170] sm:$0xff] %vm375_vm0, %v8252_v1  ;;  %487 = vst.msk [vmem:[#allocation3 + $0x178] sm:$0xff] %vm375_vm0, %v8252_v1 }
  0x68   : > { %488 = vst.msk [vmem:[#allocation3 + $0x180] sm:$0xff] %vm375_vm0, %v8252_v1  ;;  %489 = vst.msk [vmem:[#allocation3 + $0x188] sm:$0xff] %vm375_vm0, %v8252_v1 }
  0x69   : > { %490 = vst.msk [vmem:[#allocation3 + $0x190] sm:$0xff] %vm375_vm0, %v8252_v1  ;;  %491 = vst.msk [vmem:[#allocation3 + $0x198] sm:$0xff] %vm375_vm0, %v8252_v1 }
  0x6a   : > { %492 = vst.msk [vmem:[#allocation3 + $0x1a0] sm:$0xff] %vm375_vm0, %v8252_v1  ;;  %493 = vst.msk [vmem:[#allocation3 + $0x1a8] sm:$0xff] %vm375_vm0, %v8252_v1 }
  0x6b   : > { %494 = vst.msk [vmem:[#allocation3 + $0x1b0] sm:$0xff] %vm375_vm0, %v8252_v1  ;;  %495 = vst.msk [vmem:[#allocation3 + $0x1b8] sm:$0xff] %vm375_vm0, %v8252_v1 }
  0x6c   : > { %496 = vst.msk [vmem:[#allocation3 + $0x1c0] sm:$0xff] %vm375_vm0, %v8252_v1  ;;  %497 = vst.msk [vmem:[#allocation3 + $0x1c8] sm:$0xff] %vm375_vm0, %v8252_v1 }
  0x6d   : > { %498 = vst.msk [vmem:[#allocation3 + $0x1d0] sm:$0xff] %vm375_vm0, %v8252_v1  ;;  %499 = vst.msk [vmem:[#allocation3 + $0x1d8] sm:$0xff] %vm375_vm0, %v8252_v1 }
  0x6e   : > { %500 = vst.msk [vmem:[#allocation3 + $0x1e0] sm:$0xff] %vm375_vm0, %v8252_v1  ;;  %501 = vst.msk [vmem:[#allocation3 + $0x1e8] sm:$0xff] %vm375_vm0, %v8252_v1 }
  0x6f   : > { %502 = vst.msk [vmem:[#allocation3 + $0x1f0] sm:$0xff] %vm375_vm0, %v8252_v1  ;;  %503 = vst.msk [vmem:[#allocation3 + $0x1f8] sm:$0xff] %vm375_vm0, %v8252_v1 }
  0x70   : > { %504 = vst [vmem:[#allocation4 + $0xb0] sm:$0xff] %v8252_v1  ;;  %505 = vst [vmem:[#allocation4 + $0x1b0] sm:$0xff] %v8252_v1 }
  0x71   : > { %506 = vst [vmem:[#allocation4 + $0xd8] sm:$0xff] %v8252_v1  ;;  %507 = vst [vmem:[#allocation4 + $0x18] sm:$0xff] %v8252_v1 }
  0x72   : > { %508 = vst [vmem:[#allocation4 + $0x50] sm:$0xff] %v8252_v1  ;;  %509 = vst [vmem:[#allocation4 + $0x168] sm:$0xff] %v8252_v1 }
  0x73   : > { %510 = vst [vmem:[#allocation4 + $0x130] sm:$0xff] %v8252_v1  ;;  %511 = vst [vmem:[#allocation4 + $0x48] sm:$0xff] %v8252_v1 }
  0x74   : > { %512 = vst [vmem:[#allocation4 + $0x180] sm:$0xff] %v8252_v1  ;;  %513 = vst [vmem:[#allocation4 + $0x110] sm:$0xff] %v8252_v1 }
  0x75   : > { %514 = vst [vmem:[#allocation4 + $0x118] sm:$0xff] %v8252_v1  ;;  %515 = vst [vmem:[#allocation4 + $0x98] sm:$0xff] %v8252_v1 }
  0x76   : > { %516 = vst [vmem:[#allocation4 + $0x120] sm:$0xff] %v8252_v1  ;;  %517 = vst [vmem:[#allocation4 + $0x150] sm:$0xff] %v8252_v1 }
  0x77   : > { %518 = vst [vmem:[#allocation4 + $0x108] sm:$0xff] %v8252_v1  ;;  %519 = vst [vmem:[#allocation4 + $0x60] sm:$0xff] %v8252_v1 }
  0x78   : > { %520 = vst [vmem:[#allocation4 + $0xe0] sm:$0xff] %v8252_v1  ;;  %521 = vst [vmem:[#allocation4 + $0x188] sm:$0xff] %v8252_v1 }
  0x79   : > { %522 = vst [vmem:[#allocation4 + $0x138] sm:$0xff] %v8252_v1  ;;  %523 = vst [vmem:[#allocation4 + $0x140] sm:$0xff] %v8252_v1 }
  0x7a   : > { %524 = vst [vmem:[#allocation4 + $0x80] sm:$0xff] %v8252_v1  ;;  %525 = vst [vmem:[#allocation4 + $0x1a8] sm:$0xff] %v8252_v1 }
  0x7b   : > { %526 = vst [vmem:[#allocation4 + $0x1b8] sm:$0xff] %v8252_v1  ;;  %527 = vst [vmem:[#allocation4 + $0x28] sm:$0xff] %v8252_v1 }
  0x7c   : > { %528 = vst [vmem:[#allocation4 + $0x1e8] sm:$0xff] %v8252_v1  ;;  %529 = vst [vmem:[#allocation4 + $0xf8] sm:$0xff] %v8252_v1 }
  0x7d   : > { %530 = vst [vmem:[#allocation4 + $0x160] sm:$0xff] %v8252_v1  ;;  %531 = vst [vmem:[#allocation4 + $0x30] sm:$0xff] %v8252_v1 }
  0x7e   : > { %532 = vst [vmem:[#allocation4 + $0x1e0] sm:$0xff] %v8252_v1  ;;  %533 = vst [vmem:[#allocation4] sm:$0xff] %v8252_v1 }
  0x7f   : > { %534 = vst [vmem:[#allocation4 + $0xf0] sm:$0xff] %v8252_v1  ;;  %535 = vst [vmem:[#allocation4 + $0x8] sm:$0xff] %v8252_v1 }
  0x80   : > { %536 = vst [vmem:[#allocation4 + $0x148] sm:$0xff] %v8252_v1  ;;  %537 = vst [vmem:[#allocation4 + $0x1d0] sm:$0xff] %v8252_v1 }
  0x81   : > { %538 = vst [vmem:[#allocation4 + $0x100] sm:$0xff] %v8252_v1  ;;  %539 = vst [vmem:[#allocation4 + $0xc8] sm:$0xff] %v8252_v1 }
  0x82   : > { %540 = vst [vmem:[#allocation4 + $0x40] sm:$0xff] %v8252_v1  ;;  %541 = vst [vmem:[#allocation4 + $0x1f8] sm:$0xff] %v8252_v1 }
  0x83   : > { %542 = vst [vmem:[#allocation4 + $0x20] sm:$0xff] %v8252_v1  ;;  %543 = vst [vmem:[#allocation4 + $0x128] sm:$0xff] %v8252_v1 }
  0x84   : > { %544 = vst [vmem:[#allocation4 + $0x1a0] sm:$0xff] %v8252_v1  ;;  %545 = vst [vmem:[#allocation4 + $0x1f0] sm:$0xff] %v8252_v1 }
  0x85   : > { %546 = vst [vmem:[#allocation4 + $0xe8] sm:$0xff] %v8252_v1  ;;  %547 = vst [vmem:[#allocation4 + $0x78] sm:$0xff] %v8252_v1 }
  0x86   : > { %548 = vst [vmem:[#allocation4 + $0x70] sm:$0xff] %v8252_v1  ;;  %549 = vst [vmem:[#allocation4 + $0x90] sm:$0xff] %v8252_v1 }
  0x87   : > { %550 = vst [vmem:[#allocation4 + $0x1d8] sm:$0xff] %v8252_v1  ;;  %551 = vst [vmem:[#allocation4 + $0xd0] sm:$0xff] %v8252_v1 }
  0x88   : > { %552 = vst [vmem:[#allocation4 + $0xb8] sm:$0xff] %v8252_v1  ;;  %553 = vst [vmem:[#allocation4 + $0x88] sm:$0xff] %v8252_v1 }
  0x89   : > { %554 = vst [vmem:[#allocation4 + $0xa8] sm:$0xff] %v8252_v1  ;;  %555 = vst [vmem:[#allocation4 + $0x1c8] sm:$0xff] %v8252_v1 }
  0x8a   : > { %556 = vst [vmem:[#allocation4 + $0x170] sm:$0xff] %v8252_v1  ;;  %557 = vst [vmem:[#allocation4 + $0x178] sm:$0xff] %v8252_v1 }
  0x8b   : > { %558 = vst [vmem:[#allocation4 + $0x68] sm:$0xff] %v8252_v1  ;;  %559 = vst [vmem:[#allocation4 + $0x190] sm:$0xff] %v8252_v1 }
  0x8c   : > { %560 = vst [vmem:[#allocation4 + $0x198] sm:$0xff] %v8252_v1  ;;  %561 = vst [vmem:[#allocation4 + $0x38] sm:$0xff] %v8252_v1 }
  0x8d   : > { %562 = vst [vmem:[#allocation4 + $0xc0] sm:$0xff] %v8252_v1  ;;  %563 = vst [vmem:[#allocation4 + $0x1c0] sm:$0xff] %v8252_v1 }
  0x8e   : > { %564 = vst [vmem:[#allocation4 + $0x158] sm:$0xff] %v8252_v1  ;;  %565 = vst [vmem:[#allocation4 + $0x10] sm:$0xff] %v8252_v1 }
  0x8f   : > { %566 = vst [vmem:[#allocation4 + $0x58] sm:$0xff] %v8252_v1  ;;  %567 = vst [vmem:[#allocation4 + $0xa0] sm:$0xff] %v8252_v1 }
  0x90 PF: > { %v7275_v2 = vld [vmem:[%s8400_s29 + $0x78] sm:$0xff]   ;;  %vm1016_vm1 = vcmask 130048   ;;  %v7279_v7 = vld [vmem:[%s8400_s29 + $0x70] sm:$0xff]   ;;  %v7283_v13 = vld [vmem:[%s8400_s29 + $0x68] sm:$0xff]   ;;  %vm4155_vm2 = vcmask 7168   ;;  %p6997_p3 = scmp.ne.s32.totalorder %s8225_s23, 1 }
  0x91   : > { %v7276_v3 = vld [vmem:[%s8400_s29 + $0xf8] sm:$0xff]   ;;  %7164 = vmatprep.subr.msk.bf16.mxu0 %vm1016_vm1, %v7275_v2  ;;  %v7280_v9 = vld [vmem:[%s8400_s29 + $0xf0] sm:$0xff]   ;;  %v7284_v15 = vld [vmem:[%s8400_s29 + $0xe8] sm:$0xff]   ;;  %s6402_s22 = sld [smem:[#allocation5]] (!%p6997_p3) }
  0x92   : > { %v7277_v4 = vld [vmem:[%s8400_s29 + $0x38] sm:$0xff]   ;;  %7172 = vmatprep.subr.msk.bf16.mxu1 %vm1016_vm1, %v7276_v3  ;;  %v7281_v10 = vld [vmem:[%s8400_s29 + $0x30] sm:$0xff]   ;;  %v7285_v16 = vld [vmem:[%s8400_s29 + $0x28] sm:$0xff]  }
  0x93   : > { %v7278_v5 = vld [vmem:[%s8400_s29 + $0xb8] sm:$0xff]   ;;  %v1135_v6 = vsel %vm1016_vm1, %v7277_v4, 0  ;;  %v7282_v11 = vld [vmem:[%s8400_s29 + $0xb0] sm:$0xff]   ;;  %v1132_v12 = vsel %vm1016_vm1, %v7281_v10, 0  ;;  %v7286_v17 = vld [vmem:[%s8400_s29 + $0xa8] sm:$0xff]   ;;  %v1129_v18 = vsel %vm1016_vm1, %v7285_v16, 0 }
  0x94   : > { %7005 = vmatpush3.bf16.xpose.msra.mxu0 %v1135_v6  ;;  %v1183_v8 = vsel %vm1016_vm1, %v7278_v5, 0  ;;  %v1180_v14 = vsel %vm1016_vm1, %v7282_v11, 0  ;;  %v7287_v19 = vld [vmem:[%s8400_s29 + $0x60] sm:$0xff]   ;;  %v1177_v20 = vsel %vm1016_vm1, %v7286_v17, 0  ;;  %v7291_v25 = vld [vmem:[%s8400_s29 + $0x58] sm:$0xff]   ;;  %v7295_v32 = vld [vmem:[%s8400_s29 + $0x50] sm:$0xff]  }
  0x95   : > { %7085 = vmatpush3.bf16.xpose.msra.mxu1 %v1183_v8  ;;  %7165 = vmatprep.subr.msk.bf16.mxu0 %vm1016_vm1, %v7279_v7  ;;  %v7288_v21 = vld [vmem:[%s8400_s29 + $0xe0] sm:$0xff]   ;;  %v7292_v27 = vld [vmem:[%s8400_s29 + $0xd8] sm:$0xff]   ;;  %v7296_v34 = vld [vmem:[%s8400_s29 + $0xd0] sm:$0xff]  }
  0x96   : > { %7173 = vmatprep.subr.msk.bf16.mxu1 %vm1016_vm1, %v7280_v9  ;;  %v7289_v22 = vld [vmem:[%s8400_s29 + $0x20] sm:$0xff]   ;;  %v7293_v28 = vld [vmem:[%s8400_s29 + $0x18] sm:$0xff]   ;;  %v7297_v35 = vld [vmem:[%s8400_s29 + $0x10] sm:$0xff]  }
  0x97   : > { %v7290_v23 = vld [vmem:[%s8400_s29 + $0xa0] sm:$0xff]   ;;  %v1126_v24 = vsel %vm1016_vm1, %v7289_v22, 0  ;;  %v7294_v29 = vld [vmem:[%s8400_s29 + $0x98] sm:$0xff]   ;;  %v1123_v31 = vsel %vm1016_vm1, %v7293_v28, 0  ;;  %v7298_v36 = vld [vmem:[%s8400_s29 + $0x90] sm:$0xff]   ;;  %v1120_v39 = vsel %vm1016_vm1, %v7297_v35, 0 }
  0x98   : > { %v1174_v26 = vsel %vm1016_vm1, %v7290_v23, 0  ;;  %v7307_v30 = vld [vmem:[%s8395_s27] sm:$0xff]   ;;  %v1171_v33 = vsel %vm1016_vm1, %v7294_v29, 0  ;;  %v7299_v37 = vld [vmem:[%s8400_s29 + $0x48] sm:$0xff]   ;;  %v1168_v41 = vsel %vm1016_vm1, %v7298_v36, 0  ;;  %v7309_v52 = vld [vmem:[%s8395_s27 + $0x10] sm:$0xff]  }
  0x99   : > { %7020 = vmatprep.mubr.msk.bf16.mxu0 %vm1016_vm1, %v7307_v30  ;;  %7100 = vmatprep.mubr.msk.bf16.mxu1 %vm1016_vm1, %v7307_v30  ;;  %v7301_v38 = vld [vmem:[%s8400_s29 + $0x8] sm:$0xff]   ;;  %v7305_v45 = vld [vmem:[%s8400_s29] sm:$0xff]   ;;  %v7310_v53 = vld [vmem:[%s8395_s27 + $0x18] sm:$0xff]  }
  0x9a   : > { %v7302_v40 = vld [vmem:[%s8400_s29 + $0x88] sm:$0xff]   ;;  %v1117_v43 = vsel %vm1016_vm1, %v7301_v38, 0  ;;  %v7306_v46 = vld [vmem:[%s8400_s29 + $0x80] sm:$0xff]   ;;  %v1114_v49 = vsel %vm1016_vm1, %v7305_v45, 0  ;;  %v7313_v56 = vld [vmem:[%s8395_s27 + $0x30] sm:$0xff]  }
  0x9b   : > { %v7300_v42 = vld [vmem:[%s8400_s29 + $0xc8] sm:$0xff]   ;;  %v1165_v44 = vsel %vm1016_vm1, %v7302_v40, 0  ;;  %v7303_v47 = vld [vmem:[%s8400_s29 + $0x40] sm:$0xff]   ;;  %v1162_v50 = vsel %vm1016_vm1, %v7306_v46, 0  ;;  %v7314_v57 = vld [vmem:[%s8395_s27 + $0x38] sm:$0xff]  }
  0x9c   : > { %7007 = vmatpush3.bf16.xpose.msra.mxu0 %v1132_v12  ;;  %v7304_v48 = vld [vmem:[%s8400_s29 + $0xc0] sm:$0xff]   ;;  %v7308_v51 = vld [vmem:[%s8395_s27 + $0x8] sm:$0xff]   ;;  %v7317_v60 = vld [vmem:[%s8395_s27 + $0x50] sm:$0xff]  }
  0x9d   : > { %7087 = vmatpush3.bf16.xpose.msra.mxu1 %v1180_v14  ;;  %7166 = vmatprep.subr.msk.bf16.mxu0 %vm1016_vm1, %v7283_v13  ;;  %v7311_v54 = vld [vmem:[%s8395_s27 + $0x20] sm:$0xff]   ;;  %v7312_v55 = vld [vmem:[%s8395_s27 + $0x28] sm:$0xff]   ;;  %v7318_v61 = vld [vmem:[%s8395_s27 + $0x58] sm:$0xff]  }
  0x9e   : > { %7174 = vmatprep.subr.msk.bf16.mxu1 %vm1016_vm1, %v7284_v15  ;;  %v7315_v58 = vld [vmem:[%s8395_s27 + $0x40] sm:$0xff]   ;;  %v7316_v59 = vld [vmem:[%s8395_s27 + $0x48] sm:$0xff]   ;;  %v7321_v0 = vld [vmem:[%s8395_s27 + $0x70] sm:$0xff]  }
  0x9f   : > { %v7319_v62 = vld [vmem:[%s8395_s27 + $0x60] sm:$0xff]   ;;  %v7320_v63 = vld [vmem:[%s8395_s27 + $0x68] sm:$0xff]   ;;  %v7322_v1 = vld [vmem:[%s8395_s27 + $0x78] sm:$0xff]  }
  0xa0   : > { %v7323_v2 = vld [vmem:[%s8395_s27 + $0x80] sm:$0xff]   ;;  %v7324_v3 = vld [vmem:[%s8395_s27 + $0x88] sm:$0xff]   ;;  %v7325_v4 = vld [vmem:[%s8395_s27 + $0x90] sm:$0xff]  }
  0xa1   : > { %v7326_v5 = vld [vmem:[%s8395_s27 + $0x98] sm:$0xff]   ;;  %v7327_v6 = vld [vmem:[%s8395_s27 + $0xa0] sm:$0xff]   ;;  %v7328_v7 = vld [vmem:[%s8395_s27 + $0xa8] sm:$0xff]  }
  0xa2   : > { %v7329_v8 = vld [vmem:[%s8395_s27 + $0xb0] sm:$0xff]  }
  0xa4   : > { %7009 = vmatpush3.bf16.xpose.msra.mxu0 %v1129_v18 }
  0xa5   : > { %7089 = vmatpush3.bf16.xpose.msra.mxu1 %v1177_v20  ;;  %7167 = vmatprep.subr.msk.bf16.mxu0 %vm1016_vm1, %v7287_v19 }
  0xa6   : > { %7175 = vmatprep.subr.msk.bf16.mxu1 %vm1016_vm1, %v7288_v21 }
  0xac   : > { %7011 = vmatpush3.bf16.xpose.msra.mxu0 %v1126_v24 }
  0xad   : > { %7091 = vmatpush3.bf16.xpose.msra.mxu1 %v1174_v26  ;;  %7168 = vmatprep.subr.msk.bf16.mxu0 %vm1016_vm1, %v7291_v25 }
  0xae   : > { %7176 = vmatprep.subr.msk.bf16.mxu1 %vm1016_vm1, %v7292_v27 }
  0xb4   : > { %7013 = vmatpush3.bf16.xpose.msra.mxu0 %v1123_v31 }
  0xb5   : > { %7093 = vmatpush3.bf16.xpose.msra.mxu1 %v1171_v33  ;;  %7169 = vmatprep.subr.msk.bf16.mxu0 %vm1016_vm1, %v7295_v32 }
  0xb6   : > { %7177 = vmatprep.subr.msk.bf16.mxu1 %vm1016_vm1, %v7296_v34 }
  0xbc   : > { %7015 = vmatpush3.bf16.xpose.msra.mxu0 %v1120_v39 }
  0xbd   : > { %7095 = vmatpush3.bf16.xpose.msra.mxu1 %v1168_v41  ;;  %7170 = vmatprep.subr.msk.bf16.mxu0 %vm1016_vm1, %v7299_v37 }
  0xbe   : > { %7178 = vmatprep.subr.msk.bf16.mxu1 %vm1016_vm1, %v7300_v42 }
  0xc4   : > { %7017 = vmatpush3.bf16.xpose.msra.mxu0 %v1117_v43 }
  0xc5   : > { %7097 = vmatpush3.bf16.xpose.msra.mxu1 %v1165_v44  ;;  %7171 = vmatprep.subr.msk.bf16.mxu0 %vm1016_vm1, %v7303_v47 }
  0xc6   : > { %7179 = vmatprep.subr.msk.bf16.mxu1 %vm1016_vm1, %v7304_v48 }
  0xcc   : > { %7019 = vmatpush3.bf16.xpose.msra.mxu0 %v1114_v49 }
  0xcd   : > { %7099 = vmatpush3.bf16.xpose.msra.mxu1 %v1162_v50 }
  0xd3   : > { %7021 = vmatmul.mubr.msk.bf16.vlgmr.msra.gmra.mxu0 %vm1016_vm1, %v7307_v30 }
  0xd4   : > { %7101 = vmatmul.mubr.msk.bf16.vlgmr.msra.gmra.mxu1 %vm1016_vm1, %v7307_v30  ;;  %7022 = vmatprep.mubr.msk.bf16.mxu0 %vm1016_vm1, %v7308_v51 }
  0xd5   : > { %7102 = vmatprep.mubr.msk.bf16.mxu1 %vm1016_vm1, %v7308_v51 }
  0xdb   : > { %7023 = vmatmul.mubr.msk.bf16.gmra.mxu0 %vm1016_vm1, %v7308_v51 }
  0xdc   : > { %7103 = vmatmul.mubr.msk.bf16.gmra.mxu1 %vm1016_vm1, %v7308_v51  ;;  %7024 = vmatprep.mubr.msk.bf16.mxu0 %vm1016_vm1, %v7309_v52 }
  0xdd   : > { %7104 = vmatprep.mubr.msk.bf16.mxu1 %vm1016_vm1, %v7309_v52 }
  0xe3   : > { %7025 = vmatmul.mubr.msk.bf16.gmra.mxu0 %vm1016_vm1, %v7309_v52 }
  0xe4   : > { %7105 = vmatmul.mubr.msk.bf16.gmra.mxu1 %vm1016_vm1, %v7309_v52  ;;  %7026 = vmatprep.mubr.msk.bf16.mxu0 %vm1016_vm1, %v7310_v53 }
  0xe5   : > { %7106 = vmatprep.mubr.msk.bf16.mxu1 %vm1016_vm1, %v7310_v53 }
  0xeb   : > { %7027 = vmatmul.mubr.msk.bf16.gmra.mxu0 %vm1016_vm1, %v7310_v53 }
  0xec   : > { %7107 = vmatmul.mubr.msk.bf16.gmra.mxu1 %vm1016_vm1, %v7310_v53  ;;  %7028 = vmatprep.mubr.msk.bf16.mxu0 %vm1016_vm1, %v7311_v54 }
  0xed   : > { %7108 = vmatprep.mubr.msk.bf16.mxu1 %vm1016_vm1, %v7311_v54 }
  0xf3   : > { %7029 = vmatmul.mubr.msk.bf16.gmra.mxu0 %vm1016_vm1, %v7311_v54 }
  0xf4   : > { %7109 = vmatmul.mubr.msk.bf16.gmra.mxu1 %vm1016_vm1, %v7311_v54  ;;  %7030 = vmatprep.mubr.msk.bf16.mxu0 %vm1016_vm1, %v7312_v55 }
  0xf5   : > { %7110 = vmatprep.mubr.msk.bf16.mxu1 %vm1016_vm1, %v7312_v55 }
  0xfb   : > { %7031 = vmatmul.mubr.msk.bf16.gmra.mxu0 %vm1016_vm1, %v7312_v55 }
  0xfc   : > { %7111 = vmatmul.mubr.msk.bf16.gmra.mxu1 %vm1016_vm1, %v7312_v55  ;;  %7032 = vmatprep.mubr.msk.bf16.mxu0 %vm1016_vm1, %v7313_v56 }
  0xfd   : > { %7112 = vmatprep.mubr.msk.bf16.mxu1 %vm1016_vm1, %v7313_v56 }
 0x103   : > { %7033 = vmatmul.mubr.msk.bf16.gmra.mxu0 %vm1016_vm1, %v7313_v56 }
 0x104   : > { %7113 = vmatmul.mubr.msk.bf16.gmra.mxu1 %vm1016_vm1, %v7313_v56  ;;  %7034 = vmatprep.mubr.msk.bf16.mxu0 %vm1016_vm1, %v7314_v57 }
 0x105   : > { %7114 = vmatprep.mubr.msk.bf16.mxu1 %vm1016_vm1, %v7314_v57 }
 0x10b   : > { %7035 = vmatmul.mubr.msk.bf16.gmra.mxu0 %vm1016_vm1, %v7314_v57 }
 0x10c   : > { %7115 = vmatmul.mubr.msk.bf16.gmra.mxu1 %vm1016_vm1, %v7314_v57  ;;  %7036 = vmatprep.mubr.msk.bf16.mxu0 %vm1016_vm1, %v7315_v58 }
 0x10d   : > { %7116 = vmatprep.mubr.msk.bf16.mxu1 %vm1016_vm1, %v7315_v58 }
 0x113   : > { %7037 = vmatmul.mubr.msk.bf16.gmra.mxu0 %vm1016_vm1, %v7315_v58 }
 0x114   : > { %7117 = vmatmul.mubr.msk.bf16.gmra.mxu1 %vm1016_vm1, %v7315_v58  ;;  %7038 = vmatprep.mubr.msk.bf16.mxu0 %vm1016_vm1, %v7316_v59 }
 0x115   : > { %7118 = vmatprep.mubr.msk.bf16.mxu1 %vm1016_vm1, %v7316_v59 }
 0x11b   : > { %7039 = vmatmul.mubr.msk.bf16.gmra.mxu0 %vm1016_vm1, %v7316_v59 }
 0x11c   : > { %7119 = vmatmul.mubr.msk.bf16.gmra.mxu1 %vm1016_vm1, %v7316_v59  ;;  %7040 = vmatprep.mubr.msk.bf16.mxu0 %vm1016_vm1, %v7317_v60 }
 0x11d   : > { %7120 = vmatprep.mubr.msk.bf16.mxu1 %vm1016_vm1, %v7317_v60 }
 0x123   : > { %7041 = vmatmul.mubr.msk.bf16.gmra.mxu0 %vm1016_vm1, %v7317_v60 }
 0x124   : > { %7121 = vmatmul.mubr.msk.bf16.gmra.mxu1 %vm1016_vm1, %v7317_v60  ;;  %7042 = vmatprep.mubr.msk.bf16.mxu0 %vm1016_vm1, %v7318_v61 }
 0x125   : > { %7122 = vmatprep.mubr.msk.bf16.mxu1 %vm1016_vm1, %v7318_v61 }
 0x12b   : > { %7043 = vmatmul.mubr.msk.bf16.gmra.mxu0 %vm1016_vm1, %v7318_v61 }
 0x12c   : > { %7123 = vmatmul.mubr.msk.bf16.gmra.mxu1 %vm1016_vm1, %v7318_v61  ;;  %7044 = vmatprep.mubr.msk.bf16.mxu0 %vm1016_vm1, %v7319_v62 }
 0x12d   : > { %7124 = vmatprep.mubr.msk.bf16.mxu1 %vm1016_vm1, %v7319_v62 }
 0x133   : > { %7045 = vmatmul.mubr.msk.bf16.gmra.mxu0 %vm1016_vm1, %v7319_v62 }
 0x134   : > { %7125 = vmatmul.mubr.msk.bf16.gmra.mxu1 %vm1016_vm1, %v7319_v62  ;;  %7046 = vmatprep.mubr.msk.bf16.mxu0 %vm1016_vm1, %v7320_v63 }
 0x135   : > { %7126 = vmatprep.mubr.msk.bf16.mxu1 %vm1016_vm1, %v7320_v63 }
 0x13b   : > { %7047 = vmatmul.mubr.msk.bf16.gmra.mxu0 %vm1016_vm1, %v7320_v63 }
 0x13c   : > { %7127 = vmatmul.mubr.msk.bf16.gmra.mxu1 %vm1016_vm1, %v7320_v63  ;;  %7048 = vmatprep.mubr.msk.bf16.mxu0 %vm1016_vm1, %v7321_v0 }
 0x13d   : > { %7128 = vmatprep.mubr.msk.bf16.mxu1 %vm1016_vm1, %v7321_v0 }
 0x143   : > { %7049 = vmatmul.mubr.msk.bf16.gmra.mxu0 %vm1016_vm1, %v7321_v0 }
 0x144   : > { %7129 = vmatmul.mubr.msk.bf16.gmra.mxu1 %vm1016_vm1, %v7321_v0  ;;  %7050 = vmatprep.mubr.msk.bf16.mxu0 %vm1016_vm1, %v7322_v1 }
 0x145   : > { %7130 = vmatprep.mubr.msk.bf16.mxu1 %vm1016_vm1, %v7322_v1 }
 0x14b   : > { %7051 = vmatmul.mubr.msk.bf16.gmra.mxu0 %vm1016_vm1, %v7322_v1 }
 0x14c   : > { %7131 = vmatmul.mubr.msk.bf16.gmra.mxu1 %vm1016_vm1, %v7322_v1  ;;  %7052 = vmatprep.mubr.msk.bf16.mxu0 %vm1016_vm1, %v7323_v2 }
 0x14d   : > { %7132 = vmatprep.mubr.msk.bf16.mxu1 %vm1016_vm1, %v7323_v2 }
 0x153   : > { %7053 = vmatmul.mubr.msk.bf16.gmra.mxu0 %vm1016_vm1, %v7323_v2 }
 0x154   : > { %7133 = vmatmul.mubr.msk.bf16.gmra.mxu1 %vm1016_vm1, %v7323_v2  ;;  %7054 = vmatprep.mubr.msk.bf16.mxu0 %vm1016_vm1, %v7324_v3 }
 0x155   : > { %7134 = vmatprep.mubr.msk.bf16.mxu1 %vm1016_vm1, %v7324_v3 }
 0x15b   : > { %7055 = vmatmul.mubr.msk.bf16.gmra.mxu0 %vm1016_vm1, %v7324_v3 }
 0x15c   : > { %7135 = vmatmul.mubr.msk.bf16.gmra.mxu1 %vm1016_vm1, %v7324_v3  ;;  %7056 = vmatprep.mubr.msk.bf16.mxu0 %vm1016_vm1, %v7325_v4 }
 0x15d   : > { %7136 = vmatprep.mubr.msk.bf16.mxu1 %vm1016_vm1, %v7325_v4 }
 0x163   : > { %7057 = vmatmul.mubr.msk.bf16.gmra.mxu0 %vm1016_vm1, %v7325_v4 }
 0x164   : > { %7137 = vmatmul.mubr.msk.bf16.gmra.mxu1 %vm1016_vm1, %v7325_v4  ;;  %7058 = vmatprep.mubr.msk.bf16.mxu0 %vm1016_vm1, %v7326_v5 }
 0x165   : > { %7138 = vmatprep.mubr.msk.bf16.mxu1 %vm1016_vm1, %v7326_v5 }
 0x16b   : > { %7059 = vmatmul.mubr.msk.bf16.gmra.mxu0 %vm1016_vm1, %v7326_v5 }
 0x16c   : > { %7139 = vmatmul.mubr.msk.bf16.gmra.mxu1 %vm1016_vm1, %v7326_v5  ;;  %7060 = vmatprep.mubr.msk.bf16.mxu0 %vm1016_vm1, %v7327_v6 }
 0x16d   : > { %7140 = vmatprep.mubr.msk.bf16.mxu1 %vm1016_vm1, %v7327_v6 }
 0x173   : > { %7061 = vmatmul.mubr.msk.bf16.gmra.mxu0 %vm1016_vm1, %v7327_v6 }
 0x174   : > { %7141 = vmatmul.mubr.msk.bf16.gmra.mxu1 %vm1016_vm1, %v7327_v6  ;;  %7062 = vmatprep.mubr.msk.bf16.mxu0 %vm1016_vm1, %v7328_v7 }
 0x175   : > { %7142 = vmatprep.mubr.msk.bf16.mxu1 %vm1016_vm1, %v7328_v7 }
 0x17b   : > { %7063 = vmatmul.mubr.msk.bf16.gmra.mxu0 %vm1016_vm1, %v7328_v7 }
 0x17c   : > { %7143 = vmatmul.mubr.msk.bf16.gmra.mxu1 %vm1016_vm1, %v7328_v7  ;;  %7064 = vmatprep.mubr.msk.bf16.mxu0 %vm1016_vm1, %v7329_v8 }
 0x17d   : > { %7144 = vmatprep.mubr.msk.bf16.mxu1 %vm1016_vm1, %v7329_v8 }
 0x183   : > { %7065 = vmatmul.mubr.msk.bf16.gmra.mxu0 %vm1016_vm1, %v7329_v8 }
 0x184   : > { %7145 = vmatmul.mubr.msk.bf16.gmra.mxu1 %vm1016_vm1, %v7329_v8 }
 0x193   : > { %v8909_v9 = vpop.f32.mrf.mxu0 }
 0x194   : > { %v8911_v10 = vpop.f32.mrf.mxu1 }
 0x195   : > { %v8913_v11 = vpop.f32.mrf.mxu0 }
 0x196   : > { %v1979_v12 = vmax.f32 %v8909_v9, %v8913_v11  ;;  %v8917_v13 = vpop.f32.mrf.mxu1 }
 0x197   : > { %v8919_v14 = vpop.f32.mrf.mxu0 }
 0x198   : > { %v8921_v15 = vpop.f32.mrf.mxu1  ;;  %v1980_v16 = vmax.f32 %v1979_v12, %v8911_v10 }
 0x199   : > { %v8924_v17 = vpop.f32.mrf.mxu0 }
 0x19a   : > { %v1984_v18 = vmax.f32 %v8919_v14, %v8924_v17  ;;  %v8928_v19 = vpop.f32.mrf.mxu1  ;;  %v1981_v20 = vmax.f32 %v1980_v16, %v8917_v13  ;;  %v12131_v16 = vmov 0  }
 0x19b   : > { %v8931_v21 = vpop.f32.mrf.mxu0  ;;  %7274 = vset.pattern.permute.xlu1 %v12131_v16  ;;  %7273 = vset.pattern.permute.xlu0 %v12131_v16 }
 0x19c   : > { %v8933_v22 = vpop.f32.mrf.mxu1  ;;  %1982 = vmax.xlane.f32.xlu0 %v1981_v20  ;;  %v1985_v23 = vmax.f32 %v1984_v18, %v8921_v15  ;;  %v7330_v18 = vld [vmem:[%s8395_s27 + $0xb8] sm:$0xff]   ;;  %5052 = vmatprep.subr.bf16.mxu0 %v12131_v16 }
 0x19d   : > { %v8936_v24 = vpop.f32.mrf.mxu0  ;;  %5341 = vmatprep.subr.bf16.mxu1 %v12131_v16  ;;  %7066 = vmatprep.mubr.msk.bf16.mxu0 %vm1016_vm1, %v7330_v18 }
 0x19e   : > { %v1989_v25 = vmax.f32 %v8931_v21, %v8936_v24  ;;  %v8940_v26 = vpop.f32.mrf.mxu1  ;;  %v1986_v27 = vmax.f32 %v1985_v23, %v8928_v19  ;;  %7146 = vmatprep.mubr.msk.bf16.mxu1 %vm1016_vm1, %v7330_v18  ;;  %7067 = vmatmul.mubr.msk.bf16.gmra.mxu0 %vm1016_vm1, %v7330_v18 }
 0x19f   : > { %v8943_v28 = vpop.f32.mrf.mxu0  ;;  %7147 = vmatmul.mubr.msk.bf16.gmra.mxu1 %vm1016_vm1, %v7330_v18 }
 0x1a0   : > { %v8945_v29 = vpop.f32.mrf.mxu1  ;;  %1987 = vmax.xlane.f32.xlu0 %v1986_v27  ;;  %v1990_v30 = vmax.f32 %v1989_v25, %v8933_v22 }
 0x1a1   : > { %v8948_v31 = vpop.f32.mrf.mxu0 }
 0x1a2   : > { %v1994_v32 = vmax.f32 %v8943_v28, %v8948_v31  ;;  %v8952_v33 = vpop.f32.mrf.mxu1  ;;  %v1991_v34 = vmax.f32 %v1990_v30, %v8940_v26 }
 0x1a3   : > { %v8955_v35 = vpop.f32.mrf.mxu0 }
 0x1a4   : > { %v8957_v36 = vpop.f32.mrf.mxu1  ;;  %1992 = vmax.xlane.f32.xlu1 %v1991_v34  ;;  %v1995_v37 = vmax.f32 %v1994_v32, %v8945_v29 }
 0x1a5   : > { %v8960_v38 = vpop.f32.mrf.mxu0 }
 0x1a6   : > { %v1999_v39 = vmax.f32 %v8955_v35, %v8960_v38  ;;  %v8964_v40 = vpop.f32.mrf.mxu1  ;;  %v1996_v41 = vmax.f32 %v1995_v37, %v8952_v33 }
 0x1a7   : > { %v8967_v42 = vpop.f32.mrf.mxu0 }
 0x1a8   : > { %v8969_v43 = vpop.f32.mrf.mxu1  ;;  %1997 = vmax.xlane.f32.xlu1 %v1996_v41  ;;  %v2000_v44 = vmax.f32 %v1999_v39, %v8957_v36 }
 0x1a9   : > { %v8972_v45 = vpop.f32.mrf.mxu0 }
 0x1aa   : > { %v2004_v46 = vmax.f32 %v8967_v42, %v8972_v45  ;;  %v8976_v47 = vpop.f32.mrf.mxu1  ;;  %v2001_v48 = vmax.f32 %v2000_v44, %v8964_v40 }
 0x1ab   : > { %v8979_v49 = vpop.f32.mrf.mxu0 }
 0x1ac   : > { %12598 = vst [vmem:[#allocation18_spill] sm:$0xff] %v8979_v49  ;;  %v8981_v50 = vpop.f32.mrf.mxu1  ;;  %2002 = vmax.xlane.f32.xlu0 %v2001_v48  ;;  %v2005_v51 = vmax.f32 %v2004_v46, %v8969_v43 }
 0x1ad   : > { %12599 = vst [vmem:[#allocation19_spill] sm:$0xff] %v8981_v50  ;;  %v8984_v52 = vpop.f32.mrf.mxu0 }
 0x1ae   : > { %12600 = vst [vmem:[#allocation20_spill] sm:$0xff] %v8984_v52  ;;  %v2009_v53 = vmax.f32 %v8979_v49, %v8984_v52  ;;  %v8988_v54 = vpop.f32.mrf.mxu1  ;;  %v2006_v55 = vmax.f32 %v2005_v51, %v8976_v47 }
 0x1af   : > { %12601 = vst [vmem:[#allocation21_spill] sm:$0xff] %v8988_v54  ;;  %v8991_v56 = vpop.f32.mrf.mxu0 }
 0x1b0   : > { %12602 = vst [vmem:[#allocation22_spill] sm:$0xff] %v8991_v56  ;;  %v8993_v57 = vpop.f32.mrf.mxu1  ;;  %2007 = vmax.xlane.f32.xlu1 %v2006_v55  ;;  %v2010_v58 = vmax.f32 %v2009_v53, %v8981_v50  ;;  %v7370_v50 = vld [vmem:[%s8405_s10 + $0xc0] sm:$0xff]  }
 0x1b1   : > { %12603 = vst [vmem:[#allocation23_spill] sm:$0xff] %v8993_v57  ;;  %v8996_v59 = vpop.f32.mrf.mxu0 }
 0x1b2   : > { %12604 = vst [vmem:[#allocation24_spill] sm:$0xff] %v8996_v59  ;;  %v2014_v60 = vmax.f32 %v8991_v56, %v8996_v59  ;;  %v9000_v61 = vpop.f32.mrf.mxu1  ;;  %v2011_v62 = vmax.f32 %v2010_v58, %v8988_v54  ;;  %v7369_v54 = vld [vmem:[%s8405_s10 + $0x40] sm:$0xff]  }
 0x1b3   : > { %12605 = vst [vmem:[#allocation25_spill] sm:$0xff] %v9000_v61  ;;  %v9003_v63 = vpop.f32.mrf.mxu0 }
 0x1b4   : > { %12606 = vst [vmem:[#allocation26_spill] sm:$0xff] %v9003_v63  ;;  %v9005_v0 = vpop.f32.mrf.mxu1  ;;  %2012 = vmax.xlane.f32.xlu0 %v2011_v62  ;;  %v2015_v1 = vmax.f32 %v2014_v60, %v8993_v57  ;;  %v7368_v57 = vld [vmem:[%s8405_s10 + $0xc8] sm:$0xff]  }
 0x1b5   : > { %12607 = vst [vmem:[#allocation27_spill] sm:$0xff] %v9005_v0  ;;  %v9008_v2 = vpop.f32.mrf.mxu0 }
 0x1b6   : > { %12608 = vst [vmem:[#allocation28_spill] sm:$0xff] %v9008_v2  ;;  %v2019_v3 = vmax.f32 %v9003_v63, %v9008_v2  ;;  %v9012_v4 = vpop.f32.mrf.mxu1  ;;  %v2016_v5 = vmax.f32 %v2015_v1, %v9000_v61  ;;  %v7366_v63 = vld [vmem:[%s8395_s27 + $0xf8] sm:$0xff]   ;;  %v7367_v61 = vld [vmem:[%s8405_s10 + $0x48] sm:$0xff]  }
 0x1b7   : > { %12609 = vst [vmem:[#allocation29_spill] sm:$0xff] %v9012_v4  ;;  %v9015_v6 = vpop.f32.mrf.mxu0 }
 0x1b8   : > { %12610 = vst [vmem:[#allocation30_spill] sm:$0xff] %v9015_v6  ;;  %v9017_v7 = vpop.f32.mrf.mxu1  ;;  %2017 = vmax.xlane.f32.xlu1 %v2016_v5  ;;  %v2020_v8 = vmax.f32 %v2019_v3, %v9005_v0 }
 0x1b9   : > { %12611 = vst [vmem:[#allocation31_spill] sm:$0xff] %v9017_v7  ;;  %v9020_v12 = vpop.f32.mrf.mxu0 }
 0x1ba   : > { %12612 = vst [vmem:[#allocation32_spill] sm:$0xff] %v9020_v12  ;;  %v2024_v20 = vmax.f32 %v9015_v6, %v9020_v12  ;;  %v9027_v23 = vpop.f32.mrf.mxu1  ;;  %v2021_v25 = vmax.f32 %v2020_v8, %v9012_v4  ;;  %v9483_v4 = vld [vmem:[#allocation2 + $0x38] sm:$0xff]  ;;  %v9702_v6 = vld [vmem:[#allocation2 + $0xc8] sm:$0xff] }
 0x1bb   : > { %12613 = vst [vmem:[#allocation33_spill] sm:$0xff] %v9027_v23  ;;  %v9032_v27 = vpop.f32.mrf.mxu0  ;;  %12775 = vst [vmem:[#allocation194_spill] sm:$0xff] %v9702_v6 }
 0x1bc   : > { %12614 = vst [vmem:[#allocation34_spill] sm:$0xff] %v9032_v27  ;;  %v9036_v30 = vpop.f32.mrf.mxu1  ;;  %2022 = vmax.xlane.f32.xlu0 %v2021_v25  ;;  %v2025_v32 = vmax.f32 %v2024_v20, %v9017_v7 }
 0x1bd   : > { %12615 = vst [vmem:[#allocation35_spill] sm:$0xff] %v9036_v30  ;;  %v9040_v34 = vpop.f32.mrf.mxu0 }
 0x1be   : > { %12616 = vst [vmem:[#allocation36_spill] sm:$0xff] %v9040_v34  ;;  %v2029_v37 = vmax.f32 %v9032_v27, %v9040_v34  ;;  %v9045_v39 = vpop.f32.mrf.mxu1  ;;  %v2026_v41 = vmax.f32 %v2025_v32, %v9027_v23 }
 0x1bf   : > { %12617 = vst [vmem:[#allocation37_spill] sm:$0xff] %v9045_v39  ;;  %v9048_v44 = vpop.f32.mrf.mxu0 }
 0x1c0   : > { %12618 = vst [vmem:[#allocation38_spill] sm:$0xff] %v9048_v44  ;;  %v9050_v46 = vpop.f32.mrf.mxu1  ;;  %2027 = vmax.xlane.f32.xlu1 %v2026_v41  ;;  %v2030_v48 = vmax.f32 %v2029_v37, %v9036_v30 }
 0x1c1   : > { %12619 = vst [vmem:[#allocation39_spill] sm:$0xff] %v9050_v46  ;;  %v9053_v51 = vpop.f32.mrf.mxu0 }
 0x1c2   : > { %12620 = vst [vmem:[#allocation40_spill] sm:$0xff] %v9053_v51  ;;  %v2034_v53 = vmax.f32 %v9048_v44, %v9053_v51  ;;  %v9057_v55 = vpop.f32.mrf.mxu1  ;;  %v2031_v58 = vmax.f32 %v2030_v48, %v9045_v39  ;;  %v7365_v51 = vld [vmem:[%s8405_s10 + $0xd0] sm:$0xff]  }
 0x1c3   : > { %12621 = vst [vmem:[#allocation41_spill] sm:$0xff] %v9057_v55  ;;  %v9060_v60 = vpop.f32.mrf.mxu0 }
 0x1c4   : > { %12622 = vst [vmem:[#allocation42_spill] sm:$0xff] %v9060_v60  ;;  %v9062_v62 = vpop.f32.mrf.mxu1  ;;  %2032 = vmax.xlane.f32.xlu0 %v2031_v58  ;;  %v2035_v1 = vmax.f32 %v2034_v53, %v9050_v46  ;;  %v7364_v46 = vld [vmem:[%s8405_s10 + $0x50] sm:$0xff]  }
 0x1c5   : > { %12623 = vst [vmem:[#allocation43_spill] sm:$0xff] %v9062_v62  ;;  %v9065_v3 = vpop.f32.mrf.mxu0 }
 0x1c6   : > { %12624 = vst [vmem:[#allocation44_spill] sm:$0xff] %v9065_v3  ;;  %v2039_v5 = vmax.f32 %v9060_v60, %v9065_v3  ;;  %v9069_v8 = vpop.f32.mrf.mxu1  ;;  %v2036_v18 = vmax.f32 %v2035_v1, %v9057_v55  ;;  %v9502_v55 = vld [vmem:[#allocation2 + $0x40] sm:$0xff] }
 0x1c7   : > { %12625 = vst [vmem:[#allocation45_spill] sm:$0xff] %v9069_v8  ;;  %v9072_v20 = vpop.f32.mrf.mxu0  ;;  %12722 = vst [vmem:[#allocation141_spill] sm:$0xff] %v9502_v55 }
 0x1c8   : > { %12626 = vst [vmem:[#allocation46_spill] sm:$0xff] %v9072_v20  ;;  %v9074_v25 = vpop.f32.mrf.mxu1  ;;  %2037 = vmax.xlane.f32.xlu1 %v2036_v18  ;;  %v2040_v32 = vmax.f32 %v2039_v5, %v9062_v62 }
 0x1c9   : > { %12627 = vst [vmem:[#allocation47_spill] sm:$0xff] %v9074_v25  ;;  %v9077_v37 = vpop.f32.mrf.mxu0 }
 0x1ca   : > { %12628 = vst [vmem:[#allocation48_spill] sm:$0xff] %v9077_v37  ;;  %v2044_v41 = vmax.f32 %v9072_v20, %v9077_v37  ;;  %v9081_v48 = vpop.f32.mrf.mxu1  ;;  %v2041_v53 = vmax.f32 %v2040_v32, %v9069_v8  ;;  %v7360_v37 = vld [vmem:[%s8405_s10 + $0xe0] sm:$0xff]  }
 0x1cb   : > { %12629 = vst [vmem:[#allocation49_spill] sm:$0xff] %v9081_v48  ;;  %v9084_v58 = vpop.f32.mrf.mxu0 }
 0x1cc   : > { %12630 = vst [vmem:[#allocation50_spill] sm:$0xff] %v9084_v58  ;;  %v9086_v16 = vpop.f32.mrf.mxu1  ;;  %2042 = vmax.xlane.f32.xlu0 %v2041_v53  ;;  %v2045_v1 = vmax.f32 %v2044_v41, %v9074_v25  ;;  %v7359_v25 = vld [vmem:[%s8405_s10 + $0x60] sm:$0xff]  }
 0x1cd   : > { %12631 = vst [vmem:[#allocation51_spill] sm:$0xff] %v9086_v16  ;;  %v9089_v3 = vpop.f32.mrf.mxu0 }
 0x1ce   : > { %12632 = vst [vmem:[#allocation52_spill] sm:$0xff] %v9089_v3  ;;  %v2049_v5 = vmax.f32 %v9084_v58, %v9089_v3  ;;  %v9093_v18 = vpop.f32.mrf.mxu1  ;;  %v2046_v62 = vmax.f32 %v2045_v1, %v9081_v48  ;;  %v7358_v48 = vld [vmem:[%s8405_s10 + $0xe8] sm:$0xff]  }
 0x1cf   : > { %12633 = vst [vmem:[#allocation53_spill] sm:$0xff] %v9093_v18  ;;  %v9096_v60 = vpop.f32.mrf.mxu0 }
 0x1d0   : > { %12634 = vst [vmem:[#allocation54_spill] sm:$0xff] %v9096_v60  ;;  %v9098_v39 = vpop.f32.mrf.mxu1  ;;  %2047 = vmax.xlane.f32.xlu1 %v2046_v62  ;;  %v2050_v32 = vmax.f32 %v2049_v5, %v9086_v16 }
 0x1d1   : > { %12635 = vst [vmem:[#allocation55_spill] sm:$0xff] %v9098_v39  ;;  %v9101_v8 = vpop.f32.mrf.mxu0 }
 0x1d2   : > { %12636 = vst [vmem:[#allocation56_spill] sm:$0xff] %v9101_v8  ;;  %v2054_v41 = vmax.f32 %v9096_v60, %v9101_v8  ;;  %v9105_v53 = vpop.f32.mrf.mxu1  ;;  %v2051_v3 = vmax.f32 %v2050_v32, %v9093_v18 }
 0x1d3   : > { %12637 = vst [vmem:[#allocation57_spill] sm:$0xff] %v9105_v53  ;;  %v9108_v58 = vpop.f32.mrf.mxu0 }
 0x1d4   : > { %12638 = vst [vmem:[#allocation58_spill] sm:$0xff] %v9108_v58  ;;  %v9110_v30 = vpop.f32.mrf.mxu1  ;;  %2052 = vmax.xlane.f32.xlu0 %v2051_v3  ;;  %v2055_v1 = vmax.f32 %v2054_v41, %v9098_v39 }
 0x1d5   : > { %12639 = vst [vmem:[#allocation59_spill] sm:$0xff] %v9110_v30  ;;  %v9113_v34 = vpop.f32.mrf.mxu0 }
 0x1d6   : > { %12640 = vst [vmem:[#allocation60_spill] sm:$0xff] %v9113_v34  ;;  %v2059_v62 = vmax.f32 %v9108_v58, %v9113_v34  ;;  %v9117_v5 = vpop.f32.mrf.mxu1  ;;  %v2056_v16 = vmax.f32 %v2055_v1, %v9105_v53 }
 0x1d7   : > { %12641 = vst [vmem:[#allocation61_spill] sm:$0xff] %v9117_v5  ;;  %v9120_v8 = vpop.f32.mrf.mxu0 }
 0x1d8   : > { %12642 = vst [vmem:[#allocation62_spill] sm:$0xff] %v9120_v8  ;;  %v9122_v60 = vpop.f32.mrf.mxu1  ;;  %2057 = vmax.xlane.f32.xlu1 %v2056_v16  ;;  %v2060_v32 = vmax.f32 %v2059_v62, %v9110_v30 }
 0x1d9   : > { %12643 = vst [vmem:[#allocation63_spill] sm:$0xff] %v9122_v60  ;;  %v9125_v18 = vpop.f32.mrf.mxu0 }
 0x1da   : > { %12644 = vst [vmem:[#allocation64_spill] sm:$0xff] %v9125_v18  ;;  %v2064_v3 = vmax.f32 %v9120_v8, %v9125_v18  ;;  %v9129_v41 = vpop.f32.mrf.mxu1  ;;  %v2061_v34 = vmax.f32 %v2060_v32, %v9117_v5 }
 0x1db   : > { %12645 = vst [vmem:[#allocation65_spill] sm:$0xff] %v9129_v41  ;;  %v9132_v58 = vpop.f32.mrf.mxu0 }
 0x1dc   : > { %12646 = vst [vmem:[#allocation66_spill] sm:$0xff] %v9132_v58  ;;  %v9134_v39 = vpop.f32.mrf.mxu1  ;;  %2062 = vmax.xlane.f32.xlu0 %v2061_v34  ;;  %v2065_v1 = vmax.f32 %v2064_v3, %v9122_v60 }
 0x1dd   : > { %12647 = vst [vmem:[#allocation67_spill] sm:$0xff] %v9134_v39  ;;  %v9137_v53 = vpop.f32.mrf.mxu0 }
 0x1de   : > { %12648 = vst [vmem:[#allocation68_spill] sm:$0xff] %v9137_v53  ;;  %v2069_v16 = vmax.f32 %v9132_v58, %v9137_v53  ;;  %v9141_v62 = vpop.f32.mrf.mxu1  ;;  %v2066_v30 = vmax.f32 %v2065_v1, %v9129_v41 }
 0x1df   : > { %12649 = vst [vmem:[#allocation69_spill] sm:$0xff] %v9141_v62  ;;  %v9144_v18 = vpop.f32.mrf.mxu0 }
 0x1e0   : > { %12650 = vst [vmem:[#allocation70_spill] sm:$0xff] %v9144_v18  ;;  %v9146_v8 = vpop.f32.mrf.mxu1  ;;  %2067 = vmax.xlane.f32.xlu1 %v2066_v30  ;;  %v2070_v32 = vmax.f32 %v2069_v16, %v9134_v39 }
 0x1e1   : > { %12651 = vst [vmem:[#allocation71_spill] sm:$0xff] %v9146_v8  ;;  %v9149_v5 = vpop.f32.mrf.mxu0 }
 0x1e2   : > { %12652 = vst [vmem:[#allocation72_spill] sm:$0xff] %v9149_v5  ;;  %v2074_v34 = vmax.f32 %v9144_v18, %v9149_v5  ;;  %v9153_v3 = vpop.f32.mrf.mxu1  ;;  %v2071_v53 = vmax.f32 %v2070_v32, %v9141_v62 }
 0x1e3   : > { %12653 = vst [vmem:[#allocation73_spill] sm:$0xff] %v9153_v3  ;;  %v9156_v58 = vpop.f32.mrf.mxu0 }
 0x1e4   : > { %12654 = vst [vmem:[#allocation74_spill] sm:$0xff] %v9156_v58  ;;  %v9158_v60 = vpop.f32.mrf.mxu1  ;;  %2072 = vmax.xlane.f32.xlu0 %v2071_v53  ;;  %v2075_v1 = vmax.f32 %v2074_v34, %v9146_v8 }
 0x1e5   : > { %12655 = vst [vmem:[#allocation75_spill] sm:$0xff] %v9158_v60  ;;  %v9161_v41 = vpop.f32.mrf.mxu0 }
 0x1e6   : > { %12656 = vst [vmem:[#allocation76_spill] sm:$0xff] %v9161_v41  ;;  %v2079_v30 = vmax.f32 %v9156_v58, %v9161_v41  ;;  %v9165_v16 = vpop.f32.mrf.mxu1  ;;  %v2076_v39 = vmax.f32 %v2075_v1, %v9153_v3 }
 0x1e7   : > { %12657 = vst [vmem:[#allocation77_spill] sm:$0xff] %v9165_v16  ;;  %v9168_v5 = vpop.f32.mrf.mxu0 }
 0x1e8   : > { %12658 = vst [vmem:[#allocation78_spill] sm:$0xff] %v9168_v5  ;;  %v9170_v18 = vpop.f32.mrf.mxu1  ;;  %2077 = vmax.xlane.f32.xlu1 %v2076_v39  ;;  %v2080_v32 = vmax.f32 %v2079_v30, %v9158_v60 }
 0x1e9   : > { %12659 = vst [vmem:[#allocation79_spill] sm:$0xff] %v9170_v18  ;;  %v9173_v62 = vpop.f32.mrf.mxu0 }
 0x1ea   : > { %12660 = vst [vmem:[#allocation80_spill] sm:$0xff] %v9173_v62  ;;  %v2084_v53 = vmax.f32 %v9168_v5, %v9173_v62  ;;  %v9177_v34 = vpop.f32.mrf.mxu1  ;;  %v2081_v41 = vmax.f32 %v2080_v32, %v9165_v16 }
 0x1eb   : > { %12661 = vst [vmem:[#allocation81_spill] sm:$0xff] %v9177_v34  ;;  %v9180_v58 = vpop.f32.mrf.mxu0 }
 0x1ec   : > { %12662 = vst [vmem:[#allocation82_spill] sm:$0xff] %v9180_v58  ;;  %v9182_v1 = vpop.f32.mrf.mxu1  ;;  %2082 = vmax.xlane.f32.xlu0 %v2081_v41  ;;  %v2085_v3 = vmax.f32 %v2084_v53, %v9170_v18 }
 0x1ed   : > { %12663 = vst [vmem:[#allocation83_spill] sm:$0xff] %v9182_v1  ;;  %v9185_v39 = vpop.f32.mrf.mxu0 }
 0x1ee   : > { %12664 = vst [vmem:[#allocation84_spill] sm:$0xff] %v9185_v39  ;;  %v2089_v30 = vmax.f32 %v9180_v58, %v9185_v39  ;;  %v9189_v60 = vpop.f32.mrf.mxu1  ;;  %v2086_v62 = vmax.f32 %v2085_v3, %v9177_v34  ;;  %v7331_v58 = vld [vmem:[%s8395_s27 + $0xc0] sm:$0xff]  }
 0x1ef   : > { %12665 = vst [vmem:[#allocation85_spill] sm:$0xff] %v9189_v60  ;;  %v9192_v5 = vpop.f32.mrf.mxu0  ;;  %7068 = vmatprep.mubr.msk.bf16.mxu0 %vm1016_vm1, %v7331_v58  ;;  %7148 = vmatprep.mubr.msk.bf16.mxu1 %vm1016_vm1, %v7331_v58 }
 0x1f0   : > { %12666 = vst [vmem:[#allocation86_spill] sm:$0xff] %v9192_v5  ;;  %v9194_v32 = vpop.f32.mrf.mxu1  ;;  %2087 = vmax.xlane.f32.xlu1 %v2086_v62  ;;  %v2090_v16 = vmax.f32 %v2089_v30, %v9182_v1  ;;  %7069 = vmatmul.mubr.msk.bf16.gmra.mxu0 %vm1016_vm1, %v7331_v58 }
 0x1f1   : > { %12667 = vst [vmem:[#allocation87_spill] sm:$0xff] %v9194_v32  ;;  %v9197_v8 = vpop.f32.mrf.mxu0  ;;  %7149 = vmatmul.mubr.msk.bf16.gmra.mxu1 %vm1016_vm1, %v7331_v58 }
 0x1f2   : > { %12668 = vst [vmem:[#allocation88_spill] sm:$0xff] %v9197_v8  ;;  %v2094_v41 = vmax.f32 %v9192_v5, %v9197_v8  ;;  %v9201_v53 = vpop.f32.mrf.mxu1  ;;  %v2091_v39 = vmax.f32 %v2090_v16, %v9189_v60 }
 0x1f3   : > { %12669 = vst [vmem:[#allocation89_spill] sm:$0xff] %v9201_v53  ;;  %v9205_v18 = vpop.f32.mrf.mxu0 }
 0x1f4   : > { %12670 = vst [vmem:[#allocation90_spill] sm:$0xff] %v9205_v18  ;;  %v9207_v3 = vpop.f32.mrf.mxu1  ;;  %2092 = vmax.xlane.f32.xlu0 %v2091_v39  ;;  %v2095_v34 = vmax.f32 %v2094_v41, %v9194_v32 }
 0x1f5   : > { %12671 = vst [vmem:[#allocation91_spill] sm:$0xff] %v9207_v3  ;;  %v9211_v62 = vpop.f32.mrf.mxu0 }
 0x1f6   : > { %12672 = vst [vmem:[#allocation92_spill] sm:$0xff] %v9211_v62  ;;  %v2099_v30 = vmax.f32 %v9205_v18, %v9211_v62  ;;  %v9217_v16 = vpop.f32.mrf.mxu1  ;;  %v2096_v60 = vmax.f32 %v2095_v34, %v9201_v53 }
 0x1f7   : > { %12673 = vst [vmem:[#allocation93_spill] sm:$0xff] %v9217_v16  ;;  %v9221_v39 = vpop.f32.mrf.mxu0 }
 0x1f8   : > { %12674 = vst [vmem:[#allocation94_spill] sm:$0xff] %v9221_v39  ;;  %v9223_v41 = vpop.f32.mrf.mxu1  ;;  %2097 = vmax.xlane.f32.xlu1 %v2096_v60  ;;  %v2100_v1 = vmax.f32 %v2099_v30, %v9207_v3 }
 0x1f9   : > { %12675 = vst [vmem:[#allocation95_spill] sm:$0xff] %v9223_v41  ;;  %v9226_v32 = vpop.f32.mrf.mxu0 }
 0x1fa   : > { %12676 = vst [vmem:[#allocation96_spill] sm:$0xff] %v9226_v32  ;;  %v2104_v8 = vmax.f32 %v9221_v39, %v9226_v32  ;;  %v9230_v5 = vpop.f32.mrf.mxu1  ;;  %v2101_v62 = vmax.f32 %v2100_v1, %v9217_v16 }
 0x1fb   : > { %12677 = vst [vmem:[#allocation97_spill] sm:$0xff] %v9230_v5  ;;  %v9233_v18 = vpop.f32.mrf.mxu0 }
 0x1fc   : > { %12678 = vst [vmem:[#allocation98_spill] sm:$0xff] %v9233_v18  ;;  %v9235_v34 = vpop.f32.mrf.mxu1  ;;  %2102 = vmax.xlane.f32.xlu0 %v2101_v62  ;;  %v2105_v58 = vmax.f32 %v2104_v8, %v9223_v41 }
 0x1fd   : > { %12679 = vst [vmem:[#allocation99_spill] sm:$0xff] %v9235_v34  ;;  %v9238_v53 = vpop.f32.mrf.mxu0 }
 0x1fe   : > { %12680 = vst [vmem:[#allocation100_spill] sm:$0xff] %v9238_v53  ;;  %v2109_v60 = vmax.f32 %v9233_v18, %v9238_v53  ;;  %v9242_v30 = vpop.f32.mrf.mxu1  ;;  %v2106_v3 = vmax.f32 %v2105_v58, %v9230_v5 }
 0x1ff   : > { %12681 = vst [vmem:[#allocation101_spill] sm:$0xff] %v9242_v30  ;;  %v9245_v32 = vpop.f32.mrf.mxu0 }
 0x200   : > { %12682 = vst [vmem:[#allocation102_spill] sm:$0xff] %v9245_v32  ;;  %v9247_v39 = vpop.f32.mrf.mxu1  ;;  %2107 = vmax.xlane.f32.xlu1 %v2106_v3  ;;  %v2110_v1 = vmax.f32 %v2109_v60, %v9235_v34 }
 0x201   : > { %12683 = vst [vmem:[#allocation103_spill] sm:$0xff] %v9247_v39  ;;  %v9250_v16 = vpop.f32.mrf.mxu0 }
 0x202   : > { %12684 = vst [vmem:[#allocation104_spill] sm:$0xff] %v9250_v16  ;;  %v2114_v8 = vmax.f32 %v9245_v32, %v9250_v16  ;;  %v9254_v62 = vpop.f32.mrf.mxu1  ;;  %v2111_v53 = vmax.f32 %v2110_v1, %v9242_v30 }
 0x203   : > { %12685 = vst [vmem:[#allocation105_spill] sm:$0xff] %v9254_v62  ;;  %v9257_v18 = vpop.f32.mrf.mxu0 }
 0x204   : > { %12686 = vst [vmem:[#allocation106_spill] sm:$0xff] %v9257_v18  ;;  %v9259_v41 = vpop.f32.mrf.mxu1  ;;  %2112 = vmax.xlane.f32.xlu0 %v2111_v53  ;;  %v2115_v3 = vmax.f32 %v2114_v8, %v9247_v39 }
 0x205   : > { %12687 = vst [vmem:[#allocation107_spill] sm:$0xff] %v9259_v41  ;;  %v9262_v58 = vpop.f32.mrf.mxu0 }
 0x206   : > { %12688 = vst [vmem:[#allocation108_spill] sm:$0xff] %v9262_v58  ;;  %v2119_v60 = vmax.f32 %v9257_v18, %v9262_v58  ;;  %v9266_v34 = vpop.f32.mrf.mxu1  ;;  %v2116_v16 = vmax.f32 %v2115_v3, %v9254_v62  ;;  %v7332_v3 = vld [vmem:[%s8405_s10 + $0x38] sm:$0xff]  }
 0x207   : > { %12689 = vst [vmem:[#allocation109_spill] sm:$0xff] %v9266_v34  ;;  %v9269_v32 = vpop.f32.mrf.mxu0  ;;  %v7333_v62 = vld [vmem:[%s8405_s10 + $0xb8] sm:$0xff]   ;;  %5053 = vmatpush1.bf16.msra.mxu0 %v7332_v3 }
 0x208   : > { %12690 = vst [vmem:[#allocation110_spill] sm:$0xff] %v9269_v32  ;;  %v9271_v1 = vpop.f32.mrf.mxu1  ;;  %2117 = vmax.xlane.f32.xlu1 %v2116_v16  ;;  %v2120_v30 = vmax.f32 %v2119_v60, %v9259_v41  ;;  %5342 = vmatpush1.bf16.msra.mxu1 %v7333_v62 }
 0x209   : > { %12691 = vst [vmem:[#allocation111_spill] sm:$0xff] %v9271_v1  ;;  %v9274_v53 = vpop.f32.mrf.mxu0 }
 0x20a   : > { %12692 = vst [vmem:[#allocation112_spill] sm:$0xff] %v9274_v53  ;;  %v2124_v8 = vmax.f32 %v9269_v32, %v9274_v53  ;;  %v9278_v39 = vpop.f32.mrf.mxu1  ;;  %v2121_v58 = vmax.f32 %v2120_v30, %v9266_v34  ;;  %v12698_v53 = vmov 0  }
 0x20b   : > { %12693 = vst [vmem:[#allocation113_spill] sm:$0xff] %v9278_v39  ;;  %v9281_v18 = vpop.f32.mrf.mxu0  ;;  %5054 = vmatprep.subr.bf16.mxu0 %v12698_v53  ;;  %5343 = vmatprep.subr.bf16.mxu1 %v12698_v53 }
 0x20c   : > { %12694 = vst [vmem:[#allocation114_spill] sm:$0xff] %v9281_v18  ;;  %v9285_v5 = vpop.f32.mrf.mxu1  ;;  %2122 = vmax.xlane.f32.xlu0 %v2121_v58  ;;  %v2125_v16 = vmax.f32 %v2124_v8, %v9271_v1  ;;  %v7334_v58 = vld [vmem:[%s8405_s10 + $0x30] sm:$0xff]  }
 0x20d   : > { %12695 = vst [vmem:[#allocation115_spill] sm:$0xff] %v9285_v5  ;;  %v9288_v60 = vpop.f32.mrf.mxu0  ;;  %v7335_v8 = vld [vmem:[%s8405_s10 + $0xb0] sm:$0xff]   ;;  %5055 = vmatpush1.bf16.msra.mxu0 %v7334_v58 }
 0x20e   : > { %12696 = vst [vmem:[#allocation116_spill] sm:$0xff] %v9288_v60  ;;  %v2129_v41 = vmax.f32 %v9281_v18, %v9288_v60  ;;  %v9292_v30 = vpop.f32.mrf.mxu1  ;;  %v2126_v34 = vmax.f32 %v2125_v16, %v9278_v39  ;;  %5344 = vmatpush1.bf16.msra.mxu1 %v7335_v8  ;;  %v7336_v16 = vld [vmem:[%s8395_s27 + $0xc8] sm:$0xff]   ;;  %5056 = vmatprep.subr.bf16.mxu0 %v12698_v53 }
 0x20f   : > { %12697 = vst [vmem:[#allocation117_spill] sm:$0xff] %v9292_v30  ;;  %v9297_v32 = vpop.f32.mrf.mxu0  ;;  %5345 = vmatprep.subr.bf16.mxu1 %v12698_v53  ;;  %7070 = vmatprep.mubr.msk.bf16.mxu0 %vm1016_vm1, %v7336_v16 }
 0x210   : > { %12699 = vst [vmem:[#allocation118_spill] sm:$0xff] %v9297_v32  ;;  %v9301_v1 = vpop.f32.mrf.mxu1  ;;  %2127 = vmax.xlane.f32.xlu1 %v2126_v34  ;;  %v2130_v62 = vmax.f32 %v2129_v41, %v9285_v5  ;;  %7150 = vmatprep.mubr.msk.bf16.mxu1 %vm1016_vm1, %v7336_v16  ;;  %v7337_v41 = vld [vmem:[%s8405_s10 + $0x28] sm:$0xff]  }
 0x211   : > { %12700 = vst [vmem:[#allocation119_spill] sm:$0xff] %v9301_v1  ;;  %v9304_v3 = vpop.f32.mrf.mxu0  ;;  %v7338_v34 = vld [vmem:[%s8405_s10 + $0xa8] sm:$0xff]   ;;  %7071 = vmatmul.mubr.msk.bf16.gmra.mxu0 %vm1016_vm1, %v7336_v16  ;;  %7151 = vmatmul.mubr.msk.bf16.gmra.mxu1 %vm1016_vm1, %v7336_v16 }
 0x212   : > { %12701 = vst [vmem:[#allocation120_spill] sm:$0xff] %v9304_v3  ;;  %v2134_v60 = vmax.f32 %v9297_v32, %v9304_v3  ;;  %v9309_v18 = vpop.f32.mrf.mxu1  ;;  %v2131_v39 = vmax.f32 %v2130_v62, %v9292_v30  ;;  %5057 = vmatpush1.bf16.msra.mxu0 %v7337_v41  ;;  %5346 = vmatpush1.bf16.msra.mxu1 %v7338_v34 }
 0x213   : > { %12702 = vst [vmem:[#allocation121_spill] sm:$0xff] %v9309_v18  ;;  %v9314_v27 = vpop.f32.mrf.mxu0  ;;  %5058 = vmatprep.subr.bf16.mxu0 %v12698_v53  ;;  %5347 = vmatprep.subr.bf16.mxu1 %v12698_v53 }
 0x214   : > { %12703 = vst [vmem:[#allocation122_spill] sm:$0xff] %v9314_v27  ;;  %v9320_v58 = vpop.f32.mrf.mxu1  ;;  %2132 = vmax.xlane.f32.xlu0 %v2131_v39  ;;  %v2135_v8 = vmax.f32 %v2134_v60, %v9301_v1  ;;  %v7339_v60 = vld [vmem:[%s8405_s10 + $0x20] sm:$0xff]  }
 0x215   : > { %12704 = vst [vmem:[#allocation123_spill] sm:$0xff] %v9320_v58  ;;  %v9324_v62 = vpop.f32.mrf.mxu0  ;;  %v7340_v1 = vld [vmem:[%s8405_s10 + $0xa0] sm:$0xff]  }
 0x216   : > { %12705 = vst [vmem:[#allocation124_spill] sm:$0xff] %v9324_v62  ;;  %v2139_v30 = vmax.f32 %v9314_v27, %v9324_v62  ;;  %v9329_v5 = vpop.f32.mrf.mxu1  ;;  %v2136_v3 = vmax.f32 %v2135_v8, %v9309_v18  ;;  %5059 = vmatpush1.bf16.msra.mxu0 %v7339_v60  ;;  %v7341_v8 = vld [vmem:[%s8395_s27 + $0xd0] sm:$0xff]   ;;  %5348 = vmatpush1.bf16.msra.mxu1 %v7340_v1 }
 0x217   : > { %12706 = vst [vmem:[#allocation125_spill] sm:$0xff] %v9329_v5  ;;  %v9333_v39 = vpop.f32.mrf.mxu0  ;;  %5060 = vmatprep.subr.bf16.mxu0 %v12698_v53  ;;  %7072 = vmatprep.mubr.msk.bf16.mxu0 %vm1016_vm1, %v7341_v8 }
 0x218   : > { %12707 = vst [vmem:[#allocation126_spill] sm:$0xff] %v9333_v39  ;;  %v9338_v16 = vpop.f32.mrf.mxu1  ;;  %2137 = vmax.xlane.f32.xlu1 %v2136_v3  ;;  %v2140_v41 = vmax.f32 %v2139_v30, %v9320_v58  ;;  %7152 = vmatprep.mubr.msk.bf16.mxu1 %vm1016_vm1, %v7341_v8  ;;  %v7342_v30 = vld [vmem:[%s8405_s10 + $0x18] sm:$0xff]  }
 0x219   : > { %12708 = vst [vmem:[#allocation127_spill] sm:$0xff] %v9338_v16  ;;  %v9341_v62 = vpop.f32.mrf.mxu0  ;;  %v7343_v3 = vld [vmem:[%s8405_s10 + $0x98] sm:$0xff]   ;;  %7073 = vmatmul.mubr.msk.bf16.gmra.mxu0 %vm1016_vm1, %v7341_v8  ;;  %7153 = vmatmul.mubr.msk.bf16.gmra.mxu1 %vm1016_vm1, %v7341_v8  ;;  %v7344_v8 = vld [vmem:[%s8405_s10 + $0x10] sm:$0xff]  }
 0x21a   : > { %12709 = vst [vmem:[#allocation128_spill] sm:$0xff] %v9341_v62  ;;  %v2144_v34 = vmax.f32 %v9333_v39, %v9341_v62  ;;  %v9346_v27 = vpop.f32.mrf.mxu1  ;;  %v2141_v18 = vmax.f32 %v2140_v41, %v9329_v5  ;;  %5349 = vmatprep.subr.bf16.mxu1 %v12698_v53  ;;  %5061 = vmatpush1.bf16.msra.mxu0 %v7342_v30  ;;  %v9444_v39 = vld [vmem:[#allocation2 + $0x20] sm:$0xff] }
 0x21b   : > { %12710 = vst [vmem:[#allocation129_spill] sm:$0xff] %v9346_v27  ;;  %v9350_v32 = vpop.f32.mrf.mxu0  ;;  %5350 = vmatpush1.bf16.msra.mxu1 %v7343_v3  ;;  %5062 = vmatprep.subr.bf16.mxu0 %v12698_v53 }
 0x21c   : > { %12711 = vst [vmem:[#allocation130_spill] sm:$0xff] %v9350_v32  ;;  %v9356_v60 = vpop.f32.mrf.mxu1  ;;  %2142 = vmax.xlane.f32.xlu0 %v2141_v18  ;;  %v2145_v58 = vmax.f32 %v2144_v34, %v9338_v16  ;;  %5351 = vmatprep.subr.bf16.mxu1 %v12698_v53  ;;  %v7345_v34 = vld [vmem:[%s8405_s10 + $0x90] sm:$0xff]  }
 0x21d   : > { %12712 = vst [vmem:[#allocation131_spill] sm:$0xff] %v9356_v60  ;;  %v9360_v1 = vpop.f32.mrf.mxu0 }
 0x21e   : > { %12713 = vst [vmem:[#allocation132_spill] sm:$0xff] %v9360_v1  ;;  %v2149_v41 = vmax.f32 %v9350_v32, %v9360_v1  ;;  %v9366_v5 = vpop.f32.mrf.mxu1  ;;  %v2146_v62 = vmax.f32 %v2145_v58, %v9346_v27  ;;  %v7346_v58 = vld [vmem:[%s8395_s27 + $0xd8] sm:$0xff]   ;;  %5063 = vmatpush1.bf16.msra.mxu0 %v7344_v8  ;;  %v9384_v27 = vld [vmem:[#allocation2] sm:$0xff] }
 0x21f   : > { %12714 = vst [vmem:[#allocation133_spill] sm:$0xff] %v9366_v5  ;;  %v9369_v18 = vpop.f32.mrf.mxu0  ;;  %5352 = vmatpush1.bf16.msra.mxu1 %v7345_v34  ;;  %7074 = vmatprep.mubr.msk.bf16.mxu0 %vm1016_vm1, %v7346_v58 }
 0x220   : > { %12715 = vst [vmem:[#allocation134_spill] sm:$0xff] %v9369_v18  ;;  %2147 = vmax.xlane.f32.xlu1 %v2146_v62  ;;  %v2150_v16 = vmax.f32 %v2149_v41, %v9356_v60  ;;  %v9376_v1 = vpop.f32.mrf.mxu1  ;;  %7154 = vmatprep.mubr.msk.bf16.mxu1 %vm1016_vm1, %v7346_v58  ;;  %v7347_v62 = vld [vmem:[%s8405_s10 + $0x8] sm:$0xff]  }
 0x221   : > { %12716 = vst [vmem:[#allocation135_spill] sm:$0xff] %v9376_v1  ;;  %v9378_v32 = vpop.f32.mrf.mxu0  ;;  %v7348_v41 = vld [vmem:[%s8405_s10 + $0x88] sm:$0xff]   ;;  %7075 = vmatmul.mubr.msk.bf16.gmra.mxu0 %vm1016_vm1, %v7346_v58  ;;  %7155 = vmatmul.mubr.msk.bf16.gmra.mxu1 %vm1016_vm1, %v7346_v58 }
 0x222   : > { %12717 = vst [vmem:[#allocation136_spill] sm:$0xff] %v9378_v32  ;;  %v2154_v30 = vmax.f32 %v9369_v18, %v9378_v32  ;;  %v2151_v3 = vmax.f32 %v2150_v16, %v9366_v5  ;;  %v9392_v32 = vpop.f32.mrf.mxu1  ;;  %5064 = vmatprep.subr.bf16.mxu0 %v12698_v53  ;;  %5353 = vmatprep.subr.bf16.mxu1 %v12698_v53  ;;  %v7350_v5 = vld [vmem:[%s8405_s10 + $0x80] sm:$0xff]   ;;  %v7356_v18 = vld [vmem:[%s8395_s27 + $0xe8] sm:$0xff]  }
 0x223   : > { %12718 = vst [vmem:[#allocation137_spill] sm:$0xff] %v9392_v32  ;;  %5065 = vmatpush1.bf16.msra.mxu0 %v7347_v62  ;;  %5354 = vmatpush1.bf16.msra.mxu1 %v7348_v41  ;;  %v9413_v62 = vld [vmem:[#allocation2 + $0x10] sm:$0xff]  ;;  %v7352_v41 = vld [vmem:[%s8405_s10 + $0x78] sm:$0xff]  }
 0x224   : > { %2152 = vmax.xlane.f32.xlu0 %v2151_v3  ;;  %v2155_v60 = vmax.f32 %v2154_v30, %v9376_v1  ;;  %v9401_v30 = vld [vmem:[#allocation2 + $0x8] sm:$0xff]  ;;  %5066 = vmatprep.subr.bf16.mxu0 %v12698_v53  ;;  %v7349_v3 = vld [vmem:[%s8405_s10] sm:$0xff]   ;;  %v7355_v1 = vld [vmem:[%s8405_s10 + $0xf0] sm:$0xff]  }
 0x225   : > { %v1983_v16 = vpop.xlane.xlu0 %1982  ;;  %5355 = vmatprep.subr.bf16.mxu1 %v12698_v53 }
 0x226   : > { %v9397_v8 = vmax.f32 %v9384_v27, %v1983_v16  ;;  %v2156_v34 = vmax.f32 %v2155_v60, %v9392_v32  ;;  %v7351_v60 = vld [vmem:[%s8395_s27 + $0xe0] sm:$0xff]   ;;  %v7353_v32 = vld [vmem:[%s8405_s10 + $0xf8] sm:$0xff]  }
 0x227   : > { %5067 = vmatpush1.bf16.msra.mxu0 %v7349_v3  ;;  %5356 = vmatpush1.bf16.msra.mxu1 %v7350_v5 }
 0x228   : > { %5758 = vst.msk [vmem:[#allocation2] sm:$0xff] %vm4155_vm2, %v9397_v8  ;;  %2157 = vmax.xlane.f32.xlu1 %v2156_v34  ;;  %7076 = vmatprep.mubr.msk.bf16.mxu0 %vm1016_vm1, %v7351_v60  ;;  %v7354_v34 = vld [vmem:[%s8405_s10 + $0x70] sm:$0xff]  }
 0x229   : > { %v1988_v58 = vpop.xlane.xlu0 %1987  ;;  %7156 = vmatprep.mubr.msk.bf16.mxu1 %vm1016_vm1, %v7351_v60  ;;  %7077 = vmatmul.mubr.msk.bf16.gmra.mxu0 %vm1016_vm1, %v7351_v60 }
 0x22a   : > { %v9411_v16 = vmax.f32 %v9401_v30, %v1988_v58  ;;  %7157 = vmatmul.mubr.msk.bf16.gmra.mxu1 %vm1016_vm1, %v7351_v60  ;;  %5068 = vmatprep.subr.bf16.mxu0 %v12698_v53  ;;  %v9430_v58 = vld [vmem:[#allocation2 + $0x18] sm:$0xff] }
 0x22b   : > { %5357 = vmatprep.subr.bf16.mxu1 %v12698_v53  ;;  %5069 = vmatpush2.bf16.msra.mxu0 %v7352_v41 }
 0x22c   : > { %5759 = vst.msk [vmem:[#allocation2 + $0x8] sm:$0xff] %vm4155_vm2, %v9411_v16  ;;  %5358 = vmatpush2.bf16.msra.mxu1 %v7353_v32  ;;  %5070 = vmatprep.subr.bf16.mxu0 %v12698_v53  ;;  %v7357_v32 = vld [vmem:[%s8405_s10 + $0x68] sm:$0xff]  }
 0x22d   : > { %v1993_v3 = vpop.xlane.xlu1 %1992  ;;  %5359 = vmatprep.subr.bf16.mxu1 %v12698_v53  ;;  %7078 = vmatprep.mubr.msk.bf16.mxu0 %vm1016_vm1, %v7356_v18 }
 0x22e   : > { %v9427_v5 = vmax.f32 %v9413_v62, %v1993_v3  ;;  %7158 = vmatprep.mubr.msk.bf16.mxu1 %vm1016_vm1, %v7356_v18 }
 0x22f   : > { %5071 = vmatpush2.bf16.msra.mxu0 %v7354_v34  ;;  %v9461_v34 = vld [vmem:[#allocation2 + $0x28] sm:$0xff] }
 0x230   : > { %5760 = vst.msk [vmem:[#allocation2 + $0x10] sm:$0xff] %vm4155_vm2, %v9427_v5  ;;  %5360 = vmatpush2.bf16.msra.mxu1 %v7355_v1  ;;  %5072 = vmatprep.subr.bf16.mxu0 %v12698_v53 }
 0x231   : > { %v1998_v3 = vpop.xlane.xlu1 %1997  ;;  %7079 = vmatmul.mubr.msk.bf16.gmra.mxu0 %vm1016_vm1, %v7356_v18  ;;  %5361 = vmatprep.subr.bf16.mxu1 %v12698_v53 }
 0x232   : > { %v9442_v41 = vmax.f32 %v9430_v58, %v1998_v3  ;;  %7159 = vmatmul.mubr.msk.bf16.gmra.mxu1 %vm1016_vm1, %v7356_v18 }
 0x233   : > { %5073 = vmatpush2.bf16.msra.mxu0 %v7357_v32  ;;  %v9472_v32 = vld [vmem:[#allocation2 + $0x30] sm:$0xff] }
 0x234   : > { %5761 = vst.msk [vmem:[#allocation2 + $0x18] sm:$0xff] %vm4155_vm2, %v9442_v41  ;;  %5362 = vmatpush2.bf16.msra.mxu1 %v7358_v48  ;;  %5074 = vmatprep.subr.bf16.mxu0 %v12698_v53  ;;  %12719 = vst [vmem:[#allocation138_spill] sm:$0xff] %v9472_v32  ;;  %v9476_v48 = vpop.f32.mrf.mxu0 }
 0x235   : > { %v2003_v3 = vpop.xlane.xlu0 %2002  ;;  %5363 = vmatprep.subr.bf16.mxu1 %v12698_v53  ;;  %12720 = vst [vmem:[#allocation139_spill] sm:$0xff] %v9476_v48 }
 0x236   : > { %v9458_v1 = vmax.f32 %v9444_v39, %v2003_v3  ;;  %v9488_v0 = vpop.f32.mrf.mxu0 }
 0x237   : > { %5075 = vmatpush2.bf16.msra.mxu0 %v7359_v25  ;;  %12721 = vst [vmem:[#allocation140_spill] sm:$0xff] %v9488_v0  ;;  %v7363_v25 = vld [vmem:[%s8405_s10 + $0xd8] sm:$0xff]  }
 0x238   : > { %5762 = vst.msk [vmem:[#allocation2 + $0x20] sm:$0xff] %vm4155_vm2, %v9458_v1  ;;  %5364 = vmatpush2.bf16.msra.mxu1 %v7360_v37  ;;  %5076 = vmatprep.subr.bf16.mxu0 %v12698_v53  ;;  %v9508_v44 = vpop.f32.mrf.mxu0 }
 0x239   : > { %v2008_v18 = vpop.xlane.xlu1 %2007  ;;  %2562 = vperm.xlu1 %7274, %v9411_v16   ;;  %5365 = vmatprep.subr.bf16.mxu1 %v12698_v53  ;;  %12723 = vst [vmem:[#allocation142_spill] sm:$0xff] %v9508_v44 }
 0x23a   : > { %v9469_v3 = vmax.f32 %v9461_v34, %v2008_v18  ;;  %2557 = vperm.xlu0 %7273, %v9397_v8   ;;  %v7361_v18 = vld [vmem:[%s8395_s27 + $0xf0] sm:$0xff]   ;;  %v9525_v59 = vpop.f32.mrf.mxu0 }
 0x23b   : > { %7080 = vmatprep.mubr.msk.bf16.mxu0 %vm1016_vm1, %v7361_v18  ;;  %7160 = vmatprep.mubr.msk.bf16.mxu1 %vm1016_vm1, %v7361_v18  ;;  %12725 = vst [vmem:[#allocation144_spill] sm:$0xff] %v9525_v59 }
 0x23c   : > { %5763 = vst.msk [vmem:[#allocation2 + $0x28] sm:$0xff] %vm4155_vm2, %v9469_v3  ;;  %7081 = vmatmul.mubr.msk.bf16.gmra.mxu0 %vm1016_vm1, %v7361_v18  ;;  %7161 = vmatmul.mubr.msk.bf16.gmra.mxu1 %vm1016_vm1, %v7361_v18 }
 0x23d   : > { %v2013_v60 = vpop.xlane.xlu0 %2012  ;;  %5366 = vmatpush2.bf16.msra.mxu1 %v7363_v25  ;;  %7082 = vmatprep.mubr.msk.bf16.mxu0 %vm1016_vm1, %v7366_v63  ;;  %v9519_v25 = vld [vmem:[#allocation2 + $0x48] sm:$0xff] }
 0x23e   : > { %v9481_v20 = vmax.f32 %v9472_v32, %v2013_v60  ;;  %v7362_v60 = vld [vmem:[%s8405_s10 + $0x58] sm:$0xff]   ;;  %5367 = vmatprep.subr.bf16.mxu1 %v12698_v53  ;;  %7162 = vmatprep.mubr.msk.bf16.mxu1 %vm1016_vm1, %v7366_v63 }
 0x23f   : > { %5077 = vmatpush2.bf16.msra.mxu0 %v7362_v60 }
 0x240   : > { %5764 = vst.msk [vmem:[#allocation2 + $0x30] sm:$0xff] %vm4155_vm2, %v9481_v20  ;;  %5078 = vmatprep.subr.bf16.mxu0 %v12698_v53 }
 0x241   : > { %v2018_v2 = vpop.xlane.xlu1 %2017  ;;  %5368 = vmatpush2.bf16.msra.mxu1 %v7365_v51  ;;  %v9538_v51 = vld [vmem:[#allocation2 + $0x50] sm:$0xff] }
 0x242   : > { %v9497_v37 = vmax.f32 %v9483_v4, %v2018_v2  ;;  %v9510_v2 = vpop.f32.mrf.mxu1  ;;  %5369 = vmatprep.subr.bf16.mxu1 %v12698_v53  ;;  %12728 = vst [vmem:[#allocation147_spill] sm:$0xff] %v9538_v51 }
 0x243   : > { %12724 = vst [vmem:[#allocation143_spill] sm:$0xff] %v9510_v2  ;;  %5079 = vmatpush2.bf16.msra.mxu0 %v7364_v46  ;;  %v9534_v46 = vpop.f32.mrf.mxu0 }
 0x244   : > { %5765 = vst.msk [vmem:[#allocation2 + $0x38] sm:$0xff] %vm4155_vm2, %v9497_v37  ;;  %v9527_v56 = vpop.f32.mrf.mxu1  ;;  %5080 = vmatprep.subr.bf16.mxu0 %v12698_v53  ;;  %12727 = vst [vmem:[#allocation146_spill] sm:$0xff] %v9534_v46  ;;  %7083 = vmatmul.mubr.msk.bf16.gmra.mxu0 %vm1016_vm1, %v7366_v63 }
 0x245   : > { %v2023_v18 = vpop.xlane.xlu0 %2022  ;;  %12726 = vst [vmem:[#allocation145_spill] sm:$0xff] %v9527_v56  ;;  %7163 = vmatmul.mubr.msk.bf16.gmra.mxu1 %vm1016_vm1, %v7366_v63  ;;  %v9551_v63 = vpop.f32.mrf.mxu0 }
 0x246   : > { %v9517_v60 = vmax.f32 %v9502_v55, %v2023_v18  ;;  %5370 = vmatpush2.bf16.msra.mxu1 %v7368_v57  ;;  %v9544_v52 = vpop.f32.mrf.mxu1  ;;  %12731 = vst [vmem:[#allocation150_spill] sm:$0xff] %v9551_v63  ;;  %v2159_v57 = vmax.f32 %v9476_v48, %v9488_v0 }
 0x247   : > { %5081 = vmatpush2.bf16.msra.mxu0 %v7367_v61  ;;  %12729 = vst [vmem:[#allocation148_spill] sm:$0xff] %v9544_v52  ;;  %5371 = vmatprep.subr.bf16.mxu1 %v12698_v53  ;;  %v9555_v61 = vld [vmem:[#allocation2 + $0x58] sm:$0xff] }
 0x248   : > { %5766 = vst.msk [vmem:[#allocation2 + $0x40] sm:$0xff] %vm4155_vm2, %v9517_v60  ;;  %5082 = vmatprep.subr.bf16.mxu0 %v12698_v53  ;;  %12732 = vst [vmem:[#allocation151_spill] sm:$0xff] %v9555_v61  ;;  %v9559_v23 = vpop.f32.mrf.mxu1  ;;  %v2169_v53 = vmax.f32 %v9534_v46, %v9551_v63  ;;  %v2160_v0 = vmax.f32 %v2159_v57, %v9510_v2 }
 0x249   : > { %v2028_v18 = vpop.xlane.xlu1 %2027  ;;  %12733 = vst [vmem:[#allocation152_spill] sm:$0xff] %v9559_v23 }
 0x24a   : > { %v9532_v55 = vmax.f32 %v9519_v25, %v2028_v18  ;;  %5372 = vmatpush2.bf16.msra.mxu1 %v7370_v50  ;;  %v9571_v50 = vld [vmem:[#allocation2 + $0x60] sm:$0xff]  ;;  %v2161_v57 = vmax.f32 %v2160_v0, %v9527_v56  ;;  %v2363_v0 = vsub.f32 %v9384_v27, %v9397_v8  ;;  %v9615_v8 = vld [vmem:[#allocation2 + $0x88] sm:$0xff] }
 0x24b   : > { %5083 = vmatpush2.bf16.msra.mxu0 %v7369_v54  ;;  %v2164_v54 = vmax.f32 %v9508_v44, %v9525_v59  ;;  %12735 = vst [vmem:[#allocation154_spill] sm:$0xff] %v9571_v50  ;;  %v9608_v56 = vld [vmem:[#allocation2 + $0x80] sm:$0xff]  ;;  %12746 = vst [vmem:[#allocation165_spill] sm:$0xff] %v9615_v8 }
 0x24c   : > { %5767 = vst.msk [vmem:[#allocation2 + $0x48] sm:$0xff] %vm4155_vm2, %v9532_v55  ;;  %12744 = vst [vmem:[#allocation163_spill] sm:$0xff] %v9608_v56 }
 0x24d   : > { %v2033_v18 = vpop.xlane.xlu0 %2032  ;;  %v2165_v46 = vmax.f32 %v2164_v54, %v9544_v52 }
 0x24e   : > { %v9549_v49 = vmax.f32 %v9538_v51, %v2033_v18  ;;  %v9566_v51 = vpop.f32.mrf.mxu1 }
 0x24f   : > { %12734 = vst [vmem:[#allocation153_spill] sm:$0xff] %v9566_v51  ;;  %v2170_v12 = vmax.f32 %v2169_v53, %v9566_v51  ;;  %v2166_v51 = vmax.f32 %v2165_v46, %v9559_v23  ;;  %v9632_v23 = vld [vmem:[#allocation2 + $0x98] sm:$0xff] }
 0x250   : > { %12730 = vst [vmem:[#allocation149_spill] sm:$0xff] %v9549_v49  ;;  %5768 = vst.msk [vmem:[#allocation2 + $0x50] sm:$0xff] %vm4155_vm2, %v9549_v49 }
 0x251   : > { %v2038_v7 = vpop.xlane.xlu1 %2037  ;;  %12751 = vst [vmem:[#allocation170_spill] sm:$0xff] %v9632_v23 }
 0x252   : > { %v9564_v18 = vmax.f32 %v9555_v61, %v2038_v7  ;;  %v9579_v7 = vpop.f32.mrf.mxu1  ;;  %v9582_v61 = vld [vmem:[#allocation2 + $0x68] sm:$0xff] }
 0x253   : > { %12737 = vst [vmem:[#allocation156_spill] sm:$0xff] %v9579_v7  ;;  %12738 = vst [vmem:[#allocation157_spill] sm:$0xff] %v9582_v61  ;;  %v2171_v59 = vmax.f32 %v2170_v12, %v9579_v7  ;;  %v9601_v12 = vld [vmem:[#allocation2 + $0x78] sm:$0xff] }
 0x254   : > { %5769 = vst.msk [vmem:[#allocation2 + $0x58] sm:$0xff] %vm4155_vm2, %v9564_v18  ;;  %12742 = vst [vmem:[#allocation161_spill] sm:$0xff] %v9601_v12 }
 0x255   : > { %v2043_v48 = vpop.xlane.xlu0 %2042 }
 0x256   : > { %v9577_v63 = vmax.f32 %v9571_v50, %v2043_v48  ;;  %v9591_v48 = vld [vmem:[#allocation2 + $0x70] sm:$0xff] }
 0x257   : > { %12740 = vst [vmem:[#allocation159_spill] sm:$0xff] %v9591_v48 }
 0x258   : > { %12736 = vst [vmem:[#allocation155_spill] sm:$0xff] %v9577_v63  ;;  %5770 = vst.msk [vmem:[#allocation2 + $0x60] sm:$0xff] %vm4155_vm2, %v9577_v63  ;;  %v9689_v63 = vld [vmem:[#allocation2 + $0xc0] sm:$0xff] }
 0x259   : > { %v2048_v2 = vpop.xlane.xlu1 %2047  ;;  %2162 = vmax.xlane.f32.xlu0 %v2161_v57  ;;  %12771 = vst [vmem:[#allocation190_spill] sm:$0xff] %v9689_v63 }
 0x25a   : > { %v9589_v53 = vmax.f32 %v9582_v61, %v2048_v2  ;;  %v2427_v2 = vmul.f32 1.442695, %v2363_v0 }
 0x25c   : > { %12739 = vst [vmem:[#allocation158_spill] sm:$0xff] %v9589_v53  ;;  %5771 = vst.msk [vmem:[#allocation2 + $0x68] sm:$0xff] %vm4155_vm2, %v9589_v53  ;;  %7371 = vpow2.f32 %v2427_v2 }
 0x25d   : > { %v2053_v54 = vpop.xlane.xlu0 %2052  ;;  %2167 = vmax.xlane.f32.xlu1 %v2166_v51  ;;  %2172 = vmax.xlane.f32.xlu0 %v2171_v59 }
 0x25e   : > { %v9599_v57 = vmax.f32 %v9591_v48, %v2053_v54  ;;  %v9624_v54 = vpop.f32.mrf.mxu0 }
 0x25f   : > { %12749 = vst [vmem:[#allocation168_spill] sm:$0xff] %v9624_v54 }
 0x260   : > { %12741 = vst [vmem:[#allocation160_spill] sm:$0xff] %v9599_v57  ;;  %5772 = vst.msk [vmem:[#allocation2 + $0x70] sm:$0xff] %vm4155_vm2, %v9599_v57  ;;  %v9634_v52 = vpop.f32.mrf.mxu0 }
 0x261   : > { %v2058_v7 = vpop.xlane.xlu1 %2057  ;;  %12752 = vst [vmem:[#allocation171_spill] sm:$0xff] %v9634_v52 }
 0x262   : > { %v9606_v46 = vmax.f32 %v9601_v12, %v2058_v7  ;;  %v9622_v7 = vld [vmem:[#allocation2 + $0x90] sm:$0xff]  ;;  %v9649_v48 = vpop.f32.mrf.mxu0 }
 0x263   : > { %12748 = vst [vmem:[#allocation167_spill] sm:$0xff] %v9622_v7  ;;  %12757 = vst [vmem:[#allocation176_spill] sm:$0xff] %v9649_v48  ;;  %v9667_v12 = vld [vmem:[#allocation2 + $0xb0] sm:$0xff] }
 0x264   : > { %12743 = vst [vmem:[#allocation162_spill] sm:$0xff] %v9606_v46  ;;  %5773 = vst.msk [vmem:[#allocation2 + $0x78] sm:$0xff] %vm4155_vm2, %v9606_v46 }
 0x265   : > { %v2063_v59 = vpop.xlane.xlu0 %2062  ;;  %12763 = vst [vmem:[#allocation182_spill] sm:$0xff] %v9667_v12 }
 0x266   : > { %v9613_v27 = vmax.f32 %v9608_v56, %v2063_v59 }
 0x268   : > { %12745 = vst [vmem:[#allocation164_spill] sm:$0xff] %v9613_v27  ;;  %5774 = vst.msk [vmem:[#allocation2 + $0x80] sm:$0xff] %vm4155_vm2, %v9613_v27  ;;  %v9656_v27 = vld [vmem:[#allocation2 + $0xa8] sm:$0xff] }
 0x269   : > { %v2068_v51 = vpop.xlane.xlu1 %2067  ;;  %v9638_v44 = vpop.eup %7371  ;;  %12759 = vst [vmem:[#allocation178_spill] sm:$0xff] %v9656_v27 }
 0x26a   : > { %v9620_v0 = vmax.f32 %v9615_v8, %v2068_v51  ;;  %12753 = vst [vmem:[#allocation172_spill] sm:$0xff] %v9638_v44 }
 0x26c   : > { %12747 = vst [vmem:[#allocation166_spill] sm:$0xff] %v9620_v0  ;;  %5775 = vst.msk [vmem:[#allocation2 + $0x88] sm:$0xff] %vm4155_vm2, %v9620_v0  ;;  %v9678_v0 = vld [vmem:[#allocation2 + $0xb8] sm:$0xff] }
 0x26d   : > { %v2073_v2 = vpop.xlane.xlu0 %2072  ;;  %12767 = vst [vmem:[#allocation186_spill] sm:$0xff] %v9678_v0 }
 0x26e   : > { %v9629_v59 = vmax.f32 %v9622_v7, %v2073_v2  ;;  %2567 = vperm.xlu1 %7274, %v9427_v5   ;;  %v9645_v2 = vld [vmem:[#allocation2 + $0xa0] sm:$0xff]  ;;  %v9647_v7 = vpop.f32.mrf.mxu1 }
 0x26f   : > { %12755 = vst [vmem:[#allocation174_spill] sm:$0xff] %v9645_v2  ;;  %12756 = vst [vmem:[#allocation175_spill] sm:$0xff] %v9647_v7 }
 0x270   : > { %12750 = vst [vmem:[#allocation169_spill] sm:$0xff] %v9629_v59  ;;  %5776 = vst.msk [vmem:[#allocation2 + $0x90] sm:$0xff] %vm4155_vm2, %v9629_v59 }
 0x271   : > { %v2078_v51 = vpop.xlane.xlu1 %2077 }
 0x272   : > { %v9641_v56 = vmax.f32 %v9632_v23, %v2078_v51  ;;  %2572 = vperm.xlu1 %7274, %v9442_v41   ;;  %v9658_v51 = vpop.f32.mrf.mxu0  ;;  %v9660_v23 = vpop.f32.mrf.mxu1 }
 0x273   : > { %4286 = vperm.xlu0 %7273, %v9638_v44   ;;  %12760 = vst [vmem:[#allocation179_spill] sm:$0xff] %v9658_v51  ;;  %12761 = vst [vmem:[#allocation180_spill] sm:$0xff] %v9660_v23 }
 0x274   : > { %12754 = vst [vmem:[#allocation173_spill] sm:$0xff] %v9641_v56  ;;  %5777 = vst.msk [vmem:[#allocation2 + $0x98] sm:$0xff] %vm4155_vm2, %v9641_v56  ;;  %v9669_v56 = vpop.f32.mrf.mxu1  ;;  %v9671_v57 = vpop.f32.mrf.mxu0 }
 0x275   : > { %v2083_v59 = vpop.xlane.xlu0 %2082  ;;  %12764 = vst [vmem:[#allocation183_spill] sm:$0xff] %v9669_v56  ;;  %12765 = vst [vmem:[#allocation184_spill] sm:$0xff] %v9671_v57 }
 0x276   : > { %v9654_v8 = vmax.f32 %v9645_v2, %v2083_v59  ;;  %v9682_v61 = vpop.f32.mrf.mxu1 }
 0x277   : > { %12769 = vst [vmem:[#allocation188_spill] sm:$0xff] %v9682_v61 }
 0x278   : > { %12758 = vst [vmem:[#allocation177_spill] sm:$0xff] %v9654_v8  ;;  %5778 = vst.msk [vmem:[#allocation2 + $0xa0] sm:$0xff] %vm4155_vm2, %v9654_v8  ;;  %v9680_v8 = vpop.f32.mrf.mxu0 }
 0x279   : > { %v2088_v44 = vpop.xlane.xlu1 %2087  ;;  %12768 = vst [vmem:[#allocation187_spill] sm:$0xff] %v9680_v8 }
 0x27a   : > { %v9665_v50 = vmax.f32 %v9656_v27, %v2088_v44  ;;  %v9693_v46 = vpop.f32.mrf.mxu0 }
 0x27b   : > { %12773 = vst [vmem:[#allocation192_spill] sm:$0xff] %v9693_v46 }
 0x27c   : > { %12762 = vst [vmem:[#allocation181_spill] sm:$0xff] %v9665_v50  ;;  %5779 = vst.msk [vmem:[#allocation2 + $0xa8] sm:$0xff] %vm4155_vm2, %v9665_v50  ;;  %v9691_v50 = vpop.f32.mrf.mxu1 }
 0x27d   : > { %v2093_v59 = vpop.xlane.xlu0 %2092  ;;  %12772 = vst [vmem:[#allocation191_spill] sm:$0xff] %v9691_v50 }
 0x27e   : > { %v9676_v2 = vmax.f32 %v9667_v12, %v2093_v59 }
 0x280   : > { %12766 = vst [vmem:[#allocation185_spill] sm:$0xff] %v9676_v2  ;;  %5780 = vst.msk [vmem:[#allocation2 + $0xb0] sm:$0xff] %vm4155_vm2, %v9676_v2  ;;  %v2179_v2 = vmax.f32 %v9649_v48, %v9658_v51  ;;  %v2174_v48 = vmax.f32 %v9624_v54, %v9634_v52 }
 0x281   : > { %v2098_v44 = vpop.xlane.xlu1 %2097 }
 0x282   : > { %v9687_v27 = vmax.f32 %v9678_v0, %v2098_v44  ;;  %v9704_v44 = vpop.f32.mrf.mxu0  ;;  %v9706_v0 = vpop.f32.mrf.mxu1  ;;  %v2180_v53 = vmax.f32 %v2179_v2, %v9669_v56  ;;  %v9729_v56 = vld [vmem:[#allocation2 + $0xd8] sm:$0xff] }
 0x283   : > { %12776 = vst [vmem:[#allocation195_spill] sm:$0xff] %v9704_v44  ;;  %12777 = vst [vmem:[#allocation196_spill] sm:$0xff] %v9706_v0 }
 0x284   : > { %12770 = vst [vmem:[#allocation189_spill] sm:$0xff] %v9687_v27  ;;  %5781 = vst.msk [vmem:[#allocation2 + $0xb8] sm:$0xff] %vm4155_vm2, %v9687_v27  ;;  %v9718_v51 = vpop.f32.mrf.mxu1  ;;  %v2181_v2 = vmax.f32 %v2180_v53, %v9682_v61 }
 0x285   : > { %v2103_v59 = vpop.xlane.xlu0 %2102  ;;  %12780 = vst [vmem:[#allocation199_spill] sm:$0xff] %v9718_v51  ;;  %12782 = vst [vmem:[#allocation201_spill] sm:$0xff] %v9729_v56 }
 0x286   : > { %v9698_v12 = vmax.f32 %v9689_v63, %v2103_v59  ;;  %v2189_v59 = vmax.f32 %v9693_v46, %v9704_v44  ;;  %v9716_v63 = vld [vmem:[#allocation2 + $0xd0] sm:$0xff]  ;;  %v9731_v44 = vpop.f32.mrf.mxu1  ;;  %v2175_v46 = vmax.f32 %v2174_v48, %v9647_v7 }
 0x287   : > { %12779 = vst [vmem:[#allocation198_spill] sm:$0xff] %v9716_v63  ;;  %12783 = vst [vmem:[#allocation202_spill] sm:$0xff] %v9731_v44 }
 0x288   : > { %12774 = vst [vmem:[#allocation193_spill] sm:$0xff] %v9698_v12  ;;  %5782 = vst.msk [vmem:[#allocation2 + $0xc0] sm:$0xff] %vm4155_vm2, %v9698_v12  ;;  %v2176_v53 = vmax.f32 %v2175_v46, %v9660_v23  ;;  %v9758_v46 = vld [vmem:[#allocation2 + $0xf0] sm:$0xff]  ;;  %v9768_v23 = vld [vmem:[#allocation2 + $0xf8] sm:$0xff] }
 0x289   : > { %v2108_v49 = vpop.xlane.xlu1 %2107  ;;  %12790 = vst [vmem:[#allocation208_spill] sm:$0xff] %v9758_v46  ;;  %12793 = vst [vmem:[#allocation210_spill] sm:$0xff] %v9768_v23 }
 0x28a   : > { %v9712_v27 = vmax.f32 %v9702_v6, %v2108_v49  ;;  %v2190_v49 = vmax.f32 %v2189_v59, %v9718_v51  ;;  %v9748_v51 = vld [vmem:[#allocation2 + $0xe8] sm:$0xff] }
 0x28b   : > { %12787 = vst [vmem:[#allocation206_spill] sm:$0xff] %v9748_v51 }
 0x28c   : > { %12778 = vst [vmem:[#allocation197_spill] sm:$0xff] %v9712_v27  ;;  %5783 = vst.msk [vmem:[#allocation2 + $0xc8] sm:$0xff] %vm4155_vm2, %v9712_v27 }
 0x28d   : > { %v2113_v12 = vpop.xlane.xlu0 %2112 }
 0x28e   : > { %v9725_v32 = vmax.f32 %v9716_v63, %v2113_v12  ;;  %v2191_v12 = vmax.f32 %v2190_v49, %v9731_v44  ;;  %v9740_v63 = vld [vmem:[#allocation2 + $0xe0] sm:$0xff]  ;;  %v12788_v49 = vsub.f32 %v9430_v58, %v9442_v41 }
 0x28f   : > { %12785 = vst [vmem:[#allocation204_spill] sm:$0xff] %v9740_v63 }
 0x290   : > { %12781 = vst [vmem:[#allocation200_spill] sm:$0xff] %v9725_v32  ;;  %5784 = vst.msk [vmem:[#allocation2 + $0xd0] sm:$0xff] %vm4155_vm2, %v9725_v32 }
 0x291   : > { %v2118_v52 = vpop.xlane.xlu1 %2117 }
 0x292   : > { %v9737_v54 = vmax.f32 %v9729_v56, %v2118_v52  ;;  %2182 = vmax.xlane.f32.xlu0 %v2181_v2  ;;  %v2433_v2 = vmul.f32 1.442695, %v12788_v49  ;;  %v9783_v49 = vld [vmem:[#allocation2 + $0x108] sm:$0xff] }
 0x293   : > { %12797 = vst [vmem:[#allocation214_spill] sm:$0xff] %v9783_v49 }
 0x294   : > { %12784 = vst [vmem:[#allocation203_spill] sm:$0xff] %v9737_v54  ;;  %5785 = vst.msk [vmem:[#allocation2 + $0xd8] sm:$0xff] %vm4155_vm2, %v9737_v54  ;;  %7373 = vpow2.f32 %v2433_v2 }
 0x295   : > { %v2123_v59 = vpop.xlane.xlu0 %2122 }
 0x296   : > { %v9746_v48 = vmax.f32 %v9740_v63, %v2123_v59  ;;  %2177 = vmax.xlane.f32.xlu1 %v2176_v53  ;;  %2192 = vmax.xlane.f32.xlu0 %v2191_v12  ;;  %v12791_v12 = vsub.f32 %v9401_v30, %v9411_v16 }
 0x298   : > { %12786 = vst [vmem:[#allocation205_spill] sm:$0xff] %v9746_v48  ;;  %5786 = vst.msk [vmem:[#allocation2 + $0xe0] sm:$0xff] %vm4155_vm2, %v9746_v48  ;;  %v2429_v53 = vmul.f32 1.442695, %v12791_v12 }
 0x299   : > { %v2128_v52 = vpop.xlane.xlu1 %2127 }
 0x29a   : > { %v9756_v44 = vmax.f32 %v9748_v51, %v2128_v52  ;;  %7375 = vpow2.f32 %v2429_v53  ;;  %v9775_v52 = vld [vmem:[#allocation2 + $0x100] sm:$0xff] }
 0x29b   : > { %12795 = vst [vmem:[#allocation212_spill] sm:$0xff] %v9775_v52 }
 0x29c   : > { %12789 = vst [vmem:[#allocation207_spill] sm:$0xff] %v9756_v44  ;;  %5787 = vst.msk [vmem:[#allocation2 + $0xe8] sm:$0xff] %vm4155_vm2, %v9756_v44 }
 0x29d   : > { %v2133_v59 = vpop.xlane.xlu0 %2132 }
 0x29e   : > { %v9766_v61 = vmax.f32 %v9758_v46, %v2133_v59  ;;  %v9793_v59 = vld [vmem:[#allocation2 + $0x110] sm:$0xff] }
 0x29f   : > { %12800 = vst [vmem:[#allocation217_spill] sm:$0xff] %v9793_v59 }
 0x2a0   : > { %12792 = vst [vmem:[#allocation209_spill] sm:$0xff] %v9766_v61  ;;  %5788 = vst.msk [vmem:[#allocation2 + $0xf0] sm:$0xff] %vm4155_vm2, %v9766_v61 }
 0x2a1   : > { %v2138_v58 = vpop.xlane.xlu1 %2137  ;;  %v9790_v53 = vpop.eup %7373 }
 0x2a2   : > { %v9773_v41 = vmax.f32 %v9768_v23, %v2138_v58  ;;  %12799 = vst [vmem:[#allocation216_spill] sm:$0xff] %v9790_v53  ;;  %v9826_v23 = vpop.f32.mrf.mxu1 }
 0x2a3   : > { %12808 = vst [vmem:[#allocation225_spill] sm:$0xff] %v9826_v23 }
 0x2a4   : > { %12794 = vst [vmem:[#allocation211_spill] sm:$0xff] %v9773_v41  ;;  %5789 = vst.msk [vmem:[#allocation2 + $0xf8] sm:$0xff] %vm4155_vm2, %v9773_v41  ;;  %v12899_v41 = vld [vmem:[#allocation33_spill] sm:$0xff] }
 0x2a5   : > { %v2143_v30 = vpop.xlane.xlu0 %2142 }
 0x2a6   : > { %v9780_v16 = vmax.f32 %v9775_v52, %v2143_v30  ;;  %v9808_v52 = vpop.f32.mrf.mxu0 }
 0x2a7   : > { %2577 = vperm.xlu1 %7274, %v9458_v1   ;;  %v9798_v30 = vpop.eup %7375  ;;  %12804 = vst [vmem:[#allocation221_spill] sm:$0xff] %v9808_v52 }
 0x2a8   : > { %12796 = vst [vmem:[#allocation213_spill] sm:$0xff] %v9780_v16  ;;  %5790 = vst.msk [vmem:[#allocation2 + $0x100] sm:$0xff] %vm4155_vm2, %v9780_v16 }
 0x2a9   : > { %v2148_v2 = vpop.xlane.xlu1 %2147  ;;  %12801 = vst [vmem:[#allocation218_spill] sm:$0xff] %v9798_v30 }
 0x2aa   : > { %v9788_v12 = vmax.f32 %v9783_v49, %v2148_v2  ;;  %v9804_v2 = vld [vmem:[#allocation2 + $0x118] sm:$0xff] }
 0x2ab   : > { %2582 = vperm.xlu1 %7274, %v9469_v3   ;;  %12803 = vst [vmem:[#allocation220_spill] sm:$0xff] %v9804_v2 }
 0x2ac   : > { %12798 = vst [vmem:[#allocation215_spill] sm:$0xff] %v9788_v12  ;;  %5791 = vst.msk [vmem:[#allocation2 + $0x108] sm:$0xff] %vm4155_vm2, %v9788_v12  ;;  %4301 = vperm.xlu0 %7273, %v9790_v53   ;;  %v9815_v53 = vpop.f32.mrf.mxu0 }
 0x2ad   : > { %v2153_v58 = vpop.xlane.xlu0 %2152  ;;  %12806 = vst [vmem:[#allocation223_spill] sm:$0xff] %v9815_v53 }
 0x2ae   : > { %v9801_v7 = vmax.f32 %v9793_v59, %v2153_v58  ;;  %v9824_v12 = vpop.f32.mrf.mxu0 }
 0x2af   : > { %4291 = vperm.xlu1 %7274, %v9798_v30   ;;  %12807 = vst [vmem:[#allocation224_spill] sm:$0xff] %v9824_v12 }
 0x2b0   : > { %12802 = vst [vmem:[#allocation219_spill] sm:$0xff] %v9801_v7  ;;  %5792 = vst.msk [vmem:[#allocation2 + $0x110] sm:$0xff] %vm4155_vm2, %v9801_v7 }
 0x2b1   : > { %v2158_v16 = vpop.xlane.xlu1 %2157 }
 0x2b2   : > { %v9811_v46 = vmax.f32 %v9804_v2, %v2158_v16 }
 0x2b4   : > { %12805 = vst [vmem:[#allocation222_spill] sm:$0xff] %v9811_v46  ;;  %5793 = vst.msk [vmem:[#allocation2 + $0x118] sm:$0xff] %vm4155_vm2, %v9811_v46 }
 0x2b5   : > { %v2558_v58 = vpop.permute.xlu0 %2557  ;;  %v2563_v59 = vpop.permute.xlu1 %2562 }
 0x2b6   : > { %v2875_v30 = vsub.f32 %v8909_v9, %v2558_v58  ;;  %v2876_v61 = vsub.f32 %v8913_v11, %v2558_v58  ;;  %v2877_v63 = vsub.f32 %v8911_v10, %v2558_v58  ;;  %v2878_v7 = vsub.f32 %v8917_v13, %v2558_v58  ;;  %v9829_v58 = vpop.f32.mrf.mxu0 }
 0x2b7   : > { %v2879_v48 = vsub.f32 %v8919_v14, %v2563_v59  ;;  %v2880_v16 = vsub.f32 %v8924_v17, %v2563_v59  ;;  %v2881_v46 = vsub.f32 %v8921_v15, %v2563_v59  ;;  %v2882_v11 = vsub.f32 %v8928_v19, %v2563_v59  ;;  %12809 = vst [vmem:[#allocation226_spill] sm:$0xff] %v9829_v58  ;;  %v9831_v17 = vpop.f32.mrf.mxu1 }
 0x2b8   : > { %v3131_v2 = vmul.f32 1.442695, %v2875_v30  ;;  %v3133_v32 = vmul.f32 1.442695, %v2876_v61  ;;  %v3135_v49 = vmul.f32 1.442695, %v2877_v63  ;;  %v2199_v15 = vmax.f32 %v9824_v12, %v9829_v58 }
 0x2b9   : > { %v3137_v9 = vmul.f32 1.442695, %v2878_v7  ;;  %v3139_v10 = vmul.f32 1.442695, %v2879_v48  ;;  %v3141_v13 = vmul.f32 1.442695, %v2880_v16  ;;  %v9835_v61 = vpop.f32.mrf.mxu1  ;;  %v2184_v59 = vmax.f32 %v9671_v57, %v9680_v8 }
 0x2ba   : > { %7377 = vpow2.f32 %v3131_v2  ;;  %v3143_v14 = vmul.f32 1.442695, %v2881_v46  ;;  %12810 = vst [vmem:[#allocation227_spill] sm:$0xff] %v9831_v17  ;;  %v3145_v63 = vmul.f32 1.442695, %v2882_v11  ;;  %12811 = vst [vmem:[#allocation228_spill] sm:$0xff] %v9835_v61  ;;  %v2200_v19 = vmax.f32 %v2199_v15, %v9835_v61 }
 0x2bb   : > { %7379 = vpow2.f32 %v3133_v32  ;;  %v9838_v32 = vpop.f32.mrf.mxu1  ;;  %v2368_v58 = vsub.f32 %v9461_v34, %v9469_v3 }
 0x2bc   : > { %7381 = vpow2.f32 %v3135_v49  ;;  %12812 = vst [vmem:[#allocation229_spill] sm:$0xff] %v9838_v32  ;;  %v2201_v48 = vmax.f32 %v2200_v19, %v9838_v32 }
 0x2bd   : > { %7383 = vpow2.f32 %v3137_v9 }
 0x2be   : > { %7385 = vpow2.f32 %v3139_v10 }
 0x2bf   : > { %7387 = vpow2.f32 %v3141_v13 }
 0x2c0   : > { %7389 = vpow2.f32 %v3143_v14  ;;  %v2185_v14 = vmax.f32 %v2184_v59, %v9691_v50  ;;  %v2437_v59 = vmul.f32 1.442695, %v2368_v58  ;;  %v9865_v58 = vld [vmem:[#allocation2 + $0x130] sm:$0xff] }
 0x2c1   : > { %7391 = vpow2.f32 %v3145_v63  ;;  %12820 = vst [vmem:[#allocation236_spill] sm:$0xff] %v9865_v58 }
 0x2c2   : > { %7393 = vpow2.f32 %v2437_v59 }
 0x2c7   : > { %v7378_v7 = vpop.eup %7377 }
 0x2c8   : > { %v7380_v46 = vpop.eup %7379 }
 0x2c9   : > { %v7382_v49 = vpop.eup %7381  ;;  %v3771_v30 = vadd.f32 %v7380_v46, %v7378_v7 }
 0x2ca   : > { %v7384_v2 = vpop.eup %7383 }
 0x2cb   : > { %v7386_v16 = vpop.eup %7385  ;;  %2202 = vmax.xlane.f32.xlu0 %v2201_v48  ;;  %v3772_v9 = vadd.f32 %v7382_v49, %v3771_v30  ;;  %v2186_v48 = vmax.f32 %v2185_v14, %v9706_v0 }
 0x2cc   : > { %v7388_v11 = vpop.eup %7387  ;;  %v4668_v10 = vpack.c.bf16 %v7386_v16, %v7378_v7 }
 0x2cd   : > { %v7390_v13 = vpop.eup %7389  ;;  %v4669_v63 = vpack.c.bf16 %v7388_v11, %v7380_v46  ;;  %v3776_v15 = vadd.f32 %v7388_v11, %v7386_v16  ;;  %v9844_v61 = vadd.f32 %v7384_v2, %v3772_v9  ;;  %v12815_v46 = vsub.f32 %v9413_v62, %v9427_v5  ;;  %v9883_v9 = vpop.f32.mrf.mxu0 }
 0x2ce   : > { %v7392_v19 = vpop.eup %7391  ;;  %v4670_v32 = vpack.c.bf16 %v7390_v13, %v7382_v49  ;;  %v9854_v49 = vld [vmem:[#allocation2 + $0x120] sm:$0xff]  ;;  %12824 = vst [vmem:[#allocation240_spill] sm:$0xff] %v9883_v9 }
 0x2cf   : > { %12813 = vst [vmem:[#allocation230_spill] sm:$0xff] %v9844_v61  ;;  %5084 = vmatprep.mubr.bf16.mxu0 %v4669_v63  ;;  %v4671_v12 = vpack.c.bf16 %v7392_v19, %v7384_v2  ;;  %v3777_v8 = vadd.f32 %v7390_v13, %v3776_v15  ;;  %v2431_v30 = vmul.f32 1.442695, %v12815_v46  ;;  %12816 = vst [vmem:[#allocation232_spill] sm:$0xff] %v9854_v49  ;;  %v9890_v59 = vpop.f32.mrf.mxu0 }
 0x2d0   : > { %5085 = vmatmul.mubr.bf16.vlgmr.msra.gmra.mxu0 %v4668_v10  ;;  %12825 = vst [vmem:[#allocation241_spill] sm:$0xff] %v9890_v59 }
 0x2d1   : > { %5373 = vmatprep.mubr.bf16.mxu1 %v4671_v12  ;;  %v9849_v7 = vadd.f32 %v7392_v19, %v3777_v8  ;;  %7395 = vpow2.f32 %v2431_v30  ;;  %v9860_v12 = vpop.eup %7393  ;;  %v9863_v8 = vld [vmem:[#allocation2 + $0x128] sm:$0xff] }
 0x2d2   : > { %5374 = vmatmul.mubr.bf16.vlgmr.msra.gmra.mxu1 %v4670_v32  ;;  %12818 = vst [vmem:[#allocation234_spill] sm:$0xff] %v9860_v12  ;;  %12819 = vst [vmem:[#allocation235_spill] sm:$0xff] %v9863_v8 }
 0x2d3   : > { %12814 = vst [vmem:[#allocation231_spill] sm:$0xff] %v9849_v7  ;;  %2187 = vmax.xlane.f32.xlu1 %v2186_v48  ;;  %v12898_v7 = vld [vmem:[#allocation31_spill] sm:$0xff] }
 0x2de   : > { %v9870_v32 = vpop.eup %7395 }
 0x2df   : > { %12821 = vst [vmem:[#allocation237_spill] sm:$0xff] %v9870_v32 }
 0x2e1   : > { %2602 = vperm.xlu0 %7273, %v9532_v55  }
 0x2e2   : > { %v2163_v34 = vpop.xlane.xlu0 %2162 }
 0x2e3   : > { %v9858_v3 = vmax.f32 %v9854_v49, %v2163_v34 }
 0x2e4   : > { %2587 = vperm.xlu1 %7274, %v9481_v20  }
 0x2e5   : > { %12817 = vst [vmem:[#allocation233_spill] sm:$0xff] %v9858_v3  ;;  %5794 = vst.msk [vmem:[#allocation2 + $0x120] sm:$0xff] %vm4155_vm2, %v9858_v3  ;;  %4311 = vperm.xlu0 %7273, %v9860_v12  }
 0x2e6   : > { %v2168_v62 = vpop.xlane.xlu1 %2167  ;;  %v2173_v5 = vpop.xlane.xlu0 %2172 }
 0x2e7   : > { %v9873_v2 = vmax.f32 %v9863_v8, %v2168_v62  ;;  %v9876_v16 = vmax.f32 %v9865_v58, %v2173_v5  ;;  %v2194_v58 = vmax.f32 %v9808_v52, %v9815_v53 }
 0x2e8   : > { %4296 = vperm.xlu1 %7274, %v9870_v32  }
 0x2e9   : > { %12822 = vst [vmem:[#allocation238_spill] sm:$0xff] %v9873_v2  ;;  %12823 = vst [vmem:[#allocation239_spill] sm:$0xff] %v9876_v16 }
 0x2ea   : > { %5795 = vst.msk [vmem:[#allocation2 + $0x128] sm:$0xff] %vm4155_vm2, %v9873_v2  ;;  %5796 = vst.msk [vmem:[#allocation2 + $0x130] sm:$0xff] %vm4155_vm2, %v9876_v16  ;;  %v2568_v11 = vpop.permute.xlu1 %2567 }
 0x2eb   : > { %v2883_v10 = vsub.f32 %v8931_v21, %v2568_v11  ;;  %v2884_v13 = vsub.f32 %v8936_v24, %v2568_v11  ;;  %v2885_v14 = vsub.f32 %v8933_v22, %v2568_v11  ;;  %v2886_v63 = vsub.f32 %v8940_v26, %v2568_v11  ;;  %v9896_v11 = vpop.f32.mrf.mxu0 }
 0x2ec   : > { %2592 = vperm.xlu1 %7274, %v9497_v37   ;;  %12826 = vst [vmem:[#allocation242_spill] sm:$0xff] %v9896_v11 }
 0x2ed   : > { %v3147_v15 = vmul.f32 1.442695, %v2883_v10  ;;  %v3149_v19 = vmul.f32 1.442695, %v2884_v13  ;;  %v3151_v48 = vmul.f32 1.442695, %v2885_v14  ;;  %v9898_v10 = vpop.f32.mrf.mxu1 }
 0x2ee   : > { %v3153_v46 = vmul.f32 1.442695, %v2886_v63  ;;  %v2573_v30 = vpop.permute.xlu1 %2572  ;;  %12827 = vst [vmem:[#allocation243_spill] sm:$0xff] %v9898_v10 }
 0x2ef   : > { %7397 = vpow2.f32 %v3147_v15  ;;  %v2887_v34 = vsub.f32 %v8943_v28, %v2573_v30  ;;  %v2888_v21 = vsub.f32 %v8948_v31, %v2573_v30  ;;  %v2889_v24 = vsub.f32 %v8945_v29, %v2573_v30  ;;  %v9900_v28 = vpop.f32.mrf.mxu0  ;;  %v9902_v31 = vpop.f32.mrf.mxu1 }
 0x2f0   : > { %7399 = vpow2.f32 %v3149_v19  ;;  %v2890_v22 = vsub.f32 %v8952_v33, %v2573_v30  ;;  %12828 = vst [vmem:[#allocation244_spill] sm:$0xff] %v9900_v28  ;;  %12829 = vst [vmem:[#allocation245_spill] sm:$0xff] %v9902_v31  ;;  %v2209_v29 = vmax.f32 %v9896_v11, %v9900_v28 }
 0x2f1   : > { %7401 = vpow2.f32 %v3151_v48  ;;  %v3155_v26 = vmul.f32 1.442695, %v2887_v34  ;;  %v3157_v62 = vmul.f32 1.442695, %v2888_v21  ;;  %v3159_v5 = vmul.f32 1.442695, %v2889_v24  ;;  %v9906_v33 = vpop.f32.mrf.mxu1 }
 0x2f2   : > { %7403 = vpow2.f32 %v3153_v46  ;;  %v3161_v13 = vmul.f32 1.442695, %v2890_v22  ;;  %12830 = vst [vmem:[#allocation246_spill] sm:$0xff] %v9906_v33  ;;  %v2210_v63 = vmax.f32 %v2209_v29, %v9906_v33 }
 0x2f3   : > { %7405 = vpow2.f32 %v3155_v26  ;;  %v9909_v19 = vpop.f32.mrf.mxu1 }
 0x2f4   : > { %7407 = vpow2.f32 %v3157_v62  ;;  %12831 = vst [vmem:[#allocation247_spill] sm:$0xff] %v9909_v19  ;;  %v2211_v21 = vmax.f32 %v2210_v63, %v9909_v19 }
 0x2f5   : > { %7409 = vpow2.f32 %v3159_v5 }
 0x2f6   : > { %7411 = vpow2.f32 %v3161_v13 }
 0x2fc   : > { %v7398_v14 = vpop.eup %7397 }
 0x2fd   : > { %v7400_v15 = vpop.eup %7399 }
 0x2fe   : > { %v7402_v48 = vpop.eup %7401  ;;  %v3781_v46 = vadd.f32 %v7400_v15, %v7398_v14 }
 0x2ff   : > { %v7404_v30 = vpop.eup %7403 }
 0x300   : > { %v7406_v34 = vpop.eup %7405  ;;  %v3782_v24 = vadd.f32 %v7402_v48, %v3781_v46  ;;  %v2195_v46 = vmax.f32 %v2194_v58, %v9826_v23 }
 0x301   : > { %v7408_v22 = vpop.eup %7407  ;;  %v4672_v26 = vpack.c.bf16 %v7406_v34, %v7398_v14  ;;  %v2370_v14 = vsub.f32 %v9483_v4, %v9497_v37 }
 0x302   : > { %v7410_v62 = vpop.eup %7409  ;;  %v4673_v5 = vpack.c.bf16 %v7408_v22, %v7400_v15  ;;  %v9912_v13 = vadd.f32 %v7404_v30, %v3782_v24  ;;  %v3786_v28 = vadd.f32 %v7408_v22, %v7406_v34  ;;  %v9920_v15 = vpop.f32.mrf.mxu0 }
 0x303   : > { %v7412_v11 = vpop.eup %7411  ;;  %v4674_v12 = vpack.c.bf16 %v7410_v62, %v7402_v48  ;;  %12834 = vst [vmem:[#allocation250_spill] sm:$0xff] %v9920_v15  ;;  %v2441_v48 = vmul.f32 1.442695, %v2370_v14  ;;  %v9940_v24 = vpop.permute.xlu0 %4286  ;;  %v9956_v14 = vld [vmem:[#allocation2 + $0x138] sm:$0xff] }
 0x304   : > { %12832 = vst [vmem:[#allocation248_spill] sm:$0xff] %v9912_v13  ;;  %5092 = vmatprep.mubr.bf16.mxu0 %v4673_v5  ;;  %v4675_v29 = vpack.c.bf16 %v7412_v11, %v7404_v30  ;;  %2212 = vmax.xlane.f32.xlu0 %v2211_v21  ;;  %v3787_v33 = vadd.f32 %v7410_v62, %v3786_v28  ;;  %v9923_v34 = vpop.f32.mrf.mxu0  ;;  %v9925_v30 = vpop.f32.mrf.mxu1  ;;  %12848 = vst [vmem:[#allocation264_spill] sm:$0xff] %v9956_v14  ;;  %v12897_v13 = vld [vmem:[#allocation32_spill] sm:$0xff] }
 0x305   : > { %5093 = vmatmul.mubr.bf16.gmra.mxu0 %v4672_v26  ;;  %12835 = vst [vmem:[#allocation251_spill] sm:$0xff] %v9923_v34  ;;  %12836 = vst [vmem:[#allocation252_spill] sm:$0xff] %v9925_v30  ;;  %v2196_v28 = vmax.f32 %v2195_v46, %v9831_v17  ;;  %v2367_v21 = vsub.f32 %v9444_v39, %v9458_v1  ;;  %7413 = vpow2.f32 %v2441_v48  ;;  %v9944_v26 = vld [vmem:[#allocation2 + $0x140] sm:$0xff]  ;;  %v9958_v46 = vld [vmem:[#allocation2 + $0x150] sm:$0xff] }
 0x306   : > { %5381 = vmatprep.mubr.bf16.mxu1 %v4675_v29  ;;  %v9916_v63 = vadd.f32 %v7412_v11, %v3787_v33  ;;  %v9932_v11 = vpop.f32.mrf.mxu1  ;;  %12843 = vst [vmem:[#allocation259_spill] sm:$0xff] %v9944_v26  ;;  %12849 = vst [vmem:[#allocation265_spill] sm:$0xff] %v9958_v46 }
 0x307   : > { %5382 = vmatmul.mubr.bf16.gmra.mxu1 %v4674_v12  ;;  %v9930_v12 = vpop.f32.mrf.mxu0  ;;  %12838 = vst [vmem:[#allocation254_spill] sm:$0xff] %v9932_v11  ;;  %v2435_v4 = vmul.f32 1.442695, %v2367_v21 }
 0x308   : > { %12833 = vst [vmem:[#allocation249_spill] sm:$0xff] %v9916_v63  ;;  %12837 = vst [vmem:[#allocation253_spill] sm:$0xff] %v9930_v12  ;;  %v9936_v58 = vpop.f32.mrf.mxu1 }
 0x309   : > { %v9934_v37 = vpop.f32.mrf.mxu0  ;;  %12840 = vst [vmem:[#allocation256_spill] sm:$0xff] %v9936_v58  ;;  %7415 = vpow2.f32 %v2435_v4 }
 0x30a   : > { %12839 = vst [vmem:[#allocation255_spill] sm:$0xff] %v9934_v37  ;;  %v9942_v22 = vpop.f32.mrf.mxu1 }
 0x30b   : > { %v9938_v33 = vpop.f32.mrf.mxu0  ;;  %12842 = vst [vmem:[#allocation258_spill] sm:$0xff] %v9942_v22 }
 0x30c   : > { %12841 = vst [vmem:[#allocation257_spill] sm:$0xff] %v9938_v33  ;;  %v9947_v39 = vpop.f32.mrf.mxu1 }
 0x30d   : > { %12844 = vst [vmem:[#allocation260_spill] sm:$0xff] %v9947_v39  ;;  %v9949_v1 = vpop.f32.mrf.mxu0 }
 0x30e   : > { %12845 = vst [vmem:[#allocation261_spill] sm:$0xff] %v9949_v1  ;;  %v9963_v48 = vpop.f32.mrf.mxu1 }
 0x30f   : > { %12850 = vst [vmem:[#allocation266_spill] sm:$0xff] %v9963_v48 }
 0x310   : > { %2197 = vmax.xlane.f32.xlu1 %v2196_v28  ;;  %v9965_v28 = vpop.f32.mrf.mxu0 }
 0x311   : > { %12851 = vst [vmem:[#allocation267_spill] sm:$0xff] %v9965_v28 }
 0x312   : > { %v9954_v29 = vpop.eup %7413  ;;  %v9980_v17 = vpop.f32.mrf.mxu0 }
 0x313   : > { %12847 = vst [vmem:[#allocation263_spill] sm:$0xff] %v9954_v29  ;;  %12855 = vst [vmem:[#allocation271_spill] sm:$0xff] %v9980_v17 }
 0x314   : > { %v9991_v63 = vpop.f32.mrf.mxu0 }
 0x315   : > { %12858 = vst [vmem:[#allocation274_spill] sm:$0xff] %v9991_v63 }
 0x316   : > { %v9982_v23 = vpop.eup %7415 }
 0x317   : > { %12856 = vst [vmem:[#allocation272_spill] sm:$0xff] %v9982_v23 }
 0x31a   : > { %2612 = vperm.xlu0 %7273, %v9564_v18  }
 0x31b   : > { %v2183_v62 = vpop.xlane.xlu0 %2182 }
 0x31c   : > { %v9952_v5 = vmax.f32 %v9944_v26, %v2183_v62 }
 0x31e   : > { %12846 = vst [vmem:[#allocation262_spill] sm:$0xff] %v9952_v5  ;;  %4321 = vperm.xlu0 %7273, %v9954_v29   ;;  %5798 = vst.msk [vmem:[#allocation2 + $0x140] sm:$0xff] %vm4155_vm2, %v9952_v5  ;;  %v9978_v29 = vpop.f32.mrf.mxu1 }
 0x31f   : > { %v2178_v21 = vpop.xlane.xlu1 %2177  ;;  %v2193_v4 = vpop.xlane.xlu0 %2192  ;;  %12854 = vst [vmem:[#allocation270_spill] sm:$0xff] %v9978_v29 }
 0x320   : > { %v9968_v62 = vmax.f32 %v9956_v14, %v2178_v21  ;;  %v9971_v19 = vmax.f32 %v9958_v46, %v2193_v4  ;;  %v9989_v57 = vpop.f32.mrf.mxu1 }
 0x321   : > { %2597 = vperm.xlu1 %7274, %v9517_v60   ;;  %12857 = vst [vmem:[#allocation273_spill] sm:$0xff] %v9989_v57 }
 0x322   : > { %12852 = vst [vmem:[#allocation268_spill] sm:$0xff] %v9968_v62  ;;  %12853 = vst [vmem:[#allocation269_spill] sm:$0xff] %v9971_v19 }
 0x323   : > { %5797 = vst.msk [vmem:[#allocation2 + $0x138] sm:$0xff] %vm4155_vm2, %v9968_v62  ;;  %5800 = vst.msk [vmem:[#allocation2 + $0x150] sm:$0xff] %vm4155_vm2, %v9971_v19  ;;  %v2578_v26 = vpop.permute.xlu1 %2577 }
 0x324   : > { %v2891_v21 = vsub.f32 %v8955_v35, %v2578_v26  ;;  %v2892_v4 = vsub.f32 %v8960_v38, %v2578_v26  ;;  %v2893_v46 = vsub.f32 %v8957_v36, %v2578_v26  ;;  %v2894_v53 = vsub.f32 %v8964_v40, %v2578_v26 }
 0x325   : > { %4306 = vperm.xlu1 %7274, %v9982_v23   ;;  %v9999_v23 = vpop.f32.mrf.mxu0 }
 0x326   : > { %v3163_v52 = vmul.f32 1.442695, %v2891_v21  ;;  %v3165_v0 = vmul.f32 1.442695, %v2892_v4  ;;  %v3167_v50 = vmul.f32 1.442695, %v2893_v46  ;;  %v9997_v4 = vpop.f32.mrf.mxu1 }
 0x327   : > { %v3169_v19 = vmul.f32 1.442695, %v2894_v53  ;;  %v2583_v32 = vpop.permute.xlu1 %2582  ;;  %12859 = vst [vmem:[#allocation275_spill] sm:$0xff] %v9997_v4  ;;  %12860 = vst [vmem:[#allocation276_spill] sm:$0xff] %v9999_v23 }
 0x328   : > { %7417 = vpow2.f32 %v3163_v52  ;;  %v2895_v35 = vsub.f32 %v8967_v42, %v2583_v32  ;;  %v2896_v38 = vsub.f32 %v8972_v45, %v2583_v32  ;;  %v2897_v36 = vsub.f32 %v8969_v43, %v2583_v32  ;;  %v10001_v42 = vpop.f32.mrf.mxu1  ;;  %v10003_v43 = vpop.f32.mrf.mxu0 }
 0x329   : > { %7419 = vpow2.f32 %v3165_v0  ;;  %v2898_v40 = vsub.f32 %v8976_v47, %v2583_v32  ;;  %12861 = vst [vmem:[#allocation277_spill] sm:$0xff] %v10001_v42  ;;  %12862 = vst [vmem:[#allocation278_spill] sm:$0xff] %v10003_v43  ;;  %v2219_v45 = vmax.f32 %v9930_v12, %v9934_v37 }
 0x32a   : > { %7421 = vpow2.f32 %v3167_v50  ;;  %v3171_v26 = vmul.f32 1.442695, %v2895_v35  ;;  %v3173_v21 = vmul.f32 1.442695, %v2896_v38  ;;  %v3175_v46 = vmul.f32 1.442695, %v2897_v36  ;;  %v10007_v47 = vpop.f32.mrf.mxu1  ;;  %v10009_v50 = vpop.f32.mrf.mxu0 }
 0x32b   : > { %7423 = vpow2.f32 %v3169_v19  ;;  %v3177_v53 = vmul.f32 1.442695, %v2898_v40  ;;  %12863 = vst [vmem:[#allocation279_spill] sm:$0xff] %v10007_v47  ;;  %12864 = vst [vmem:[#allocation280_spill] sm:$0xff] %v10009_v50  ;;  %v2220_v52 = vmax.f32 %v2219_v45, %v9936_v58 }
 0x32c   : > { %7425 = vpow2.f32 %v3171_v26  ;;  %v10012_v19 = vpop.f32.mrf.mxu1  ;;  %v10014_v38 = vpop.f32.mrf.mxu0 }
 0x32d   : > { %7427 = vpow2.f32 %v3173_v21  ;;  %12865 = vst [vmem:[#allocation281_spill] sm:$0xff] %v10012_v19  ;;  %12866 = vst [vmem:[#allocation282_spill] sm:$0xff] %v10014_v38  ;;  %v2221_v21 = vmax.f32 %v2220_v52, %v9942_v22  ;;  %v10074_v22 = vpop.permute.xlu1 %4291 }
 0x32e   : > { %7429 = vpow2.f32 %v3175_v46  ;;  %v10017_v12 = vpop.f32.mrf.mxu1  ;;  %v10019_v5 = vpop.f32.mrf.mxu0 }
 0x32f   : > { %7431 = vpow2.f32 %v3177_v53  ;;  %12867 = vst [vmem:[#allocation283_spill] sm:$0xff] %v10017_v12  ;;  %12868 = vst [vmem:[#allocation284_spill] sm:$0xff] %v10019_v5 }
 0x330   : > { %v10023_v52 = vpop.f32.mrf.mxu1 }
 0x331   : > { %12870 = vst [vmem:[#allocation286_spill] sm:$0xff] %v10023_v52 }
 0x335   : > { %v7418_v0 = vpop.eup %7417 }
 0x336   : > { %v7420_v32 = vpop.eup %7419 }
 0x337   : > { %v7422_v35 = vpop.eup %7421  ;;  %v3791_v36 = vadd.f32 %v7420_v32, %v7418_v0 }
 0x338   : > { %v7424_v40 = vpop.eup %7423 }
 0x339   : > { %v7426_v26 = vpop.eup %7425  ;;  %v3792_v46 = vadd.f32 %v7422_v35, %v3791_v36  ;;  %v10027_v36 = vpop.f32.mrf.mxu0 }
 0x33a   : > { %v7428_v53 = vpop.eup %7427  ;;  %v4676_v37 = vpack.c.bf16 %v7426_v26, %v7418_v0  ;;  %v2204_v0 = vmax.f32 %v9883_v9, %v9890_v59  ;;  %12871 = vst [vmem:[#allocation287_spill] sm:$0xff] %v10027_v36 }
 0x33b   : > { %v7430_v14 = vpop.eup %7429  ;;  %v4677_v49 = vpack.c.bf16 %v7428_v53, %v7420_v32  ;;  %v10021_v45 = vadd.f32 %v7424_v40, %v3792_v46  ;;  %v3796_v58 = vadd.f32 %v7428_v53, %v7426_v26  ;;  %v2372_v26 = vsub.f32 %v9519_v25, %v9532_v55  ;;  %v10053_v53 = vpop.permute.xlu0 %4301 }
 0x33c   : > { %v7432_v16 = vpop.eup %7431  ;;  %v4678_v61 = vpack.c.bf16 %v7430_v14, %v7422_v35  ;;  %v10033_v35 = vpop.f32.mrf.mxu1 }
 0x33d   : > { %12869 = vst [vmem:[#allocation285_spill] sm:$0xff] %v10021_v45  ;;  %5100 = vmatprep.mubr.bf16.mxu0 %v4677_v49  ;;  %v4679_v8 = vpack.c.bf16 %v7432_v16, %v7424_v40  ;;  %2222 = vmax.xlane.f32.xlu0 %v2221_v21  ;;  %v3797_v3 = vadd.f32 %v7430_v14, %v3796_v58  ;;  %12873 = vst [vmem:[#allocation289_spill] sm:$0xff] %v10033_v35  ;;  %v10036_v58 = vpop.f32.mrf.mxu0 }
 0x33e   : > { %5101 = vmatmul.mubr.bf16.gmra.mxu0 %v4676_v37  ;;  %v2205_v49 = vmax.f32 %v2204_v0, %v9898_v10  ;;  %12874 = vst [vmem:[#allocation290_spill] sm:$0xff] %v10036_v58  ;;  %v2445_v37 = vmul.f32 1.442695, %v2372_v26  ;;  %v10038_v14 = vpop.f32.mrf.mxu1  ;;  %v10055_v0 = vld [vmem:[#allocation2 + $0x160] sm:$0xff]  ;;  %v10077_v10 = vld [vmem:[#allocation2 + $0x148] sm:$0xff] }
 0x33f   : > { %5389 = vmatprep.mubr.bf16.mxu1 %v4679_v8  ;;  %v10029_v32 = vadd.f32 %v7432_v16, %v3797_v3  ;;  %12875 = vst [vmem:[#allocation291_spill] sm:$0xff] %v10038_v14  ;;  %v10041_v8 = vpop.f32.mrf.mxu0  ;;  %v12877_v3 = vld [vmem:[#allocation138_spill] sm:$0xff]  ;;  %12882 = vst [vmem:[#allocation296_spill] sm:$0xff] %v10055_v0 }
 0x340   : > { %5390 = vmatmul.mubr.bf16.gmra.mxu1 %v4678_v61  ;;  %v2206_v40 = vmax.f32 %v2205_v49, %v9902_v31  ;;  %12876 = vst [vmem:[#allocation292_spill] sm:$0xff] %v10041_v8  ;;  %v2369_v16 = vsub.f32 %v12877_v3, %v9481_v20  ;;  %7433 = vpow2.f32 %v2445_v37  ;;  %v10045_v61 = vpop.f32.mrf.mxu1  ;;  %v12884_v49 = vld [vmem:[#allocation158_spill] sm:$0xff]  ;;  %v12890_v31 = vld [vmem:[#allocation149_spill] sm:$0xff] }
 0x341   : > { %12872 = vst [vmem:[#allocation288_spill] sm:$0xff] %v10029_v32  ;;  %12878 = vst [vmem:[#allocation138_spill] sm:$0xff] %v10045_v61  ;;  %v10047_v55 = vpop.f32.mrf.mxu0 }
 0x342   : > { %12879 = vst [vmem:[#allocation293_spill] sm:$0xff] %v10047_v55  ;;  %v2439_v25 = vmul.f32 1.442695, %v2369_v16  ;;  %v10049_v21 = vpop.f32.mrf.mxu1  ;;  %12891 = vst [vmem:[#allocation149_spill] sm:$0xff] %v10077_v10 }
 0x343   : > { %12880 = vst [vmem:[#allocation294_spill] sm:$0xff] %v10049_v21  ;;  %v10051_v46 = vpop.f32.mrf.mxu0 }
 0x344   : > { %12881 = vst [vmem:[#allocation295_spill] sm:$0xff] %v10051_v46  ;;  %7435 = vpow2.f32 %v2439_v25  ;;  %v10057_v26 = vpop.f32.mrf.mxu1 }
 0x345   : > { %12883 = vst [vmem:[#allocation297_spill] sm:$0xff] %v10057_v26  ;;  %v10060_v20 = vpop.f32.mrf.mxu0 }
 0x346   : > { %12885 = vst [vmem:[#allocation158_spill] sm:$0xff] %v10060_v20  ;;  %v10067_v16 = vpop.f32.mrf.mxu1 }
 0x347   : > { %12888 = vst [vmem:[#allocation300_spill] sm:$0xff] %v10067_v16  ;;  %v10072_v25 = vpop.f32.mrf.mxu0 }
 0x348   : > { %12889 = vst [vmem:[#allocation301_spill] sm:$0xff] %v10072_v25  ;;  %v10079_v59 = vpop.f32.mrf.mxu1 }
 0x349   : > { %2207 = vmax.xlane.f32.xlu1 %v2206_v40  ;;  %12892 = vst [vmem:[#allocation302_spill] sm:$0xff] %v10079_v59 }
 0x34a   : > { %v10093_v44 = vpop.f32.mrf.mxu1 }
 0x34d   : > { %v10065_v3 = vpop.eup %7433 }
 0x34e   : > { %12887 = vst [vmem:[#allocation299_spill] sm:$0xff] %v10065_v3 }
 0x351   : > { %v10083_v32 = vpop.eup %7435 }
 0x352   : > { %12894 = vst [vmem:[#allocation304_spill] sm:$0xff] %v10083_v32 }
 0x353   : > { %2622 = vperm.xlu0 %7273, %v12884_v49  }
 0x354   : > { %v2203_v37 = vpop.xlane.xlu0 %2202 }
 0x355   : > { %v10063_v40 = vmax.f32 %v10055_v0, %v2203_v37  ;;  %v10081_v37 = vpop.f32.mrf.mxu0 }
 0x356   : > { %12893 = vst [vmem:[#allocation303_spill] sm:$0xff] %v10081_v37  ;;  %v2229_v37 = vmax.f32 %v9965_v28, %v9980_v17 }
 0x357   : > { %12886 = vst [vmem:[#allocation298_spill] sm:$0xff] %v10063_v40  ;;  %4331 = vperm.xlu0 %7273, %v10065_v3   ;;  %5802 = vst.msk [vmem:[#allocation2 + $0x160] sm:$0xff] %vm4155_vm2, %v10063_v40  ;;  %v12896_v40 = vld [vmem:[#allocation30_spill] sm:$0xff] }
 0x358   : > { %12900 = vst [vmem:[#allocation30_spill] sm:$0xff] %v10093_v44  ;;  %v12906_v44 = vld [vmem:[#allocation21_spill] sm:$0xff] }
 0x35a   : > { %2607 = vperm.xlu1 %7274, %v12890_v31  }
 0x35c   : > { %v2188_v0 = vpop.xlane.xlu1 %2187  ;;  %v2603_v9 = vpop.permute.xlu0 %2602 }
 0x35d   : > { %v10086_v3 = vmax.f32 %v10077_v10, %v2188_v0  ;;  %v2911_v45 = vsub.f32 %v12896_v40, %v2603_v9  ;;  %v2912_v62 = vsub.f32 %v12897_v13, %v2603_v9  ;;  %v2913_v2 = vsub.f32 %v12898_v7, %v2603_v9  ;;  %v10097_v10 = vpop.f32.mrf.mxu0  ;;  %v12902_v13 = vld [vmem:[#allocation18_spill] sm:$0xff]  ;;  %v12903_v7 = vld [vmem:[#allocation20_spill] sm:$0xff] }
 0x35e   : > { %v2914_v51 = vsub.f32 %v12899_v41, %v2603_v9  ;;  %4316 = vperm.xlu1 %7274, %v10083_v32   ;;  %12901 = vst [vmem:[#allocation32_spill] sm:$0xff] %v10097_v10  ;;  %v12904_v41 = vld [vmem:[#allocation19_spill] sm:$0xff]  ;;  %v10102_v32 = vpop.f32.mrf.mxu1 }
 0x35f   : > { %12895 = vst [vmem:[#allocation305_spill] sm:$0xff] %v10086_v3  ;;  %5799 = vst.msk [vmem:[#allocation2 + $0x148] sm:$0xff] %vm4155_vm2, %v10086_v3  ;;  %v3203_v56 = vmul.f32 1.442695, %v2911_v45  ;;  %v3205_v54 = vmul.f32 1.442695, %v2912_v62  ;;  %v10107_v62 = vpop.f32.mrf.mxu0 }
 0x360   : > { %v3207_v6 = vmul.f32 1.442695, %v2913_v2  ;;  %v2588_v0 = vpop.permute.xlu1 %2587  ;;  %v3209_v40 = vmul.f32 1.442695, %v2914_v51  ;;  %12905 = vst [vmem:[#allocation31_spill] sm:$0xff] %v10102_v32  ;;  %12907 = vst [vmem:[#allocation33_spill] sm:$0xff] %v10107_v62  ;;  %v10109_v51 = vpop.f32.mrf.mxu1 }
 0x361   : > { %7437 = vpow2.f32 %v3203_v56  ;;  %v2899_v27 = vsub.f32 %v12902_v13, %v2588_v0  ;;  %v2900_v59 = vsub.f32 %v12903_v7, %v2588_v0  ;;  %v2901_v9 = vsub.f32 %v12904_v41, %v2588_v0  ;;  %12908 = vst [vmem:[#allocation18_spill] sm:$0xff] %v10109_v51  ;;  %v10111_v7 = vpop.f32.mrf.mxu0  ;;  %v12910_v41 = vld [vmem:[#allocation22_spill] sm:$0xff] }
 0x362   : > { %7439 = vpow2.f32 %v3205_v54  ;;  %v2902_v25 = vsub.f32 %v12906_v44, %v2588_v0  ;;  %12909 = vst [vmem:[#allocation20_spill] sm:$0xff] %v10111_v7 }
 0x363   : > { %v3179_v3 = vmul.f32 1.442695, %v2899_v27  ;;  %v3181_v45 = vmul.f32 1.442695, %v2900_v59  ;;  %7441 = vpow2.f32 %v3207_v6  ;;  %v3183_v56 = vmul.f32 1.442695, %v2901_v9  ;;  %v10121_v7 = vpop.f32.mrf.mxu0 }
 0x364   : > { %v10105_v2 = vpop.permute.xlu1 %4296  ;;  %7443 = vpow2.f32 %v3209_v40  ;;  %v3185_v54 = vmul.f32 1.442695, %v2902_v25  ;;  %v12911_v27 = vld [vmem:[#allocation24_spill] sm:$0xff]  ;;  %v12912_v6 = vld [vmem:[#allocation23_spill] sm:$0xff]  ;;  %v12913_v40 = vld [vmem:[#allocation25_spill] sm:$0xff]  ;;  %12915 = vst [vmem:[#allocation21_spill] sm:$0xff] %v10121_v7 }
 0x365   : > { %7445 = vpow2.f32 %v3179_v3  ;;  %v10119_v3 = vpop.f32.mrf.mxu1  ;;  %v12924_v7 = vld [vmem:[#allocation151_spill] sm:$0xff] }
 0x366   : > { %7447 = vpow2.f32 %v3181_v45  ;;  %12914 = vst [vmem:[#allocation19_spill] sm:$0xff] %v10119_v3 }
 0x367   : > { %7449 = vpow2.f32 %v3183_v56 }
 0x368   : > { %v2593_v13 = vpop.permute.xlu1 %2592  ;;  %7451 = vpow2.f32 %v3185_v54 }
 0x369   : > { %v2903_v44 = vsub.f32 %v12910_v41, %v2593_v13  ;;  %v2904_v59 = vsub.f32 %v12911_v27, %v2593_v13  ;;  %v2905_v0 = vsub.f32 %v12912_v6, %v2593_v13  ;;  %v2906_v9 = vsub.f32 %v12913_v40, %v2593_v13  ;;  %v10126_v27 = vpop.f32.mrf.mxu1  ;;  %v10130_v13 = vpop.f32.mrf.mxu0 }
 0x36a   : > { %v2230_v41 = vmax.f32 %v2229_v37, %v9978_v29  ;;  %12916 = vst [vmem:[#allocation22_spill] sm:$0xff] %v10126_v27  ;;  %12917 = vst [vmem:[#allocation24_spill] sm:$0xff] %v10130_v13 }
 0x36b   : > { %v3187_v45 = vmul.f32 1.442695, %v2903_v44  ;;  %v3189_v25 = vmul.f32 1.442695, %v2904_v59  ;;  %v3191_v21 = vmul.f32 1.442695, %v2905_v0  ;;  %v10139_v40 = vpop.f32.mrf.mxu1 }
 0x36c   : > { %v3193_v61 = vmul.f32 1.442695, %v2906_v9  ;;  %v2231_v0 = vmax.f32 %v2230_v41, %v9989_v57  ;;  %12918 = vst [vmem:[#allocation23_spill] sm:$0xff] %v10139_v40  ;;  %v2214_v41 = vmax.f32 %v9920_v15, %v9923_v34  ;;  %v2374_v40 = vsub.f32 %v12924_v7, %v9564_v18 }
 0x36d   : > { %7453 = vpow2.f32 %v3187_v45  ;;  %v10147_v17 = vpop.f32.mrf.mxu1 }
 0x36e   : > { %v10123_v56 = vpop.eup %7437  ;;  %7455 = vpow2.f32 %v3189_v25  ;;  %v10142_v25 = vpop.f32.mrf.mxu0  ;;  %12921 = vst [vmem:[#allocation307_spill] sm:$0xff] %v10147_v17  ;;  %v2215_v17 = vmax.f32 %v2214_v41, %v9925_v30  ;;  %v4221_v30 = vld [vmem:[#allocation4 + $0x1b0] sm:$0xff] }
 0x36f   : > { %v10128_v6 = vpop.eup %7439  ;;  %7457 = vpow2.f32 %v3191_v21  ;;  %12919 = vst [vmem:[#allocation25_spill] sm:$0xff] %v10142_v25 }
 0x370   : > { %7459 = vpow2.f32 %v3193_v61  ;;  %v3816_v54 = vadd.f32 %v10128_v6, %v10123_v56  ;;  %v10134_v44 = vpop.eup %7441  ;;  %v10151_v57 = vpop.f32.mrf.mxu0  ;;  %v2216_v18 = vmax.f32 %v2215_v17, %v9932_v11  ;;  %v12942_v11 = vld [vmem:[#allocation155_spill] sm:$0xff] }
 0x371   : > { %v10136_v59 = vpop.eup %7443  ;;  %12922 = vst [vmem:[#allocation308_spill] sm:$0xff] %v10151_v57  ;;  %v2449_v57 = vmul.f32 1.442695, %v2374_v40  ;;  %v10179_v17 = vpop.permute.xlu0 %4311 }
 0x372   : > { %v3817_v37 = vadd.f32 %v10134_v44, %v3816_v54  ;;  %v7446_v9 = vpop.eup %7445  ;;  %v10160_v25 = vpop.f32.mrf.mxu0 }
 0x373   : > { %v7448_v45 = vpop.eup %7447  ;;  %12926 = vst [vmem:[#allocation310_spill] sm:$0xff] %v10160_v25  ;;  %7461 = vpow2.f32 %v2449_v57  ;;  %v12938_v57 = vld [vmem:[#allocation162_spill] sm:$0xff]  ;;  %v12945_v25 = vld [vmem:[#allocation39_spill] sm:$0xff] }
 0x374   : > { %v10145_v61 = vadd.f32 %v10136_v59, %v3817_v37  ;;  %v3801_v21 = vadd.f32 %v7448_v45, %v7446_v9  ;;  %v7450_v29 = vpop.eup %7449  ;;  %v10157_v37 = vpop.f32.mrf.mxu1 }
 0x375   : > { %v7452_v27 = vpop.eup %7451  ;;  %12925 = vst [vmem:[#allocation151_spill] sm:$0xff] %v10157_v37  ;;  %v10165_v7 = vpop.f32.mrf.mxu0  ;;  %v12944_v37 = vld [vmem:[#allocation40_spill] sm:$0xff] }
 0x376   : > { %12920 = vst [vmem:[#allocation306_spill] sm:$0xff] %v10145_v61  ;;  %2232 = vmax.xlane.f32.xlu0 %v2231_v0  ;;  %v3802_v28 = vadd.f32 %v7450_v29, %v3801_v21  ;;  %12928 = vst [vmem:[#allocation312_spill] sm:$0xff] %v10165_v7 }
 0x378   : > { %v10153_v54 = vadd.f32 %v7452_v27, %v3802_v28 }
 0x37a   : > { %12923 = vst [vmem:[#allocation309_spill] sm:$0xff] %v10153_v54  ;;  %v7454_v3 = vpop.eup %7453  ;;  %v10162_v54 = vpop.f32.mrf.mxu1 }
 0x37b   : > { %v7456_v61 = vpop.eup %7455  ;;  %v4680_v13 = vpack.c.bf16 %v7454_v3, %v7446_v9  ;;  %12927 = vst [vmem:[#allocation311_spill] sm:$0xff] %v10162_v54 }
 0x37c   : > { %v7458_v0 = vpop.eup %7457  ;;  %v4681_v21 = vpack.c.bf16 %v7456_v61, %v7448_v45  ;;  %v3806_v8 = vadd.f32 %v7456_v61, %v7454_v3  ;;  %v12930_v45 = vld [vmem:[#allocation141_spill] sm:$0xff]  ;;  %v10173_v3 = vpop.f32.mrf.mxu0 }
 0x37d   : > { %v7460_v34 = vpop.eup %7459  ;;  %v4682_v15 = vpack.c.bf16 %v7458_v0, %v7450_v29  ;;  %v2371_v41 = vsub.f32 %v12930_v45, %v9517_v60  ;;  %v10171_v29 = vpop.f32.mrf.mxu1  ;;  %12932 = vst [vmem:[#allocation314_spill] sm:$0xff] %v10173_v3 }
 0x37e   : > { %5108 = vmatprep.mubr.bf16.mxu0 %v4681_v21  ;;  %v4683_v28 = vpack.c.bf16 %v7460_v34, %v7452_v27  ;;  %v3807_v55 = vadd.f32 %v7458_v0, %v3806_v8  ;;  %12931 = vst [vmem:[#allocation141_spill] sm:$0xff] %v10171_v29  ;;  %v4220_v21 = vld [vmem:[#allocation4 + $0xb0] sm:$0xff] }
 0x37f   : > { %5109 = vmatmul.mubr.bf16.gmra.mxu0 %v4680_v13  ;;  %v2443_v27 = vmul.f32 1.442695, %v2371_v41  ;;  %v10175_v8 = vpop.f32.mrf.mxu1  ;;  %v10177_v13 = vpop.f32.mrf.mxu0  ;;  %v4604_v41 = vmul.f32 %v9940_v24, %v4220_v21  ;;  %v4605_v24 = vmul.f32 %v10074_v22, %v4221_v30 }
 0x380   : > { %5397 = vmatprep.mubr.bf16.mxu1 %v4683_v28  ;;  %v10167_v9 = vadd.f32 %v7460_v34, %v3807_v55  ;;  %12933 = vst [vmem:[#allocation315_spill] sm:$0xff] %v10175_v8  ;;  %12934 = vst [vmem:[#allocation316_spill] sm:$0xff] %v10177_v13  ;;  %v10183_v55 = vld [vmem:[#allocation2 + $0x170] sm:$0xff]  ;;  %v10193_v0 = vpop.eup %7461 }
 0x381   : > { %5398 = vmatmul.mubr.bf16.gmra.mxu1 %v4682_v15  ;;  %7463 = vpow2.f32 %v2443_v27  ;;  %v10181_v34 = vpop.f32.mrf.mxu1  ;;  %12936 = vst [vmem:[#allocation318_spill] sm:$0xff] %v10183_v55  ;;  %v10185_v60 = vpop.f32.mrf.mxu0  ;;  %12941 = vst [vmem:[#allocation321_spill] sm:$0xff] %v10193_v0 }
 0x382   : > { %12929 = vst [vmem:[#allocation313_spill] sm:$0xff] %v10167_v9  ;;  %2217 = vmax.xlane.f32.xlu1 %v2216_v18  ;;  %12935 = vst [vmem:[#allocation317_spill] sm:$0xff] %v10181_v34 }
 0x383   : > { %12937 = vst [vmem:[#allocation319_spill] sm:$0xff] %v10185_v60  ;;  %v10188_v40 = vpop.f32.mrf.mxu1 }
 0x384   : > { %12939 = vst [vmem:[#allocation162_spill] sm:$0xff] %v10188_v40 }
 0x38c   : > { %2632 = vperm.xlu0 %7273, %v12938_v57  }
 0x38d   : > { %v2213_v15 = vpop.xlane.xlu0 %2212 }
 0x38e   : > { %v10191_v61 = vmax.f32 %v10183_v55, %v2213_v15  ;;  %v10200_v34 = vpop.eup %7463 }
 0x390   : > { %12940 = vst [vmem:[#allocation320_spill] sm:$0xff] %v10191_v61  ;;  %v5086_v28 = vpop.f32.mrf.mxu0  ;;  %4341 = vperm.xlu0 %7273, %v10193_v0   ;;  %5804 = vst.msk [vmem:[#allocation2 + $0x170] sm:$0xff] %vm4155_vm2, %v10191_v61  ;;  %v12943_v0 = vld [vmem:[#allocation38_spill] sm:$0xff] }
 0x392   : > { %v5375_v18 = vpop.f32.mrf.mxu1  ;;  %v5088_v45 = vpop.f32.mrf.mxu0 }
 0x393   : > { %v5376_v27 = vadd.f32 %v5375_v18, %v5086_v28  ;;  %2617 = vperm.xlu1 %7274, %v12942_v11   ;;  %v12946_v28 = vld [vmem:[#allocation41_spill] sm:$0xff] }
 0x394   : > { %v5377_v9 = vpop.f32.mrf.mxu1  ;;  %v5089_v15 = vpop.f32.mrf.mxu0 }
 0x395   : > { %v5630_v55 = vadd.f32 %v5376_v27, %v4604_v41  ;;  %v2613_v40 = vpop.permute.xlu0 %2612  ;;  %v10208_v9 = vld [vmem:[#allocation2 + $0x158] sm:$0xff] }
 0x396   : > { %v5378_v13 = vpop.f32.mrf.mxu1  ;;  %v5091_v60 = vpop.f32.mrf.mxu0  ;;  %v2919_v54 = vsub.f32 %v12943_v0, %v2613_v40  ;;  %v2920_v61 = vsub.f32 %v12944_v37, %v2613_v40  ;;  %v2921_v45 = vsub.f32 %v12945_v25, %v2613_v40  ;;  %v2922_v18 = vsub.f32 %v12946_v28, %v2613_v40  ;;  %v12947_v25 = vld [vmem:[#allocation26_spill] sm:$0xff]  ;;  %v12949_v40 = vld [vmem:[#allocation27_spill] sm:$0xff] }
 0x397   : > { %5694 = vst [vmem:[#allocation4 + $0xb0] sm:$0xff] %v5630_v55  ;;  %v5379_v21 = vadd.f32 %v5378_v13, %v5089_v15  ;;  %4326 = vperm.xlu1 %7274, %v10200_v34   ;;  %v12948_v55 = vld [vmem:[#allocation28_spill] sm:$0xff]  ;;  %v12950_v15 = vld [vmem:[#allocation29_spill] sm:$0xff] }
 0x398   : > { %v5380_v41 = vpop.f32.mrf.mxu1  ;;  %v3219_v27 = vmul.f32 1.442695, %v2919_v54  ;;  %v3221_v8 = vmul.f32 1.442695, %v2920_v61  ;;  %v3223_v29 = vmul.f32 1.442695, %v2921_v45 }
 0x399   : > { %v5631_v60 = vadd.f32 %v5379_v21, %v4605_v24  ;;  %v2198_v0 = vpop.xlane.xlu1 %2197  ;;  %v3225_v30 = vmul.f32 1.442695, %v2922_v18 }
 0x39a   : > { %7465 = vpow2.f32 %v3219_v27  ;;  %v10211_v37 = vmax.f32 %v10208_v9, %v2198_v0 }
 0x39b   : > { %5695 = vst [vmem:[#allocation4 + $0x1b0] sm:$0xff] %v5631_v60  ;;  %7467 = vpow2.f32 %v3221_v8  ;;  %v2239_v8 = vmax.f32 %v10003_v43, %v10009_v50 }
 0x39c   : > { %5801 = vst.msk [vmem:[#allocation2 + $0x158] sm:$0xff] %vm4155_vm2, %v10211_v37  ;;  %7469 = vpow2.f32 %v3223_v29 }
 0x39d   : > { %v2598_v22 = vpop.permute.xlu1 %2597  ;;  %7471 = vpow2.f32 %v3225_v30  ;;  %v2240_v18 = vmax.f32 %v2239_v8, %v10007_v47  ;;  %v12959_v47 = vld [vmem:[#allocation48_spill] sm:$0xff] }
 0x39e   : > { %v2907_v13 = vsub.f32 %v12947_v25, %v2598_v22  ;;  %v2908_v54 = vsub.f32 %v12948_v55, %v2598_v22  ;;  %v2909_v61 = vsub.f32 %v12949_v40, %v2598_v22  ;;  %v2910_v45 = vsub.f32 %v12950_v15, %v2598_v22 }
 0x39f   : > { %v2241_v30 = vmax.f32 %v2240_v18, %v10012_v19  ;;  %v2224_v15 = vmax.f32 %v9938_v33, %v9949_v1 }
 0x3a0   : > { %v3195_v24 = vmul.f32 1.442695, %v2907_v13  ;;  %v3197_v21 = vmul.f32 1.442695, %v2908_v54  ;;  %v3199_v28 = vmul.f32 1.442695, %v2909_v61 }
 0x3a1   : > { %v3201_v41 = vmul.f32 1.442695, %v2910_v45 }
 0x3a2   : > { %7473 = vpow2.f32 %v3195_v24 }
 0x3a3   : > { %7475 = vpow2.f32 %v3197_v21 }
 0x3a4   : > { %7477 = vpow2.f32 %v3199_v28 }
 0x3a5   : > { %7479 = vpow2.f32 %v3201_v41  ;;  %v12951_v41 = vld [vmem:[#allocation157_spill] sm:$0xff] }
 0x3a6   : > { %v2376_v8 = vsub.f32 %v12951_v41, %v12884_v49 }
 0x3a7   : > { %v10221_v29 = vpop.eup %7465 }
 0x3a8   : > { %v10224_v27 = vpop.eup %7467 }
 0x3a9   : > { %v3826_v60 = vadd.f32 %v10224_v27, %v10221_v29  ;;  %v10228_v0 = vpop.eup %7469 }
 0x3aa   : > { %v10232_v25 = vpop.eup %7471 }
 0x3ab   : > { %v3827_v22 = vadd.f32 %v10228_v0, %v3826_v60 }
 0x3ad   : > { %v10235_v13 = vadd.f32 %v10232_v25, %v3827_v22  ;;  %v2453_v22 = vmul.f32 1.442695, %v2376_v8 }
 0x3af   : > { %v7474_v55 = vpop.eup %7473  ;;  %2242 = vmax.xlane.f32.xlu0 %v2241_v30  ;;  %7481 = vpow2.f32 %v2453_v22 }
 0x3b0   : > { %v7476_v54 = vpop.eup %7475  ;;  %v4684_v40 = vpack.c.bf16 %v10123_v56, %v7474_v55  ;;  %v2225_v56 = vmax.f32 %v2224_v15, %v9947_v39  ;;  %v12954_v15 = vld [vmem:[#allocation166_spill] sm:$0xff]  ;;  %v13217_v39 = vld [vmem:[#allocation237_spill] sm:$0xff] }
 0x3b1   : > { %v7478_v61 = vpop.eup %7477  ;;  %v4685_v45 = vpack.c.bf16 %v10128_v6, %v7476_v54  ;;  %v3811_v24 = vadd.f32 %v7476_v54, %v7474_v55  ;;  %v12952_v55 = vld [vmem:[#allocation147_spill] sm:$0xff]  ;;  %v10251_v54 = vpop.permute.xlu0 %4321 }
 0x3b2   : > { %v7480_v21 = vpop.eup %7479  ;;  %v4686_v28 = vpack.c.bf16 %v10134_v44, %v7478_v61  ;;  %v2226_v6 = vmax.f32 %v2225_v56, %v9963_v48  ;;  %v2373_v44 = vsub.f32 %v12952_v55, %v12890_v31 }
 0x3b3   : > { %5116 = vmatprep.mubr.bf16.mxu0 %v4685_v45  ;;  %v4687_v18 = vpack.c.bf16 %v10136_v59, %v7480_v21  ;;  %v3812_v60 = vadd.f32 %v7478_v61, %v3811_v24  ;;  %v10253_v59 = vld [vmem:[#allocation2 + $0x180] sm:$0xff] }
 0x3b4   : > { %5117 = vmatmul.mubr.bf16.gmra.mxu0 %v4684_v40  ;;  %v2447_v49 = vmul.f32 1.442695, %v2373_v44  ;;  %12953 = vst [vmem:[#allocation155_spill] sm:$0xff] %v10253_v59  ;;  %v4222_v40 = vld [vmem:[#allocation4 + $0xd8] sm:$0xff] }
 0x3b5   : > { %5405 = vmatprep.mubr.bf16.mxu1 %v4687_v18  ;;  %v10246_v30 = vadd.f32 %v7480_v21, %v3812_v60  ;;  %v4606_v31 = vmul.f32 %v10105_v2, %v4222_v40  ;;  %v4223_v18 = vld [vmem:[#allocation4 + $0x18] sm:$0xff]  ;;  %v10267_v2 = vpop.permute.xlu1 %4306 }
 0x3b6   : > { %5406 = vmatmul.mubr.bf16.gmra.mxu1 %v4686_v28  ;;  %7483 = vpow2.f32 %v2447_v49  ;;  %v4607_v44 = vmul.f32 %v10053_v53, %v4223_v18  ;;  %v10276_v18 = vld [vmem:[#allocation2 + $0x168] sm:$0xff] }
 0x3bb   : > { %2227 = vmax.xlane.f32.xlu1 %v2226_v6 }
 0x3bc   : > { %v10259_v41 = vpop.eup %7481 }
 0x3bd   : > { %12955 = vst [vmem:[#allocation38_spill] sm:$0xff] %v10259_v41 }
 0x3c5   : > { %v5094_v61 = vpop.f32.mrf.mxu0  ;;  %2642 = vperm.xlu0 %7273, %v12954_v15  }
 0x3c6   : > { %v2223_v45 = vpop.xlane.xlu0 %2222 }
 0x3c7   : > { %v5383_v24 = vpop.f32.mrf.mxu1  ;;  %v5096_v21 = vpop.f32.mrf.mxu0  ;;  %v10257_v28 = vmax.f32 %v10253_v59, %v2223_v45  ;;  %v12956_v45 = vld [vmem:[#allocation160_spill] sm:$0xff] }
 0x3c8   : > { %v5384_v8 = vadd.f32 %v5383_v24, %v5094_v61  ;;  %v10269_v24 = vpop.eup %7483 }
 0x3c9   : > { %v5385_v60 = vpop.f32.mrf.mxu1  ;;  %v5097_v56 = vpop.f32.mrf.mxu0  ;;  %4351 = vperm.xlu0 %7273, %v10259_v41   ;;  %5806 = vst.msk [vmem:[#allocation2 + $0x180] sm:$0xff] %vm4155_vm2, %v10257_v28  ;;  %12957 = vst [vmem:[#allocation40_spill] sm:$0xff] %v10269_v24 }
 0x3ca   : > { %v5632_v22 = vadd.f32 %v5384_v8, %v4606_v31  ;;  %v12958_v60 = vld [vmem:[#allocation46_spill] sm:$0xff]  ;;  %v12960_v31 = vld [vmem:[#allocation47_spill] sm:$0xff] }
 0x3cb   : > { %v5386_v6 = vpop.f32.mrf.mxu1  ;;  %v5099_v55 = vpop.f32.mrf.mxu0 }
 0x3cc   : > { %5696 = vst [vmem:[#allocation4 + $0xd8] sm:$0xff] %v5632_v22  ;;  %v5387_v49 = vadd.f32 %v5386_v6, %v5097_v56  ;;  %2627 = vperm.xlu1 %7274, %v12956_v45   ;;  %v12961_v55 = vld [vmem:[#allocation49_spill] sm:$0xff] }
 0x3cd   : > { %v5388_v21 = vpop.f32.mrf.mxu1 }
 0x3ce   : > { %v5633_v40 = vadd.f32 %v5387_v49, %v4607_v44  ;;  %v2623_v61 = vpop.permute.xlu0 %2622 }
 0x3cf   : > { %v2927_v19 = vsub.f32 %v12958_v60, %v2623_v61  ;;  %v2928_v50 = vsub.f32 %v12959_v47, %v2623_v61  ;;  %v2929_v8 = vsub.f32 %v12960_v31, %v2623_v61  ;;  %v2930_v53 = vsub.f32 %v12961_v55, %v2623_v61  ;;  %v12963_v60 = vld [vmem:[#allocation36_spill] sm:$0xff]  ;;  %v12964_v55 = vld [vmem:[#allocation35_spill] sm:$0xff] }
 0x3d0   : > { %5697 = vst [vmem:[#allocation4 + $0x18] sm:$0xff] %v5633_v40  ;;  %4336 = vperm.xlu1 %7274, %v10269_v24   ;;  %v12962_v40 = vld [vmem:[#allocation34_spill] sm:$0xff] }
 0x3d1   : > { %v3235_v56 = vmul.f32 1.442695, %v2927_v19  ;;  %v3237_v22 = vmul.f32 1.442695, %v2928_v50  ;;  %v3239_v6 = vmul.f32 1.442695, %v2929_v8 }
 0x3d2   : > { %v2208_v44 = vpop.xlane.xlu1 %2207  ;;  %v3241_v21 = vmul.f32 1.442695, %v2930_v53  ;;  %v12965_v50 = vld [vmem:[#allocation37_spill] sm:$0xff]  ;;  %v2249_v53 = vmax.f32 %v10027_v36, %v10036_v58 }
 0x3d3   : > { %7485 = vpow2.f32 %v3235_v56  ;;  %v10279_v49 = vmax.f32 %v10276_v18, %v2208_v44 }
 0x3d4   : > { %7487 = vpow2.f32 %v3237_v22 }
 0x3d5   : > { %5803 = vst.msk [vmem:[#allocation2 + $0x168] sm:$0xff] %vm4155_vm2, %v10279_v49  ;;  %7489 = vpow2.f32 %v3239_v6  ;;  %v2250_v6 = vmax.f32 %v2249_v53, %v10033_v35 }
 0x3d6   : > { %v2608_v47 = vpop.permute.xlu1 %2607  ;;  %7491 = vpow2.f32 %v3241_v21 }
 0x3d7   : > { %v2915_v61 = vsub.f32 %v12962_v40, %v2608_v47  ;;  %v2916_v31 = vsub.f32 %v12963_v60, %v2608_v47  ;;  %v2917_v19 = vsub.f32 %v12964_v55, %v2608_v47  ;;  %v2918_v8 = vsub.f32 %v12965_v50, %v2608_v47 }
 0x3d9   : > { %v3211_v56 = vmul.f32 1.442695, %v2915_v61  ;;  %v3213_v43 = vmul.f32 1.442695, %v2916_v31  ;;  %v3215_v44 = vmul.f32 1.442695, %v2917_v19  ;;  %v2251_v61 = vmax.f32 %v2250_v6, %v10038_v14 }
 0x3da   : > { %v3217_v41 = vmul.f32 1.442695, %v2918_v8  ;;  %v2234_v8 = vmax.f32 %v9991_v63, %v9999_v23  ;;  %v4241_v63 = vld [vmem:[#allocation4 + $0x1a8] sm:$0xff] }
 0x3db   : > { %7493 = vpow2.f32 %v3211_v56 }
 0x3dc   : > { %7495 = vpow2.f32 %v3213_v43 }
 0x3dd   : > { %7497 = vpow2.f32 %v3215_v44 }
 0x3de   : > { %7499 = vpow2.f32 %v3217_v41 }
 0x3e0   : > { %v10289_v22 = vpop.eup %7485 }
 0x3e1   : > { %v10292_v40 = vpop.eup %7487 }
 0x3e2   : > { %v3836_v21 = vadd.f32 %v10292_v40, %v10289_v22  ;;  %v10296_v47 = vpop.eup %7489 }
 0x3e3   : > { %v10300_v31 = vpop.eup %7491 }
 0x3e4   : > { %v3837_v60 = vadd.f32 %v10296_v47, %v3836_v21  ;;  %v12967_v21 = vld [vmem:[#allocation161_spill] sm:$0xff] }
 0x3e5   : > { %v2378_v14 = vsub.f32 %v12967_v21, %v12938_v57  ;;  %v4225_v21 = vld [vmem:[#allocation4 + $0x168] sm:$0xff] }
 0x3e6   : > { %v10303_v43 = vadd.f32 %v10300_v31, %v3837_v60 }
 0x3e7   : > { %v2457_v58 = vmul.f32 1.442695, %v2378_v14 }
 0x3e8   : > { %12966 = vst [vmem:[#allocation39_spill] sm:$0xff] %v10303_v43  ;;  %v7494_v41 = vpop.eup %7493  ;;  %2252 = vmax.xlane.f32.xlu0 %v2251_v61 }
 0x3e9   : > { %v7496_v55 = vpop.eup %7495  ;;  %v4688_v19 = vpack.c.bf16 %v10221_v29, %v7494_v41  ;;  %v2235_v29 = vmax.f32 %v2234_v8, %v9997_v4  ;;  %7501 = vpow2.f32 %v2457_v58  ;;  %v12970_v8 = vld [vmem:[#allocation173_spill] sm:$0xff] }
 0x3ea   : > { %v7498_v50 = vpop.eup %7497  ;;  %v4689_v56 = vpack.c.bf16 %v10224_v27, %v7496_v55  ;;  %v3821_v44 = vadd.f32 %v7496_v55, %v7494_v41  ;;  %v12968_v41 = vld [vmem:[#allocation154_spill] sm:$0xff]  ;;  %v10319_v55 = vpop.permute.xlu0 %4331 }
 0x3eb   : > { %v7500_v53 = vpop.eup %7499  ;;  %v4690_v6 = vpack.c.bf16 %v10228_v0, %v7498_v50  ;;  %v2236_v27 = vmax.f32 %v2235_v29, %v10001_v42  ;;  %v2375_v0 = vsub.f32 %v12968_v41, %v12942_v11 }
 0x3ec   : > { %5124 = vmatprep.mubr.bf16.mxu0 %v4689_v56  ;;  %v4691_v60 = vpack.c.bf16 %v10232_v25, %v7500_v53  ;;  %v3822_v61 = vadd.f32 %v7498_v50, %v3821_v44  ;;  %v10321_v25 = vld [vmem:[#allocation2 + $0x190] sm:$0xff] }
 0x3ed   : > { %5125 = vmatmul.mubr.bf16.gmra.mxu0 %v4688_v19  ;;  %v2451_v57 = vmul.f32 1.442695, %v2375_v0  ;;  %12969 = vst [vmem:[#allocation41_spill] sm:$0xff] %v10321_v25  ;;  %v4224_v19 = vld [vmem:[#allocation4 + $0x50] sm:$0xff]  ;;  %v4609_v0 = vmul.f32 %v10179_v17, %v4225_v21  ;;  %v10344_v21 = vld [vmem:[#allocation2 + $0x178] sm:$0xff] }
 0x3ee   : > { %5413 = vmatprep.mubr.bf16.mxu1 %v4691_v60  ;;  %v10314_v35 = vadd.f32 %v7500_v53, %v3822_v61  ;;  %v4608_v11 = vmul.f32 %v10267_v2, %v4224_v19  ;;  %v10335_v2 = vpop.permute.xlu1 %4316 }
 0x3ef   : > { %5414 = vmatmul.mubr.bf16.gmra.mxu1 %v4690_v6  ;;  %7503 = vpow2.f32 %v2451_v57 }
 0x3f4   : > { %2237 = vmax.xlane.f32.xlu1 %v2236_v27 }
 0x3f6   : > { %v10327_v6 = vpop.eup %7501 }
 0x3f7   : > { %12972 = vst [vmem:[#allocation28_spill] sm:$0xff] %v10327_v6 }
 0x3fe   : > { %v5102_v50 = vpop.f32.mrf.mxu0  ;;  %2652 = vperm.xlu0 %7273, %v12970_v8  }
 0x3ff   : > { %v2233_v56 = vpop.xlane.xlu0 %2232 }
 0x400   : > { %v5391_v44 = vpop.f32.mrf.mxu1  ;;  %v5104_v14 = vpop.f32.mrf.mxu0  ;;  %v10325_v53 = vmax.f32 %v10321_v25, %v2233_v56  ;;  %v12973_v56 = vld [vmem:[#allocation164_spill] sm:$0xff] }
 0x401   : > { %v5392_v58 = vadd.f32 %v5391_v44, %v5102_v50  ;;  %v10337_v44 = vpop.eup %7503 }
 0x402   : > { %12971 = vst [vmem:[#allocation26_spill] sm:$0xff] %v10325_v53  ;;  %v5393_v60 = vpop.f32.mrf.mxu1  ;;  %v5105_v61 = vpop.f32.mrf.mxu0  ;;  %4361 = vperm.xlu0 %7273, %v10327_v6   ;;  %5808 = vst.msk [vmem:[#allocation2 + $0x190] sm:$0xff] %vm4155_vm2, %v10325_v53  ;;  %v12976_v6 = vld [vmem:[#allocation56_spill] sm:$0xff] }
 0x403   : > { %v5634_v29 = vadd.f32 %v5392_v58, %v4608_v11  ;;  %12974 = vst [vmem:[#allocation27_spill] sm:$0xff] %v10337_v44  ;;  %v12975_v60 = vld [vmem:[#allocation54_spill] sm:$0xff]  ;;  %v12977_v11 = vld [vmem:[#allocation55_spill] sm:$0xff] }
 0x404   : > { %v5394_v27 = vpop.f32.mrf.mxu1  ;;  %v5107_v41 = vpop.f32.mrf.mxu0 }
 0x405   : > { %5698 = vst [vmem:[#allocation4 + $0x50] sm:$0xff] %v5634_v29  ;;  %v5395_v57 = vadd.f32 %v5394_v27, %v5105_v61  ;;  %2637 = vperm.xlu1 %7274, %v12973_v56   ;;  %v12978_v41 = vld [vmem:[#allocation57_spill] sm:$0xff] }
 0x406   : > { %v5396_v14 = vpop.f32.mrf.mxu1 }
 0x407   : > { %v5635_v19 = vadd.f32 %v5395_v57, %v4609_v0  ;;  %v2633_v50 = vpop.permute.xlu0 %2632 }
 0x408   : > { %v2935_v36 = vsub.f32 %v12975_v60, %v2633_v50  ;;  %v2936_v25 = vsub.f32 %v12976_v6, %v2633_v50  ;;  %v2937_v58 = vsub.f32 %v12977_v11, %v2633_v50  ;;  %v2938_v17 = vsub.f32 %v12978_v41, %v2633_v50  ;;  %v12980_v60 = vld [vmem:[#allocation44_spill] sm:$0xff]  ;;  %v12981_v41 = vld [vmem:[#allocation43_spill] sm:$0xff] }
 0x409   : > { %5699 = vst [vmem:[#allocation4 + $0x168] sm:$0xff] %v5635_v19  ;;  %4346 = vperm.xlu1 %7274, %v10337_v44   ;;  %v12979_v19 = vld [vmem:[#allocation42_spill] sm:$0xff] }
 0x40a   : > { %v3251_v61 = vmul.f32 1.442695, %v2935_v36  ;;  %v3253_v29 = vmul.f32 1.442695, %v2936_v25  ;;  %v3255_v27 = vmul.f32 1.442695, %v2937_v58 }
 0x40b   : > { %v2218_v0 = vpop.xlane.xlu1 %2217  ;;  %v3257_v14 = vmul.f32 1.442695, %v2938_v17  ;;  %v12982_v25 = vld [vmem:[#allocation45_spill] sm:$0xff]  ;;  %v2259_v17 = vmax.f32 %v10051_v46, %v10060_v20 }
 0x40c   : > { %7505 = vpow2.f32 %v3251_v61  ;;  %v10347_v57 = vmax.f32 %v10344_v21, %v2218_v0 }
 0x40d   : > { %7507 = vpow2.f32 %v3253_v29 }
 0x40e   : > { %5805 = vst.msk [vmem:[#allocation2 + $0x178] sm:$0xff] %vm4155_vm2, %v10347_v57  ;;  %7509 = vpow2.f32 %v3255_v27  ;;  %v2260_v27 = vmax.f32 %v2259_v17, %v10057_v26 }
 0x40f   : > { %v2618_v6 = vpop.permute.xlu1 %2617  ;;  %7511 = vpow2.f32 %v3257_v14 }
 0x410   : > { %v2923_v50 = vsub.f32 %v12979_v19, %v2618_v6  ;;  %v2924_v11 = vsub.f32 %v12980_v60, %v2618_v6  ;;  %v2925_v36 = vsub.f32 %v12981_v41, %v2618_v6  ;;  %v2926_v58 = vsub.f32 %v12982_v25, %v2618_v6 }
 0x412   : > { %v3227_v61 = vmul.f32 1.442695, %v2923_v50  ;;  %v3229_v59 = vmul.f32 1.442695, %v2924_v11  ;;  %v3231_v0 = vmul.f32 1.442695, %v2925_v36  ;;  %v2261_v50 = vmax.f32 %v2260_v27, %v10067_v16 }
 0x413   : > { %v3233_v42 = vmul.f32 1.442695, %v2926_v58  ;;  %v2244_v58 = vmax.f32 %v10014_v38, %v10019_v5 }
 0x414   : > { %7513 = vpow2.f32 %v3227_v61 }
 0x415   : > { %7515 = vpow2.f32 %v3229_v59 }
 0x416   : > { %7517 = vpow2.f32 %v3231_v0 }
 0x417   : > { %7519 = vpow2.f32 %v3233_v42 }
 0x419   : > { %v10357_v29 = vpop.eup %7505 }
 0x41a   : > { %v10360_v19 = vpop.eup %7507 }
 0x41b   : > { %v3846_v14 = vadd.f32 %v10360_v19, %v10357_v29  ;;  %v10364_v6 = vpop.eup %7509 }
 0x41c   : > { %v10368_v11 = vpop.eup %7511 }
 0x41d   : > { %v3847_v60 = vadd.f32 %v10364_v6, %v3846_v14  ;;  %v12984_v14 = vld [vmem:[#allocation165_spill] sm:$0xff] }
 0x41e   : > { %v2380_v16 = vsub.f32 %v12984_v14, %v12954_v15 }
 0x41f   : > { %v10371_v59 = vadd.f32 %v10368_v11, %v3847_v60 }
 0x420   : > { %v2461_v20 = vmul.f32 1.442695, %v2380_v16 }
 0x421   : > { %12983 = vst [vmem:[#allocation29_spill] sm:$0xff] %v10371_v59  ;;  %v7514_v42 = vpop.eup %7513  ;;  %2262 = vmax.xlane.f32.xlu0 %v2261_v50 }
 0x422   : > { %v7516_v41 = vpop.eup %7515  ;;  %v4692_v36 = vpack.c.bf16 %v10289_v22, %v7514_v42  ;;  %v2245_v22 = vmax.f32 %v2244_v58, %v10017_v12  ;;  %7521 = vpow2.f32 %v2461_v20  ;;  %v12990_v20 = vld [vmem:[#allocation169_spill] sm:$0xff]  ;;  %v4227_v12 = vld [vmem:[#allocation4 + $0x48] sm:$0xff] }
 0x423   : > { %v7518_v25 = vpop.eup %7517  ;;  %v4693_v61 = vpack.c.bf16 %v10292_v40, %v7516_v41  ;;  %v3831_v0 = vadd.f32 %v7516_v41, %v7514_v42  ;;  %v12985_v42 = vld [vmem:[#allocation159_spill] sm:$0xff]  ;;  %v10387_v41 = vpop.permute.xlu0 %4341 }
 0x424   : > { %v7520_v17 = vpop.eup %7519  ;;  %v4694_v27 = vpack.c.bf16 %v10296_v47, %v7518_v25  ;;  %v2246_v40 = vmax.f32 %v2245_v22, %v10023_v52  ;;  %v2377_v47 = vsub.f32 %v12985_v42, %v12956_v45  ;;  %v4226_v45 = vld [vmem:[#allocation4 + $0x130] sm:$0xff]  ;;  %v12994_v42 = vld [vmem:[#allocation63_spill] sm:$0xff] }
 0x425   : > { %5132 = vmatprep.mubr.bf16.mxu0 %v4693_v61  ;;  %v4695_v60 = vpack.c.bf16 %v10300_v31, %v7520_v17  ;;  %v3832_v50 = vadd.f32 %v7518_v25, %v3831_v0  ;;  %v10389_v31 = vld [vmem:[#allocation2 + $0x1a0] sm:$0xff]  ;;  %v10401_v0 = vpop.permute.xlu1 %4326  ;;  %v12993_v22 = vld [vmem:[#allocation64_spill] sm:$0xff]  ;;  %v10411_v52 = vld [vmem:[#allocation2 + $0x188] sm:$0xff] }
 0x426   : > { %5133 = vmatmul.mubr.bf16.gmra.mxu0 %v4692_v36  ;;  %v2455_v15 = vmul.f32 1.442695, %v2377_v47  ;;  %12986 = vst [vmem:[#allocation157_spill] sm:$0xff] %v10389_v31  ;;  %v12987_v36 = vld [vmem:[#allocation181_spill] sm:$0xff]  ;;  %12996 = vst [vmem:[#allocation46_spill] sm:$0xff] %v10411_v52 }
 0x427   : > { %5421 = vmatprep.mubr.bf16.mxu1 %v4695_v60  ;;  %v10382_v26 = vadd.f32 %v7520_v17, %v3832_v50  ;;  %v12992_v60 = vld [vmem:[#allocation62_spill] sm:$0xff] }
 0x428   : > { %5422 = vmatmul.mubr.bf16.gmra.mxu1 %v4694_v27  ;;  %7523 = vpow2.f32 %v2455_v15 }
 0x42d   : > { %2247 = vmax.xlane.f32.xlu1 %v2246_v40 }
 0x42f   : > { %v10395_v16 = vpop.eup %7521 }
 0x430   : > { %12989 = vst [vmem:[#allocation166_spill] sm:$0xff] %v10395_v16 }
 0x435   : > { %v10403_v27 = vpop.eup %7523 }
 0x436   : > { %12991 = vst [vmem:[#allocation160_spill] sm:$0xff] %v10403_v27 }
 0x437   : > { %2662 = vperm.xlu0 %7273, %v12987_v36  }
 0x438   : > { %v2243_v25 = vpop.xlane.xlu0 %2242 }
 0x439   : > { %v10393_v58 = vmax.f32 %v10389_v31, %v2243_v25  ;;  %v4610_v25 = vmul.f32 %v10335_v2, %v4226_v45 }
 0x43b   : > { %12988 = vst [vmem:[#allocation147_spill] sm:$0xff] %v10393_v58  ;;  %4371 = vperm.xlu0 %7273, %v10395_v16   ;;  %5810 = vst.msk [vmem:[#allocation2 + $0x1a0] sm:$0xff] %vm4155_vm2, %v10393_v58  ;;  %v12995_v16 = vld [vmem:[#allocation65_spill] sm:$0xff] }
 0x43e   : > { %2647 = vperm.xlu1 %7274, %v12990_v20  }
 0x43f   : > { %v5110_v61 = vpop.f32.mrf.mxu0 }
 0x440   : > { %v2643_v17 = vpop.permute.xlu0 %2642 }
 0x441   : > { %v5399_v14 = vpop.f32.mrf.mxu1  ;;  %v2943_v50 = vsub.f32 %v12992_v60, %v2643_v17  ;;  %v2944_v40 = vsub.f32 %v12993_v22, %v2643_v17  ;;  %v2945_v47 = vsub.f32 %v12994_v42, %v2643_v17  ;;  %v5112_v15 = vpop.f32.mrf.mxu0  ;;  %v2946_v31 = vsub.f32 %v12995_v16, %v2643_v17 }
 0x442   : > { %v5400_v46 = vadd.f32 %v5399_v14, %v5110_v61  ;;  %4356 = vperm.xlu1 %7274, %v10403_v27   ;;  %v4611_v16 = vmul.f32 %v10251_v54, %v4227_v12  ;;  %v12997_v14 = vld [vmem:[#allocation50_spill] sm:$0xff]  ;;  %v13000_v12 = vld [vmem:[#allocation53_spill] sm:$0xff] }
 0x443   : > { %v5401_v5 = vpop.f32.mrf.mxu1  ;;  %v3267_v38 = vmul.f32 1.442695, %v2943_v50  ;;  %v3269_v59 = vmul.f32 1.442695, %v2944_v40  ;;  %v5113_v4 = vpop.f32.mrf.mxu0  ;;  %v3271_v23 = vmul.f32 1.442695, %v2945_v47 }
 0x444   : > { %v5636_v60 = vadd.f32 %v5400_v46, %v4610_v25  ;;  %v2228_v22 = vpop.xlane.xlu1 %2227  ;;  %v3273_v45 = vmul.f32 1.442695, %v2946_v31  ;;  %v12998_v50 = vld [vmem:[#allocation52_spill] sm:$0xff]  ;;  %v12999_v47 = vld [vmem:[#allocation51_spill] sm:$0xff] }
 0x445   : > { %7525 = vpow2.f32 %v3267_v38  ;;  %v5402_v42 = vpop.f32.mrf.mxu1  ;;  %v10414_v15 = vmax.f32 %v10411_v52, %v2228_v22  ;;  %v5115_v2 = vpop.f32.mrf.mxu0  ;;  %v13215_v52 = vld [vmem:[#allocation125_spill] sm:$0xff] }
 0x446   : > { %5700 = vst [vmem:[#allocation4 + $0x130] sm:$0xff] %v5636_v60  ;;  %7527 = vpow2.f32 %v3269_v59  ;;  %v5403_v61 = vadd.f32 %v5402_v42, %v5113_v4 }
 0x447   : > { %v5404_v17 = vpop.f32.mrf.mxu1  ;;  %5807 = vst.msk [vmem:[#allocation2 + $0x188] sm:$0xff] %vm4155_vm2, %v10414_v15  ;;  %7529 = vpow2.f32 %v3271_v23  ;;  %v2269_v23 = vmax.f32 %v10097_v10, %v10107_v62  ;;  %v13014_v62 = vld [vmem:[#allocation70_spill] sm:$0xff] }
 0x448   : > { %v5637_v5 = vadd.f32 %v5403_v61, %v4611_v16  ;;  %v2628_v46 = vpop.permute.xlu1 %2627  ;;  %7531 = vpow2.f32 %v3273_v45 }
 0x449   : > { %v2931_v38 = vsub.f32 %v12997_v14, %v2628_v46  ;;  %v2932_v40 = vsub.f32 %v12998_v50, %v2628_v46  ;;  %v2933_v25 = vsub.f32 %v12999_v47, %v2628_v46  ;;  %v2934_v54 = vsub.f32 %v13000_v12, %v2628_v46  ;;  %v13002_v47 = vld [vmem:[#allocation293_spill] sm:$0xff] }
 0x44a   : > { %5701 = vst [vmem:[#allocation4 + $0x48] sm:$0xff] %v5637_v5  ;;  %v2270_v42 = vmax.f32 %v2269_v23, %v10102_v32 }
 0x44b   : > { %v3243_v59 = vmul.f32 1.442695, %v2931_v38  ;;  %v3245_v31 = vmul.f32 1.442695, %v2932_v40  ;;  %v3247_v4 = vmul.f32 1.442695, %v2933_v25 }
 0x44c   : > { %v3249_v60 = vmul.f32 1.442695, %v2934_v54  ;;  %v2271_v61 = vmax.f32 %v2270_v42, %v10109_v51  ;;  %v13003_v25 = vld [vmem:[#allocation292_spill] sm:$0xff] }
 0x44d   : > { %7533 = vpow2.f32 %v3243_v59  ;;  %v2254_v12 = vmax.f32 %v13003_v25, %v13002_v47 }
 0x44e   : > { %7535 = vpow2.f32 %v3245_v31 }
 0x44f   : > { %7537 = vpow2.f32 %v3247_v4 }
 0x450   : > { %7539 = vpow2.f32 %v3249_v60  ;;  %v13004_v60 = vld [vmem:[#allocation170_spill] sm:$0xff] }
 0x451   : > { %v2382_v23 = vsub.f32 %v13004_v60, %v12970_v8 }
 0x452   : > { %v10425_v22 = vpop.eup %7525 }
 0x453   : > { %v10428_v2 = vpop.eup %7527  ;;  %v2465_v51 = vmul.f32 1.442695, %v2382_v23 }
 0x454   : > { %v3856_v16 = vadd.f32 %v10428_v2, %v10425_v22  ;;  %v10432_v45 = vpop.eup %7529 }
 0x455   : > { %v10436_v5 = vpop.eup %7531  ;;  %7541 = vpow2.f32 %v2465_v51 }
 0x456   : > { %v3857_v17 = vadd.f32 %v10432_v45, %v3856_v16 }
 0x458   : > { %v10439_v46 = vadd.f32 %v10436_v5, %v3857_v17 }
 0x45a   : > { %13001 = vst [vmem:[#allocation48_spill] sm:$0xff] %v10439_v46  ;;  %v7534_v14 = vpop.eup %7533  ;;  %2272 = vmax.xlane.f32.xlu0 %v2271_v61 }
 0x45b   : > { %v7536_v38 = vpop.eup %7535  ;;  %v4696_v50 = vpack.c.bf16 %v10357_v29, %v7534_v14  ;;  %v13005_v29 = vld [vmem:[#allocation138_spill] sm:$0xff] }
 0x45c   : > { %v7538_v40 = vpop.eup %7537  ;;  %v4697_v54 = vpack.c.bf16 %v10360_v19, %v7536_v38  ;;  %v3841_v59 = vadd.f32 %v7536_v38, %v7534_v14  ;;  %v2255_v61 = vmax.f32 %v2254_v12, %v13005_v29  ;;  %v13006_v19 = vld [vmem:[#allocation294_spill] sm:$0xff]  ;;  %v13007_v38 = vld [vmem:[#allocation163_spill] sm:$0xff] }
 0x45d   : > { %v7540_v31 = vpop.eup %7539  ;;  %v4698_v4 = vpack.c.bf16 %v10364_v6, %v7538_v40  ;;  %v2379_v6 = vsub.f32 %v13007_v38, %v12973_v56  ;;  %v10470_v38 = vpop.permute.xlu1 %4336 }
 0x45e   : > { %5140 = vmatprep.mubr.bf16.mxu0 %v4697_v54  ;;  %v4699_v42 = vpack.c.bf16 %v10368_v11, %v7540_v31  ;;  %v3842_v16 = vadd.f32 %v7538_v40, %v3841_v59  ;;  %v2256_v14 = vmax.f32 %v2255_v61, %v13006_v19  ;;  %v10455_v54 = vpop.permute.xlu0 %4351  ;;  %v10457_v11 = vld [vmem:[#allocation2 + $0x1b0] sm:$0xff] }
 0x45f   : > { %5141 = vmatmul.mubr.bf16.gmra.mxu0 %v4696_v50  ;;  %v2459_v8 = vmul.f32 1.442695, %v2379_v6  ;;  %13008 = vst [vmem:[#allocation47_spill] sm:$0xff] %v10457_v11  ;;  %v13009_v50 = vld [vmem:[#allocation189_spill] sm:$0xff] }
 0x460   : > { %5429 = vmatprep.mubr.bf16.mxu1 %v4699_v42  ;;  %v10450_v17 = vadd.f32 %v7540_v31, %v3842_v16  ;;  %v4228_v31 = vld [vmem:[#allocation4 + $0x180] sm:$0xff]  ;;  %v13012_v42 = vld [vmem:[#allocation177_spill] sm:$0xff]  ;;  %v4229_v16 = vld [vmem:[#allocation4 + $0x110] sm:$0xff] }
 0x461   : > { %5430 = vmatmul.mubr.bf16.gmra.mxu1 %v4698_v4  ;;  %7543 = vpow2.f32 %v2459_v8  ;;  %v4612_v60 = vmul.f32 %v10401_v0, %v4228_v31  ;;  %v4613_v31 = vmul.f32 %v10319_v55, %v4229_v16  ;;  %v13019_v16 = vld [vmem:[#allocation58_spill] sm:$0xff] }
 0x462   : > { %v10463_v59 = vpop.eup %7541 }
 0x463   : > { %13011 = vst [vmem:[#allocation34_spill] sm:$0xff] %v10463_v59 }
 0x466   : > { %2257 = vmax.xlane.f32.xlu1 %v2256_v14 }
 0x470   : > { %2672 = vperm.xlu0 %7273, %v13009_v50  }
 0x471   : > { %v2253_v40 = vpop.xlane.xlu0 %2252 }
 0x472   : > { %v10461_v12 = vmax.f32 %v10457_v11, %v2253_v40  ;;  %v10472_v40 = vpop.eup %7543 }
 0x473   : > { %13013 = vst [vmem:[#allocation36_spill] sm:$0xff] %v10472_v40 }
 0x474   : > { %13010 = vst [vmem:[#allocation49_spill] sm:$0xff] %v10461_v12  ;;  %v5118_v4 = vpop.f32.mrf.mxu0  ;;  %4381 = vperm.xlu0 %7273, %v10463_v59   ;;  %5812 = vst.msk [vmem:[#allocation2 + $0x1b0] sm:$0xff] %vm4155_vm2, %v10461_v12  ;;  %v13015_v59 = vld [vmem:[#allocation72_spill] sm:$0xff] }
 0x476   : > { %v5407_v51 = vpop.f32.mrf.mxu1  ;;  %v5120_v56 = vpop.f32.mrf.mxu0 }
 0x477   : > { %v5408_v23 = vadd.f32 %v5407_v51, %v5118_v4  ;;  %2657 = vperm.xlu1 %7274, %v13012_v42   ;;  %v13016_v56 = vld [vmem:[#allocation71_spill] sm:$0xff]  ;;  %v13017_v51 = vld [vmem:[#allocation73_spill] sm:$0xff] }
 0x478   : > { %v5409_v61 = vpop.f32.mrf.mxu1  ;;  %v5121_v14 = vpop.f32.mrf.mxu0 }
 0x479   : > { %v5638_v6 = vadd.f32 %v5408_v23, %v4612_v60  ;;  %v2653_v8 = vpop.permute.xlu0 %2652  ;;  %v10480_v60 = vld [vmem:[#allocation2 + $0x198] sm:$0xff] }
 0x47a   : > { %v5410_v32 = vpop.f32.mrf.mxu1  ;;  %v2951_v10 = vsub.f32 %v13014_v62, %v2653_v8  ;;  %v2952_v11 = vsub.f32 %v13015_v59, %v2653_v8  ;;  %v2953_v19 = vsub.f32 %v13016_v56, %v2653_v8  ;;  %v5123_v0 = vpop.f32.mrf.mxu0  ;;  %v2954_v61 = vsub.f32 %v13017_v51, %v2653_v8  ;;  %13018 = vst [vmem:[#allocation35_spill] sm:$0xff] %v10480_v60 }
 0x47b   : > { %5702 = vst [vmem:[#allocation4 + $0x180] sm:$0xff] %v5638_v6  ;;  %v5411_v4 = vadd.f32 %v5410_v32, %v5121_v14  ;;  %4366 = vperm.xlu1 %7274, %v10472_v40   ;;  %v13020_v6 = vld [vmem:[#allocation60_spill] sm:$0xff] }
 0x47c   : > { %v5412_v23 = vpop.f32.mrf.mxu1  ;;  %v3283_v29 = vmul.f32 1.442695, %v2951_v10  ;;  %v3285_v47 = vmul.f32 1.442695, %v2952_v11  ;;  %v3287_v62 = vmul.f32 1.442695, %v2953_v19 }
 0x47d   : > { %v5639_v25 = vadd.f32 %v5411_v4, %v4613_v31  ;;  %v2238_v46 = vpop.xlane.xlu1 %2237  ;;  %v3289_v55 = vmul.f32 1.442695, %v2954_v61  ;;  %v13021_v11 = vld [vmem:[#allocation59_spill] sm:$0xff]  ;;  %v13022_v19 = vld [vmem:[#allocation61_spill] sm:$0xff]  ;;  %v13024_v31 = vld [vmem:[#allocation24_spill] sm:$0xff] }
 0x47e   : > { %7545 = vpow2.f32 %v3283_v29  ;;  %v10483_v59 = vmax.f32 %v10480_v60, %v2238_v46  ;;  %v13025_v61 = vld [vmem:[#allocation23_spill] sm:$0xff] }
 0x47f   : > { %5703 = vst [vmem:[#allocation4 + $0x110] sm:$0xff] %v5639_v25  ;;  %7547 = vpow2.f32 %v3285_v47  ;;  %v13023_v47 = vld [vmem:[#allocation25_spill] sm:$0xff] }
 0x480   : > { %5809 = vst.msk [vmem:[#allocation2 + $0x198] sm:$0xff] %vm4155_vm2, %v10483_v59  ;;  %7549 = vpow2.f32 %v3287_v62  ;;  %v2279_v4 = vmax.f32 %v13024_v31, %v13023_v47  ;;  %v13031_v31 = vld [vmem:[#allocation302_spill] sm:$0xff] }
 0x481   : > { %v2638_v32 = vpop.permute.xlu1 %2637  ;;  %7551 = vpow2.f32 %v3289_v55 }
 0x482   : > { %v2939_v14 = vsub.f32 %v13019_v16, %v2638_v32  ;;  %v2940_v10 = vsub.f32 %v13020_v6, %v2638_v32  ;;  %v2941_v8 = vsub.f32 %v13021_v11, %v2638_v32  ;;  %v2942_v29 = vsub.f32 %v13022_v19, %v2638_v32  ;;  %v13026_v16 = vld [vmem:[#allocation307_spill] sm:$0xff] }
 0x483   : > { %v2280_v23 = vmax.f32 %v2279_v4, %v13025_v61 }
 0x484   : > { %v3259_v56 = vmul.f32 1.442695, %v2939_v14  ;;  %v3261_v46 = vmul.f32 1.442695, %v2940_v10  ;;  %v3263_v0 = vmul.f32 1.442695, %v2941_v8 }
 0x485   : > { %v3265_v25 = vmul.f32 1.442695, %v2942_v29  ;;  %v2281_v14 = vmax.f32 %v2280_v23, %v13026_v16  ;;  %v13030_v16 = vld [vmem:[#allocation178_spill] sm:$0xff] }
 0x486   : > { %7553 = vpow2.f32 %v3259_v56  ;;  %v2384_v47 = vsub.f32 %v13030_v16, %v12987_v36  ;;  %v10523_v16 = vpop.permute.xlu0 %4361 }
 0x487   : > { %7555 = vpow2.f32 %v3261_v46  ;;  %v13028_v46 = vld [vmem:[#allocation303_spill] sm:$0xff] }
 0x488   : > { %7557 = vpow2.f32 %v3263_v0  ;;  %v13029_v0 = vld [vmem:[#allocation301_spill] sm:$0xff] }
 0x489   : > { %7559 = vpow2.f32 %v3265_v25  ;;  %v2264_v25 = vmax.f32 %v13029_v0, %v13028_v46  ;;  %v2469_v46 = vmul.f32 1.442695, %v2384_v47 }
 0x48b   : > { %v10493_v51 = vpop.eup %7545  ;;  %7561 = vpow2.f32 %v2469_v46 }
 0x48c   : > { %v10496_v62 = vpop.eup %7547 }
 0x48d   : > { %v3866_v55 = vadd.f32 %v10496_v62, %v10493_v51  ;;  %v10500_v32 = vpop.eup %7549 }
 0x48e   : > { %v10504_v10 = vpop.eup %7551 }
 0x48f   : > { %v3867_v6 = vadd.f32 %v10500_v32, %v3866_v55 }
 0x491   : > { %v10507_v11 = vadd.f32 %v10504_v10, %v3867_v6 }
 0x493   : > { %13027 = vst [vmem:[#allocation37_spill] sm:$0xff] %v10507_v11  ;;  %v7554_v8 = vpop.eup %7553  ;;  %2282 = vmax.xlane.f32.xlu0 %v2281_v14 }
 0x494   : > { %v7556_v19 = vpop.eup %7555  ;;  %v4700_v29 = vpack.c.bf16 %v10425_v22, %v7554_v8  ;;  %v2265_v22 = vmax.f32 %v2264_v25, %v13031_v31  ;;  %v4230_v25 = vld [vmem:[#allocation4 + $0x118] sm:$0xff]  ;;  %v13042_v31 = vld [vmem:[#allocation80_spill] sm:$0xff] }
 0x495   : > { %v7558_v56 = vpop.eup %7557  ;;  %v4701_v4 = vpack.c.bf16 %v10428_v2, %v7556_v19  ;;  %v3851_v61 = vadd.f32 %v7556_v19, %v7554_v8  ;;  %v13033_v2 = vld [vmem:[#allocation30_spill] sm:$0xff]  ;;  %v13034_v19 = vld [vmem:[#allocation167_spill] sm:$0xff] }
 0x496   : > { %v7560_v23 = vpop.eup %7559  ;;  %v4702_v55 = vpack.c.bf16 %v10432_v45, %v7558_v56  ;;  %v2266_v8 = vmax.f32 %v2265_v22, %v13033_v2  ;;  %v2381_v45 = vsub.f32 %v13034_v19, %v12990_v20  ;;  %v10538_v19 = vpop.permute.xlu1 %4346 }
 0x497   : > { %5148 = vmatprep.mubr.bf16.mxu0 %v4701_v4  ;;  %v4703_v6 = vpack.c.bf16 %v10436_v5, %v7560_v23  ;;  %v3852_v14 = vadd.f32 %v7558_v56, %v3851_v61  ;;  %v10525_v5 = vld [vmem:[#allocation2 + $0x1c0] sm:$0xff]  ;;  %v13036_v61 = vld [vmem:[#allocation197_spill] sm:$0xff] }
 0x498   : > { %5149 = vmatmul.mubr.bf16.gmra.mxu0 %v4700_v29  ;;  %v2463_v36 = vmul.f32 1.442695, %v2381_v45  ;;  %13035 = vst [vmem:[#allocation154_spill] sm:$0xff] %v10525_v5  ;;  %v10531_v47 = vpop.eup %7561 }
 0x499   : > { %5437 = vmatprep.mubr.bf16.mxu1 %v4703_v6  ;;  %v10518_v11 = vadd.f32 %v7560_v23, %v3852_v14  ;;  %13038 = vst [vmem:[#allocation164_spill] sm:$0xff] %v10531_v47  ;;  %v4614_v23 = vmul.f32 %v10470_v38, %v4230_v25  ;;  %v13039_v6 = vld [vmem:[#allocation185_spill] sm:$0xff] }
 0x49a   : > { %5438 = vmatmul.mubr.bf16.gmra.mxu1 %v4702_v55  ;;  %7563 = vpow2.f32 %v2463_v36  ;;  %v4231_v14 = vld [vmem:[#allocation4 + $0x98] sm:$0xff] }
 0x49b   : > { %13032 = vst [vmem:[#allocation161_spill] sm:$0xff] %v10518_v11  ;;  %v4615_v25 = vmul.f32 %v10387_v41, %v4231_v14  ;;  %v13047_v14 = vld [vmem:[#allocation66_spill] sm:$0xff]  ;;  %v13214_v11 = vld [vmem:[#allocation123_spill] sm:$0xff] }
 0x49f   : > { %2267 = vmax.xlane.f32.xlu1 %v2266_v8 }
 0x4a9   : > { %2682 = vperm.xlu0 %7273, %v13036_v61  }
 0x4aa   : > { %v2263_v29 = vpop.xlane.xlu0 %2262 }
 0x4ab   : > { %v10529_v56 = vmax.f32 %v10525_v5, %v2263_v29  ;;  %v10540_v29 = vpop.eup %7563  ;;  %v13041_v5 = vld [vmem:[#allocation78_spill] sm:$0xff] }
 0x4ac   : > { %13040 = vst [vmem:[#allocation54_spill] sm:$0xff] %v10540_v29 }
 0x4ad   : > { %13037 = vst [vmem:[#allocation173_spill] sm:$0xff] %v10529_v56  ;;  %v5126_v4 = vpop.f32.mrf.mxu0  ;;  %4391 = vperm.xlu0 %7273, %v10531_v47   ;;  %5814 = vst.msk [vmem:[#allocation2 + $0x1c0] sm:$0xff] %vm4155_vm2, %v10529_v56 }
 0x4af   : > { %v5415_v20 = vpop.f32.mrf.mxu1  ;;  %v5128_v46 = vpop.f32.mrf.mxu0 }
 0x4b0   : > { %v5416_v55 = vadd.f32 %v5415_v20, %v5126_v4  ;;  %2667 = vperm.xlu1 %7274, %v13039_v6   ;;  %v13043_v46 = vld [vmem:[#allocation79_spill] sm:$0xff]  ;;  %v13044_v20 = vld [vmem:[#allocation81_spill] sm:$0xff] }
 0x4b1   : > { %v5417_v22 = vpop.f32.mrf.mxu1  ;;  %v5129_v8 = vpop.f32.mrf.mxu0 }
 0x4b2   : > { %v5640_v45 = vadd.f32 %v5416_v55, %v4614_v23  ;;  %v2663_v36 = vpop.permute.xlu0 %2662  ;;  %v10548_v23 = vld [vmem:[#allocation2 + $0x1a8] sm:$0xff] }
 0x4b3   : > { %v5418_v47 = vpop.f32.mrf.mxu1  ;;  %v2959_v2 = vsub.f32 %v13041_v5, %v2663_v36  ;;  %v2960_v0 = vsub.f32 %v13042_v31, %v2663_v36  ;;  %v2961_v56 = vsub.f32 %v13043_v46, %v2663_v36  ;;  %v5131_v38 = vpop.f32.mrf.mxu0  ;;  %v2962_v22 = vsub.f32 %v13044_v20, %v2663_v36  ;;  %13045 = vst [vmem:[#allocation56_spill] sm:$0xff] %v10548_v23 }
 0x4b4   : > { %5704 = vst [vmem:[#allocation4 + $0x118] sm:$0xff] %v5640_v45  ;;  %v5419_v4 = vadd.f32 %v5418_v47, %v5129_v8  ;;  %4376 = vperm.xlu1 %7274, %v10540_v29   ;;  %v13048_v45 = vld [vmem:[#allocation68_spill] sm:$0xff] }
 0x4b5   : > { %v5420_v55 = vpop.f32.mrf.mxu1  ;;  %v3299_v40 = vmul.f32 1.442695, %v2959_v2  ;;  %v3301_v12 = vmul.f32 1.442695, %v2960_v0  ;;  %v3303_v5 = vmul.f32 1.442695, %v2961_v56 }
 0x4b6   : > { %v5641_v27 = vadd.f32 %v5419_v4, %v4615_v25  ;;  %v2248_v60 = vpop.xlane.xlu1 %2247  ;;  %v3305_v41 = vmul.f32 1.442695, %v2962_v22  ;;  %v13049_v0 = vld [vmem:[#allocation67_spill] sm:$0xff]  ;;  %v13050_v56 = vld [vmem:[#allocation69_spill] sm:$0xff] }
 0x4b7   : > { %7565 = vpow2.f32 %v3299_v40  ;;  %v10551_v31 = vmax.f32 %v10548_v23, %v2248_v60  ;;  %v13051_v4 = vld [vmem:[#allocation141_spill] sm:$0xff] }
 0x4b8   : > { %5705 = vst [vmem:[#allocation4 + $0x98] sm:$0xff] %v5641_v27  ;;  %7567 = vpow2.f32 %v3301_v12  ;;  %v2289_v12 = vmax.f32 %v10165_v7, %v10173_v3 }
 0x4b9   : > { %13046 = vst [vmem:[#allocation55_spill] sm:$0xff] %v10551_v31  ;;  %5811 = vst.msk [vmem:[#allocation2 + $0x1a8] sm:$0xff] %vm4155_vm2, %v10551_v31  ;;  %7569 = vpow2.f32 %v3303_v5 }
 0x4ba   : > { %v2648_v47 = vpop.permute.xlu1 %2647  ;;  %7571 = vpow2.f32 %v3305_v41  ;;  %v2290_v20 = vmax.f32 %v2289_v12, %v13051_v4  ;;  %v13052_v41 = vld [vmem:[#allocation315_spill] sm:$0xff] }
 0x4bb   : > { %v2947_v8 = vsub.f32 %v13047_v14, %v2648_v47  ;;  %v2948_v2 = vsub.f32 %v13048_v45, %v2648_v47  ;;  %v2949_v36 = vsub.f32 %v13049_v0, %v2648_v47  ;;  %v2950_v40 = vsub.f32 %v13050_v56, %v2648_v47  ;;  %v13057_v4 = vld [vmem:[#allocation19_spill] sm:$0xff] }
 0x4bc   : > { %v2291_v47 = vmax.f32 %v2290_v20, %v13052_v41 }
 0x4bd   : > { %v3275_v46 = vmul.f32 1.442695, %v2947_v8  ;;  %v3277_v60 = vmul.f32 1.442695, %v2948_v2  ;;  %v3279_v38 = vmul.f32 1.442695, %v2949_v36 }
 0x4be   : > { %v3281_v27 = vmul.f32 1.442695, %v2950_v40  ;;  %v13054_v40 = vld [vmem:[#allocation21_spill] sm:$0xff] }
 0x4bf   : > { %7573 = vpow2.f32 %v3275_v46  ;;  %v13055_v46 = vld [vmem:[#allocation20_spill] sm:$0xff] }
 0x4c0   : > { %7575 = vpow2.f32 %v3277_v60  ;;  %v2274_v60 = vmax.f32 %v13055_v46, %v13054_v40 }
 0x4c1   : > { %7577 = vpow2.f32 %v3279_v38 }
 0x4c2   : > { %7579 = vpow2.f32 %v3281_v27 }
 0x4c4   : > { %v10561_v25 = vpop.eup %7565 }
 0x4c5   : > { %v10564_v22 = vpop.eup %7567 }
 0x4c6   : > { %v3876_v55 = vadd.f32 %v10564_v22, %v10561_v25  ;;  %v10568_v5 = vpop.eup %7569 }
 0x4c7   : > { %v10572_v8 = vpop.eup %7571 }
 0x4c8   : > { %v3877_v14 = vadd.f32 %v10568_v5, %v3876_v55  ;;  %v13056_v55 = vld [vmem:[#allocation186_spill] sm:$0xff] }
 0x4c9   : > { %v2386_v41 = vsub.f32 %v13056_v55, %v13009_v50  ;;  %v13061_v50 = vld [vmem:[#allocation194_spill] sm:$0xff] }
 0x4ca   : > { %v10575_v45 = vadd.f32 %v10572_v8, %v3877_v14  ;;  %v4232_v55 = vld [vmem:[#allocation4 + $0x120] sm:$0xff] }
 0x4cb   : > { %v2473_v7 = vmul.f32 1.442695, %v2386_v41  ;;  %v10597_v41 = vld [vmem:[#allocation2 + $0x1d0] sm:$0xff] }
 0x4cc   : > { %13053 = vst [vmem:[#allocation57_spill] sm:$0xff] %v10575_v45  ;;  %v7574_v2 = vpop.eup %7573  ;;  %2292 = vmax.xlane.f32.xlu0 %v2291_v47  ;;  %13064 = vst [vmem:[#allocation44_spill] sm:$0xff] %v10597_v41 }
 0x4cd   : > { %v7576_v0 = vpop.eup %7575  ;;  %v4704_v36 = vpack.c.bf16 %v10493_v51, %v7574_v2  ;;  %v2275_v51 = vmax.f32 %v2274_v60, %v13057_v4  ;;  %7581 = vpow2.f32 %v2473_v7  ;;  %v13062_v60 = vld [vmem:[#allocation203_spill] sm:$0xff]  ;;  %v13072_v4 = vld [vmem:[#allocation88_spill] sm:$0xff] }
 0x4ce   : > { %v7578_v56 = vpop.eup %7577  ;;  %v4705_v38 = vpack.c.bf16 %v10496_v62, %v7576_v0  ;;  %v3861_v27 = vadd.f32 %v7576_v0, %v7574_v2  ;;  %v13059_v62 = vld [vmem:[#allocation22_spill] sm:$0xff] }
 0x4cf   : > { %v7580_v12 = vpop.eup %7579  ;;  %v4706_v20 = vpack.c.bf16 %v10500_v32, %v7578_v56  ;;  %v2276_v2 = vmax.f32 %v2275_v51, %v13059_v62  ;;  %v13060_v0 = vld [vmem:[#allocation174_spill] sm:$0xff] }
 0x4d0   : > { %5156 = vmatprep.mubr.bf16.mxu0 %v4705_v38  ;;  %v4707_v14 = vpack.c.bf16 %v10504_v10, %v7580_v12  ;;  %v3862_v47 = vadd.f32 %v7578_v56, %v3861_v27  ;;  %v2383_v32 = vsub.f32 %v13060_v0, %v13012_v42  ;;  %v2388_v38 = vsub.f32 %v13061_v50, %v13036_v61  ;;  %v13063_v27 = vld [vmem:[#allocation201_spill] sm:$0xff]  ;;  %v13068_v51 = vld [vmem:[#allocation206_spill] sm:$0xff] }
 0x4d1   : > { %5157 = vmatmul.mubr.bf16.gmra.mxu0 %v4704_v36  ;;  %v10593_v36 = vpop.permute.xlu0 %4371  ;;  %v4616_v50 = vmul.f32 %v10538_v19, %v4232_v55  ;;  %v13073_v55 = vld [vmem:[#allocation87_spill] sm:$0xff] }
 0x4d2   : > { %5445 = vmatprep.mubr.bf16.mxu1 %v4707_v14  ;;  %v10586_v3 = vadd.f32 %v7580_v12, %v3862_v47  ;;  %v2467_v10 = vmul.f32 1.442695, %v2383_v32  ;;  %v2477_v56 = vmul.f32 1.442695, %v2388_v38  ;;  %v2390_v12 = vsub.f32 %v13063_v27, %v13062_v60  ;;  %v13067_v47 = vld [vmem:[#allocation207_spill] sm:$0xff] }
 0x4d3   : > { %5446 = vmatmul.mubr.bf16.gmra.mxu1 %v4706_v20 }
 0x4d4   : > { %13058 = vst [vmem:[#allocation42_spill] sm:$0xff] %v10586_v3  ;;  %7583 = vpow2.f32 %v2467_v10  ;;  %v2481_v42 = vmul.f32 1.442695, %v2390_v12  ;;  %v13069_v10 = vld [vmem:[#allocation193_spill] sm:$0xff] }
 0x4d5   : > { %7585 = vpow2.f32 %v2477_v56  ;;  %v4233_v56 = vld [vmem:[#allocation4 + $0x150] sm:$0xff] }
 0x4d6   : > { %7587 = vpow2.f32 %v2481_v42 }
 0x4d8   : > { %2277 = vmax.xlane.f32.xlu1 %v2276_v2  ;;  %v2392_v2 = vsub.f32 %v13068_v51, %v13067_v47  ;;  %v13071_v51 = vld [vmem:[#allocation86_spill] sm:$0xff] }
 0x4da   : > { %v10603_v61 = vpop.eup %7581  ;;  %v2485_v12 = vmul.f32 1.442695, %v2392_v2  ;;  %v13075_v2 = vld [vmem:[#allocation89_spill] sm:$0xff] }
 0x4db   : > { %13066 = vst [vmem:[#allocation45_spill] sm:$0xff] %v10603_v61 }
 0x4dc   : > { %7589 = vpow2.f32 %v2485_v12  ;;  %v13080_v12 = vld [vmem:[#allocation74_spill] sm:$0xff] }
 0x4e1   : > { %v10615_v62 = vpop.eup %7583 }
 0x4e2   : > { %2692 = vperm.xlu0 %7273, %v13062_v60   ;;  %13070 = vst [vmem:[#allocation165_spill] sm:$0xff] %v10615_v62  ;;  %v10620_v40 = vpop.eup %7585 }
 0x4e3   : > { %v2273_v20 = vpop.xlane.xlu0 %2272  ;;  %13074 = vst [vmem:[#allocation159_spill] sm:$0xff] %v10620_v40 }
 0x4e4   : > { %v10601_v7 = vmax.f32 %v10597_v41, %v2273_v20  ;;  %v10613_v20 = vpop.permute.xlu1 %4356 }
 0x4e6   : > { %13065 = vst [vmem:[#allocation43_spill] sm:$0xff] %v10601_v7  ;;  %v5134_v14 = vpop.f32.mrf.mxu0  ;;  %4401 = vperm.xlu0 %7273, %v10603_v61   ;;  %5816 = vst.msk [vmem:[#allocation2 + $0x1d0] sm:$0xff] %vm4155_vm2, %v10601_v7 }
 0x4e8   : > { %v5423_v0 = vpop.f32.mrf.mxu1  ;;  %v5136_v32 = vpop.f32.mrf.mxu0 }
 0x4e9   : > { %v5424_v38 = vadd.f32 %v5423_v0, %v5134_v14  ;;  %2677 = vperm.xlu1 %7274, %v13069_v10  }
 0x4ea   : > { %v5425_v60 = vpop.f32.mrf.mxu1  ;;  %v5137_v27 = vpop.f32.mrf.mxu0  ;;  %2702 = vperm.xlu0 %7273, %v13067_v47  }
 0x4eb   : > { %v5642_v61 = vadd.f32 %v5424_v38, %v4616_v50  ;;  %v2673_v41 = vpop.permute.xlu0 %2672  ;;  %v4617_v60 = vmul.f32 %v10455_v54, %v4233_v56  ;;  %v10625_v50 = vld [vmem:[#allocation2 + $0x1b8] sm:$0xff] }
 0x4ec   : > { %v5426_v42 = vpop.f32.mrf.mxu1  ;;  %v2967_v32 = vsub.f32 %v13071_v51, %v2673_v41  ;;  %v2968_v19 = vsub.f32 %v13072_v4, %v2673_v41  ;;  %v2969_v14 = vsub.f32 %v13073_v55, %v2673_v41  ;;  %v5139_v0 = vpop.f32.mrf.mxu0  ;;  %v2970_v46 = vsub.f32 %v13075_v2, %v2673_v41  ;;  %13076 = vst [vmem:[#allocation181_spill] sm:$0xff] %v10625_v50  ;;  %v13077_v4 = vld [vmem:[#allocation211_spill] sm:$0xff]  ;;  %v13078_v55 = vld [vmem:[#allocation210_spill] sm:$0xff] }
 0x4ed   : > { %5706 = vst [vmem:[#allocation4 + $0x120] sm:$0xff] %v5642_v61  ;;  %v5427_v47 = vadd.f32 %v5426_v42, %v5137_v27  ;;  %4386 = vperm.xlu1 %7274, %v10615_v62   ;;  %v2394_v0 = vsub.f32 %v13078_v55, %v13077_v4 }
 0x4ee   : > { %v5428_v38 = vpop.f32.mrf.mxu1  ;;  %v3315_v45 = vmul.f32 1.442695, %v2967_v32  ;;  %v3317_v51 = vmul.f32 1.442695, %v2968_v19  ;;  %4411 = vperm.xlu0 %7273, %v10620_v40   ;;  %v3319_v29 = vmul.f32 1.442695, %v2969_v14 }
 0x4ef   : > { %v5643_v7 = vadd.f32 %v5427_v47, %v4617_v60  ;;  %v2258_v54 = vpop.xlane.xlu1 %2257  ;;  %v3321_v41 = vmul.f32 1.442695, %v2970_v46  ;;  %v2489_v56 = vmul.f32 1.442695, %v2394_v0  ;;  %v13081_v32 = vld [vmem:[#allocation76_spill] sm:$0xff]  ;;  %v13082_v14 = vld [vmem:[#allocation75_spill] sm:$0xff]  ;;  %v10639_v60 = vpop.eup %7587 }
 0x4f0   : > { %7591 = vpow2.f32 %v3315_v45  ;;  %v10631_v61 = vmax.f32 %v10625_v50, %v2258_v54  ;;  %13083 = vst [vmem:[#allocation62_spill] sm:$0xff] %v10639_v60  ;;  %v10646_v0 = vpop.eup %7589 }
 0x4f1   : > { %5707 = vst [vmem:[#allocation4 + $0x150] sm:$0xff] %v5643_v7  ;;  %7593 = vpow2.f32 %v3317_v51  ;;  %v13084_v7 = vld [vmem:[#allocation77_spill] sm:$0xff]  ;;  %13087 = vst [vmem:[#allocation64_spill] sm:$0xff] %v10646_v0 }
 0x4f2   : > { %13079 = vst [vmem:[#allocation169_spill] sm:$0xff] %v10631_v61  ;;  %5813 = vst.msk [vmem:[#allocation2 + $0x1b8] sm:$0xff] %vm4155_vm2, %v10631_v61  ;;  %2712 = vperm.xlu0 %7273, %v13077_v4   ;;  %7595 = vpow2.f32 %v3319_v29  ;;  %v13085_v29 = vld [vmem:[#allocation215_spill] sm:$0xff]  ;;  %v13086_v4 = vld [vmem:[#allocation214_spill] sm:$0xff] }
 0x4f3   : > { %v2658_v27 = vpop.permute.xlu1 %2657  ;;  %7597 = vpow2.f32 %v3321_v41  ;;  %v2396_v55 = vsub.f32 %v13086_v4, %v13085_v29  ;;  %v13180_v61 = vld [vmem:[#allocation121_spill] sm:$0xff] }
 0x4f4   : > { %v2955_v42 = vsub.f32 %v13080_v12, %v2658_v27  ;;  %v2956_v19 = vsub.f32 %v13081_v32, %v2658_v27  ;;  %v2957_v45 = vsub.f32 %v13082_v14, %v2658_v27  ;;  %v2958_v47 = vsub.f32 %v13084_v7, %v2658_v27 }
 0x4f5   : > { %7599 = vpow2.f32 %v2489_v56  ;;  %v2493_v54 = vmul.f32 1.442695, %v2396_v55 }
 0x4f6   : > { %v3291_v46 = vmul.f32 1.442695, %v2955_v42  ;;  %v3293_v2 = vmul.f32 1.442695, %v2956_v19  ;;  %v3295_v38 = vmul.f32 1.442695, %v2957_v45  ;;  %4421 = vperm.xlu0 %7273, %v10639_v60  }
 0x4f7   : > { %v3297_v51 = vmul.f32 1.442695, %v2958_v47  ;;  %v13088_v19 = vld [vmem:[#allocation222_spill] sm:$0xff] }
 0x4f8   : > { %7601 = vpow2.f32 %v3291_v46  ;;  %v13093_v60 = vld [vmem:[#allocation238_spill] sm:$0xff] }
 0x4f9   : > { %7603 = vpow2.f32 %v3293_v2 }
 0x4fa   : > { %7605 = vpow2.f32 %v3295_v38  ;;  %2722 = vperm.xlu0 %7273, %v13085_v29   ;;  %v13091_v38 = vld [vmem:[#allocation310_spill] sm:$0xff] }
 0x4fb   : > { %7607 = vpow2.f32 %v3297_v51  ;;  %v13092_v51 = vld [vmem:[#allocation308_spill] sm:$0xff] }
 0x4fc   : > { %7609 = vpow2.f32 %v2493_v54  ;;  %v2284_v29 = vmax.f32 %v13092_v51, %v13091_v38 }
 0x4fd   : > { %v10648_v41 = vpop.eup %7591 }
 0x4fe   : > { %v10650_v27 = vpop.eup %7593  ;;  %4431 = vperm.xlu0 %7273, %v10646_v0  }
 0x4ff   : > { %v3886_v56 = vadd.f32 %v10650_v27, %v10648_v41  ;;  %v10655_v12 = vpop.eup %7595 }
 0x500   : > { %v10658_v32 = vpop.eup %7597 }
 0x501   : > { %v3887_v42 = vadd.f32 %v10655_v12, %v3886_v56 }
 0x502   : > { %2732 = vperm.xlu0 %7273, %v13088_v19   ;;  %v10664_v45 = vpop.eup %7599 }
 0x503   : > { %v10662_v14 = vadd.f32 %v10658_v32, %v3887_v42  ;;  %13090 = vst [vmem:[#allocation65_spill] sm:$0xff] %v10664_v45 }
 0x505   : > { %13089 = vst [vmem:[#allocation63_spill] sm:$0xff] %v10662_v14  ;;  %v7602_v7 = vpop.eup %7601  ;;  %v13104_v14 = vld [vmem:[#allocation96_spill] sm:$0xff] }
 0x506   : > { %v7604_v47 = vpop.eup %7603  ;;  %4441 = vperm.xlu0 %7273, %v10664_v45   ;;  %v4708_v46 = vpack.c.bf16 %v10561_v25, %v7602_v7  ;;  %v13094_v45 = vld [vmem:[#allocation151_spill] sm:$0xff] }
 0x507   : > { %v7606_v2 = vpop.eup %7605  ;;  %v4709_v4 = vpack.c.bf16 %v10564_v22, %v7604_v47  ;;  %v3871_v55 = vadd.f32 %v7604_v47, %v7602_v7  ;;  %v2285_v40 = vmax.f32 %v2284_v29, %v13094_v45  ;;  %v13097_v22 = vld [vmem:[#allocation311_spill] sm:$0xff]  ;;  %v13103_v45 = vld [vmem:[#allocation94_spill] sm:$0xff] }
 0x508   : > { %v7608_v54 = vpop.eup %7607  ;;  %v4710_v56 = vpack.c.bf16 %v10568_v5, %v7606_v2  ;;  %v13098_v5 = vld [vmem:[#allocation182_spill] sm:$0xff] }
 0x509   : > { %5164 = vmatprep.mubr.bf16.mxu0 %v4709_v4  ;;  %v4711_v42 = vpack.c.bf16 %v10572_v8, %v7608_v54  ;;  %v3872_v0 = vadd.f32 %v7606_v2, %v3871_v55  ;;  %v10677_v38 = vpop.eup %7609  ;;  %v2286_v7 = vmax.f32 %v2285_v40, %v13097_v22  ;;  %v2385_v47 = vsub.f32 %v13098_v5, %v13039_v6  ;;  %v10685_v2 = vld [vmem:[#allocation2 + $0x1e0] sm:$0xff]  ;;  %v4234_v4 = vld [vmem:[#allocation4 + $0x108] sm:$0xff] }
 0x50a   : > { %5165 = vmatmul.mubr.bf16.gmra.mxu0 %v4708_v46  ;;  %2742 = vperm.xlu0 %7273, %v13093_v60   ;;  %13096 = vst [vmem:[#allocation52_spill] sm:$0xff] %v10677_v38  ;;  %v10683_v46 = vpop.permute.xlu0 %4381  ;;  %13099 = vst [vmem:[#allocation51_spill] sm:$0xff] %v10685_v2  ;;  %v4618_v6 = vmul.f32 %v10613_v20, %v4234_v4 }
 0x50b   : > { %5453 = vmatprep.mubr.bf16.mxu1 %v4711_v42  ;;  %v10675_v25 = vadd.f32 %v7608_v54, %v3872_v0  ;;  %v2471_v8 = vmul.f32 1.442695, %v2385_v47  ;;  %v13101_v42 = vld [vmem:[#allocation200_spill] sm:$0xff] }
 0x50c   : > { %5454 = vmatmul.mubr.bf16.gmra.mxu1 %v4710_v56 }
 0x50d   : > { %13095 = vst [vmem:[#allocation50_spill] sm:$0xff] %v10675_v25  ;;  %7611 = vpow2.f32 %v2471_v8  ;;  %v10694_v8 = vpop.permute.xlu1 %4366 }
 0x50e   : > { %4451 = vperm.xlu0 %7273, %v10677_v38  }
 0x511   : > { %2287 = vmax.xlane.f32.xlu1 %v2286_v7  ;;  %v4235_v7 = vld [vmem:[#allocation4 + $0x60] sm:$0xff] }
 0x512   : > { %v4619_v4 = vmul.f32 %v10523_v16, %v4235_v7 }
 0x51c   : > { %v2283_v29 = vpop.xlane.xlu0 %2282 }
 0x51d   : > { %v10688_v0 = vmax.f32 %v10685_v2, %v2283_v29  ;;  %v10696_v2 = vpop.eup %7611 }
 0x51e   : > { %13102 = vst [vmem:[#allocation170_spill] sm:$0xff] %v10696_v2 }
 0x51f   : > { %13100 = vst [vmem:[#allocation53_spill] sm:$0xff] %v10688_v0  ;;  %v5142_v55 = vpop.f32.mrf.mxu0  ;;  %5818 = vst.msk [vmem:[#allocation2 + $0x1e0] sm:$0xff] %vm4155_vm2, %v10688_v0 }
 0x521   : > { %v5431_v40 = vpop.f32.mrf.mxu1  ;;  %v5144_v54 = vpop.f32.mrf.mxu0 }
 0x522   : > { %v5432_v56 = vadd.f32 %v5431_v40, %v5142_v55  ;;  %2687 = vperm.xlu1 %7274, %v13101_v42   ;;  %v13105_v54 = vld [vmem:[#allocation95_spill] sm:$0xff]  ;;  %v13106_v40 = vld [vmem:[#allocation97_spill] sm:$0xff] }
 0x523   : > { %v5433_v5 = vpop.f32.mrf.mxu1  ;;  %v5145_v47 = vpop.f32.mrf.mxu0 }
 0x524   : > { %v5644_v38 = vadd.f32 %v5432_v56, %v4618_v6  ;;  %v2683_v29 = vpop.permute.xlu0 %2682  ;;  %v10704_v6 = vld [vmem:[#allocation2 + $0x1c8] sm:$0xff] }
 0x525   : > { %v5434_v22 = vpop.f32.mrf.mxu1  ;;  %v2975_v51 = vsub.f32 %v13103_v45, %v2683_v29  ;;  %v2976_v0 = vsub.f32 %v13104_v14, %v2683_v29  ;;  %v2977_v62 = vsub.f32 %v13105_v54, %v2683_v29  ;;  %v5147_v20 = vpop.f32.mrf.mxu0  ;;  %v2978_v5 = vsub.f32 %v13106_v40, %v2683_v29  ;;  %13107 = vst [vmem:[#allocation163_spill] sm:$0xff] %v10704_v6 }
 0x526   : > { %5708 = vst [vmem:[#allocation4 + $0x108] sm:$0xff] %v5644_v38  ;;  %v5435_v55 = vadd.f32 %v5434_v22, %v5145_v47  ;;  %4396 = vperm.xlu1 %7274, %v10696_v2   ;;  %v13109_v22 = vld [vmem:[#allocation82_spill] sm:$0xff]  ;;  %v13110_v47 = vld [vmem:[#allocation84_spill] sm:$0xff]  ;;  %v13130_v2 = vld [vmem:[#allocation103_spill] sm:$0xff] }
 0x527   : > { %v5436_v56 = vpop.f32.mrf.mxu1  ;;  %v3331_v50 = vmul.f32 1.442695, %v2975_v51  ;;  %v3333_v25 = vmul.f32 1.442695, %v2976_v0  ;;  %v3335_v45 = vmul.f32 1.442695, %v2977_v62 }
 0x528   : > { %v5645_v23 = vadd.f32 %v5435_v55, %v4619_v4  ;;  %v2268_v3 = vpop.xlane.xlu1 %2267  ;;  %v3337_v16 = vmul.f32 1.442695, %v2978_v5  ;;  %v13111_v0 = vld [vmem:[#allocation83_spill] sm:$0xff] }
 0x529   : > { %7613 = vpow2.f32 %v3331_v50  ;;  %v10707_v14 = vmax.f32 %v10704_v6, %v2268_v3  ;;  %v13112_v62 = vld [vmem:[#allocation231_spill] sm:$0xff]  ;;  %v13113_v50 = vld [vmem:[#allocation85_spill] sm:$0xff] }
 0x52a   : > { %5709 = vst [vmem:[#allocation4 + $0x60] sm:$0xff] %v5645_v23  ;;  %7615 = vpow2.f32 %v3333_v25 }
 0x52b   : > { %13108 = vst [vmem:[#allocation189_spill] sm:$0xff] %v10707_v14  ;;  %5815 = vst.msk [vmem:[#allocation2 + $0x1c8] sm:$0xff] %vm4155_vm2, %v10707_v14  ;;  %7617 = vpow2.f32 %v3335_v45 }
 0x52c   : > { %v2668_v38 = vpop.permute.xlu1 %2667  ;;  %7619 = vpow2.f32 %v3337_v16 }
 0x52d   : > { %v2963_v7 = vsub.f32 %v13109_v22, %v2668_v38  ;;  %v2964_v51 = vsub.f32 %v13110_v47, %v2668_v38  ;;  %v2965_v29 = vsub.f32 %v13111_v0, %v2668_v38  ;;  %3779 = vadd.xlane.f32.xlu0 %v13112_v62  ;;  %v2966_v3 = vsub.f32 %v13113_v50, %v2668_v38  ;;  %v13116_v0 = vld [vmem:[#allocation316_spill] sm:$0xff] }
 0x52f   : > { %v3307_v54 = vmul.f32 1.442695, %v2963_v7  ;;  %v3309_v23 = vmul.f32 1.442695, %v2964_v51  ;;  %v3311_v25 = vmul.f32 1.442695, %v2965_v29 }
 0x530   : > { %v3313_v20 = vmul.f32 1.442695, %v2966_v3  ;;  %v13115_v51 = vld [vmem:[#allocation319_spill] sm:$0xff] }
 0x531   : > { %7621 = vpow2.f32 %v3307_v54  ;;  %v2294_v29 = vmax.f32 %v13116_v0, %v13115_v51  ;;  %v13120_v51 = vld [vmem:[#allocation162_spill] sm:$0xff] }
 0x532   : > { %7623 = vpow2.f32 %v3309_v23 }
 0x533   : > { %7625 = vpow2.f32 %v3311_v25 }
 0x534   : > { %7627 = vpow2.f32 %v3313_v20  ;;  %v13117_v20 = vld [vmem:[#allocation268_spill] sm:$0xff] }
 0x536   : > { %v10716_v4 = vpop.eup %7613 }
 0x537   : > { %v10718_v55 = vpop.eup %7615 }
 0x538   : > { %v3896_v40 = vadd.f32 %v10718_v55, %v10716_v4  ;;  %v10722_v5 = vpop.eup %7617 }
 0x539   : > { %v10725_v45 = vpop.eup %7619 }
 0x53a   : > { %v3897_v56 = vadd.f32 %v10722_v5, %v3896_v40  ;;  %v13118_v40 = vld [vmem:[#allocation317_spill] sm:$0xff] }
 0x53c   : > { %v10728_v16 = vadd.f32 %v10725_v45, %v3897_v56  ;;  %v2295_v56 = vmax.f32 %v2294_v29, %v13118_v40 }
 0x53e   : > { %13114 = vst [vmem:[#allocation177_spill] sm:$0xff] %v10728_v16  ;;  %v7622_v38 = vpop.eup %7621  ;;  %v2296_v0 = vmax.f32 %v2295_v56, %v13120_v51  ;;  %v13128_v16 = vld [vmem:[#allocation102_spill] sm:$0xff] }
 0x53f   : > { %v7624_v22 = vpop.eup %7623  ;;  %v4712_v7 = vpack.c.bf16 %v10648_v41, %v7622_v38 }
 0x540   : > { %v7626_v47 = vpop.eup %7625  ;;  %v4713_v62 = vpack.c.bf16 %v10650_v27, %v7624_v22  ;;  %v3881_v50 = vadd.f32 %v7624_v22, %v7622_v38  ;;  %v13121_v27 = vld [vmem:[#allocation190_spill] sm:$0xff] }
 0x541   : > { %v7628_v3 = vpop.eup %7627  ;;  %v4714_v54 = vpack.c.bf16 %v10655_v12, %v7626_v47  ;;  %v2387_v38 = vsub.f32 %v13121_v27, %v13069_v10  ;;  %v13125_v10 = vld [vmem:[#allocation205_spill] sm:$0xff] }
 0x542   : > { %5172 = vmatprep.mubr.bf16.mxu0 %v4713_v62  ;;  %v4715_v23 = vpack.c.bf16 %v10658_v32, %v7628_v3  ;;  %v3882_v25 = vadd.f32 %v7626_v47, %v3881_v50  ;;  %v13122_v32 = vld [vmem:[#allocation198_spill] sm:$0xff]  ;;  %v10747_v47 = vld [vmem:[#allocation2 + $0x1f0] sm:$0xff] }
 0x543   : > { %5173 = vmatmul.mubr.bf16.gmra.mxu0 %v4712_v7  ;;  %2752 = vperm.xlu0 %7273, %v13117_v20   ;;  %v2475_v12 = vmul.f32 1.442695, %v2387_v38  ;;  %v2389_v22 = vsub.f32 %v13122_v32, %v13101_v42  ;;  %v10745_v7 = vpop.permute.xlu0 %4391  ;;  %13123 = vst [vmem:[#allocation72_spill] sm:$0xff] %v10747_v47  ;;  %v4237_v38 = vld [vmem:[#allocation4 + $0x188] sm:$0xff] }
 0x544   : > { %5461 = vmatprep.mubr.bf16.mxu1 %v4715_v23  ;;  %v10738_v41 = vadd.f32 %v7628_v3, %v3882_v25  ;;  %v4236_v3 = vld [vmem:[#allocation4 + $0xe0] sm:$0xff] }
 0x545   : > { %5462 = vmatmul.mubr.bf16.gmra.mxu1 %v4714_v54  ;;  %7629 = vpow2.f32 %v2475_v12  ;;  %v2479_v29 = vmul.f32 1.442695, %v2389_v22  ;;  %v4620_v56 = vmul.f32 %v10694_v8, %v4236_v3 }
 0x546   : > { %13119 = vst [vmem:[#allocation70_spill] sm:$0xff] %v10738_v41 }
 0x547   : > { %7631 = vpow2.f32 %v2479_v29 }
 0x54a   : > { %2297 = vmax.xlane.f32.xlu1 %v2296_v0  ;;  %v13126_v0 = vld [vmem:[#allocation204_spill] sm:$0xff] }
 0x54b   : > { %v2391_v23 = vsub.f32 %v13126_v0, %v13125_v10 }
 0x54d   : > { %v2483_v22 = vmul.f32 1.442695, %v2391_v23 }
 0x54f   : > { %7633 = vpow2.f32 %v2483_v22 }
 0x552   : > { %v10760_v40 = vpop.eup %7629 }
 0x553   : > { %13127 = vst [vmem:[#allocation73_spill] sm:$0xff] %v10760_v40 }
 0x555   : > { %v2293_v62 = vpop.xlane.xlu0 %2292 }
 0x556   : > { %v10750_v50 = vmax.f32 %v10747_v47, %v2293_v62  ;;  %v10758_v62 = vpop.permute.xlu1 %4376 }
 0x558   : > { %13124 = vst [vmem:[#allocation71_spill] sm:$0xff] %v10750_v50  ;;  %v5150_v54 = vpop.f32.mrf.mxu0  ;;  %5820 = vst.msk [vmem:[#allocation2 + $0x1f0] sm:$0xff] %vm4155_vm2, %v10750_v50  ;;  %v13129_v50 = vld [vmem:[#allocation104_spill] sm:$0xff] }
 0x55a   : > { %v5439_v25 = vpop.f32.mrf.mxu1  ;;  %v5152_v42 = vpop.f32.mrf.mxu0 }
 0x55b   : > { %v5440_v27 = vadd.f32 %v5439_v25, %v5150_v54  ;;  %2697 = vperm.xlu1 %7274, %v13125_v10   ;;  %v4621_v54 = vmul.f32 %v10593_v36, %v4237_v38  ;;  %v13131_v25 = vld [vmem:[#allocation105_spill] sm:$0xff]  ;;  %v13137_v38 = vld [vmem:[#allocation248_spill] sm:$0xff] }
 0x55c   : > { %v5441_v12 = vpop.f32.mrf.mxu1  ;;  %v5153_v32 = vpop.f32.mrf.mxu0 }
 0x55d   : > { %v5646_v47 = vadd.f32 %v5440_v27, %v4620_v56  ;;  %v2693_v51 = vpop.permute.xlu0 %2692  ;;  %v10768_v56 = vld [vmem:[#allocation2 + $0x1d8] sm:$0xff]  ;;  %v13134_v12 = vld [vmem:[#allocation208_spill] sm:$0xff] }
 0x55e   : > { %v5442_v29 = vpop.f32.mrf.mxu1  ;;  %v2983_v0 = vsub.f32 %v13128_v16, %v2693_v51  ;;  %v2984_v42 = vsub.f32 %v13129_v50, %v2693_v51  ;;  %v2985_v8 = vsub.f32 %v13130_v2, %v2693_v51  ;;  %v5155_v3 = vpop.f32.mrf.mxu0  ;;  %v2986_v23 = vsub.f32 %v13131_v25, %v2693_v51  ;;  %13132 = vst [vmem:[#allocation58_spill] sm:$0xff] %v10768_v56  ;;  %v13133_v27 = vld [vmem:[#allocation209_spill] sm:$0xff]  ;;  %v13135_v2 = vld [vmem:[#allocation220_spill] sm:$0xff] }
 0x55f   : > { %5710 = vst [vmem:[#allocation4 + $0xe0] sm:$0xff] %v5646_v47  ;;  %v5443_v10 = vadd.f32 %v5442_v29, %v5153_v32  ;;  %4406 = vperm.xlu1 %7274, %v10760_v40   ;;  %v2393_v6 = vsub.f32 %v13134_v12, %v13133_v27  ;;  %v2398_v50 = vsub.f32 %v13135_v2, %v13088_v19  ;;  %v10781_v29 = vpop.eup %7631  ;;  %v13144_v2 = vld [vmem:[#allocation212_spill] sm:$0xff] }
 0x560   : > { %v5444_v41 = vpop.f32.mrf.mxu1  ;;  %v3347_v16 = vmul.f32 1.442695, %v2983_v0  ;;  %v3349_v14 = vmul.f32 1.442695, %v2984_v42  ;;  %v3351_v36 = vmul.f32 1.442695, %v2985_v8 }
 0x561   : > { %v5647_v3 = vadd.f32 %v5443_v10, %v4621_v54  ;;  %v2278_v47 = vpop.xlane.xlu1 %2277  ;;  %v3353_v32 = vmul.f32 1.442695, %v2986_v23  ;;  %v2487_v41 = vmul.f32 1.442695, %v2393_v6  ;;  %v2497_v22 = vmul.f32 1.442695, %v2398_v50 }
 0x562   : > { %7635 = vpow2.f32 %v3347_v16  ;;  %v10775_v51 = vmax.f32 %v10768_v56, %v2278_v47  ;;  %3784 = vadd.xlane.f32.xlu0 %v13137_v38  ;;  %13138 = vst [vmem:[#allocation59_spill] sm:$0xff] %v10781_v29  ;;  %v13139_v0 = vld [vmem:[#allocation90_spill] sm:$0xff]  ;;  %v13140_v8 = vld [vmem:[#allocation92_spill] sm:$0xff]  ;;  %v13141_v10 = vld [vmem:[#allocation91_spill] sm:$0xff]  ;;  %v10791_v47 = vpop.eup %7633 }
 0x563   : > { %5711 = vst [vmem:[#allocation4 + $0x188] sm:$0xff] %v5647_v3  ;;  %7637 = vpow2.f32 %v3349_v14  ;;  %2707 = vperm.xlu1 %7274, %v13133_v27   ;;  %v13142_v14 = vld [vmem:[#allocation93_spill] sm:$0xff]  ;;  %13145 = vst [vmem:[#allocation61_spill] sm:$0xff] %v10791_v47 }
 0x564   : > { %13136 = vst [vmem:[#allocation60_spill] sm:$0xff] %v10775_v51  ;;  %5817 = vst.msk [vmem:[#allocation2 + $0x1d8] sm:$0xff] %vm4155_vm2, %v10775_v51  ;;  %7639 = vpow2.f32 %v3351_v36  ;;  %v13143_v16 = vld [vmem:[#allocation213_spill] sm:$0xff] }
 0x565   : > { %v2678_v19 = vpop.permute.xlu1 %2677  ;;  %7641 = vpow2.f32 %v3353_v32  ;;  %v2395_v50 = vsub.f32 %v13144_v2, %v13143_v16 }
 0x566   : > { %v2971_v42 = vsub.f32 %v13139_v0, %v2678_v19  ;;  %v2972_v54 = vsub.f32 %v13140_v8, %v2678_v19  ;;  %v2973_v25 = vsub.f32 %v13141_v10, %v2678_v19  ;;  %v2974_v23 = vsub.f32 %v13142_v14, %v2678_v19  ;;  %v13146_v19 = vld [vmem:[#allocation219_spill] sm:$0xff] }
 0x567   : > { %4416 = vperm.xlu1 %7274, %v10781_v29   ;;  %7643 = vpow2.f32 %v2487_v41  ;;  %v2491_v36 = vmul.f32 1.442695, %v2395_v50 }
 0x568   : > { %v3323_v6 = vmul.f32 1.442695, %v2971_v42  ;;  %v3325_v27 = vmul.f32 1.442695, %v2972_v54  ;;  %v3327_v12 = vmul.f32 1.442695, %v2973_v25  ;;  %7645 = vpow2.f32 %v2497_v22  ;;  %v10813_v25 = vpop.permute.xlu0 %4401 }
 0x569   : > { %v3329_v3 = vmul.f32 1.442695, %v2974_v23 }
 0x56a   : > { %7647 = vpow2.f32 %v3323_v6 }
 0x56b   : > { %7649 = vpow2.f32 %v3325_v27  ;;  %2717 = vperm.xlu1 %7274, %v13143_v16  }
 0x56c   : > { %7651 = vpow2.f32 %v3327_v12 }
 0x56d   : > { %7653 = vpow2.f32 %v3329_v3 }
 0x56e   : > { %7655 = vpow2.f32 %v2491_v36  ;;  %v13150_v36 = vld [vmem:[#allocation233_spill] sm:$0xff] }
 0x56f   : > { %v10793_v38 = vpop.eup %7635  ;;  %4426 = vperm.xlu1 %7274, %v10791_v47   ;;  %v10839_v47 = vpop.permute.xlu1 %4386 }
 0x570   : > { %v10796_v32 = vpop.eup %7637 }
 0x571   : > { %v3906_v41 = vadd.f32 %v10796_v32, %v10793_v38  ;;  %v10800_v22 = vpop.eup %7639 }
 0x572   : > { %v10804_v42 = vpop.eup %7641 }
 0x573   : > { %2727 = vperm.xlu1 %7274, %v13146_v19   ;;  %v3907_v0 = vadd.f32 %v10800_v22, %v3906_v41 }
 0x574   : > { %v10806_v8 = vpop.eup %7643 }
 0x575   : > { %13147 = vst [vmem:[#allocation178_spill] sm:$0xff] %v10806_v8  ;;  %v10809_v54 = vadd.f32 %v10804_v42, %v3907_v0  ;;  %v10811_v10 = vpop.eup %7645  ;;  %v10822_v0 = vpop.permute.xlu0 %2702 }
 0x576   : > { %13149 = vst [vmem:[#allocation197_spill] sm:$0xff] %v10811_v10 }
 0x577   : > { %13148 = vst [vmem:[#allocation167_spill] sm:$0xff] %v10809_v54  ;;  %v7648_v14 = vpop.eup %7647  ;;  %4436 = vperm.xlu1 %7274, %v10806_v8   ;;  %v13151_v8 = vld [vmem:[#allocation305_spill] sm:$0xff] }
 0x578   : > { %v7650_v23 = vpop.eup %7649  ;;  %4461 = vperm.xlu0 %7273, %v10811_v10   ;;  %v4716_v6 = vpack.c.bf16 %v10716_v4, %v7648_v14 }
 0x579   : > { %v7652_v27 = vpop.eup %7651  ;;  %v4717_v12 = vpack.c.bf16 %v10718_v55, %v7650_v23  ;;  %v3891_v16 = vadd.f32 %v7650_v23, %v7648_v14  ;;  %v10830_v55 = vpop.permute.xlu0 %4411  ;;  %v4238_v14 = vld [vmem:[#allocation4 + $0x138] sm:$0xff] }
 0x57a   : > { %v7654_v2 = vpop.eup %7653  ;;  %v4718_v50 = vpack.c.bf16 %v10722_v5, %v7652_v27 }
 0x57b   : > { %5180 = vmatprep.mubr.bf16.mxu0 %v4717_v12  ;;  %v4719_v3 = vpack.c.bf16 %v10725_v45, %v7654_v2  ;;  %2737 = vperm.xlu1 %7274, %v13150_v36   ;;  %v3892_v41 = vadd.f32 %v7652_v27, %v3891_v16  ;;  %v10827_v10 = vpop.eup %7655  ;;  %v4622_v12 = vmul.f32 %v10758_v62, %v4238_v14  ;;  %v13155_v62 = vld [vmem:[#allocation235_spill] sm:$0xff] }
 0x57c   : > { %5181 = vmatmul.mubr.bf16.gmra.mxu0 %v4716_v6  ;;  %2762 = vperm.xlu0 %7273, %v13151_v8   ;;  %13153 = vst [vmem:[#allocation78_spill] sm:$0xff] %v10827_v10  ;;  %v2400_v14 = vsub.f32 %v13155_v62, %v13093_v60  ;;  %v13160_v60 = vld [vmem:[#allocation99_spill] sm:$0xff] }
 0x57d   : > { %5469 = vmatprep.mubr.bf16.mxu1 %v4719_v3  ;;  %v10825_v4 = vadd.f32 %v7654_v2, %v3892_v41  ;;  %v10832_v5 = vpop.permute.xlu0 %2712  ;;  %v4239_v3 = vld [vmem:[#allocation4 + $0x140] sm:$0xff] }
 0x57e   : > { %5470 = vmatmul.mubr.bf16.gmra.mxu1 %v4718_v50  ;;  %v4623_v40 = vmul.f32 %v10683_v46, %v4239_v3  ;;  %v2501_v46 = vmul.f32 1.442695, %v2400_v14  ;;  %v13163_v14 = vld [vmem:[#allocation230_spill] sm:$0xff] }
 0x57f   : > { %13152 = vst [vmem:[#allocation185_spill] sm:$0xff] %v10825_v4  ;;  %4446 = vperm.xlu1 %7274, %v10827_v10   ;;  %v10842_v4 = vld [vmem:[#allocation2 + $0x1e8] sm:$0xff] }
 0x580   : > { %13154 = vst [vmem:[#allocation80_spill] sm:$0xff] %v10842_v4  ;;  %7657 = vpow2.f32 %v2501_v46 }
 0x581   : > { %v10834_v45 = vpop.permute.xlu0 %4421 }
 0x585   : > { %v10837_v16 = vpop.permute.xlu0 %2722 }
 0x589   : > { %v10846_v51 = vpop.permute.xlu0 %4431 }
 0x591   : > { %v5158_v23 = vpop.f32.mrf.mxu0 }
 0x593   : > { %v5447_v27 = vpop.f32.mrf.mxu1  ;;  %v5160_v6 = vpop.f32.mrf.mxu0 }
 0x594   : > { %v5448_v2 = vadd.f32 %v5447_v27, %v5158_v23 }
 0x595   : > { %v5449_v41 = vpop.f32.mrf.mxu1  ;;  %v5161_v50 = vpop.f32.mrf.mxu0 }
 0x596   : > { %v5648_v10 = vadd.f32 %v5448_v2, %v4622_v12  ;;  %v13157_v12 = vld [vmem:[#allocation285_spill] sm:$0xff]  ;;  %v13159_v2 = vld [vmem:[#allocation100_spill] sm:$0xff] }
 0x597   : > { %v5450_v29 = vpop.f32.mrf.mxu1  ;;  %v5163_v54 = vpop.f32.mrf.mxu0 }
 0x598   : > { %5712 = vst [vmem:[#allocation4 + $0x138] sm:$0xff] %v5648_v10  ;;  %v5451_v56 = vadd.f32 %v5450_v29, %v5161_v50  ;;  %v13158_v54 = vld [vmem:[#allocation98_spill] sm:$0xff] }
 0x599   : > { %v5452_v6 = vpop.f32.mrf.mxu1 }
 0x59a   : > { %v5649_v23 = vadd.f32 %v5451_v56, %v4623_v40  ;;  %v2288_v27 = vpop.xlane.xlu1 %2287  ;;  %v10857_v6 = vpop.permute.xlu0 %2732  ;;  %v13161_v40 = vld [vmem:[#allocation101_spill] sm:$0xff] }
 0x59b   : > { %v10849_v41 = vmax.f32 %v10842_v4, %v2288_v27  ;;  %3794 = vadd.xlane.f32.xlu0 %v13157_v12 }
 0x59c   : > { %5713 = vst [vmem:[#allocation4 + $0x140] sm:$0xff] %v5649_v23  ;;  %v13162_v23 = vld [vmem:[#allocation217_spill] sm:$0xff] }
 0x59d   : > { %13156 = vst [vmem:[#allocation79_spill] sm:$0xff] %v10849_v41  ;;  %5819 = vst.msk [vmem:[#allocation2 + $0x1e8] sm:$0xff] %vm4155_vm2, %v10849_v41  ;;  %v2397_v12 = vsub.f32 %v13162_v23, %v13146_v19  ;;  %v13166_v23 = vld [vmem:[#allocation239_spill] sm:$0xff] }
 0x59e   : > { %v2688_v29 = vpop.permute.xlu1 %2687 }
 0x59f   : > { %v2979_v10 = vsub.f32 %v13158_v54, %v2688_v29  ;;  %v2980_v3 = vsub.f32 %v13159_v2, %v2688_v29  ;;  %v2981_v50 = vsub.f32 %v13160_v60, %v2688_v29  ;;  %v2982_v56 = vsub.f32 %v13161_v40, %v2688_v29  ;;  %v10863_v2 = vpop.permute.xlu0 %4441  ;;  %v10867_v29 = vpop.eup %7657  ;;  %v3644_v40 = vld [vmem:[#allocation3 + $0x8] sm:$0xff] }
 0x5a0   : > { %v2495_v54 = vmul.f32 1.442695, %v2397_v12  ;;  %13164 = vst [vmem:[#allocation81_spill] sm:$0xff] %v10867_v29 }
 0x5a1   : > { %v3339_v62 = vmul.f32 1.442695, %v2979_v10  ;;  %v3341_v27 = vmul.f32 1.442695, %v2980_v3  ;;  %v3343_v4 = vmul.f32 1.442695, %v2981_v50 }
 0x5a2   : > { %v3345_v41 = vmul.f32 1.442695, %v2982_v56  ;;  %v10909_v43 = vpop.permute.xlu1 %4396 }
 0x5a3   : > { %7659 = vpow2.f32 %v3339_v62  ;;  %3774 = vadd.xlane.f32.xlu1 %v13163_v14  ;;  %v10865_v60 = vpop.permute.xlu0 %2742 }
 0x5a4   : > { %7661 = vpow2.f32 %v3341_v27 }
 0x5a5   : > { %7663 = vpow2.f32 %v3343_v4 }
 0x5a6   : > { %7665 = vpow2.f32 %v3345_v41 }
 0x5a7   : > { %7667 = vpow2.f32 %v2495_v54  ;;  %v10871_v50 = vpop.permute.xlu0 %4451 }
 0x5a8   : > { %13165 = vst [vmem:[#allocation66_spill] sm:$0xff] %v10871_v50 }
 0x5b0   : > { %v7660_v10 = vpop.eup %7659 }
 0x5b1   : > { %v7662_v3 = vpop.eup %7661  ;;  %4471 = vperm.xlu0 %7273, %v10867_v29   ;;  %v4720_v19 = vpack.c.bf16 %v10793_v38, %v7660_v10  ;;  %v13167_v38 = vld [vmem:[#allocation218_spill] sm:$0xff] }
 0x5b2   : > { %v7664_v46 = vpop.eup %7663  ;;  %v4721_v4 = vpack.c.bf16 %v10796_v32, %v7662_v3  ;;  %v3901_v56 = vadd.f32 %v7662_v3, %v7660_v10  ;;  %v3708_v14 = vmul.f32 %v13167_v38, %v3644_v40 }
 0x5b3   : > { %v7666_v62 = vpop.eup %7665  ;;  %v4722_v41 = vpack.c.bf16 %v10800_v22, %v7664_v46  ;;  %v13170_v22 = vld [vmem:[#allocation262_spill] sm:$0xff] }
 0x5b4   : > { %5188 = vmatprep.mubr.bf16.mxu0 %v4721_v4  ;;  %v4723_v27 = vpack.c.bf16 %v10804_v42, %v7666_v62  ;;  %2747 = vperm.xlu1 %7274, %v13166_v23   ;;  %v3902_v12 = vadd.f32 %v7664_v46, %v3901_v56  ;;  %v10881_v32 = vpop.eup %7667  ;;  %v13171_v42 = vld [vmem:[#allocation232_spill] sm:$0xff]  ;;  %v13173_v4 = vld [vmem:[#allocation110_spill] sm:$0xff] }
 0x5b5   : > { %5189 = vmatmul.mubr.bf16.gmra.mxu0 %v4720_v19  ;;  %2772 = vperm.xlu0 %7273, %v10211_v37   ;;  %13169 = vst [vmem:[#allocation67_spill] sm:$0xff] %v10881_v32  ;;  %v2399_v3 = vsub.f32 %v13171_v42, %v13150_v36  ;;  %v13172_v19 = vld [vmem:[#allocation264_spill] sm:$0xff]  ;;  %v2991_v40 = vsub.f32 %v13173_v4, %v10822_v0  ;;  %v13177_v42 = vld [vmem:[#allocation118_spill] sm:$0xff] }
 0x5b6   : > { %5477 = vmatprep.mubr.bf16.mxu1 %v4723_v27  ;;  %v3780_v54 = vpop.xlane.xlu0 %3779  ;;  %v10879_v29 = vadd.f32 %v7666_v62, %v3902_v12  ;;  %v2402_v46 = vsub.f32 %v13172_v19, %v13117_v20  ;;  %v13174_v62 = vld [vmem:[#allocation112_spill] sm:$0xff]  ;;  %v13175_v27 = vld [vmem:[#allocation111_spill] sm:$0xff]  ;;  %v2999_v20 = vsub.f32 %v13177_v42, %v10832_v5  ;;  %v3002_v42 = vsub.f32 %v13180_v61, %v10832_v5 }
 0x5b7   : > { %5478 = vmatmul.mubr.bf16.gmra.mxu1 %v4722_v41  ;;  %v4092_v10 = vadd.f32 %v3780_v54, %v3708_v14  ;;  %v2499_v56 = vmul.f32 1.442695, %v2399_v3  ;;  %v2992_v41 = vsub.f32 %v13174_v62, %v10822_v0  ;;  %v2993_v12 = vsub.f32 %v13175_v27, %v10822_v0  ;;  %v13176_v14 = vld [vmem:[#allocation113_spill] sm:$0xff]  ;;  %v13178_v3 = vld [vmem:[#allocation120_spill] sm:$0xff]  ;;  %v13179_v27 = vld [vmem:[#allocation119_spill] sm:$0xff] }
 0x5b8   : > { %13168 = vst [vmem:[#allocation68_spill] sm:$0xff] %v10879_v29  ;;  %4456 = vperm.xlu1 %7274, %v10881_v32   ;;  %v2505_v38 = vmul.f32 1.442695, %v2402_v46  ;;  %v2994_v54 = vsub.f32 %v13176_v14, %v10822_v0  ;;  %v3363_v36 = vmul.f32 1.442695, %v2991_v40  ;;  %v3000_v4 = vsub.f32 %v13178_v3, %v10832_v5  ;;  %v13181_v3 = vld [vmem:[#allocation126_spill] sm:$0xff] }
 0x5b9   : > { %4157 = vst.msk [vmem:[#allocation3 + $0x8] sm:$0xff] %vm4155_vm2, %v4092_v10  ;;  %v4240_v10 = vld [vmem:[#allocation4 + $0x80] sm:$0xff]  ;;  %7669 = vpow2.f32 %v2499_v56  ;;  %v3365_v19 = vmul.f32 1.442695, %v2992_v41  ;;  %v3367_v58 = vmul.f32 1.442695, %v2993_v12  ;;  %v3001_v0 = vsub.f32 %v13179_v27, %v10832_v5 }
 0x5ba   : > { %v4624_v46 = vmul.f32 %v10839_v47, %v4240_v10  ;;  %7671 = vpow2.f32 %v2505_v38  ;;  %v3369_v40 = vmul.f32 1.442695, %v2994_v54  ;;  %v3379_v44 = vmul.f32 1.442695, %v2999_v20  ;;  %v13183_v5 = vld [vmem:[#allocation127_spill] sm:$0xff]  ;;  %v10916_v27 = vld [vmem:[#allocation2 + $0x1f8] sm:$0xff] }
 0x5bb   : > { %7673 = vpow2.f32 %v3363_v36  ;;  %v4625_v47 = vmul.f32 %v10745_v7, %v4241_v63  ;;  %v3381_v10 = vmul.f32 1.442695, %v3000_v4  ;;  %v3383_v61 = vmul.f32 1.442695, %v3001_v0  ;;  %13184 = vst [vmem:[#allocation69_spill] sm:$0xff] %v10916_v27  ;;  %v13185_v63 = vld [vmem:[#allocation129_spill] sm:$0xff] }
 0x5bc   : > { %2757 = vperm.xlu1 %7274, %v13170_v22   ;;  %7675 = vpow2.f32 %v3365_v19  ;;  %v3009_v36 = vsub.f32 %v13183_v5, %v10837_v16  ;;  %v3010_v7 = vsub.f32 %v13185_v63, %v10837_v16  ;;  %v13194_v5 = vld [vmem:[#allocation136_spill] sm:$0xff] }
 0x5bd   : > { %7677 = vpow2.f32 %v3367_v58 }
 0x5be   : > { %7679 = vpow2.f32 %v3369_v40  ;;  %v13188_v40 = vld [vmem:[#allocation106_spill] sm:$0xff] }
 0x5bf   : > { %7681 = vpow2.f32 %v3379_v44  ;;  %v3401_v44 = vmul.f32 1.442695, %v3010_v7  ;;  %v13196_v7 = vld [vmem:[#allocation135_spill] sm:$0xff] }
 0x5c0   : > { %7683 = vpow2.f32 %v3381_v10 }
 0x5c1   : > { %7685 = vpow2.f32 %v3383_v61 }
 0x5ca   : > { %v5166_v32 = vpop.f32.mrf.mxu0 }
 0x5cc   : > { %v5455_v29 = vpop.f32.mrf.mxu1  ;;  %v5168_v62 = vpop.f32.mrf.mxu0 }
 0x5cd   : > { %v5456_v14 = vadd.f32 %v5455_v29, %v5166_v32  ;;  %v3007_v62 = vsub.f32 %v13181_v3, %v10837_v16  ;;  %v13182_v29 = vld [vmem:[#allocation128_spill] sm:$0xff]  ;;  %v13187_v3 = vld [vmem:[#allocation309_spill] sm:$0xff] }
 0x5ce   : > { %v5457_v56 = vpop.f32.mrf.mxu1  ;;  %v5169_v41 = vpop.f32.mrf.mxu0  ;;  %v3008_v32 = vsub.f32 %v13182_v29, %v10837_v16 }
 0x5cf   : > { %v5650_v12 = vadd.f32 %v5456_v14, %v4624_v46  ;;  %v3385_v46 = vmul.f32 1.442695, %v3002_v42  ;;  %v3395_v19 = vmul.f32 1.442695, %v3007_v62  ;;  %v13189_v62 = vld [vmem:[#allocation108_spill] sm:$0xff]  ;;  %v10929_v29 = vpop.eup %7669 }
 0x5d0   : > { %v5458_v38 = vpop.f32.mrf.mxu1  ;;  %v5171_v54 = vpop.f32.mrf.mxu0  ;;  %v3397_v58 = vmul.f32 1.442695, %v3008_v32  ;;  %13191 = vst [vmem:[#allocation174_spill] sm:$0xff] %v10929_v29  ;;  %v13192_v32 = vld [vmem:[#allocation134_spill] sm:$0xff] }
 0x5d1   : > { %5714 = vst [vmem:[#allocation4 + $0x80] sm:$0xff] %v5650_v12  ;;  %v5459_v20 = vadd.f32 %v5458_v38, %v5169_v41  ;;  %v3399_v41 = vmul.f32 1.442695, %v3009_v36  ;;  %7687 = vpow2.f32 %v3385_v46  ;;  %v3015_v38 = vsub.f32 %v13192_v32, %v10857_v6  ;;  %v13193_v54 = vld [vmem:[#allocation109_spill] sm:$0xff]  ;;  %v10936_v63 = vpop.eup %7671  ;;  %v13203_v32 = vld [vmem:[#allocation116_spill] sm:$0xff] }
 0x5d2   : > { %v5460_v14 = vpop.f32.mrf.mxu1  ;;  %7689 = vpow2.f32 %v3395_v19  ;;  %v3016_v36 = vsub.f32 %v13194_v5, %v10857_v6  ;;  %13195 = vst [vmem:[#allocation194_spill] sm:$0xff] %v10936_v63  ;;  %v3017_v19 = vsub.f32 %v13196_v7, %v10857_v6 }
 0x5d3   : > { %v5651_v4 = vadd.f32 %v5459_v20, %v4625_v47  ;;  %v2298_v56 = vpop.xlane.xlu1 %2297  ;;  %7691 = vpow2.f32 %v3397_v58  ;;  %v13190_v47 = vld [vmem:[#allocation107_spill] sm:$0xff]  ;;  %v10942_v58 = vpop.eup %7673 }
 0x5d4   : > { %v10921_v0 = vmax.f32 %v10916_v27, %v2298_v56  ;;  %3804 = vadd.xlane.f32.xlu0 %v13187_v3  ;;  %7693 = vpow2.f32 %v3399_v41  ;;  %13197 = vst [vmem:[#allocation203_spill] sm:$0xff] %v10942_v58  ;;  %v10944_v3 = vpop.eup %7675  ;;  %v3411_v41 = vmul.f32 1.442695, %v3015_v38 }
 0x5d5   : > { %5715 = vst [vmem:[#allocation4 + $0x1a8] sm:$0xff] %v5651_v4  ;;  %7695 = vpow2.f32 %v3401_v44  ;;  %13198 = vst [vmem:[#allocation201_spill] sm:$0xff] %v10944_v3  ;;  %v3415_v44 = vmul.f32 1.442695, %v3017_v19 }
 0x5d6   : > { %13186 = vst [vmem:[#allocation186_spill] sm:$0xff] %v10921_v0  ;;  %5821 = vst.msk [vmem:[#allocation2 + $0x1f8] sm:$0xff] %vm4155_vm2, %v10921_v0 }
 0x5d7   : > { %v2698_v16 = vpop.permute.xlu1 %2697 }
 0x5d8   : > { %v2987_v42 = vsub.f32 %v13188_v40, %v2698_v16  ;;  %v2988_v12 = vsub.f32 %v13189_v62, %v2698_v16  ;;  %v2989_v10 = vsub.f32 %v13190_v47, %v2698_v16  ;;  %v2990_v61 = vsub.f32 %v13193_v54, %v2698_v16  ;;  %v10946_v16 = vpop.eup %7677  ;;  %v13202_v47 = vld [vmem:[#allocation114_spill] sm:$0xff] }
 0x5d9   : > { %13199 = vst [vmem:[#allocation207_spill] sm:$0xff] %v10946_v16  ;;  %v3413_v40 = vmul.f32 1.442695, %v3016_v36  ;;  %v13208_v36 = vld [vmem:[#allocation137_spill] sm:$0xff] }
 0x5da   : > { %v3355_v20 = vmul.f32 1.442695, %v2987_v42  ;;  %v3357_v46 = vmul.f32 1.442695, %v2988_v12  ;;  %v3359_v14 = vmul.f32 1.442695, %v2989_v10  ;;  %v10948_v42 = vpop.eup %7679 }
 0x5db   : > { %v3361_v4 = vmul.f32 1.442695, %v2990_v61  ;;  %v10940_v56 = vpop.permute.xlu1 %4406  ;;  %13200 = vst [vmem:[#allocation206_spill] sm:$0xff] %v10948_v42  ;;  %v10950_v12 = vpop.eup %7681  ;;  %v13204_v61 = vld [vmem:[#allocation115_spill] sm:$0xff] }
 0x5dc   : > { %7697 = vpow2.f32 %v3355_v20  ;;  %13201 = vst [vmem:[#allocation193_spill] sm:$0xff] %v10950_v12  ;;  %v13205_v20 = vld [vmem:[#allocation117_spill] sm:$0xff]  ;;  %v10957_v7 = vpop.eup %7683 }
 0x5dd   : > { %7699 = vpow2.f32 %v3357_v46  ;;  %v13206_v46 = vld [vmem:[#allocation249_spill] sm:$0xff]  ;;  %13207 = vst [vmem:[#allocation86_spill] sm:$0xff] %v10957_v7  ;;  %v10961_v19 = vpop.eup %7685 }
 0x5de   : > { %7701 = vpow2.f32 %v3359_v14  ;;  %v3018_v14 = vsub.f32 %v13208_v36, %v10857_v6  ;;  %13209 = vst [vmem:[#allocation88_spill] sm:$0xff] %v10961_v19  ;;  %v10963_v0 = vpop.eup %7687 }
 0x5df   : > { %7703 = vpow2.f32 %v3361_v4  ;;  %v2708_v62 = vpop.permute.xlu1 %2707  ;;  %13210 = vst [vmem:[#allocation87_spill] sm:$0xff] %v10963_v0 }
 0x5e0   : > { %v2995_v10 = vsub.f32 %v13202_v47, %v2708_v62  ;;  %v2996_v54 = vsub.f32 %v13203_v32, %v2708_v62  ;;  %v2997_v5 = vsub.f32 %v13204_v61, %v2708_v62  ;;  %v2998_v38 = vsub.f32 %v13205_v20, %v2708_v62  ;;  %3789 = vadd.xlane.f32.xlu1 %v13206_v46  ;;  %v10967_v62 = vpop.eup %7689 }
 0x5e1   : > { %7705 = vpow2.f32 %v3411_v41  ;;  %v10969_v20 = vpop.eup %7691  ;;  %v3417_v46 = vmul.f32 1.442695, %v3018_v14  ;;  %v3645_v41 = vld [vmem:[#allocation3 + $0x10] sm:$0xff] }
 0x5e2   : > { %7707 = vpow2.f32 %v3413_v40  ;;  %v3371_v4 = vmul.f32 1.442695, %v2995_v10  ;;  %v3373_v27 = vmul.f32 1.442695, %v2996_v54  ;;  %v3375_v47 = vmul.f32 1.442695, %v2997_v5  ;;  %v10971_v6 = vpop.eup %7693  ;;  %v10973_v40 = vpop.permute.xlu0 %2752 }
 0x5e3   : > { %7709 = vpow2.f32 %v3415_v44  ;;  %v3377_v32 = vmul.f32 1.442695, %v2998_v38  ;;  %v10965_v61 = vpop.permute.xlu1 %4416  ;;  %v10975_v54 = vpop.eup %7695  ;;  %v13212_v44 = vld [vmem:[#allocation122_spill] sm:$0xff]  ;;  %v13213_v38 = vld [vmem:[#allocation124_spill] sm:$0xff]  ;;  %v3709_v1 = vmul.f32 %v13217_v39, %v3645_v41 }
 0x5e4   : > { %7711 = vpow2.f32 %v3371_v4  ;;  %13211 = vst [vmem:[#allocation89_spill] sm:$0xff] %v10975_v54 }
 0x5e5   : > { %7713 = vpow2.f32 %v3373_v27  ;;  %v13216_v27 = vld [vmem:[#allocation142_spill] sm:$0xff] }
 0x5e6   : > { %7715 = vpow2.f32 %v3375_v47  ;;  %v3023_v47 = vsub.f32 %v13216_v27, %v10865_v60 }
 0x5e7   : > { %7717 = vpow2.f32 %v3377_v32  ;;  %v2718_v10 = vpop.permute.xlu1 %2717 }
 0x5e8   : > { %v3003_v5 = vsub.f32 %v13212_v44, %v2718_v10  ;;  %v3004_v36 = vsub.f32 %v13213_v38, %v2718_v10  ;;  %v3005_v4 = vsub.f32 %v13214_v11, %v2718_v10  ;;  %v3006_v48 = vsub.f32 %v13215_v52, %v2718_v10  ;;  %v13218_v11 = vld [vmem:[#allocation144_spill] sm:$0xff] }
 0x5e9   : > { %v7698_v14 = vpop.eup %7697  ;;  %7719 = vpow2.f32 %v3417_v46  ;;  %v3024_v24 = vsub.f32 %v13218_v11, %v10865_v60 }
 0x5ea   : > { %v7700_v33 = vpop.eup %7699  ;;  %v3387_v32 = vmul.f32 1.442695, %v3003_v5  ;;  %v3389_v53 = vmul.f32 1.442695, %v3004_v36  ;;  %v3391_v31 = vmul.f32 1.442695, %v3005_v4  ;;  %4481 = vperm.xlu0 %7273, %v10936_v63   ;;  %v4724_v44 = vpack.c.bf16 %v10942_v58, %v7698_v14 }
 0x5eb   : > { %v7702_v38 = vpop.eup %7701  ;;  %v3393_v52 = vmul.f32 1.442695, %v3006_v48  ;;  %v3785_v10 = vpop.xlane.xlu0 %3784  ;;  %v4725_v27 = vpack.c.bf16 %v10944_v3, %v7700_v33  ;;  %v3911_v50 = vadd.f32 %v7700_v33, %v7698_v14  ;;  %v3427_v36 = vmul.f32 1.442695, %v3023_v47 }
 0x5ec   : > { %v10988_v46 = vpop.permute.xlu1 %4426  ;;  %v7704_v39 = vpop.eup %7703  ;;  %7721 = vpow2.f32 %v3387_v32  ;;  %v4093_v41 = vadd.f32 %v3785_v10, %v3709_v1  ;;  %v4726_v5 = vpack.c.bf16 %v10946_v16, %v7702_v38  ;;  %v3429_v48 = vmul.f32 1.442695, %v3024_v24  ;;  %v13222_v32 = vld [vmem:[#allocation132_spill] sm:$0xff] }
 0x5ed   : > { %7723 = vpow2.f32 %v3389_v53  ;;  %5196 = vmatprep.mubr.bf16.mxu0 %v4725_v27  ;;  %v4727_v4 = vpack.c.bf16 %v10948_v42, %v7704_v39  ;;  %v3912_v63 = vadd.f32 %v7702_v38, %v3911_v50  ;;  %v13221_v50 = vld [vmem:[#allocation130_spill] sm:$0xff]  ;;  %v13223_v38 = vld [vmem:[#allocation131_spill] sm:$0xff] }
 0x5ee   : > { %v10993_v58 = vpop.eup %7705  ;;  %7725 = vpow2.f32 %v3391_v31  ;;  %4158 = vst.msk [vmem:[#allocation3 + $0x10] sm:$0xff] %vm4155_vm2, %v4093_v41  ;;  %5197 = vmatmul.mubr.bf16.gmra.mxu0 %v4724_v44  ;;  %2782 = vperm.xlu0 %7273, %v10279_v49   ;;  %v13224_v44 = vld [vmem:[#allocation133_spill] sm:$0xff]  ;;  %v13225_v41 = vld [vmem:[#allocation148_spill] sm:$0xff] }
 0x5ef   : > { %v10997_v33 = vpop.eup %7707  ;;  %7727 = vpow2.f32 %v3393_v52  ;;  %5485 = vmatprep.mubr.bf16.mxu1 %v4727_v4  ;;  %v10999_v14 = vadd.f32 %v7704_v39, %v3912_v63  ;;  %v3025_v24 = vsub.f32 %v13225_v41, %v10865_v60  ;;  %v13226_v52 = vld [vmem:[#allocation152_spill] sm:$0xff] }
 0x5f0   : > { %v2728_v1 = vpop.permute.xlu1 %2727  ;;  %v11001_v53 = vpop.eup %7709  ;;  %5486 = vmatmul.mubr.bf16.gmra.mxu1 %v4726_v5  ;;  %v3026_v4 = vsub.f32 %v13226_v52, %v10865_v60  ;;  %7729 = vpow2.f32 %v3427_v36 }
 0x5f1   : > { %13219 = vst [vmem:[#allocation211_spill] sm:$0xff] %v10999_v14  ;;  %13220 = vst [vmem:[#allocation210_spill] sm:$0xff] %v11001_v53  ;;  %v3011_v47 = vsub.f32 %v13221_v50, %v2728_v1  ;;  %v3012_v31 = vsub.f32 %v13222_v32, %v2728_v1  ;;  %v3013_v11 = vsub.f32 %v13223_v38, %v2728_v1  ;;  %v7712_v27 = vpop.eup %7711  ;;  %4466 = vperm.xlu1 %7274, %v10929_v29  }
 0x5f2   : > { %v3014_v10 = vsub.f32 %v13224_v44, %v2728_v1  ;;  %v7714_v63 = vpop.eup %7713  ;;  %v4728_v32 = vpack.c.bf16 %v10950_v12, %v7712_v27  ;;  %7731 = vpow2.f32 %v3429_v48  ;;  %v3431_v52 = vmul.f32 1.442695, %v3025_v24  ;;  %v13230_v24 = vld [vmem:[#allocation184_spill] sm:$0xff] }
 0x5f3   : > { %v3403_v39 = vmul.f32 1.442695, %v3011_v47  ;;  %v3405_v5 = vmul.f32 1.442695, %v3012_v31  ;;  %v3407_v50 = vmul.f32 1.442695, %v3013_v11  ;;  %v7716_v42 = vpop.eup %7715  ;;  %v11013_v1 = vpop.permute.xlu0 %4461  ;;  %v4729_v41 = vpack.c.bf16 %v10957_v7, %v7714_v63 }
 0x5f4   : > { %v3409_v38 = vmul.f32 1.442695, %v3014_v10  ;;  %v11015_v44 = vpop.permute.xlu1 %4436  ;;  %v3921_v16 = vadd.f32 %v7714_v63, %v7712_v27  ;;  %v7718_v60 = vpop.eup %7717  ;;  %v4730_v36 = vpack.c.bf16 %v10961_v19, %v7716_v42  ;;  %v13227_v31 = vld [vmem:[#allocation269_spill] sm:$0xff]  ;;  %v3433_v10 = vmul.f32 1.442695, %v3026_v4  ;;  %v13233_v7 = vld [vmem:[#allocation196_spill] sm:$0xff] }
 0x5f5   : > { %7733 = vpow2.f32 %v3403_v39  ;;  %5204 = vmatprep.mubr.bf16.mxu0 %v4729_v41  ;;  %v4731_v47 = vpack.c.bf16 %v10963_v0, %v7718_v60  ;;  %2767 = vperm.xlu1 %7274, %v13227_v31   ;;  %v13231_v41 = vld [vmem:[#allocation187_spill] sm:$0xff]  ;;  %v13235_v4 = vld [vmem:[#allocation140_spill] sm:$0xff] }
 0x5f6   : > { %7735 = vpow2.f32 %v3405_v5  ;;  %v3922_v48 = vadd.f32 %v7716_v42, %v3921_v16  ;;  %v11021_v11 = vpop.eup %7719  ;;  %5205 = vmatmul.mubr.bf16.gmra.mxu0 %v4728_v32  ;;  %v13232_v0 = vld [vmem:[#allocation191_spill] sm:$0xff] }
 0x5f7   : > { %13228 = vst [vmem:[#allocation74_spill] sm:$0xff] %v11021_v11  ;;  %7737 = vpow2.f32 %v3407_v50  ;;  %5493 = vmatprep.mubr.bf16.mxu1 %v4731_v47  ;;  %v2763_v27 = vpop.permute.xlu0 %2762  ;;  %v13234_v50 = vld [vmem:[#allocation139_spill] sm:$0xff] }
 0x5f8   : > { %7739 = vpow2.f32 %v3409_v38  ;;  %v2738_v63 = vpop.permute.xlu1 %2737  ;;  %v11023_v39 = vadd.f32 %v7718_v60, %v3922_v48  ;;  %5494 = vmatmul.mubr.bf16.gmra.mxu1 %v4730_v36  ;;  %v3039_v5 = vsub.f32 %v13230_v24, %v2763_v27  ;;  %v3040_v29 = vsub.f32 %v13231_v41, %v2763_v27  ;;  %v13236_v47 = vld [vmem:[#allocation143_spill] sm:$0xff] }
 0x5f9   : > { %v3041_v19 = vsub.f32 %v13232_v0, %v2763_v27  ;;  %v3042_v16 = vsub.f32 %v13233_v7, %v2763_v27  ;;  %v7722_v42 = vpop.eup %7721  ;;  %7741 = vpow2.f32 %v3431_v52  ;;  %v3019_v32 = vsub.f32 %v13234_v50, %v2738_v63  ;;  %v13237_v0 = vld [vmem:[#allocation145_spill] sm:$0xff] }
 0x5fa   : > { %13229 = vst [vmem:[#allocation76_spill] sm:$0xff] %v11023_v39  ;;  %v3020_v38 = vsub.f32 %v13235_v4, %v2738_v63  ;;  %v3021_v12 = vsub.f32 %v13236_v47, %v2738_v63  ;;  %v7724_v3 = vpop.eup %7723  ;;  %v3459_v60 = vmul.f32 1.442695, %v3039_v5  ;;  %v3461_v48 = vmul.f32 1.442695, %v3040_v29 }
 0x5fb   : > { %v3463_v36 = vmul.f32 1.442695, %v3041_v19  ;;  %v4732_v24 = vpack.c.bf16 %v10967_v62, %v7722_v42  ;;  %v7726_v39 = vpop.eup %7725  ;;  %7743 = vpow2.f32 %v3433_v10  ;;  %v3465_v41 = vmul.f32 1.442695, %v3042_v16 }
 0x5fc   : > { %v3022_v14 = vsub.f32 %v13237_v0, %v2738_v63  ;;  %v4733_v7 = vpack.c.bf16 %v10969_v20, %v7724_v3  ;;  %v7728_v52 = vpop.eup %7727  ;;  %7745 = vpow2.f32 %v3459_v60  ;;  %v3419_v27 = vmul.f32 1.442695, %v3019_v32 }
 0x5fd   : > { %v3421_v50 = vmul.f32 1.442695, %v3020_v38  ;;  %7747 = vpow2.f32 %v3461_v48  ;;  %v4735_v4 = vpack.c.bf16 %v10975_v54, %v7728_v52  ;;  %v4734_v29 = vpack.c.bf16 %v10971_v6, %v7726_v39  ;;  %v11037_v5 = vpop.eup %7729  ;;  %v4242_v48 = vld [vmem:[#allocation4 + $0x1b8] sm:$0xff] }
 0x5fe   : > { %5212 = vmatprep.mubr.bf16.mxu0 %v4733_v7  ;;  %v3931_v19 = vadd.f32 %v7724_v3, %v7722_v42  ;;  %13238 = vst [vmem:[#allocation75_spill] sm:$0xff] %v11037_v5  ;;  %7749 = vpow2.f32 %v3463_v36  ;;  %v3423_v10 = vmul.f32 1.442695, %v3021_v12  ;;  %v3425_v63 = vmul.f32 1.442695, %v3022_v14 }
 0x5ff   : > { %5213 = vmatmul.mubr.bf16.gmra.mxu0 %v4732_v24  ;;  %7751 = vpow2.f32 %v3465_v41  ;;  %5501 = vmatprep.mubr.bf16.mxu1 %v4735_v4  ;;  %v11039_v47 = vpop.eup %7731 }
 0x600   : > { %v3932_v16 = vadd.f32 %v7726_v39, %v3931_v19  ;;  %13239 = vst [vmem:[#allocation77_spill] sm:$0xff] %v11039_v47  ;;  %7753 = vpow2.f32 %v3419_v27  ;;  %5502 = vmatmul.mubr.bf16.gmra.mxu1 %v4734_v29  ;;  %v4243_v29 = vld [vmem:[#allocation4 + $0x28] sm:$0xff] }
 0x601   : > { %7755 = vpow2.f32 %v3421_v50  ;;  %v4626_v50 = vmul.f32 %v10909_v43, %v4242_v48  ;;  %v4627_v43 = vmul.f32 %v10813_v25, %v4243_v29 }
 0x602   : > { %v7734_v32 = vpop.eup %7733  ;;  %v11041_v38 = vadd.f32 %v7728_v52, %v3932_v16  ;;  %7757 = vpow2.f32 %v3423_v10 }
 0x603   : > { %v7736_v60 = vpop.eup %7735  ;;  %v4736_v3 = vpack.c.bf16 %v10993_v58, %v7734_v32  ;;  %7759 = vpow2.f32 %v3425_v63  ;;  %v5174_v12 = vpop.f32.mrf.mxu0 }
 0x604   : > { %v7738_v42 = vpop.eup %7737  ;;  %v4737_v14 = vpack.c.bf16 %v10997_v33, %v7736_v60  ;;  %v3941_v36 = vadd.f32 %v7736_v60, %v7734_v32 }
 0x605   : > { %v7740_v39 = vpop.eup %7739  ;;  %v4738_v24 = vpack.c.bf16 %v11001_v53, %v7738_v42  ;;  %v5463_v41 = vpop.f32.mrf.mxu1  ;;  %v13262_v53 = vld [vmem:[#allocation156_spill] sm:$0xff] }
 0x606   : > { %v5176_v0 = vpop.f32.mrf.mxu0  ;;  %5220 = vmatprep.mubr.bf16.mxu0 %v4737_v14  ;;  %v4739_v7 = vpack.c.bf16 %v11021_v11, %v7740_v39  ;;  %v3942_v52 = vadd.f32 %v7738_v42, %v3941_v36  ;;  %v11047_v27 = vpop.eup %7741  ;;  %v5464_v4 = vadd.f32 %v5463_v41, %v5174_v12 }
 0x607   : > { %13240 = vst [vmem:[#allocation215_spill] sm:$0xff] %v11047_v27  ;;  %5221 = vmatmul.mubr.bf16.gmra.mxu0 %v4736_v3  ;;  %v5465_v19 = vpop.f32.mrf.mxu1 }
 0x608   : > { %5509 = vmatprep.mubr.bf16.mxu1 %v4739_v7  ;;  %v5177_v10 = vpop.f32.mrf.mxu0  ;;  %v11050_v63 = vadd.f32 %v7740_v39, %v3942_v52  ;;  %v11052_v16 = vpop.eup %7743  ;;  %v5652_v32 = vadd.f32 %v5464_v4, %v4626_v50  ;;  %v13242_v7 = vld [vmem:[#allocation149_spill] sm:$0xff] }
 0x609   : > { %13241 = vst [vmem:[#allocation214_spill] sm:$0xff] %v11052_v16  ;;  %5510 = vmatmul.mubr.bf16.gmra.mxu1 %v4738_v24  ;;  %v11054_v60 = vpop.eup %7745  ;;  %v5466_v14 = vpop.f32.mrf.mxu1  ;;  %v2404_v52 = vsub.f32 %v13242_v7, %v13151_v8  ;;  %v3647_v7 = vld [vmem:[#allocation3 + $0x20] sm:$0xff] }
 0x60a   : > { %v5179_v42 = vpop.f32.mrf.mxu0  ;;  %v11056_v36 = vpop.eup %7747  ;;  %5716 = vst [vmem:[#allocation4 + $0x1b8] sm:$0xff] %v5652_v32  ;;  %v5467_v3 = vadd.f32 %v5466_v14, %v5177_v10 }
 0x60b   : > { %v11059_v48 = vpop.eup %7749  ;;  %v5468_v12 = vpop.f32.mrf.mxu1  ;;  %v3976_v39 = vadd.f32 %v11056_v36, %v11054_v60 }
 0x60c   : > { %v11063_v41 = vpop.eup %7751  ;;  %v5653_v0 = vadd.f32 %v5467_v3, %v4627_v43  ;;  %v2509_v43 = vmul.f32 1.442695, %v2404_v52  ;;  %v13244_v12 = vld [vmem:[#allocation236_spill] sm:$0xff] }
 0x60d   : > { %v7754_v24 = vpop.eup %7753  ;;  %3814 = vadd.xlane.f32.xlu0 %v10246_v30  ;;  %v3977_v50 = vadd.f32 %v11059_v48, %v3976_v39  ;;  %v2401_v39 = vsub.f32 %v13244_v12, %v13166_v23  ;;  %v13247_v52 = vld [vmem:[#allocation272_spill] sm:$0xff]  ;;  %v13249_v23 = vld [vmem:[#allocation171_spill] sm:$0xff] }
 0x60e   : > { %v7756_v25 = vpop.eup %7755  ;;  %5717 = vst [vmem:[#allocation4 + $0x28] sm:$0xff] %v5653_v0  ;;  %v4740_v4 = vpack.c.bf16 %v11037_v5, %v7754_v24  ;;  %7761 = vpow2.f32 %v2509_v43  ;;  %v3643_v43 = vld [vmem:[#allocation3] sm:$0xff] }
 0x60f   : > { %v7758_v29 = vpop.eup %7757  ;;  %v4741_v19 = vpack.c.bf16 %v11039_v47, %v7756_v25  ;;  %v3951_v10 = vadd.f32 %v7756_v25, %v7754_v24  ;;  %v11072_v32 = vadd.f32 %v11063_v41, %v3977_v50  ;;  %v2503_v0 = vmul.f32 1.442695, %v2401_v39  ;;  %v13245_v24 = vld [vmem:[#allocation288_spill] sm:$0xff] }
 0x610   : > { %v7760_v14 = vpop.eup %7759  ;;  %v4742_v42 = vpack.c.bf16 %v11047_v27, %v7758_v29  ;;  %v3711_v25 = vmul.f32 %v13247_v52, %v3647_v7  ;;  %v13253_v7 = vld [vmem:[#allocation180_spill] sm:$0xff] }
 0x611   : > { %13243 = vst [vmem:[#allocation222_spill] sm:$0xff] %v11072_v32  ;;  %5228 = vmatprep.mubr.bf16.mxu0 %v4741_v19  ;;  %v4743_v30 = vpack.c.bf16 %v11052_v16, %v7760_v14  ;;  %v3952_v8 = vadd.f32 %v7758_v29, %v3951_v10  ;;  %7763 = vpow2.f32 %v2503_v0  ;;  %v13248_v19 = vld [vmem:[#allocation168_spill] sm:$0xff]  ;;  %v3034_v52 = vsub.f32 %v13253_v7, %v10973_v40  ;;  %v13255_v32 = vld [vmem:[#allocation221_spill] sm:$0xff]  ;;  %v13258_v7 = vld [vmem:[#allocation227_spill] sm:$0xff] }
 0x612   : > { %5229 = vmatmul.mubr.bf16.gmra.mxu0 %v4740_v4  ;;  %v3031_v10 = vsub.f32 %v13248_v19, %v10973_v40  ;;  %v13252_v0 = vld [vmem:[#allocation172_spill] sm:$0xff] }
 0x613   : > { %5517 = vmatprep.mubr.bf16.mxu1 %v4743_v30  ;;  %v11076_v3 = vadd.f32 %v7760_v14, %v3952_v8  ;;  %v3032_v14 = vsub.f32 %v13249_v23, %v10973_v40  ;;  %v13251_v8 = vld [vmem:[#allocation175_spill] sm:$0xff] }
 0x614   : > { %5518 = vmatmul.mubr.bf16.gmra.mxu1 %v4742_v42  ;;  %v11091_v42 = vpop.permute.xlu1 %4446  ;;  %v3033_v12 = vsub.f32 %v13251_v8, %v10973_v40  ;;  %v3443_v39 = vmul.f32 1.442695, %v3031_v10  ;;  %v3449_v8 = vmul.f32 1.442695, %v3034_v52  ;;  %v13257_v40 = vld [vmem:[#allocation225_spill] sm:$0xff] }
 0x616   : > { %v3447_v23 = vmul.f32 1.442695, %v3033_v12  ;;  %7765 = vpow2.f32 %v3443_v39 }
 0x619   : > { %3799 = vadd.xlane.f32.xlu1 %v13245_v24  ;;  %v3707_v24 = vmul.f32 %v13252_v0, %v3643_v43  ;;  %v13256_v0 = vld [vmem:[#allocation223_spill] sm:$0xff] }
 0x61b   : > { %v11081_v50 = vpop.eup %7761 }
 0x61c   : > { %13246 = vst [vmem:[#allocation238_spill] sm:$0xff] %v11081_v50 }
 0x61e   : > { %v11093_v30 = vpop.eup %7763 }
 0x61f   : > { %13250 = vst [vmem:[#allocation182_spill] sm:$0xff] %v11093_v30 }
 0x623   : > { %4491 = vperm.xlu0 %7273, %v11081_v50   ;;  %v13254_v50 = vld [vmem:[#allocation298_spill] sm:$0xff] }
 0x624   : > { %v3795_v4 = vpop.xlane.xlu0 %3794 }
 0x625   : > { %v4095_v29 = vadd.f32 %v3795_v4, %v3711_v25  ;;  %v3445_v25 = vmul.f32 1.442695, %v3032_v14 }
 0x627   : > { %4160 = vst.msk [vmem:[#allocation3 + $0x20] sm:$0xff] %vm4155_vm2, %v4095_v29  ;;  %2792 = vperm.xlu0 %7273, %v10347_v57   ;;  %7767 = vpow2.f32 %v3445_v25  ;;  %v13261_v25 = vld [vmem:[#allocation153_spill] sm:$0xff] }
 0x628   : > { %7769 = vpow2.f32 %v3447_v23 }
 0x629   : > { %7771 = vpow2.f32 %v3449_v8  ;;  %v13265_v8 = vld [vmem:[#allocation183_spill] sm:$0xff] }
 0x62a   : > { %4476 = vperm.xlu1 %7274, %v11093_v30  }
 0x62c   : > { %v11101_v4 = vpop.permute.xlu0 %4471  ;;  %v3775_v29 = vpop.xlane.xlu1 %3774 }
 0x62d   : > { %v4091_v19 = vadd.f32 %v3775_v29, %v3707_v24  ;;  %v13259_v24 = vld [vmem:[#allocation146_spill] sm:$0xff] }
 0x62e   : > { %2777 = vperm.xlu1 %7274, %v13254_v50   ;;  %v13260_v29 = vld [vmem:[#allocation150_spill] sm:$0xff] }
 0x62f   : > { %4156 = vst.msk [vmem:[#allocation3] sm:$0xff] %vm4155_vm2, %v4091_v19 }
 0x630   : > { %v2773_v30 = vpop.permute.xlu0 %2772  ;;  %v2748_v10 = vpop.permute.xlu1 %2747 }
 0x631   : > { %v3047_v43 = vsub.f32 %v13255_v32, %v2773_v30  ;;  %v3048_v16 = vsub.f32 %v13256_v0, %v2773_v30  ;;  %v3049_v14 = vsub.f32 %v13257_v40, %v2773_v30  ;;  %v3050_v27 = vsub.f32 %v13258_v7, %v2773_v30 }
 0x632   : > { %v3027_v12 = vsub.f32 %v13259_v24, %v2748_v10  ;;  %v3028_v11 = vsub.f32 %v13260_v29, %v2748_v10  ;;  %v3029_v52 = vsub.f32 %v13261_v25, %v2748_v10  ;;  %v3030_v32 = vsub.f32 %v13262_v53, %v2748_v10  ;;  %v13266_v53 = vld [vmem:[#allocation188_spill] sm:$0xff] }
 0x633   : > { %v3475_v39 = vmul.f32 1.442695, %v3047_v43  ;;  %v3477_v47 = vmul.f32 1.442695, %v3048_v16  ;;  %v3479_v19 = vmul.f32 1.442695, %v3049_v14 }
 0x634   : > { %v3481_v5 = vmul.f32 1.442695, %v3050_v27  ;;  %v11113_v54 = vpop.permute.xlu1 %4456  ;;  %v3435_v0 = vmul.f32 1.442695, %v3027_v12  ;;  %v3437_v30 = vmul.f32 1.442695, %v3028_v11  ;;  %v11119_v11 = vpop.eup %7765 }
 0x635   : > { %7773 = vpow2.f32 %v3475_v39  ;;  %v3439_v23 = vmul.f32 1.442695, %v3029_v52  ;;  %v3441_v40 = vmul.f32 1.442695, %v3030_v32  ;;  %v13263_v16 = vld [vmem:[#allocation176_spill] sm:$0xff]  ;;  %v13264_v14 = vld [vmem:[#allocation179_spill] sm:$0xff]  ;;  %v11121_v25 = vpop.eup %7767 }
 0x636   : > { %7775 = vpow2.f32 %v3477_v47  ;;  %v4244_v39 = vld [vmem:[#allocation4 + $0x1e8] sm:$0xff] }
 0x637   : > { %7777 = vpow2.f32 %v3479_v19 }
 0x638   : > { %7779 = vpow2.f32 %v3481_v5  ;;  %v2758_v7 = vpop.permute.xlu1 %2757 }
 0x639   : > { %7781 = vpow2.f32 %v3435_v0  ;;  %v3035_v43 = vsub.f32 %v13263_v16, %v2758_v7  ;;  %v3036_v24 = vsub.f32 %v13264_v14, %v2758_v7  ;;  %v3037_v27 = vsub.f32 %v13265_v8, %v2758_v7  ;;  %v11123_v0 = vpop.eup %7769 }
 0x63a   : > { %7783 = vpow2.f32 %v3437_v30  ;;  %v3038_v10 = vsub.f32 %v13266_v53, %v2758_v7  ;;  %v4628_v30 = vmul.f32 %v10940_v56, %v4244_v39  ;;  %v4245_v7 = vld [vmem:[#allocation4 + $0xf8] sm:$0xff]  ;;  %v11126_v14 = vpop.eup %7771 }
 0x63b   : > { %7785 = vpow2.f32 %v3439_v23  ;;  %v3451_v29 = vmul.f32 1.442695, %v3035_v43  ;;  %v3453_v12 = vmul.f32 1.442695, %v3036_v24  ;;  %v3455_v47 = vmul.f32 1.442695, %v3037_v27 }
 0x63c   : > { %7787 = vpow2.f32 %v3441_v40  ;;  %v3457_v5 = vmul.f32 1.442695, %v3038_v10  ;;  %v5182_v19 = vpop.f32.mrf.mxu0  ;;  %v4629_v10 = vmul.f32 %v10830_v55, %v4245_v7 }
 0x63d   : > { %7789 = vpow2.f32 %v3451_v29 }
 0x63e   : > { %7791 = vpow2.f32 %v3453_v12  ;;  %v5471_v52 = vpop.f32.mrf.mxu1  ;;  %v5184_v32 = vpop.f32.mrf.mxu0 }
 0x63f   : > { %7793 = vpow2.f32 %v3455_v47  ;;  %v5472_v23 = vadd.f32 %v5471_v52, %v5182_v19  ;;  %v2406_v52 = vsub.f32 %v10208_v9, %v10211_v37 }
 0x640   : > { %7795 = vpow2.f32 %v3457_v5  ;;  %v5473_v16 = vpop.f32.mrf.mxu1  ;;  %v5185_v43 = vpop.f32.mrf.mxu0 }
 0x641   : > { %v5654_v40 = vadd.f32 %v5472_v23, %v4628_v30  ;;  %v2513_v9 = vmul.f32 1.442695, %v2406_v52 }
 0x642   : > { %v11128_v24 = vpop.eup %7773  ;;  %v5474_v8 = vpop.f32.mrf.mxu1 }
 0x643   : > { %v5187_v27 = vpop.f32.mrf.mxu0  ;;  %v11130_v53 = vpop.eup %7775  ;;  %5718 = vst [vmem:[#allocation4 + $0x1e8] sm:$0xff] %v5654_v40  ;;  %v5475_v29 = vadd.f32 %v5474_v8, %v5185_v43  ;;  %7797 = vpow2.f32 %v2513_v9 }
 0x644   : > { %v11133_v56 = vpop.eup %7777  ;;  %v5476_v12 = vpop.f32.mrf.mxu1  ;;  %v3986_v47 = vadd.f32 %v11130_v53, %v11128_v24 }
 0x645   : > { %v11137_v39 = vpop.eup %7779  ;;  %v5655_v5 = vadd.f32 %v5475_v29, %v4629_v10 }
 0x646   : > { %v7782_v19 = vpop.eup %7781  ;;  %3824 = vadd.xlane.f32.xlu0 %v10314_v35  ;;  %v3987_v32 = vadd.f32 %v11133_v56, %v3986_v47 }
 0x647   : > { %v7784_v55 = vpop.eup %7783  ;;  %5719 = vst [vmem:[#allocation4 + $0xf8] sm:$0xff] %v5655_v5  ;;  %v4744_v30 = vpack.c.bf16 %v11119_v11, %v7782_v19 }
 0x648   : > { %v7786_v23 = vpop.eup %7785  ;;  %v4745_v7 = vpack.c.bf16 %v11121_v25, %v7784_v55  ;;  %v3961_v16 = vadd.f32 %v7784_v55, %v7782_v19  ;;  %v11146_v43 = vadd.f32 %v11137_v39, %v3987_v32  ;;  %v13268_v32 = vld [vmem:[#allocation259_spill] sm:$0xff] }
 0x649   : > { %v7788_v40 = vpop.eup %7787  ;;  %v4746_v8 = vpack.c.bf16 %v11123_v0, %v7786_v23  ;;  %v2403_v55 = vsub.f32 %v13268_v32, %v13170_v22  ;;  %v3649_v22 = vld [vmem:[#allocation3 + $0x30] sm:$0xff] }
 0x64a   : > { %13267 = vst [vmem:[#allocation200_spill] sm:$0xff] %v11146_v43  ;;  %v7790_v27 = vpop.eup %7789  ;;  %5236 = vmatprep.mubr.bf16.mxu0 %v4745_v7  ;;  %v4747_v35 = vpack.c.bf16 %v11126_v14, %v7788_v40  ;;  %v3962_v37 = vadd.f32 %v7786_v23, %v3961_v16  ;;  %v13275_v32 = vld [vmem:[#allocation240_spill] sm:$0xff] }
 0x64b   : > { %v7792_v10 = vpop.eup %7791  ;;  %5237 = vmatmul.mubr.bf16.gmra.mxu0 %v4744_v30  ;;  %v4748_v23 = vpack.c.bf16 %v11054_v60, %v7790_v27  ;;  %v2507_v16 = vmul.f32 1.442695, %v2403_v55 }
 0x64c   : > { %v7794_v29 = vpop.eup %7793  ;;  %5525 = vmatprep.mubr.bf16.mxu1 %v4747_v35  ;;  %v4749_v12 = vpack.c.bf16 %v11056_v36, %v7792_v10  ;;  %v11151_v47 = vadd.f32 %v7788_v40, %v3962_v37  ;;  %v3971_v5 = vadd.f32 %v7792_v10, %v7790_v27  ;;  %v13269_v40 = vld [vmem:[#allocation313_spill] sm:$0xff]  ;;  %v13273_v10 = vld [vmem:[#allocation320_spill] sm:$0xff] }
 0x64d   : > { %v7796_v19 = vpop.eup %7795  ;;  %5526 = vmatmul.mubr.bf16.gmra.mxu1 %v4746_v8  ;;  %v4750_v36 = vpack.c.bf16 %v11059_v48, %v7794_v29  ;;  %7799 = vpow2.f32 %v2507_v16  ;;  %v3646_v37 = vld [vmem:[#allocation3 + $0x18] sm:$0xff] }
 0x64e   : > { %5244 = vmatprep.mubr.bf16.mxu0 %v4749_v12  ;;  %v4751_v52 = vpack.c.bf16 %v11063_v41, %v7796_v19  ;;  %v3972_v7 = vadd.f32 %v7794_v29, %v3971_v5  ;;  %v13271_v41 = vld [vmem:[#allocation304_spill] sm:$0xff] }
 0x64f   : > { %v3713_v9 = vmul.f32 %v13271_v41, %v3649_v22  ;;  %v13274_v12 = vld [vmem:[#allocation216_spill] sm:$0xff] }
 0x650   : > { %5533 = vmatprep.mubr.bf16.mxu1 %v4751_v52  ;;  %v11157_v30 = vadd.f32 %v7796_v19, %v3972_v7  ;;  %v11161_v8 = vpop.eup %7797  ;;  %v3710_v5 = vmul.f32 %v13274_v12, %v3646_v37  ;;  %v13276_v52 = vld [vmem:[#allocation241_spill] sm:$0xff] }
 0x651   : > { %13270 = vst [vmem:[#allocation94_spill] sm:$0xff] %v11161_v8 }
 0x652   : > { %3809 = vadd.xlane.f32.xlu1 %v13269_v40 }
 0x653   : > { %5245 = vmatmul.mubr.bf16.gmra.mxu0 %v4748_v23  ;;  %v13277_v23 = vld [vmem:[#allocation243_spill] sm:$0xff] }
 0x655   : > { %5534 = vmatmul.mubr.bf16.gmra.mxu1 %v4750_v36  ;;  %v13278_v36 = vld [vmem:[#allocation245_spill] sm:$0xff] }
 0x65a   : > { %v11167_v27 = vpop.eup %7799 }
 0x65b   : > { %13272 = vst [vmem:[#allocation96_spill] sm:$0xff] %v11167_v27 }
 0x65c   : > { %4501 = vperm.xlu0 %7273, %v11161_v8  }
 0x65d   : > { %v3805_v35 = vpop.xlane.xlu0 %3804 }
 0x65e   : > { %v4097_v60 = vadd.f32 %v3805_v35, %v3713_v9 }
 0x660   : > { %4162 = vst.msk [vmem:[#allocation3 + $0x30] sm:$0xff] %vm4155_vm2, %v4097_v60  ;;  %2802 = vperm.xlu0 %7273, %v10414_v15  }
 0x663   : > { %4486 = vperm.xlu1 %7274, %v11167_v27  }
 0x665   : > { %v11170_v48 = vpop.permute.xlu0 %4481 }
 0x667   : > { %2787 = vperm.xlu1 %7274, %v13273_v10  }
 0x669   : > { %v2783_v29 = vpop.permute.xlu0 %2782  ;;  %v3790_v19 = vpop.xlane.xlu1 %3789 }
 0x66a   : > { %v3055_v55 = vsub.f32 %v13275_v32, %v2783_v29  ;;  %v3056_v7 = vsub.f32 %v13276_v52, %v2783_v29  ;;  %v3057_v16 = vsub.f32 %v13277_v23, %v2783_v29  ;;  %v3058_v40 = vsub.f32 %v13278_v36, %v2783_v29  ;;  %v13279_v32 = vld [vmem:[#allocation192_spill] sm:$0xff]  ;;  %v13280_v52 = vld [vmem:[#allocation195_spill] sm:$0xff]  ;;  %v13282_v29 = vld [vmem:[#allocation202_spill] sm:$0xff] }
 0x66b   : > { %v4094_v22 = vadd.f32 %v3790_v19, %v3710_v5  ;;  %v13281_v23 = vld [vmem:[#allocation199_spill] sm:$0xff] }
 0x66c   : > { %v3491_v41 = vmul.f32 1.442695, %v3055_v55  ;;  %v3493_v9 = vmul.f32 1.442695, %v3056_v7  ;;  %v3495_v35 = vmul.f32 1.442695, %v3057_v16 }
 0x66d   : > { %4159 = vst.msk [vmem:[#allocation3 + $0x18] sm:$0xff] %vm4155_vm2, %v4094_v22  ;;  %v11179_v60 = vpop.permute.xlu1 %4466  ;;  %v3497_v37 = vmul.f32 1.442695, %v3058_v40  ;;  %v4246_v16 = vld [vmem:[#allocation4 + $0x160] sm:$0xff] }
 0x66e   : > { %7801 = vpow2.f32 %v3491_v41 }
 0x66f   : > { %7803 = vpow2.f32 %v3493_v9  ;;  %v4630_v9 = vmul.f32 %v10965_v61, %v4246_v16  ;;  %v2408_v16 = vsub.f32 %v10276_v18, %v10279_v49 }
 0x670   : > { %7805 = vpow2.f32 %v3495_v35 }
 0x671   : > { %v2768_v12 = vpop.permute.xlu1 %2767  ;;  %7807 = vpow2.f32 %v3497_v37 }
 0x672   : > { %v3043_v8 = vsub.f32 %v13279_v32, %v2768_v12  ;;  %v3044_v27 = vsub.f32 %v13280_v52, %v2768_v12  ;;  %v3045_v43 = vsub.f32 %v13281_v23, %v2768_v12  ;;  %v3046_v5 = vsub.f32 %v13282_v29, %v2768_v12  ;;  %v4247_v32 = vld [vmem:[#allocation4 + $0x30] sm:$0xff] }
 0x673   : > { %v4631_v29 = vmul.f32 %v10834_v45, %v4247_v32 }
 0x674   : > { %v3467_v19 = vmul.f32 1.442695, %v3043_v8  ;;  %v3469_v55 = vmul.f32 1.442695, %v3044_v27  ;;  %v3471_v7 = vmul.f32 1.442695, %v3045_v43 }
 0x675   : > { %v3473_v36 = vmul.f32 1.442695, %v3046_v5  ;;  %v5190_v22 = vpop.f32.mrf.mxu0 }
 0x676   : > { %7809 = vpow2.f32 %v3467_v19 }
 0x677   : > { %7811 = vpow2.f32 %v3469_v55  ;;  %v5479_v40 = vpop.f32.mrf.mxu1  ;;  %v5192_v41 = vpop.f32.mrf.mxu0 }
 0x678   : > { %7813 = vpow2.f32 %v3471_v7  ;;  %v5480_v35 = vadd.f32 %v5479_v40, %v5190_v22  ;;  %v2517_v41 = vmul.f32 1.442695, %v2408_v16  ;;  %v3648_v16 = vld [vmem:[#allocation3 + $0x28] sm:$0xff] }
 0x679   : > { %7815 = vpow2.f32 %v3473_v36  ;;  %v5481_v52 = vpop.f32.mrf.mxu1  ;;  %v5193_v23 = vpop.f32.mrf.mxu0 }
 0x67a   : > { %v5656_v12 = vadd.f32 %v5480_v35, %v4630_v9  ;;  %7817 = vpow2.f32 %v2517_v41 }
 0x67b   : > { %v11186_v37 = vpop.eup %7801  ;;  %v5482_v8 = vpop.f32.mrf.mxu1 }
 0x67c   : > { %v5195_v43 = vpop.f32.mrf.mxu0  ;;  %v11188_v27 = vpop.eup %7803  ;;  %5720 = vst [vmem:[#allocation4 + $0x160] sm:$0xff] %v5656_v12  ;;  %v5483_v5 = vadd.f32 %v5482_v8, %v5193_v23 }
 0x67d   : > { %v5484_v19 = vpop.f32.mrf.mxu1  ;;  %v3996_v61 = vadd.f32 %v11188_v27, %v11186_v37  ;;  %v11193_v55 = vpop.eup %7805 }
 0x67e   : > { %v5657_v7 = vadd.f32 %v5483_v5, %v4631_v29  ;;  %v11199_v22 = vpop.eup %7807  ;;  %v13284_v5 = vld [vmem:[#allocation306_spill] sm:$0xff] }
 0x67f   : > { %3834 = vadd.xlane.f32.xlu0 %v10382_v26  ;;  %v3997_v36 = vadd.f32 %v11193_v55, %v3996_v61  ;;  %v13283_v26 = vld [vmem:[#allocation265_spill] sm:$0xff] }
 0x680   : > { %5721 = vst [vmem:[#allocation4 + $0x30] sm:$0xff] %v5657_v7  ;;  %v2405_v49 = vsub.f32 %v13283_v26, %v13227_v31  ;;  %v13291_v26 = vld [vmem:[#allocation254_spill] sm:$0xff] }
 0x681   : > { %v11202_v45 = vadd.f32 %v11199_v22, %v3997_v36 }
 0x683   : > { %v7810_v40 = vpop.eup %7809 }
 0x684   : > { %v7812_v9 = vpop.eup %7811  ;;  %v4752_v35 = vpack.c.bf16 %v11128_v24, %v7810_v40  ;;  %v2511_v24 = vmul.f32 1.442695, %v2405_v49 }
 0x685   : > { %v7814_v32 = vpop.eup %7813  ;;  %v4753_v52 = vpack.c.bf16 %v11130_v53, %v7812_v9  ;;  %v3981_v23 = vadd.f32 %v7812_v9, %v7810_v40  ;;  %v3651_v53 = vld [vmem:[#allocation3 + $0x40] sm:$0xff] }
 0x686   : > { %v7816_v18 = vpop.eup %7815  ;;  %v4754_v12 = vpack.c.bf16 %v11133_v56, %v7814_v32  ;;  %7819 = vpow2.f32 %v2511_v24  ;;  %v3715_v31 = vmul.f32 %v10200_v34, %v3651_v53  ;;  %v13287_v40 = vld [vmem:[#allocation234_spill] sm:$0xff] }
 0x687   : > { %5252 = vmatprep.mubr.bf16.mxu0 %v4753_v52  ;;  %v4755_v8 = vpack.c.bf16 %v11137_v39, %v7816_v18  ;;  %v3982_v43 = vadd.f32 %v7814_v32, %v3981_v23  ;;  %v11213_v19 = vpop.eup %7817  ;;  %v3712_v41 = vmul.f32 %v13287_v40, %v3648_v16  ;;  %v13288_v34 = vld [vmem:[#allocation250_spill] sm:$0xff]  ;;  %v13289_v32 = vld [vmem:[#allocation251_spill] sm:$0xff]  ;;  %v13290_v23 = vld [vmem:[#allocation252_spill] sm:$0xff] }
 0x688   : > { %5253 = vmatmul.mubr.bf16.gmra.mxu0 %v4752_v35  ;;  %13285 = vst [vmem:[#allocation95_spill] sm:$0xff] %v11213_v19  ;;  %v13293_v16 = vld [vmem:[#allocation226_spill] sm:$0xff] }
 0x689   : > { %5541 = vmatprep.mubr.bf16.mxu1 %v4755_v8  ;;  %v11210_v29 = vadd.f32 %v7816_v18, %v3982_v43 }
 0x68a   : > { %5542 = vmatmul.mubr.bf16.gmra.mxu1 %v4754_v12 }
 0x68b   : > { %3819 = vadd.xlane.f32.xlu1 %v13284_v5 }
 0x693   : > { %v11219_v39 = vpop.eup %7819 }
 0x694   : > { %13286 = vst [vmem:[#allocation97_spill] sm:$0xff] %v11219_v39 }
 0x695   : > { %4511 = vperm.xlu0 %7273, %v11213_v19  }
 0x696   : > { %v3815_v56 = vpop.xlane.xlu0 %3814 }
 0x697   : > { %v4099_v61 = vadd.f32 %v3815_v56, %v3715_v31  ;;  %v13292_v56 = vld [vmem:[#allocation224_spill] sm:$0xff] }
 0x699   : > { %4164 = vst.msk [vmem:[#allocation3 + $0x40] sm:$0xff] %vm4155_vm2, %v4099_v61  ;;  %2812 = vperm.xlu0 %7273, %v10483_v59  }
 0x69c   : > { %4496 = vperm.xlu1 %7274, %v11219_v39  }
 0x69e   : > { %v11222_v7 = vpop.permute.xlu0 %4491 }
 0x6a0   : > { %2797 = vperm.xlu1 %7274, %v10257_v28  }
 0x6a2   : > { %v2793_v36 = vpop.permute.xlu0 %2792  ;;  %v3800_v9 = vpop.xlane.xlu1 %3799 }
 0x6a3   : > { %v3063_v35 = vsub.f32 %v13288_v34, %v2793_v36  ;;  %v3064_v52 = vsub.f32 %v13289_v32, %v2793_v36  ;;  %v3065_v18 = vsub.f32 %v13290_v23, %v2793_v36  ;;  %v3066_v49 = vsub.f32 %v13291_v26, %v2793_v36  ;;  %v13294_v34 = vld [vmem:[#allocation228_spill] sm:$0xff]  ;;  %v13295_v36 = vld [vmem:[#allocation229_spill] sm:$0xff]  ;;  %v4248_v23 = vld [vmem:[#allocation4 + $0x1e0] sm:$0xff] }
 0x6a4   : > { %v4096_v12 = vadd.f32 %v3800_v9, %v3712_v41 }
 0x6a5   : > { %v3507_v8 = vmul.f32 1.442695, %v3063_v35  ;;  %v3509_v43 = vmul.f32 1.442695, %v3064_v52  ;;  %v3511_v24 = vmul.f32 1.442695, %v3065_v18 }
 0x6a6   : > { %4161 = vst.msk [vmem:[#allocation3 + $0x28] sm:$0xff] %vm4155_vm2, %v4096_v12  ;;  %v11231_v5 = vpop.permute.xlu1 %4476  ;;  %v3513_v53 = vmul.f32 1.442695, %v3066_v49 }
 0x6a7   : > { %7821 = vpow2.f32 %v3507_v8  ;;  %v4632_v8 = vmul.f32 %v10988_v46, %v4248_v23 }
 0x6a8   : > { %7823 = vpow2.f32 %v3509_v43 }
 0x6a9   : > { %7825 = vpow2.f32 %v3511_v24  ;;  %v4249_v24 = vld [vmem:[#allocation4] sm:$0xff] }
 0x6aa   : > { %v2778_v31 = vpop.permute.xlu1 %2777  ;;  %7827 = vpow2.f32 %v3513_v53 }
 0x6ab   : > { %v3051_v61 = vsub.f32 %v13292_v56, %v2778_v31  ;;  %v3052_v40 = vsub.f32 %v13293_v16, %v2778_v31  ;;  %v3053_v32 = vsub.f32 %v13294_v34, %v2778_v31  ;;  %v3054_v41 = vsub.f32 %v13295_v36, %v2778_v31 }
 0x6ad   : > { %v3483_v9 = vmul.f32 1.442695, %v3051_v61  ;;  %v3485_v35 = vmul.f32 1.442695, %v3052_v40  ;;  %v3487_v52 = vmul.f32 1.442695, %v3053_v32  ;;  %v4633_v32 = vmul.f32 %v10846_v51, %v4249_v24 }
 0x6ae   : > { %v3489_v18 = vmul.f32 1.442695, %v3054_v41  ;;  %v5198_v26 = vpop.f32.mrf.mxu0  ;;  %v4250_v41 = vld [vmem:[#allocation4 + $0xf0] sm:$0xff]  ;;  %v4251_v24 = vld [vmem:[#allocation4 + $0x8] sm:$0xff] }
 0x6af   : > { %7829 = vpow2.f32 %v3483_v9 }
 0x6b0   : > { %7831 = vpow2.f32 %v3485_v35  ;;  %v5487_v49 = vpop.f32.mrf.mxu1  ;;  %v5200_v12 = vpop.f32.mrf.mxu0 }
 0x6b1   : > { %7833 = vpow2.f32 %v3487_v52  ;;  %v5488_v43 = vadd.f32 %v5487_v49, %v5198_v26 }
 0x6b2   : > { %7835 = vpow2.f32 %v3489_v18  ;;  %v5489_v56 = vpop.f32.mrf.mxu1  ;;  %v5201_v16 = vpop.f32.mrf.mxu0  ;;  %v2410_v18 = vsub.f32 %v10344_v21, %v10347_v57 }
 0x6b3   : > { %v5658_v31 = vadd.f32 %v5488_v43, %v4632_v8  ;;  %v4634_v8 = vmul.f32 %v11015_v44, %v4250_v41 }
 0x6b4   : > { %v11238_v53 = vpop.eup %7821  ;;  %v5490_v61 = vpop.f32.mrf.mxu1  ;;  %v2521_v57 = vmul.f32 1.442695, %v2410_v18 }
 0x6b5   : > { %v5203_v40 = vpop.f32.mrf.mxu0  ;;  %v11240_v34 = vpop.eup %7823  ;;  %5722 = vst [vmem:[#allocation4 + $0x1e0] sm:$0xff] %v5658_v31  ;;  %v5491_v36 = vadd.f32 %v5490_v61, %v5201_v16 }
 0x6b6   : > { %v5492_v9 = vpop.f32.mrf.mxu1  ;;  %v4006_v35 = vadd.f32 %v11240_v34, %v11238_v53  ;;  %v11245_v52 = vpop.eup %7825  ;;  %7837 = vpow2.f32 %v2521_v57 }
 0x6b7   : > { %v5206_v46 = vpop.f32.mrf.mxu0  ;;  %v5659_v23 = vadd.f32 %v5491_v36, %v4633_v32  ;;  %v11251_v12 = vpop.eup %7827  ;;  %v4635_v36 = vmul.f32 %v10863_v2, %v4251_v24 }
 0x6b8   : > { %v5495_v26 = vpop.f32.mrf.mxu1  ;;  %3844 = vadd.xlane.f32.xlu0 %v10450_v17  ;;  %v4007_v51 = vadd.f32 %v11245_v52, %v4006_v35 }
 0x6b9   : > { %v5208_v49 = vpop.f32.mrf.mxu0  ;;  %5723 = vst [vmem:[#allocation4] sm:$0xff] %v5659_v23  ;;  %v5496_v43 = vadd.f32 %v5495_v26, %v5206_v46  ;;  %v4252_v46 = vld [vmem:[#allocation4 + $0x148] sm:$0xff] }
 0x6ba   : > { %v5497_v56 = vpop.f32.mrf.mxu1  ;;  %v11255_v31 = vadd.f32 %v11251_v12, %v4007_v51 }
 0x6bb   : > { %v5209_v16 = vpop.f32.mrf.mxu0  ;;  %v5660_v61 = vadd.f32 %v5496_v43, %v4634_v8  ;;  %v13296_v8 = vld [vmem:[#allocation296_spill] sm:$0xff] }
 0x6bc   : > { %v7830_v21 = vpop.eup %7829  ;;  %v5498_v40 = vpop.f32.mrf.mxu1  ;;  %v2407_v18 = vsub.f32 %v13296_v8, %v13254_v50  ;;  %v4255_v8 = vld [vmem:[#allocation4 + $0xc8] sm:$0xff] }
 0x6bd   : > { %v5211_v32 = vpop.f32.mrf.mxu0  ;;  %v7832_v17 = vpop.eup %7831  ;;  %5724 = vst [vmem:[#allocation4 + $0xf0] sm:$0xff] %v5660_v61  ;;  %v5499_v9 = vadd.f32 %v5498_v40, %v5209_v16  ;;  %v4756_v44 = vpack.c.bf16 %v11186_v37, %v7830_v21  ;;  %v4636_v61 = vmul.f32 %v11091_v42, %v4252_v46 }
 0x6be   : > { %v7834_v41 = vpop.eup %7833  ;;  %v5500_v35 = vpop.f32.mrf.mxu1  ;;  %v4757_v26 = vpack.c.bf16 %v11188_v27, %v7832_v17  ;;  %v3991_v49 = vadd.f32 %v7832_v17, %v7830_v21  ;;  %v4253_v27 = vld [vmem:[#allocation4 + $0x1d0] sm:$0xff]  ;;  %v2515_v17 = vmul.f32 1.442695, %v2407_v18 }
 0x6bf   : > { %v5214_v23 = vpop.f32.mrf.mxu0  ;;  %v7836_v51 = vpop.eup %7835  ;;  %v5661_v43 = vadd.f32 %v5499_v9, %v4635_v36  ;;  %v4758_v56 = vpack.c.bf16 %v11193_v55, %v7834_v41 }
 0x6c0   : > { %v5503_v2 = vpop.f32.mrf.mxu1  ;;  %5260 = vmatprep.mubr.bf16.mxu0 %v4757_v26  ;;  %v4759_v37 = vpack.c.bf16 %v11199_v22, %v7836_v51  ;;  %v3992_v16 = vadd.f32 %v7834_v41, %v3991_v49  ;;  %v13297_v22 = vld [vmem:[#allocation66_spill] sm:$0xff]  ;;  %7839 = vpow2.f32 %v2515_v17 }
 0x6c1   : > { %v5216_v24 = vpop.f32.mrf.mxu0  ;;  %5725 = vst [vmem:[#allocation4 + $0x8] sm:$0xff] %v5661_v43  ;;  %v5504_v40 = vadd.f32 %v5503_v2, %v5214_v23  ;;  %5261 = vmatmul.mubr.bf16.gmra.mxu0 %v4756_v44  ;;  %v4637_v9 = vmul.f32 %v13297_v22, %v4253_v27  ;;  %v4254_v41 = vld [vmem:[#allocation4 + $0x100] sm:$0xff]  ;;  %v13299_v27 = vld [vmem:[#allocation40_spill] sm:$0xff] }
 0x6c2   : > { %v5505_v21 = vpop.f32.mrf.mxu1  ;;  %5549 = vmatprep.mubr.bf16.mxu1 %v4759_v37  ;;  %v11265_v50 = vadd.f32 %v7836_v51, %v3992_v16  ;;  %v4638_v49 = vmul.f32 %v11113_v54, %v4254_v41  ;;  %v4639_v16 = vmul.f32 %v11013_v1, %v4255_v8  ;;  %v3650_v8 = vld [vmem:[#allocation3 + $0x38] sm:$0xff] }
 0x6c3   : > { %v5217_v32 = vpop.f32.mrf.mxu0  ;;  %v5662_v55 = vadd.f32 %v5504_v40, %v4636_v61  ;;  %5550 = vmatmul.mubr.bf16.gmra.mxu1 %v4758_v56  ;;  %v11270_v37 = vpop.eup %7837 }
 0x6c4   : > { %v5506_v57 = vpop.f32.mrf.mxu1  ;;  %3829 = vadd.xlane.f32.xlu1 %v10235_v13  ;;  %v3653_v13 = vld [vmem:[#allocation3 + $0x50] sm:$0xff]  ;;  %13298 = vst [vmem:[#allocation82_spill] sm:$0xff] %v11270_v37 }
 0x6c5   : > { %v5219_v36 = vpop.f32.mrf.mxu0  ;;  %5726 = vst [vmem:[#allocation4 + $0x148] sm:$0xff] %v5662_v55  ;;  %v5507_v42 = vadd.f32 %v5506_v57, %v5217_v32  ;;  %v3717_v54 = vmul.f32 %v13299_v27, %v3653_v13  ;;  %v4256_v55 = vld [vmem:[#allocation4 + $0x40] sm:$0xff] }
 0x6c6   : > { %v5508_v46 = vpop.f32.mrf.mxu1  ;;  %v13300_v36 = vld [vmem:[#allocation55_spill] sm:$0xff] }
 0x6c7   : > { %v5222_v44 = vpop.f32.mrf.mxu0  ;;  %v5663_v35 = vadd.f32 %v5507_v42, %v4637_v9  ;;  %v4640_v42 = vmul.f32 %v11179_v60, %v4256_v55  ;;  %v4257_v46 = vld [vmem:[#allocation4 + $0x1f8] sm:$0xff]  ;;  %v13307_v55 = vld [vmem:[#allocation266_spill] sm:$0xff] }
 0x6c9   : > { %v5511_v23 = vpop.f32.mrf.mxu1  ;;  %v5224_v26 = vpop.f32.mrf.mxu0  ;;  %5727 = vst [vmem:[#allocation4 + $0x1d0] sm:$0xff] %v5663_v35 }
 0x6ca   : > { %v5512_v51 = vadd.f32 %v5511_v23, %v5222_v44 }
 0x6cb   : > { %v5513_v18 = vpop.f32.mrf.mxu1  ;;  %v5225_v43 = vpop.f32.mrf.mxu0 }
 0x6cc   : > { %v5664_v56 = vadd.f32 %v5512_v51, %v4638_v49  ;;  %v4641_v18 = vmul.f32 %v11101_v4, %v4257_v46 }
 0x6cd   : > { %v5514_v2 = vpop.f32.mrf.mxu1  ;;  %v5227_v24 = vpop.f32.mrf.mxu0 }
 0x6ce   : > { %5728 = vst [vmem:[#allocation4 + $0x100] sm:$0xff] %v5664_v56  ;;  %v5515_v61 = vadd.f32 %v5514_v2, %v5225_v43  ;;  %4521 = vperm.xlu0 %7273, %v11270_v37   ;;  %v11277_v22 = vpop.eup %7839  ;;  %v13302_v56 = vld [vmem:[#allocation26_spill] sm:$0xff]  ;;  %v13303_v24 = vld [vmem:[#allocation263_spill] sm:$0xff] }
 0x6cf   : > { %v5516_v40 = vpop.f32.mrf.mxu1  ;;  %v3825_v32 = vpop.xlane.xlu0 %3824  ;;  %13301 = vst [vmem:[#allocation84_spill] sm:$0xff] %v11277_v22 }
 0x6d0   : > { %v5665_v21 = vadd.f32 %v5515_v61, %v4639_v16  ;;  %v4101_v17 = vadd.f32 %v3825_v32, %v3717_v54  ;;  %v3714_v16 = vmul.f32 %v13303_v24, %v3650_v8  ;;  %v13304_v40 = vld [vmem:[#allocation257_spill] sm:$0xff]  ;;  %v13306_v32 = vld [vmem:[#allocation260_spill] sm:$0xff]  ;;  %v13310_v8 = vld [vmem:[#allocation246_spill] sm:$0xff] }
 0x6d1   : > { %v13305_v54 = vld [vmem:[#allocation261_spill] sm:$0xff] }
 0x6d2   : > { %5729 = vst [vmem:[#allocation4 + $0xc8] sm:$0xff] %v5665_v21  ;;  %v5230_v57 = vpop.f32.mrf.mxu0  ;;  %4166 = vst.msk [vmem:[#allocation3 + $0x50] sm:$0xff] %vm4155_vm2, %v4101_v17  ;;  %2822 = vperm.xlu0 %7273, %v13300_v36  }
 0x6d4   : > { %v5519_v1 = vpop.f32.mrf.mxu1  ;;  %v5232_v9 = vpop.f32.mrf.mxu0 }
 0x6d5   : > { %v5520_v41 = vadd.f32 %v5519_v1, %v5230_v57  ;;  %4506 = vperm.xlu1 %7274, %v11277_v22  }
 0x6d6   : > { %v5521_v44 = vpop.f32.mrf.mxu1  ;;  %v5233_v35 = vpop.f32.mrf.mxu0 }
 0x6d7   : > { %v5666_v23 = vadd.f32 %v5520_v41, %v4640_v42  ;;  %v11281_v26 = vpop.permute.xlu0 %4501 }
 0x6d8   : > { %v5522_v49 = vpop.f32.mrf.mxu1  ;;  %v5235_v51 = vpop.f32.mrf.mxu0 }
 0x6d9   : > { %5730 = vst [vmem:[#allocation4 + $0x40] sm:$0xff] %v5666_v23  ;;  %v5523_v43 = vadd.f32 %v5522_v49, %v5233_v35  ;;  %2807 = vperm.xlu1 %7274, %v13302_v56   ;;  %v13308_v35 = vld [vmem:[#allocation242_spill] sm:$0xff]  ;;  %v13309_v49 = vld [vmem:[#allocation244_spill] sm:$0xff] }
 0x6da   : > { %v5524_v13 = vpop.f32.mrf.mxu1 }
 0x6db   : > { %v5667_v60 = vadd.f32 %v5523_v43, %v4641_v18  ;;  %v2803_v2 = vpop.permute.xlu0 %2802  ;;  %v3810_v61 = vpop.xlane.xlu1 %3809  ;;  %v13311_v43 = vld [vmem:[#allocation247_spill] sm:$0xff] }
 0x6dc   : > { %v3071_v27 = vsub.f32 %v13304_v40, %v2803_v2  ;;  %v3072_v21 = vsub.f32 %v13305_v54, %v2803_v2  ;;  %v3073_v17 = vsub.f32 %v13306_v32, %v2803_v2  ;;  %v3074_v57 = vsub.f32 %v13307_v55, %v2803_v2 }
 0x6dd   : > { %5731 = vst [vmem:[#allocation4 + $0x1f8] sm:$0xff] %v5667_v60  ;;  %v4098_v4 = vadd.f32 %v3810_v61, %v3714_v16 }
 0x6de   : > { %v3523_v1 = vmul.f32 1.442695, %v3071_v27  ;;  %v3525_v9 = vmul.f32 1.442695, %v3072_v21  ;;  %v3527_v42 = vmul.f32 1.442695, %v3073_v17 }
 0x6df   : > { %4163 = vst.msk [vmem:[#allocation3 + $0x38] sm:$0xff] %vm4155_vm2, %v4098_v4  ;;  %v11291_v41 = vpop.permute.xlu1 %4486  ;;  %v3529_v46 = vmul.f32 1.442695, %v3074_v57  ;;  %v13312_v21 = vld [vmem:[#allocation46_spill] sm:$0xff]  ;;  %v13313_v17 = vld [vmem:[#allocation161_spill] sm:$0xff] }
 0x6e0   : > { %7841 = vpow2.f32 %v3523_v1  ;;  %v2412_v32 = vsub.f32 %v13312_v21, %v10414_v15  ;;  %v13314_v15 = vld [vmem:[#allocation318_spill] sm:$0xff]  ;;  %v13318_v21 = vld [vmem:[#allocation169_spill] sm:$0xff] }
 0x6e1   : > { %7843 = vpow2.f32 %v3525_v9 }
 0x6e2   : > { %7845 = vpow2.f32 %v3527_v42  ;;  %v2525_v9 = vmul.f32 1.442695, %v2412_v32 }
 0x6e3   : > { %v2788_v44 = vpop.permute.xlu1 %2787  ;;  %7847 = vpow2.f32 %v3529_v46 }
 0x6e4   : > { %v3059_v23 = vsub.f32 %v13308_v35, %v2788_v44  ;;  %v3060_v51 = vsub.f32 %v13309_v49, %v2788_v44  ;;  %v3061_v18 = vsub.f32 %v13310_v8, %v2788_v44  ;;  %v3062_v13 = vsub.f32 %v13311_v43, %v2788_v44 }
 0x6e6   : > { %v3499_v60 = vmul.f32 1.442695, %v3059_v23  ;;  %v3501_v2 = vmul.f32 1.442695, %v3060_v51  ;;  %v3503_v24 = vmul.f32 1.442695, %v3061_v18  ;;  %v2409_v51 = vsub.f32 %v13314_v15, %v13273_v10 }
 0x6e7   : > { %v3505_v16 = vmul.f32 1.442695, %v3062_v13  ;;  %v13317_v10 = vld [vmem:[#allocation27_spill] sm:$0xff] }
 0x6e8   : > { %7849 = vpow2.f32 %v3499_v60  ;;  %v13315_v60 = vld [vmem:[#allocation39_spill] sm:$0xff] }
 0x6e9   : > { %7851 = vpow2.f32 %v3501_v2 }
 0x6ea   : > { %7853 = vpow2.f32 %v3503_v24 }
 0x6eb   : > { %7855 = vpow2.f32 %v3505_v16 }
 0x6ec   : > { %7857 = vpow2.f32 %v2525_v9 }
 0x6ed   : > { %v11297_v61 = vpop.eup %7841 }
 0x6ee   : > { %v11299_v40 = vpop.eup %7843 }
 0x6ef   : > { %v4016_v27 = vadd.f32 %v11299_v40, %v11297_v61  ;;  %v11303_v54 = vpop.eup %7845 }
 0x6f0   : > { %v11309_v57 = vpop.eup %7847 }
 0x6f1   : > { %3854 = vadd.xlane.f32.xlu0 %v13313_v17  ;;  %v4017_v55 = vadd.f32 %v11303_v54, %v4016_v27 }
 0x6f3   : > { %v11312_v4 = vadd.f32 %v11309_v57, %v4017_v55 }
 0x6f5   : > { %v7850_v1 = vpop.eup %7849 }
 0x6f6   : > { %v7852_v42 = vpop.eup %7851  ;;  %v4760_v46 = vpack.c.bf16 %v11238_v53, %v7850_v1  ;;  %v2519_v53 = vmul.f32 1.442695, %v2409_v51  ;;  %v3652_v51 = vld [vmem:[#allocation3 + $0x48] sm:$0xff] }
 0x6f7   : > { %v7854_v44 = vpop.eup %7853  ;;  %v4761_v35 = vpack.c.bf16 %v11240_v34, %v7852_v42  ;;  %v4001_v23 = vadd.f32 %v7852_v42, %v7850_v1  ;;  %v3655_v34 = vld [vmem:[#allocation3 + $0x60] sm:$0xff]  ;;  %v4259_v42 = vld [vmem:[#allocation4 + $0x128] sm:$0xff] }
 0x6f8   : > { %v7856_v49 = vpop.eup %7855  ;;  %v4762_v8 = vpack.c.bf16 %v11245_v52, %v7854_v44  ;;  %7859 = vpow2.f32 %v2519_v53  ;;  %v3719_v52 = vmul.f32 %v13317_v10, %v3655_v34  ;;  %v4260_v53 = vld [vmem:[#allocation4 + $0x1a0] sm:$0xff] }
 0x6f9   : > { %5268 = vmatprep.mubr.bf16.mxu0 %v4761_v35  ;;  %v4763_v18 = vpack.c.bf16 %v11251_v12, %v7856_v49  ;;  %v4002_v43 = vadd.f32 %v7854_v44, %v4001_v23  ;;  %v11323_v2 = vpop.eup %7857  ;;  %v4258_v12 = vld [vmem:[#allocation4 + $0x20] sm:$0xff] }
 0x6fa   : > { %5269 = vmatmul.mubr.bf16.gmra.mxu0 %v4760_v46  ;;  %13316 = vst [vmem:[#allocation83_spill] sm:$0xff] %v11323_v2  ;;  %v4642_v1 = vmul.f32 %v11231_v5, %v4258_v12 }
 0x6fb   : > { %5557 = vmatprep.mubr.bf16.mxu1 %v4763_v18  ;;  %v11320_v13 = vadd.f32 %v7856_v49, %v4002_v43  ;;  %v13320_v43 = vld [vmem:[#allocation147_spill] sm:$0xff] }
 0x6fc   : > { %5558 = vmatmul.mubr.bf16.gmra.mxu1 %v4762_v8  ;;  %v4643_v8 = vmul.f32 %v11170_v48, %v4259_v42  ;;  %v4644_v42 = vmul.f32 %v11291_v41, %v4260_v53 }
 0x6fd   : > { %3839 = vadd.xlane.f32.xlu1 %v13315_v60 }
 0x705   : > { %v11329_v32 = vpop.eup %7859 }
 0x706   : > { %13319 = vst [vmem:[#allocation231_spill] sm:$0xff] %v11329_v32 }
 0x707   : > { %4531 = vperm.xlu0 %7273, %v11323_v2  }
 0x708   : > { %v3835_v24 = vpop.xlane.xlu0 %3834 }
 0x709   : > { %v4103_v16 = vadd.f32 %v3835_v24, %v3719_v52  ;;  %v13321_v52 = vld [vmem:[#allocation299_spill] sm:$0xff] }
 0x70a   : > { %v3716_v24 = vmul.f32 %v13321_v52, %v3652_v51 }
 0x70b   : > { %v5238_v27 = vpop.f32.mrf.mxu0  ;;  %4168 = vst.msk [vmem:[#allocation3 + $0x60] sm:$0xff] %vm4155_vm2, %v4103_v16  ;;  %2832 = vperm.xlu0 %7273, %v13318_v21  }
 0x70d   : > { %v5527_v17 = vpop.f32.mrf.mxu1  ;;  %v5240_v55 = vpop.f32.mrf.mxu0 }
 0x70e   : > { %v5528_v9 = vadd.f32 %v5527_v17, %v5238_v27  ;;  %4516 = vperm.xlu1 %7274, %v11329_v32   ;;  %v13322_v17 = vld [vmem:[#allocation274_spill] sm:$0xff] }
 0x70f   : > { %v5529_v46 = vpop.f32.mrf.mxu1  ;;  %v5241_v44 = vpop.f32.mrf.mxu0 }
 0x710   : > { %v5668_v35 = vadd.f32 %v5528_v9, %v4642_v1  ;;  %v11333_v23 = vpop.permute.xlu0 %4511  ;;  %v13323_v1 = vld [vmem:[#allocation276_spill] sm:$0xff]  ;;  %v13324_v46 = vld [vmem:[#allocation275_spill] sm:$0xff] }
 0x711   : > { %v5530_v49 = vpop.f32.mrf.mxu1  ;;  %v5243_v15 = vpop.f32.mrf.mxu0 }
 0x712   : > { %5732 = vst [vmem:[#allocation4 + $0x20] sm:$0xff] %v5668_v35  ;;  %v5531_v18 = vadd.f32 %v5530_v49, %v5241_v44  ;;  %2817 = vperm.xlu1 %7274, %v13320_v43   ;;  %v13325_v35 = vld [vmem:[#allocation277_spill] sm:$0xff] }
 0x713   : > { %v5532_v5 = vpop.f32.mrf.mxu1  ;;  %v5246_v60 = vpop.f32.mrf.mxu0 }
 0x714   : > { %v5669_v34 = vadd.f32 %v5531_v18, %v4643_v8  ;;  %v2813_v10 = vpop.permute.xlu0 %2812  ;;  %v3820_v16 = vpop.xlane.xlu1 %3819  ;;  %v4261_v8 = vld [vmem:[#allocation4 + $0x1f0] sm:$0xff] }
 0x715   : > { %v5535_v12 = vpop.f32.mrf.mxu1  ;;  %v5248_v27 = vpop.f32.mrf.mxu0  ;;  %v3079_v55 = vsub.f32 %v13322_v17, %v2813_v10  ;;  %v3080_v9 = vsub.f32 %v13323_v1, %v2813_v10  ;;  %v3081_v48 = vsub.f32 %v13324_v46, %v2813_v10  ;;  %v3082_v49 = vsub.f32 %v13325_v35, %v2813_v10 }
 0x716   : > { %5733 = vst [vmem:[#allocation4 + $0x128] sm:$0xff] %v5669_v34  ;;  %v5536_v44 = vadd.f32 %v5535_v12, %v5246_v60  ;;  %v4100_v15 = vadd.f32 %v3820_v16, %v3716_v24  ;;  %v4645_v41 = vmul.f32 %v11222_v7, %v4261_v8  ;;  %v13326_v16 = vld [vmem:[#allocation253_spill] sm:$0xff] }
 0x717   : > { %v5537_v18 = vpop.f32.mrf.mxu1  ;;  %v5249_v5 = vpop.f32.mrf.mxu0  ;;  %v3539_v51 = vmul.f32 1.442695, %v3079_v55  ;;  %v3541_v52 = vmul.f32 1.442695, %v3080_v9  ;;  %v3543_v27 = vmul.f32 1.442695, %v3081_v48 }
 0x718   : > { %v5670_v2 = vadd.f32 %v5536_v44, %v4644_v42  ;;  %4165 = vst.msk [vmem:[#allocation3 + $0x48] sm:$0xff] %vm4155_vm2, %v4100_v15  ;;  %v11344_v17 = vpop.permute.xlu1 %4496  ;;  %v3545_v60 = vmul.f32 1.442695, %v3082_v49  ;;  %v13327_v55 = vld [vmem:[#allocation255_spill] sm:$0xff]  ;;  %v13328_v48 = vld [vmem:[#allocation256_spill] sm:$0xff]  ;;  %v13329_v44 = vld [vmem:[#allocation258_spill] sm:$0xff] }
 0x719   : > { %v5538_v1 = vpop.f32.mrf.mxu1  ;;  %7861 = vpow2.f32 %v3539_v51  ;;  %v5251_v46 = vpop.f32.mrf.mxu0 }
 0x71a   : > { %5734 = vst [vmem:[#allocation4 + $0x1a0] sm:$0xff] %v5670_v2  ;;  %v5539_v53 = vadd.f32 %v5538_v1, %v5249_v5  ;;  %7863 = vpow2.f32 %v3541_v52  ;;  %v13330_v52 = vld [vmem:[#allocation35_spill] sm:$0xff]  ;;  %v13331_v1 = vld [vmem:[#allocation42_spill] sm:$0xff] }
 0x71b   : > { %v5540_v34 = vpop.f32.mrf.mxu1  ;;  %7865 = vpow2.f32 %v3543_v27  ;;  %v2414_v27 = vsub.f32 %v13330_v52, %v10483_v59  ;;  %v13332_v59 = vld [vmem:[#allocation155_spill] sm:$0xff] }
 0x71c   : > { %v5671_v10 = vadd.f32 %v5539_v53, %v4645_v41  ;;  %v2798_v24 = vpop.permute.xlu1 %2797  ;;  %7867 = vpow2.f32 %v3545_v60 }
 0x71d   : > { %v3067_v12 = vsub.f32 %v13326_v16, %v2798_v24  ;;  %v3068_v9 = vsub.f32 %v13327_v55, %v2798_v24  ;;  %v3069_v42 = vsub.f32 %v13328_v48, %v2798_v24  ;;  %v3070_v35 = vsub.f32 %v13329_v44, %v2798_v24 }
 0x71e   : > { %5735 = vst [vmem:[#allocation4 + $0x1f0] sm:$0xff] %v5671_v10  ;;  %v2529_v34 = vmul.f32 1.442695, %v2414_v27  ;;  %v2411_v48 = vsub.f32 %v13332_v59, %v10257_v28  ;;  %v13335_v28 = vld [vmem:[#allocation160_spill] sm:$0xff]  ;;  %v4262_v27 = vld [vmem:[#allocation4 + $0xe8] sm:$0xff] }
 0x71f   : > { %v3515_v15 = vmul.f32 1.442695, %v3067_v12  ;;  %v3517_v7 = vmul.f32 1.442695, %v3068_v9  ;;  %v3519_v2 = vmul.f32 1.442695, %v3069_v42 }
 0x720   : > { %v3521_v8 = vmul.f32 1.442695, %v3070_v35 }
 0x721   : > { %7869 = vpow2.f32 %v3515_v15 }
 0x722   : > { %7871 = vpow2.f32 %v3517_v7  ;;  %v13333_v7 = vld [vmem:[#allocation29_spill] sm:$0xff] }
 0x723   : > { %7873 = vpow2.f32 %v3519_v2 }
 0x724   : > { %7875 = vpow2.f32 %v3521_v8 }
 0x725   : > { %7877 = vpow2.f32 %v2529_v34 }
 0x726   : > { %v11351_v49 = vpop.eup %7861 }
 0x727   : > { %v11353_v18 = vpop.eup %7863 }
 0x728   : > { %v4026_v5 = vadd.f32 %v11353_v18, %v11351_v49  ;;  %v11357_v51 = vpop.eup %7865 }
 0x729   : > { %v11363_v41 = vpop.eup %7867 }
 0x72a   : > { %3864 = vadd.xlane.f32.xlu0 %v13331_v1  ;;  %v4027_v46 = vadd.f32 %v11357_v51, %v4026_v5 }
 0x72c   : > { %v11366_v53 = vadd.f32 %v11363_v41, %v4027_v46 }
 0x72e   : > { %v7870_v60 = vpop.eup %7869 }
 0x72f   : > { %v7872_v10 = vpop.eup %7871  ;;  %v4764_v24 = vpack.c.bf16 %v11297_v61, %v7870_v60  ;;  %v2523_v61 = vmul.f32 1.442695, %v2411_v48 }
 0x730   : > { %v7874_v16 = vpop.eup %7873  ;;  %v4765_v12 = vpack.c.bf16 %v11299_v40, %v7872_v10  ;;  %v4011_v55 = vadd.f32 %v7872_v10, %v7870_v60  ;;  %v3657_v40 = vld [vmem:[#allocation3 + $0x70] sm:$0xff]  ;;  %v3654_v10 = vld [vmem:[#allocation3 + $0x58] sm:$0xff] }
 0x731   : > { %v7876_v9 = vpop.eup %7875  ;;  %v4766_v42 = vpack.c.bf16 %v11303_v54, %v7874_v16  ;;  %7879 = vpow2.f32 %v2523_v61  ;;  %v3721_v54 = vmul.f32 %v13335_v28, %v3657_v40  ;;  %v13340_v40 = vld [vmem:[#allocation282_spill] sm:$0xff] }
 0x732   : > { %5276 = vmatprep.mubr.bf16.mxu0 %v4765_v12  ;;  %v4767_v44 = vpack.c.bf16 %v11309_v57, %v7876_v9  ;;  %v4012_v35 = vadd.f32 %v7874_v16, %v4011_v55  ;;  %v11377_v2 = vpop.eup %7877  ;;  %v13336_v57 = vld [vmem:[#allocation189_spill] sm:$0xff] }
 0x733   : > { %5277 = vmatmul.mubr.bf16.gmra.mxu0 %v4764_v24  ;;  %13334 = vst [vmem:[#allocation85_spill] sm:$0xff] %v11377_v2  ;;  %v4646_v24 = vmul.f32 %v11344_v17, %v4262_v27  ;;  %v13338_v12 = vld [vmem:[#allocation49_spill] sm:$0xff] }
 0x734   : > { %5565 = vmatprep.mubr.bf16.mxu1 %v4767_v44  ;;  %v11374_v15 = vadd.f32 %v7876_v9, %v4012_v35  ;;  %v4263_v55 = vld [vmem:[#allocation4 + $0x78] sm:$0xff] }
 0x735   : > { %5566 = vmatmul.mubr.bf16.gmra.mxu1 %v4766_v42  ;;  %v13339_v44 = vld [vmem:[#allocation321_spill] sm:$0xff]  ;;  %v4647_v17 = vmul.f32 %v11281_v26, %v4263_v55  ;;  %v13344_v55 = vld [vmem:[#allocation267_spill] sm:$0xff] }
 0x736   : > { %3849 = vadd.xlane.f32.xlu1 %v13333_v7  ;;  %v3718_v35 = vmul.f32 %v13339_v44, %v3654_v10 }
 0x73e   : > { %v11383_v52 = vpop.eup %7879 }
 0x73f   : > { %13337 = vst [vmem:[#allocation268_spill] sm:$0xff] %v11383_v52 }
 0x740   : > { %4541 = vperm.xlu0 %7273, %v11377_v2  }
 0x741   : > { %v3845_v8 = vpop.xlane.xlu0 %3844 }
 0x742   : > { %v4105_v5 = vadd.f32 %v3845_v8, %v3721_v54  ;;  %v13341_v54 = vld [vmem:[#allocation284_spill] sm:$0xff] }
 0x744   : > { %4170 = vst.msk [vmem:[#allocation3 + $0x70] sm:$0xff] %vm4155_vm2, %v4105_v5  ;;  %2842 = vperm.xlu0 %7273, %v13336_v57   ;;  %v13342_v5 = vld [vmem:[#allocation283_spill] sm:$0xff] }
 0x747   : > { %4526 = vperm.xlu1 %7274, %v11383_v52  }
 0x748   : > { %v5254_v1 = vpop.f32.mrf.mxu0 }
 0x749   : > { %v11386_v46 = vpop.permute.xlu0 %4521 }
 0x74a   : > { %v5543_v60 = vpop.f32.mrf.mxu1  ;;  %v5256_v34 = vpop.f32.mrf.mxu0 }
 0x74b   : > { %v5544_v16 = vadd.f32 %v5543_v60, %v5254_v1  ;;  %2827 = vperm.xlu1 %7274, %v13338_v12   ;;  %v13343_v1 = vld [vmem:[#allocation286_spill] sm:$0xff] }
 0x74c   : > { %v5545_v9 = vpop.f32.mrf.mxu1  ;;  %v5257_v59 = vpop.f32.mrf.mxu0 }
 0x74d   : > { %v5672_v48 = vadd.f32 %v5544_v16, %v4646_v24  ;;  %v2823_v42 = vpop.permute.xlu0 %2822  ;;  %v3830_v61 = vpop.xlane.xlu1 %3829 }
 0x74e   : > { %v5546_v7 = vpop.f32.mrf.mxu1  ;;  %v3087_v28 = vsub.f32 %v13340_v40, %v2823_v42  ;;  %v3088_v8 = vsub.f32 %v13341_v54, %v2823_v42  ;;  %v3089_v34 = vsub.f32 %v13342_v5, %v2823_v42  ;;  %v5259_v2 = vpop.f32.mrf.mxu0  ;;  %v3090_v60 = vsub.f32 %v13343_v1, %v2823_v42 }
 0x74f   : > { %5736 = vst [vmem:[#allocation4 + $0xe8] sm:$0xff] %v5672_v48  ;;  %v5547_v27 = vadd.f32 %v5546_v7, %v5257_v59  ;;  %v4102_v9 = vadd.f32 %v3830_v61, %v3718_v35  ;;  %v13345_v48 = vld [vmem:[#allocation271_spill] sm:$0xff]  ;;  %v13346_v35 = vld [vmem:[#allocation270_spill] sm:$0xff]  ;;  %v13347_v7 = vld [vmem:[#allocation273_spill] sm:$0xff] }
 0x750   : > { %v3555_v24 = vmul.f32 1.442695, %v3087_v28  ;;  %v3557_v16 = vmul.f32 1.442695, %v3088_v8  ;;  %v5548_v37 = vpop.f32.mrf.mxu1  ;;  %v3559_v44 = vmul.f32 1.442695, %v3089_v34 }
 0x751   : > { %v5673_v10 = vadd.f32 %v5547_v27, %v4647_v17  ;;  %4167 = vst.msk [vmem:[#allocation3 + $0x58] sm:$0xff] %vm4155_vm2, %v4102_v9  ;;  %v11397_v40 = vpop.permute.xlu1 %4506  ;;  %v3561_v2 = vmul.f32 1.442695, %v3090_v60  ;;  %v13348_v60 = vld [vmem:[#allocation56_spill] sm:$0xff] }
 0x752   : > { %7881 = vpow2.f32 %v3555_v24  ;;  %v2416_v9 = vsub.f32 %v13348_v60, %v13300_v36  ;;  %v13349_v24 = vld [vmem:[#allocation50_spill] sm:$0xff]  ;;  %v13350_v36 = vld [vmem:[#allocation41_spill] sm:$0xff] }
 0x753   : > { %5737 = vst [vmem:[#allocation4 + $0x78] sm:$0xff] %v5673_v10  ;;  %7883 = vpow2.f32 %v3557_v16 }
 0x754   : > { %7885 = vpow2.f32 %v3559_v44 }
 0x755   : > { %v2808_v26 = vpop.permute.xlu1 %2807  ;;  %7887 = vpow2.f32 %v3561_v2 }
 0x756   : > { %v3075_v59 = vsub.f32 %v13344_v55, %v2808_v26  ;;  %v3076_v42 = vsub.f32 %v13345_v48, %v2808_v26  ;;  %v3077_v61 = vsub.f32 %v13346_v35, %v2808_v26  ;;  %v3078_v37 = vsub.f32 %v13347_v7, %v2808_v26 }
 0x757   : > { %v2533_v26 = vmul.f32 1.442695, %v2416_v9  ;;  %v2413_v7 = vsub.f32 %v13350_v36, %v13302_v56  ;;  %v13353_v56 = vld [vmem:[#allocation36_spill] sm:$0xff] }
 0x758   : > { %v3531_v28 = vmul.f32 1.442695, %v3075_v59  ;;  %v3533_v54 = vmul.f32 1.442695, %v3076_v42  ;;  %v3535_v8 = vmul.f32 1.442695, %v3077_v61 }
 0x759   : > { %v3537_v5 = vmul.f32 1.442695, %v3078_v37  ;;  %v4265_v36 = vld [vmem:[#allocation4 + $0x90] sm:$0xff] }
 0x75a   : > { %7889 = vpow2.f32 %v3531_v28 }
 0x75b   : > { %7891 = vpow2.f32 %v3533_v54 }
 0x75c   : > { %7893 = vpow2.f32 %v3535_v8 }
 0x75d   : > { %7895 = vpow2.f32 %v3537_v5  ;;  %v13351_v5 = vld [vmem:[#allocation48_spill] sm:$0xff] }
 0x75e   : > { %7897 = vpow2.f32 %v2533_v26 }
 0x75f   : > { %v11403_v34 = vpop.eup %7881 }
 0x760   : > { %v11405_v17 = vpop.eup %7883 }
 0x761   : > { %v4036_v27 = vadd.f32 %v11405_v17, %v11403_v34  ;;  %v11409_v1 = vpop.eup %7885 }
 0x762   : > { %v11415_v10 = vpop.eup %7887 }
 0x763   : > { %3874 = vadd.xlane.f32.xlu0 %v13349_v24  ;;  %v4037_v16 = vadd.f32 %v11409_v1, %v4036_v27 }
 0x765   : > { %v11418_v44 = vadd.f32 %v11415_v10, %v4037_v16  ;;  %v4264_v16 = vld [vmem:[#allocation4 + $0x70] sm:$0xff] }
 0x767   : > { %v7890_v2 = vpop.eup %7889 }
 0x768   : > { %v7892_v55 = vpop.eup %7891  ;;  %v4768_v59 = vpack.c.bf16 %v11351_v49, %v7890_v2  ;;  %v2527_v49 = vmul.f32 1.442695, %v2413_v7 }
 0x769   : > { %v7894_v48 = vpop.eup %7893  ;;  %v4769_v42 = vpack.c.bf16 %v11353_v18, %v7892_v55  ;;  %v4021_v35 = vadd.f32 %v7892_v55, %v7890_v2  ;;  %v3659_v18 = vld [vmem:[#allocation3 + $0x80] sm:$0xff] }
 0x76a   : > { %v7896_v61 = vpop.eup %7895  ;;  %v4770_v37 = vpack.c.bf16 %v11357_v51, %v7894_v48  ;;  %7899 = vpow2.f32 %v2527_v49  ;;  %v3723_v51 = vmul.f32 %v13353_v56, %v3659_v18  ;;  %v13357_v49 = vld [vmem:[#allocation38_spill] sm:$0xff] }
 0x76b   : > { %5284 = vmatprep.mubr.bf16.mxu0 %v4769_v42  ;;  %v4771_v28 = vpack.c.bf16 %v11363_v41, %v7896_v61  ;;  %v4022_v54 = vadd.f32 %v7894_v48, %v4021_v35  ;;  %v11429_v27 = vpop.eup %7897  ;;  %v13354_v41 = vld [vmem:[#allocation60_spill] sm:$0xff]  ;;  %v3656_v48 = vld [vmem:[#allocation3 + $0x68] sm:$0xff]  ;;  %v4648_v42 = vmul.f32 %v11397_v40, %v4264_v16  ;;  %v4649_v40 = vmul.f32 %v11333_v23, %v4265_v36  ;;  %v13362_v36 = vld [vmem:[#allocation278_spill] sm:$0xff] }
 0x76c   : > { %5285 = vmatmul.mubr.bf16.gmra.mxu0 %v4768_v59  ;;  %13352 = vst [vmem:[#allocation190_spill] sm:$0xff] %v11429_v27 }
 0x76d   : > { %5573 = vmatprep.mubr.bf16.mxu1 %v4771_v28  ;;  %v11426_v8 = vadd.f32 %v7896_v61, %v4022_v54  ;;  %v13356_v61 = vld [vmem:[#allocation173_spill] sm:$0xff] }
 0x76e   : > { %5574 = vmatmul.mubr.bf16.gmra.mxu1 %v4770_v37 }
 0x76f   : > { %3859 = vadd.xlane.f32.xlu1 %v13351_v5  ;;  %v3720_v5 = vmul.f32 %v13357_v49, %v3656_v48 }
 0x777   : > { %v11435_v24 = vpop.eup %7899 }
 0x778   : > { %13355 = vst [vmem:[#allocation198_spill] sm:$0xff] %v11435_v24 }
 0x779   : > { %4551 = vperm.xlu0 %7273, %v11429_v27  }
 0x77a   : > { %v3855_v60 = vpop.xlane.xlu0 %3854 }
 0x77b   : > { %v4107_v9 = vadd.f32 %v3855_v60, %v3723_v51  ;;  %v13358_v51 = vld [vmem:[#allocation292_spill] sm:$0xff] }
 0x77d   : > { %4172 = vst.msk [vmem:[#allocation3 + $0x80] sm:$0xff] %vm4155_vm2, %v4107_v9  ;;  %2852 = vperm.xlu0 %7273, %v13354_v41   ;;  %v13359_v9 = vld [vmem:[#allocation293_spill] sm:$0xff] }
 0x780   : > { %4536 = vperm.xlu1 %7274, %v11435_v24  }
 0x781   : > { %v5262_v2 = vpop.f32.mrf.mxu0 }
 0x782   : > { %v11438_v26 = vpop.permute.xlu0 %4531 }
 0x783   : > { %v5551_v55 = vpop.f32.mrf.mxu1  ;;  %v5264_v59 = vpop.f32.mrf.mxu0 }
 0x784   : > { %v5552_v35 = vadd.f32 %v5551_v55, %v5262_v2  ;;  %2837 = vperm.xlu1 %7274, %v13356_v61   ;;  %v13360_v59 = vld [vmem:[#allocation138_spill] sm:$0xff] }
 0x785   : > { %v5553_v7 = vpop.f32.mrf.mxu1  ;;  %v5265_v37 = vpop.f32.mrf.mxu0  ;;  %v13361_v2 = vld [vmem:[#allocation294_spill] sm:$0xff] }
 0x786   : > { %v5674_v28 = vadd.f32 %v5552_v35, %v4648_v42  ;;  %v2833_v54 = vpop.permute.xlu0 %2832  ;;  %v3840_v18 = vpop.xlane.xlu1 %3839 }
 0x787   : > { %v5554_v56 = vpop.f32.mrf.mxu1  ;;  %v3095_v60 = vsub.f32 %v13358_v51, %v2833_v54  ;;  %v3096_v27 = vsub.f32 %v13359_v9, %v2833_v54  ;;  %v3097_v19 = vsub.f32 %v13360_v59, %v2833_v54  ;;  %v5267_v24 = vpop.f32.mrf.mxu0  ;;  %v3098_v55 = vsub.f32 %v13361_v2, %v2833_v54 }
 0x788   : > { %5738 = vst [vmem:[#allocation4 + $0x70] sm:$0xff] %v5674_v28  ;;  %v5555_v16 = vadd.f32 %v5554_v56, %v5265_v37  ;;  %v4104_v7 = vadd.f32 %v3840_v18, %v3720_v5  ;;  %v13363_v28 = vld [vmem:[#allocation280_spill] sm:$0xff]  ;;  %v13364_v5 = vld [vmem:[#allocation279_spill] sm:$0xff] }
 0x789   : > { %v3571_v42 = vmul.f32 1.442695, %v3095_v60  ;;  %v3573_v35 = vmul.f32 1.442695, %v3096_v27  ;;  %v5556_v52 = vpop.f32.mrf.mxu1  ;;  %v3575_v49 = vmul.f32 1.442695, %v3097_v19 }
 0x78a   : > { %v5675_v48 = vadd.f32 %v5555_v16, %v4649_v40  ;;  %4169 = vst.msk [vmem:[#allocation3 + $0x68] sm:$0xff] %vm4155_vm2, %v4104_v7  ;;  %v11449_v51 = vpop.permute.xlu1 %4516  ;;  %v3577_v24 = vmul.f32 1.442695, %v3098_v55  ;;  %v13365_v27 = vld [vmem:[#allocation281_spill] sm:$0xff] }
 0x78b   : > { %7901 = vpow2.f32 %v3571_v42  ;;  %v13366_v55 = vld [vmem:[#allocation181_spill] sm:$0xff]  ;;  %v13367_v42 = vld [vmem:[#allocation70_spill] sm:$0xff] }
 0x78c   : > { %5739 = vst [vmem:[#allocation4 + $0x90] sm:$0xff] %v5675_v48  ;;  %7903 = vpow2.f32 %v3573_v35  ;;  %v2418_v7 = vsub.f32 %v13366_v55, %v13318_v21  ;;  %v13368_v21 = vld [vmem:[#allocation157_spill] sm:$0xff] }
 0x78d   : > { %7905 = vpow2.f32 %v3575_v49 }
 0x78e   : > { %v2818_v23 = vpop.permute.xlu1 %2817  ;;  %7907 = vpow2.f32 %v3577_v24 }
 0x78f   : > { %v3083_v37 = vsub.f32 %v13362_v36, %v2818_v23  ;;  %v3084_v54 = vsub.f32 %v13363_v28, %v2818_v23  ;;  %v3085_v18 = vsub.f32 %v13364_v5, %v2818_v23  ;;  %v3086_v52 = vsub.f32 %v13365_v27, %v2818_v23 }
 0x790   : > { %v2537_v23 = vmul.f32 1.442695, %v2418_v7  ;;  %v2415_v27 = vsub.f32 %v13368_v21, %v13320_v43  ;;  %v13371_v43 = vld [vmem:[#allocation54_spill] sm:$0xff]  ;;  %v4267_v21 = vld [vmem:[#allocation4 + $0xd0] sm:$0xff] }
 0x791   : > { %v3547_v19 = vmul.f32 1.442695, %v3083_v37  ;;  %v3549_v56 = vmul.f32 1.442695, %v3084_v54  ;;  %v3551_v60 = vmul.f32 1.442695, %v3085_v18 }
 0x792   : > { %v3553_v9 = vmul.f32 1.442695, %v3086_v52 }
 0x793   : > { %7909 = vpow2.f32 %v3547_v19 }
 0x794   : > { %7911 = vpow2.f32 %v3549_v56 }
 0x795   : > { %7913 = vpow2.f32 %v3551_v60 }
 0x796   : > { %7915 = vpow2.f32 %v3553_v9  ;;  %v13369_v9 = vld [vmem:[#allocation37_spill] sm:$0xff] }
 0x797   : > { %7917 = vpow2.f32 %v2537_v23 }
 0x798   : > { %v11455_v59 = vpop.eup %7901 }
 0x799   : > { %v11457_v40 = vpop.eup %7903 }
 0x79a   : > { %v4046_v16 = vadd.f32 %v11457_v40, %v11455_v59  ;;  %v11461_v2 = vpop.eup %7905 }
 0x79b   : > { %v11467_v48 = vpop.eup %7907 }
 0x79c   : > { %3884 = vadd.xlane.f32.xlu0 %v13367_v42  ;;  %v4047_v35 = vadd.f32 %v11461_v2, %v4046_v16 }
 0x79e   : > { %v11470_v49 = vadd.f32 %v11467_v48, %v4047_v35  ;;  %v4266_v35 = vld [vmem:[#allocation4 + $0x1d8] sm:$0xff] }
 0x7a0   : > { %v7910_v24 = vpop.eup %7909 }
 0x7a1   : > { %v7912_v36 = vpop.eup %7911  ;;  %v4772_v37 = vpack.c.bf16 %v11403_v34, %v7910_v24  ;;  %v2531_v34 = vmul.f32 1.442695, %v2415_v27 }
 0x7a2   : > { %v7914_v28 = vpop.eup %7913  ;;  %v4773_v54 = vpack.c.bf16 %v11405_v17, %v7912_v36  ;;  %v4031_v5 = vadd.f32 %v7912_v36, %v7910_v24  ;;  %v3661_v17 = vld [vmem:[#allocation3 + $0x90] sm:$0xff] }
 0x7a3   : > { %v7916_v18 = vpop.eup %7915  ;;  %v4774_v52 = vpack.c.bf16 %v11409_v1, %v7914_v28  ;;  %7919 = vpow2.f32 %v2531_v34  ;;  %v3725_v1 = vmul.f32 %v13371_v43, %v3661_v17  ;;  %v13375_v34 = vld [vmem:[#allocation28_spill] sm:$0xff] }
 0x7a4   : > { %5292 = vmatprep.mubr.bf16.mxu0 %v4773_v54  ;;  %v4775_v19 = vpack.c.bf16 %v11415_v10, %v7916_v18  ;;  %v4032_v56 = vadd.f32 %v7914_v28, %v4031_v5  ;;  %v11481_v16 = vpop.eup %7917  ;;  %v13372_v10 = vld [vmem:[#allocation79_spill] sm:$0xff]  ;;  %v3658_v28 = vld [vmem:[#allocation3 + $0x78] sm:$0xff]  ;;  %v4650_v54 = vmul.f32 %v11449_v51, %v4266_v35  ;;  %v4651_v51 = vmul.f32 %v11386_v46, %v4267_v21 }
 0x7a5   : > { %5293 = vmatmul.mubr.bf16.gmra.mxu0 %v4772_v37  ;;  %13370 = vst [vmem:[#allocation205_spill] sm:$0xff] %v11481_v16  ;;  %v13380_v21 = vld [vmem:[#allocation287_spill] sm:$0xff] }
 0x7a6   : > { %5581 = vmatprep.mubr.bf16.mxu1 %v4775_v19  ;;  %v11478_v60 = vadd.f32 %v7916_v18, %v4032_v56  ;;  %v13374_v18 = vld [vmem:[#allocation43_spill] sm:$0xff] }
 0x7a7   : > { %5582 = vmatmul.mubr.bf16.gmra.mxu1 %v4774_v52 }
 0x7a8   : > { %3869 = vadd.xlane.f32.xlu1 %v13369_v9  ;;  %v3722_v9 = vmul.f32 %v13375_v34, %v3658_v28 }
 0x7b0   : > { %v11487_v42 = vpop.eup %7919 }
 0x7b1   : > { %13373 = vst [vmem:[#allocation204_spill] sm:$0xff] %v11487_v42 }
 0x7b2   : > { %4561 = vperm.xlu0 %7273, %v11481_v16  }
 0x7b3   : > { %v3865_v55 = vpop.xlane.xlu0 %3864 }
 0x7b4   : > { %v4109_v7 = vadd.f32 %v3865_v55, %v3725_v1  ;;  %v13376_v1 = vld [vmem:[#allocation301_spill] sm:$0xff] }
 0x7b6   : > { %4174 = vst.msk [vmem:[#allocation3 + $0x90] sm:$0xff] %vm4155_vm2, %v4109_v7  ;;  %2862 = vperm.xlu0 %7273, %v13372_v10   ;;  %v13377_v7 = vld [vmem:[#allocation303_spill] sm:$0xff] }
 0x7b9   : > { %4546 = vperm.xlu1 %7274, %v11487_v42  }
 0x7ba   : > { %v5270_v24 = vpop.f32.mrf.mxu0 }
 0x7bb   : > { %v11490_v23 = vpop.permute.xlu0 %4541 }
 0x7bc   : > { %v5559_v36 = vpop.f32.mrf.mxu1  ;;  %v5272_v37 = vpop.f32.mrf.mxu0 }
 0x7bd   : > { %v5560_v5 = vadd.f32 %v5559_v36, %v5270_v24  ;;  %2847 = vperm.xlu1 %7274, %v13374_v18   ;;  %v13378_v37 = vld [vmem:[#allocation302_spill] sm:$0xff] }
 0x7be   : > { %v5561_v27 = vpop.f32.mrf.mxu1  ;;  %v5273_v52 = vpop.f32.mrf.mxu0  ;;  %v13379_v24 = vld [vmem:[#allocation30_spill] sm:$0xff] }
 0x7bf   : > { %v5676_v19 = vadd.f32 %v5560_v5, %v4650_v54  ;;  %v2843_v56 = vpop.permute.xlu0 %2842  ;;  %v3850_v17 = vpop.xlane.xlu1 %3849 }
 0x7c0   : > { %v5562_v43 = vpop.f32.mrf.mxu1  ;;  %v3103_v55 = vsub.f32 %v13376_v1, %v2843_v56  ;;  %v3104_v16 = vsub.f32 %v13377_v7, %v2843_v56  ;;  %v3105_v42 = vsub.f32 %v13378_v37, %v2843_v56  ;;  %v5275_v32 = vpop.f32.mrf.mxu0  ;;  %v3106_v36 = vsub.f32 %v13379_v24, %v2843_v56 }
 0x7c1   : > { %5740 = vst [vmem:[#allocation4 + $0x1d8] sm:$0xff] %v5676_v19  ;;  %v5563_v35 = vadd.f32 %v5562_v43, %v5273_v52  ;;  %v4106_v27 = vadd.f32 %v3850_v17, %v3722_v9  ;;  %v13381_v19 = vld [vmem:[#allocation290_spill] sm:$0xff]  ;;  %v13382_v9 = vld [vmem:[#allocation289_spill] sm:$0xff] }
 0x7c2   : > { %v3587_v54 = vmul.f32 1.442695, %v3103_v55  ;;  %v3589_v5 = vmul.f32 1.442695, %v3104_v16  ;;  %v5564_v22 = vpop.f32.mrf.mxu1  ;;  %v3591_v34 = vmul.f32 1.442695, %v3105_v42 }
 0x7c3   : > { %v5677_v28 = vadd.f32 %v5563_v35, %v4651_v51  ;;  %4171 = vst.msk [vmem:[#allocation3 + $0x78] sm:$0xff] %vm4155_vm2, %v4106_v27  ;;  %v11501_v1 = vpop.permute.xlu1 %4526  ;;  %v3593_v32 = vmul.f32 1.442695, %v3106_v36  ;;  %v13383_v16 = vld [vmem:[#allocation291_spill] sm:$0xff] }
 0x7c4   : > { %7921 = vpow2.f32 %v3587_v54  ;;  %v13384_v36 = vld [vmem:[#allocation163_spill] sm:$0xff]  ;;  %v13385_v54 = vld [vmem:[#allocation185_spill] sm:$0xff] }
 0x7c5   : > { %5741 = vst [vmem:[#allocation4 + $0xd0] sm:$0xff] %v5677_v28  ;;  %7923 = vpow2.f32 %v3589_v5  ;;  %v2420_v27 = vsub.f32 %v13384_v36, %v13336_v57  ;;  %v13387_v57 = vld [vmem:[#allocation47_spill] sm:$0xff] }
 0x7c6   : > { %7925 = vpow2.f32 %v3591_v34 }
 0x7c7   : > { %v2828_v46 = vpop.permute.xlu1 %2827  ;;  %7927 = vpow2.f32 %v3593_v32 }
 0x7c8   : > { %v3091_v52 = vsub.f32 %v13380_v21, %v2828_v46  ;;  %v3092_v56 = vsub.f32 %v13381_v19, %v2828_v46  ;;  %v3093_v17 = vsub.f32 %v13382_v9, %v2828_v46  ;;  %v3094_v22 = vsub.f32 %v13383_v16, %v2828_v46 }
 0x7c9   : > { %v2541_v46 = vmul.f32 1.442695, %v2420_v27  ;;  %v2417_v16 = vsub.f32 %v13387_v57, %v13338_v12  ;;  %v13390_v12 = vld [vmem:[#allocation165_spill] sm:$0xff]  ;;  %v4269_v57 = vld [vmem:[#allocation4 + $0x88] sm:$0xff] }
 0x7ca   : > { %v3563_v42 = vmul.f32 1.442695, %v3091_v52  ;;  %v3565_v43 = vmul.f32 1.442695, %v3092_v56  ;;  %v3567_v55 = vmul.f32 1.442695, %v3093_v17 }
 0x7cb   : > { %v3569_v7 = vmul.f32 1.442695, %v3094_v22 }
 0x7cc   : > { %7929 = vpow2.f32 %v3563_v42 }
 0x7cd   : > { %7931 = vpow2.f32 %v3565_v43 }
 0x7ce   : > { %7933 = vpow2.f32 %v3567_v55 }
 0x7cf   : > { %7935 = vpow2.f32 %v3569_v7  ;;  %v13388_v7 = vld [vmem:[#allocation57_spill] sm:$0xff] }
 0x7d0   : > { %7937 = vpow2.f32 %v2541_v46 }
 0x7d1   : > { %v11507_v37 = vpop.eup %7921 }
 0x7d2   : > { %v11509_v51 = vpop.eup %7923 }
 0x7d3   : > { %v4056_v35 = vadd.f32 %v11509_v51, %v11507_v37  ;;  %v11513_v24 = vpop.eup %7925 }
 0x7d4   : > { %v11519_v28 = vpop.eup %7927 }
 0x7d5   : > { %3894 = vadd.xlane.f32.xlu0 %v13385_v54  ;;  %v4057_v5 = vadd.f32 %v11513_v24, %v4056_v35 }
 0x7d7   : > { %v11522_v34 = vadd.f32 %v11519_v28, %v4057_v5  ;;  %v4268_v5 = vld [vmem:[#allocation4 + $0xb8] sm:$0xff] }
 0x7d9   : > { %13386 = vst [vmem:[#allocation102_spill] sm:$0xff] %v11522_v34  ;;  %v7930_v32 = vpop.eup %7929 }
 0x7da   : > { %v7932_v21 = vpop.eup %7931  ;;  %v4776_v52 = vpack.c.bf16 %v11455_v59, %v7930_v32  ;;  %v2535_v59 = vmul.f32 1.442695, %v2417_v16 }
 0x7db   : > { %v7934_v19 = vpop.eup %7933  ;;  %v4777_v56 = vpack.c.bf16 %v11457_v40, %v7932_v21  ;;  %v4041_v9 = vadd.f32 %v7932_v21, %v7930_v32  ;;  %v3663_v40 = vld [vmem:[#allocation3 + $0xa0] sm:$0xff] }
 0x7dc   : > { %v7936_v17 = vpop.eup %7935  ;;  %v4778_v22 = vpack.c.bf16 %v11461_v2, %v7934_v19  ;;  %7939 = vpow2.f32 %v2535_v59  ;;  %v3727_v2 = vmul.f32 %v13390_v12, %v3663_v40  ;;  %v13394_v59 = vld [vmem:[#allocation166_spill] sm:$0xff] }
 0x7dd   : > { %5300 = vmatprep.mubr.bf16.mxu0 %v4777_v56  ;;  %v4779_v42 = vpack.c.bf16 %v11467_v48, %v7936_v17  ;;  %v4042_v43 = vadd.f32 %v7934_v19, %v4041_v9  ;;  %v11533_v35 = vpop.eup %7937  ;;  %v13391_v48 = vld [vmem:[#allocation186_spill] sm:$0xff]  ;;  %v3660_v19 = vld [vmem:[#allocation3 + $0x88] sm:$0xff]  ;;  %v4652_v56 = vmul.f32 %v11501_v1, %v4268_v5  ;;  %v4653_v1 = vmul.f32 %v11438_v26, %v4269_v57 }
 0x7de   : > { %5301 = vmatmul.mubr.bf16.gmra.mxu0 %v4776_v52  ;;  %13389 = vst [vmem:[#allocation104_spill] sm:$0xff] %v11533_v35  ;;  %v13399_v57 = vld [vmem:[#allocation295_spill] sm:$0xff] }
 0x7df   : > { %5589 = vmatprep.mubr.bf16.mxu1 %v4779_v42  ;;  %v11530_v55 = vadd.f32 %v7936_v17, %v4042_v43  ;;  %v13393_v17 = vld [vmem:[#allocation53_spill] sm:$0xff] }
 0x7e0   : > { %5590 = vmatmul.mubr.bf16.gmra.mxu1 %v4778_v22 }
 0x7e1   : > { %3879 = vadd.xlane.f32.xlu1 %v13388_v7  ;;  %v3724_v7 = vmul.f32 %v13394_v59, %v3660_v19 }
 0x7e9   : > { %v11539_v54 = vpop.eup %7939 }
 0x7ea   : > { %13392 = vst [vmem:[#allocation103_spill] sm:$0xff] %v11539_v54 }
 0x7eb   : > { %4571 = vperm.xlu0 %7273, %v11533_v35  }
 0x7ec   : > { %v3875_v36 = vpop.xlane.xlu0 %3874 }
 0x7ed   : > { %v4111_v27 = vadd.f32 %v3875_v36, %v3727_v2  ;;  %v13395_v2 = vld [vmem:[#allocation20_spill] sm:$0xff] }
 0x7ef   : > { %4176 = vst.msk [vmem:[#allocation3 + $0xa0] sm:$0xff] %vm4155_vm2, %v4111_v27  ;;  %2872 = vperm.xlu0 %7273, %v13391_v48   ;;  %v13396_v27 = vld [vmem:[#allocation21_spill] sm:$0xff] }
 0x7f2   : > { %4556 = vperm.xlu1 %7274, %v11539_v54  }
 0x7f3   : > { %v5278_v32 = vpop.f32.mrf.mxu0 }
 0x7f4   : > { %v11542_v46 = vpop.permute.xlu0 %4551 }
 0x7f5   : > { %v5567_v21 = vpop.f32.mrf.mxu1  ;;  %v5280_v52 = vpop.f32.mrf.mxu0 }
 0x7f6   : > { %v5568_v9 = vadd.f32 %v5567_v21, %v5278_v32  ;;  %2857 = vperm.xlu1 %7274, %v13393_v17   ;;  %v13397_v52 = vld [vmem:[#allocation19_spill] sm:$0xff]  ;;  %v13398_v32 = vld [vmem:[#allocation22_spill] sm:$0xff] }
 0x7f7   : > { %v5569_v16 = vpop.f32.mrf.mxu1  ;;  %v5281_v22 = vpop.f32.mrf.mxu0 }
 0x7f8   : > { %v5678_v42 = vadd.f32 %v5568_v9, %v4652_v56  ;;  %v2853_v43 = vpop.permute.xlu0 %2852  ;;  %v3860_v40 = vpop.xlane.xlu1 %3859 }
 0x7f9   : > { %v5570_v12 = vpop.f32.mrf.mxu1  ;;  %v3111_v36 = vsub.f32 %v13395_v2, %v2853_v43  ;;  %v3112_v35 = vsub.f32 %v13396_v27, %v2853_v43  ;;  %v3113_v54 = vsub.f32 %v13397_v52, %v2853_v43  ;;  %v5283_v39 = vpop.f32.mrf.mxu0  ;;  %v3114_v21 = vsub.f32 %v13398_v32, %v2853_v43 }
 0x7fa   : > { %5742 = vst [vmem:[#allocation4 + $0xb8] sm:$0xff] %v5678_v42  ;;  %v5571_v5 = vadd.f32 %v5570_v12, %v5281_v22  ;;  %v4108_v16 = vadd.f32 %v3860_v40, %v3724_v7  ;;  %v13400_v42 = vld [vmem:[#allocation158_spill] sm:$0xff]  ;;  %v13401_v7 = vld [vmem:[#allocation297_spill] sm:$0xff] }
 0x7fb   : > { %v3603_v56 = vmul.f32 1.442695, %v3111_v36  ;;  %v3605_v9 = vmul.f32 1.442695, %v3112_v35  ;;  %v5572_v34 = vpop.f32.mrf.mxu1  ;;  %v3607_v59 = vmul.f32 1.442695, %v3113_v54 }
 0x7fc   : > { %v5679_v19 = vadd.f32 %v5571_v5, %v4653_v1  ;;  %4173 = vst.msk [vmem:[#allocation3 + $0x88] sm:$0xff] %vm4155_vm2, %v4108_v16  ;;  %v11553_v2 = vpop.permute.xlu1 %4536  ;;  %v3609_v39 = vmul.f32 1.442695, %v3114_v21  ;;  %v13402_v35 = vld [vmem:[#allocation300_spill] sm:$0xff]  ;;  %v13403_v21 = vld [vmem:[#allocation58_spill] sm:$0xff] }
 0x7fd   : > { %7941 = vpow2.f32 %v3603_v56  ;;  %v2422_v16 = vsub.f32 %v13403_v21, %v13354_v41  ;;  %v13404_v56 = vld [vmem:[#allocation68_spill] sm:$0xff]  ;;  %v13405_v41 = vld [vmem:[#allocation154_spill] sm:$0xff] }
 0x7fe   : > { %5743 = vst [vmem:[#allocation4 + $0x88] sm:$0xff] %v5679_v19  ;;  %7943 = vpow2.f32 %v3605_v9 }
 0x7ff   : > { %7945 = vpow2.f32 %v3607_v59 }
 0x800   : > { %v2838_v26 = vpop.permute.xlu1 %2837  ;;  %7947 = vpow2.f32 %v3609_v39 }
 0x801   : > { %v3099_v22 = vsub.f32 %v13399_v57, %v2838_v26  ;;  %v3100_v43 = vsub.f32 %v13400_v42, %v2838_v26  ;;  %v3101_v40 = vsub.f32 %v13401_v7, %v2838_v26  ;;  %v3102_v34 = vsub.f32 %v13402_v35, %v2838_v26 }
 0x802   : > { %v2545_v26 = vmul.f32 1.442695, %v2422_v16  ;;  %v2419_v35 = vsub.f32 %v13405_v41, %v13356_v61  ;;  %v13408_v61 = vld [vmem:[#allocation170_spill] sm:$0xff] }
 0x803   : > { %v3579_v54 = vmul.f32 1.442695, %v3099_v22  ;;  %v3581_v12 = vmul.f32 1.442695, %v3100_v43  ;;  %v3583_v36 = vmul.f32 1.442695, %v3101_v40 }
 0x804   : > { %v3585_v27 = vmul.f32 1.442695, %v3102_v34 }
 0x805   : > { %7949 = vpow2.f32 %v3579_v54 }
 0x806   : > { %7951 = vpow2.f32 %v3581_v12 }
 0x807   : > { %7953 = vpow2.f32 %v3583_v36 }
 0x808   : > { %7955 = vpow2.f32 %v3585_v27  ;;  %v13406_v27 = vld [vmem:[#allocation63_spill] sm:$0xff] }
 0x809   : > { %7957 = vpow2.f32 %v2545_v26 }
 0x80a   : > { %v11559_v52 = vpop.eup %7941 }
 0x80b   : > { %v11561_v1 = vpop.eup %7943 }
 0x80c   : > { %v4066_v5 = vadd.f32 %v11561_v1, %v11559_v52  ;;  %v11565_v32 = vpop.eup %7945 }
 0x80d   : > { %v11571_v19 = vpop.eup %7947 }
 0x80e   : > { %3904 = vadd.xlane.f32.xlu0 %v13404_v56  ;;  %v4067_v9 = vadd.f32 %v11565_v32, %v4066_v5  ;;  %v4270_v56 = vld [vmem:[#allocation4 + $0xa8] sm:$0xff] }
 0x810   : > { %v11574_v59 = vadd.f32 %v11571_v19, %v4067_v9 }
 0x812   : > { %v7950_v39 = vpop.eup %7949 }
 0x813   : > { %v7952_v57 = vpop.eup %7951  ;;  %v4780_v22 = vpack.c.bf16 %v11507_v37, %v7950_v39  ;;  %v2539_v37 = vmul.f32 1.442695, %v2419_v35 }
 0x814   : > { %v7954_v42 = vpop.eup %7953  ;;  %v4781_v43 = vpack.c.bf16 %v11509_v51, %v7952_v57  ;;  %v4051_v7 = vadd.f32 %v7952_v57, %v7950_v39  ;;  %v3665_v51 = vld [vmem:[#allocation3 + $0xb0] sm:$0xff] }
 0x815   : > { %v7956_v40 = vpop.eup %7955  ;;  %v4782_v34 = vpack.c.bf16 %v11513_v24, %v7954_v42  ;;  %7959 = vpow2.f32 %v2539_v37  ;;  %v3729_v24 = vmul.f32 %v13408_v61, %v3665_v51  ;;  %v13412_v61 = vld [vmem:[#allocation308_spill] sm:$0xff] }
 0x816   : > { %5308 = vmatprep.mubr.bf16.mxu0 %v4781_v43  ;;  %v4783_v54 = vpack.c.bf16 %v11519_v28, %v7956_v40  ;;  %v4052_v12 = vadd.f32 %v7954_v42, %v4051_v7  ;;  %v11585_v5 = vpop.eup %7957  ;;  %v4654_v42 = vmul.f32 %v11553_v2, %v4270_v56  ;;  %v13410_v7 = vld [vmem:[#allocation71_spill] sm:$0xff] }
 0x817   : > { %5309 = vmatmul.mubr.bf16.gmra.mxu0 %v4780_v22  ;;  %13407 = vst [vmem:[#allocation105_spill] sm:$0xff] %v11585_v5  ;;  %v3662_v22 = vld [vmem:[#allocation3 + $0x98] sm:$0xff] }
 0x818   : > { %5597 = vmatprep.mubr.bf16.mxu1 %v4783_v54  ;;  %v11582_v36 = vadd.f32 %v7956_v40, %v4052_v12  ;;  %v4271_v40 = vld [vmem:[#allocation4 + $0x1c8] sm:$0xff]  ;;  %v13411_v12 = vld [vmem:[#allocation34_spill] sm:$0xff] }
 0x819   : > { %5598 = vmatmul.mubr.bf16.gmra.mxu1 %v4782_v34  ;;  %v3726_v37 = vmul.f32 %v13411_v12, %v3662_v22  ;;  %v4655_v2 = vmul.f32 %v11490_v23, %v4271_v40  ;;  %v13416_v40 = vld [vmem:[#allocation32_spill] sm:$0xff] }
 0x81a   : > { %3889 = vadd.xlane.f32.xlu1 %v13406_v27 }
 0x822   : > { %v11590_v28 = vpop.eup %7959 }
 0x823   : > { %13409 = vst [vmem:[#allocation209_spill] sm:$0xff] %v11590_v28 }
 0x824   : > { %4581 = vperm.xlu0 %7273, %v11585_v5  }
 0x825   : > { %v3885_v21 = vpop.xlane.xlu0 %3884 }
 0x826   : > { %v4113_v16 = vadd.f32 %v3885_v21, %v3729_v24  ;;  %v13413_v21 = vld [vmem:[#allocation310_spill] sm:$0xff] }
 0x828   : > { %4178 = vst.msk [vmem:[#allocation3 + $0xb0] sm:$0xff] %vm4155_vm2, %v4113_v16 }
 0x82b   : > { %4566 = vperm.xlu1 %7274, %v11590_v28  }
 0x82c   : > { %v5286_v9 = vpop.f32.mrf.mxu0 }
 0x82d   : > { %v11593_v39 = vpop.permute.xlu0 %4561 }
 0x82e   : > { %v5575_v26 = vpop.f32.mrf.mxu1  ;;  %v5288_v57 = vpop.f32.mrf.mxu0 }
 0x82f   : > { %v5576_v43 = vadd.f32 %v5575_v26, %v5286_v9  ;;  %2867 = vperm.xlu1 %7274, %v13410_v7   ;;  %v13414_v57 = vld [vmem:[#allocation151_spill] sm:$0xff] }
 0x830   : > { %v5577_v41 = vpop.f32.mrf.mxu1  ;;  %v5289_v35 = vpop.f32.mrf.mxu0  ;;  %v13415_v9 = vld [vmem:[#allocation311_spill] sm:$0xff] }
 0x831   : > { %v5680_v34 = vadd.f32 %v5576_v43, %v4654_v42  ;;  %v2863_v54 = vpop.permute.xlu0 %2862  ;;  %v3870_v27 = vpop.xlane.xlu1 %3869 }
 0x832   : > { %v5578_v51 = vpop.f32.mrf.mxu1  ;;  %v3119_v24 = vsub.f32 %v13412_v61, %v2863_v54  ;;  %v3120_v16 = vsub.f32 %v13413_v21, %v2863_v54  ;;  %v3121_v5 = vsub.f32 %v13414_v57, %v2863_v54  ;;  %v5291_v28 = vpop.f32.mrf.mxu0  ;;  %v3122_v26 = vsub.f32 %v13415_v9, %v2863_v54  ;;  %v13421_v9 = vld [vmem:[#allocation211_spill] sm:$0xff] }
 0x833   : > { %5744 = vst [vmem:[#allocation4 + $0xa8] sm:$0xff] %v5680_v34  ;;  %v5579_v56 = vadd.f32 %v5578_v51, %v5289_v35  ;;  %v4110_v41 = vadd.f32 %v3870_v27, %v3726_v37  ;;  %v13417_v34 = vld [vmem:[#allocation33_spill] sm:$0xff]  ;;  %v13418_v37 = vld [vmem:[#allocation31_spill] sm:$0xff]  ;;  %v13419_v51 = vld [vmem:[#allocation18_spill] sm:$0xff] }
 0x834   : > { %v3619_v42 = vmul.f32 1.442695, %v3119_v24  ;;  %v3621_v43 = vmul.f32 1.442695, %v3120_v16  ;;  %v5580_v7 = vpop.f32.mrf.mxu1  ;;  %v3623_v12 = vmul.f32 1.442695, %v3121_v5 }
 0x835   : > { %v5681_v22 = vadd.f32 %v5579_v56, %v4655_v2  ;;  %4175 = vst.msk [vmem:[#allocation3 + $0x98] sm:$0xff] %vm4155_vm2, %v4110_v41  ;;  %v11604_v61 = vpop.permute.xlu1 %4546  ;;  %v3625_v28 = vmul.f32 1.442695, %v3122_v26  ;;  %v13420_v2 = vld [vmem:[#allocation80_spill] sm:$0xff] }
 0x836   : > { %7961 = vpow2.f32 %v3619_v42  ;;  %v2424_v56 = vsub.f32 %v13420_v2, %v13372_v10  ;;  %v13425_v2 = vld [vmem:[#allocation73_spill] sm:$0xff] }
 0x837   : > { %5745 = vst [vmem:[#allocation4 + $0x1c8] sm:$0xff] %v5681_v22  ;;  %7963 = vpow2.f32 %v3621_v43 }
 0x838   : > { %7965 = vpow2.f32 %v3623_v12  ;;  %v2549_v43 = vmul.f32 1.442695, %v2424_v56 }
 0x839   : > { %v2848_v23 = vpop.permute.xlu1 %2847  ;;  %7967 = vpow2.f32 %v3625_v28 }
 0x83a   : > { %v3107_v35 = vsub.f32 %v13416_v40, %v2848_v23  ;;  %v3108_v54 = vsub.f32 %v13417_v34, %v2848_v23  ;;  %v3109_v27 = vsub.f32 %v13418_v37, %v2848_v23  ;;  %v3110_v7 = vsub.f32 %v13419_v51, %v2848_v23 }
 0x83c   : > { %v3595_v5 = vmul.f32 1.442695, %v3107_v35  ;;  %v3597_v24 = vmul.f32 1.442695, %v3108_v54  ;;  %v3599_v21 = vmul.f32 1.442695, %v3109_v27 }
 0x83d   : > { %v3601_v16 = vmul.f32 1.442695, %v3110_v7  ;;  %v13422_v27 = vld [vmem:[#allocation44_spill] sm:$0xff] }
 0x83e   : > { %7969 = vpow2.f32 %v3595_v5  ;;  %v2421_v51 = vsub.f32 %v13422_v27, %v13374_v18  ;;  %v3667_v18 = vld [vmem:[#allocation3 + $0xc0] sm:$0xff] }
 0x83f   : > { %7971 = vpow2.f32 %v3597_v24 }
 0x840   : > { %7973 = vpow2.f32 %v3599_v21 }
 0x841   : > { %7975 = vpow2.f32 %v3601_v16  ;;  %v2543_v16 = vmul.f32 1.442695, %v2421_v51 }
 0x842   : > { %7977 = vpow2.f32 %v2549_v43 }
 0x843   : > { %v11610_v57 = vpop.eup %7961  ;;  %3914 = vadd.xlane.f32.xlu0 %v13421_v9  ;;  %7979 = vpow2.f32 %v2543_v16 }
 0x844   : > { %v11615_v26 = vpop.eup %7963 }
 0x845   : > { %v4076_v41 = vadd.f32 %v11615_v26, %v11610_v57  ;;  %v11619_v42 = vpop.eup %7965 }
 0x846   : > { %v11622_v12 = vpop.eup %7967 }
 0x847   : > { %v4077_v22 = vadd.f32 %v11619_v42, %v4076_v41  ;;  %v4272_v41 = vld [vmem:[#allocation4 + $0x170] sm:$0xff] }
 0x849   : > { %v11625_v28 = vadd.f32 %v11622_v12, %v4077_v22 }
 0x84b   : > { %v7970_v23 = vpop.eup %7969 }
 0x84c   : > { %v7972_v10 = vpop.eup %7971  ;;  %v4784_v40 = vpack.c.bf16 %v11559_v52, %v7970_v23  ;;  %v13423_v52 = vld [vmem:[#allocation177_spill] sm:$0xff] }
 0x84d   : > { %v7974_v35 = vpop.eup %7973  ;;  %v4785_v34 = vpack.c.bf16 %v11561_v1, %v7972_v10  ;;  %v4061_v54 = vadd.f32 %v7972_v10, %v7970_v23 }
 0x84e   : > { %v7976_v37 = vpop.eup %7975  ;;  %v4786_v7 = vpack.c.bf16 %v11565_v32, %v7974_v35  ;;  %v3731_v32 = vmul.f32 %v13425_v2, %v3667_v18  ;;  %v13428_v18 = vld [vmem:[#allocation316_spill] sm:$0xff] }
 0x84f   : > { %5316 = vmatprep.mubr.bf16.mxu0 %v4785_v34  ;;  %v4787_v5 = vpack.c.bf16 %v11571_v19, %v7976_v37  ;;  %v4062_v24 = vadd.f32 %v7974_v35, %v4061_v54  ;;  %v11636_v1 = vpop.eup %7977  ;;  %v4656_v35 = vmul.f32 %v11604_v61, %v4272_v41  ;;  %v4273_v54 = vld [vmem:[#allocation4 + $0x178] sm:$0xff]  ;;  %v13431_v41 = vld [vmem:[#allocation162_spill] sm:$0xff] }
 0x850   : > { %5317 = vmatmul.mubr.bf16.gmra.mxu0 %v4784_v40  ;;  %13424 = vst [vmem:[#allocation208_spill] sm:$0xff] %v11636_v1  ;;  %v11641_v19 = vpop.eup %7979  ;;  %v3664_v40 = vld [vmem:[#allocation3 + $0xa8] sm:$0xff] }
 0x851   : > { %5605 = vmatprep.mubr.bf16.mxu1 %v4787_v5  ;;  %v11633_v21 = vadd.f32 %v7976_v37, %v4062_v24  ;;  %13426 = vst [vmem:[#allocation220_spill] sm:$0xff] %v11641_v19  ;;  %v13427_v5 = vld [vmem:[#allocation164_spill] sm:$0xff] }
 0x852   : > { %5606 = vmatmul.mubr.bf16.gmra.mxu1 %v4786_v7  ;;  %v3728_v24 = vmul.f32 %v13427_v5, %v3664_v40 }
 0x853   : > { %3899 = vadd.xlane.f32.xlu1 %v13423_v52 }
 0x859   : > { %4591 = vperm.xlu0 %7273, %v11636_v1  }
 0x85e   : > { %v3895_v56 = vpop.xlane.xlu0 %3894 }
 0x85f   : > { %v4115_v9 = vadd.f32 %v3895_v56, %v3731_v32  ;;  %v13429_v32 = vld [vmem:[#allocation319_spill] sm:$0xff] }
 0x861   : > { %4180 = vst.msk [vmem:[#allocation3 + $0xc0] sm:$0xff] %vm4155_vm2, %v4115_v9  ;;  %v13430_v9 = vld [vmem:[#allocation317_spill] sm:$0xff] }
 0x864   : > { %4576 = vperm.xlu1 %7274, %v11641_v19   ;;  %v4657_v19 = vmul.f32 %v11542_v46, %v4273_v54  ;;  %v13432_v54 = vld [vmem:[#allocation24_spill] sm:$0xff] }
 0x865   : > { %v5294_v43 = vpop.f32.mrf.mxu0 }
 0x866   : > { %v11644_v22 = vpop.permute.xlu0 %4571 }
 0x867   : > { %v5583_v23 = vpop.f32.mrf.mxu1  ;;  %v5296_v10 = vpop.f32.mrf.mxu0 }
 0x868   : > { %v5584_v34 = vadd.f32 %v5583_v23, %v5294_v43 }
 0x869   : > { %v5585_v37 = vpop.f32.mrf.mxu1  ;;  %v5297_v27 = vpop.f32.mrf.mxu0 }
 0x86a   : > { %v5682_v51 = vadd.f32 %v5584_v34, %v4656_v35  ;;  %v2873_v7 = vpop.permute.xlu0 %2872  ;;  %v3880_v16 = vpop.xlane.xlu1 %3879 }
 0x86b   : > { %v5586_v52 = vpop.f32.mrf.mxu1  ;;  %v3127_v2 = vsub.f32 %v13428_v18, %v2873_v7  ;;  %v3128_v56 = vsub.f32 %v13429_v32, %v2873_v7  ;;  %v3129_v1 = vsub.f32 %v13430_v9, %v2873_v7  ;;  %v5299_v10 = vpop.f32.mrf.mxu0  ;;  %v3130_v43 = vsub.f32 %v13431_v41, %v2873_v7 }
 0x86c   : > { %5746 = vst [vmem:[#allocation4 + $0x170] sm:$0xff] %v5682_v51  ;;  %v5587_v61 = vadd.f32 %v5586_v52, %v5297_v27  ;;  %v4112_v23 = vadd.f32 %v3880_v16, %v3728_v24  ;;  %v13433_v51 = vld [vmem:[#allocation25_spill] sm:$0xff]  ;;  %v13434_v24 = vld [vmem:[#allocation23_spill] sm:$0xff]  ;;  %v13436_v10 = vld [vmem:[#allocation76_spill] sm:$0xff] }
 0x86d   : > { %v3635_v35 = vmul.f32 1.442695, %v3127_v2  ;;  %v3637_v34 = vmul.f32 1.442695, %v3128_v56  ;;  %v5588_v37 = vpop.f32.mrf.mxu1  ;;  %v3639_v5 = vmul.f32 1.442695, %v3129_v1 }
 0x86e   : > { %v5683_v40 = vadd.f32 %v5587_v61, %v4657_v19  ;;  %4177 = vst.msk [vmem:[#allocation3 + $0xa8] sm:$0xff] %vm4155_vm2, %v4112_v23  ;;  %v11654_v18 = vpop.permute.xlu1 %4556  ;;  %v3641_v32 = vmul.f32 1.442695, %v3130_v43  ;;  %v13435_v52 = vld [vmem:[#allocation307_spill] sm:$0xff] }
 0x86f   : > { %7981 = vpow2.f32 %v3635_v35 }
 0x870   : > { %5747 = vst [vmem:[#allocation4 + $0x178] sm:$0xff] %v5683_v40  ;;  %7983 = vpow2.f32 %v3637_v34  ;;  %v13437_v40 = vld [vmem:[#allocation51_spill] sm:$0xff] }
 0x871   : > { %7985 = vpow2.f32 %v3639_v5  ;;  %v2423_v5 = vsub.f32 %v13437_v40, %v13393_v17 }
 0x872   : > { %v2858_v46 = vpop.permute.xlu1 %2857  ;;  %7987 = vpow2.f32 %v3641_v32 }
 0x873   : > { %v3115_v27 = vsub.f32 %v13432_v54, %v2858_v46  ;;  %v3116_v7 = vsub.f32 %v13433_v51, %v2858_v46  ;;  %v3117_v16 = vsub.f32 %v13434_v24, %v2858_v46  ;;  %v3118_v2 = vsub.f32 %v13435_v52, %v2858_v46  ;;  %v13438_v24 = vld [vmem:[#allocation167_spill] sm:$0xff] }
 0x874   : > { %v2547_v51 = vmul.f32 1.442695, %v2423_v5 }
 0x875   : > { %v3611_v1 = vmul.f32 1.442695, %v3115_v27  ;;  %v3613_v19 = vmul.f32 1.442695, %v3116_v7  ;;  %v3615_v56 = vmul.f32 1.442695, %v3117_v16 }
 0x876   : > { %v3617_v9 = vmul.f32 1.442695, %v3118_v2 }
 0x877   : > { %7989 = vpow2.f32 %v3611_v1 }
 0x878   : > { %7991 = vpow2.f32 %v3613_v19  ;;  %3924 = vadd.xlane.f32.xlu0 %v13436_v10  ;;  %v4275_v19 = vld [vmem:[#allocation4 + $0x190] sm:$0xff] }
 0x879   : > { %7993 = vpow2.f32 %v3615_v56 }
 0x87a   : > { %7995 = vpow2.f32 %v3617_v9 }
 0x87b   : > { %7997 = vpow2.f32 %v2547_v51 }
 0x87c   : > { %v11661_v61 = vpop.eup %7981  ;;  %3934 = vadd.xlane.f32.xlu0 %v11041_v38 }
 0x87d   : > { %v11664_v41 = vpop.eup %7983 }
 0x87e   : > { %v4086_v43 = vadd.f32 %v11664_v41, %v11661_v61  ;;  %v11668_v23 = vpop.eup %7985 }
 0x87f   : > { %v11672_v34 = vpop.eup %7987 }
 0x880   : > { %3944 = vadd.xlane.f32.xlu0 %v11050_v63  ;;  %v4087_v35 = vadd.f32 %v11668_v23, %v4086_v43 }
 0x882   : > { %v11675_v37 = vadd.f32 %v11672_v34, %v4087_v35 }
 0x884   : > { %v7990_v38 = vpop.eup %7989  ;;  %3954 = vadd.xlane.f32.xlu0 %v11076_v3  ;;  %v3669_v3 = vld [vmem:[#allocation3 + $0xd0] sm:$0xff] }
 0x885   : > { %v7992_v32 = vpop.eup %7991  ;;  %v4788_v46 = vpack.c.bf16 %v11610_v57, %v7990_v38  ;;  %v13439_v57 = vld [vmem:[#allocation59_spill] sm:$0xff] }
 0x886   : > { %v11681_v54 = vpop.eup %7993  ;;  %v4789_v63 = vpack.c.bf16 %v11615_v26, %v7992_v32  ;;  %v3733_v26 = vmul.f32 %v13439_v57, %v3669_v3  ;;  %v13442_v57 = vld [vmem:[#allocation314_spill] sm:$0xff] }
 0x887   : > { %v11684_v27 = vpop.eup %7995  ;;  %v4790_v7 = vpack.c.bf16 %v11619_v42, %v11681_v54 }
 0x888   : > { %5324 = vmatprep.mubr.bf16.mxu0 %v4789_v63  ;;  %v4791_v17 = vpack.c.bf16 %v11622_v12, %v11684_v27  ;;  %3909 = vadd.xlane.f32.xlu1 %v13438_v24  ;;  %v11696_v16 = vpop.eup %7997  ;;  %v13441_v24 = vld [vmem:[#allocation312_spill] sm:$0xff] }
 0x889   : > { %3964 = vadd.xlane.f32.xlu0 %v11151_v47  ;;  %5325 = vmatmul.mubr.bf16.gmra.mxu0 %v4788_v46  ;;  %v4274_v47 = vld [vmem:[#allocation4 + $0x68] sm:$0xff]  ;;  %v4659_v46 = vmul.f32 %v11593_v39, %v4275_v19  ;;  %v13443_v39 = vld [vmem:[#allocation141_spill] sm:$0xff] }
 0x88a   : > { %5613 = vmatprep.mubr.bf16.mxu1 %v4791_v17  ;;  %v4071_v17 = vadd.f32 %v7992_v32, %v7990_v38  ;;  %v13445_v38 = vld [vmem:[#allocation203_spill] sm:$0xff]  ;;  %v13446_v32 = vld [vmem:[#allocation201_spill] sm:$0xff] }
 0x88b   : > { %5614 = vmatmul.mubr.bf16.gmra.mxu1 %v4790_v7 }
 0x88d   : > { %3974 = vadd.xlane.f32.xlu0 %v11157_v30 }
 0x891   : > { %3984 = vadd.xlane.f32.xlu0 %v11210_v29  ;;  %v3666_v29 = vld [vmem:[#allocation3 + $0xb8] sm:$0xff] }
 0x895   : > { %3994 = vadd.xlane.f32.xlu0 %v11265_v50  ;;  %v4658_v50 = vmul.f32 %v11654_v18, %v4274_v47 }
 0x897   : > { %v3905_v42 = vpop.xlane.xlu0 %3904 }
 0x898   : > { %v4117_v12 = vadd.f32 %v3905_v42, %v3733_v26 }
 0x899   : > { %4004 = vadd.xlane.f32.xlu0 %v11320_v13  ;;  %4586 = vperm.xlu1 %7274, %v11696_v16   ;;  %v13440_v13 = vld [vmem:[#allocation45_spill] sm:$0xff] }
 0x89a   : > { %4182 = vst.msk [vmem:[#allocation3 + $0xd0] sm:$0xff] %vm4155_vm2, %v4117_v12  ;;  %v3730_v10 = vmul.f32 %v13440_v13, %v3666_v29  ;;  %v13444_v12 = vld [vmem:[#allocation315_spill] sm:$0xff]  ;;  %v13450_v13 = vld [vmem:[#allocation88_spill] sm:$0xff] }
 0x89d   : > { %4014 = vadd.xlane.f32.xlu0 %v11374_v15 }
 0x89e   : > { %v5302_v30 = vpop.f32.mrf.mxu0 }
 0x8a0   : > { %v5591_v52 = vpop.f32.mrf.mxu1  ;;  %v5304_v2 = vpop.f32.mrf.mxu0 }
 0x8a1   : > { %v5592_v1 = vadd.f32 %v5591_v52, %v5302_v30  ;;  %4024 = vadd.xlane.f32.xlu0 %v11426_v8  ;;  %v4072_v2 = vadd.f32 %v11681_v54, %v4071_v17  ;;  %v13451_v54 = vld [vmem:[#allocation206_spill] sm:$0xff] }
 0x8a2   : > { %v5593_v56 = vpop.f32.mrf.mxu1  ;;  %v5305_v9 = vpop.f32.mrf.mxu0 }
 0x8a3   : > { %v5684_v43 = vadd.f32 %v5592_v1, %v4658_v50  ;;  %v3890_v35 = vpop.xlane.xlu1 %3889  ;;  %v3916_v50 = vadd.f32 %v13446_v32, %v13445_v38  ;;  %v13447_v1 = vld [vmem:[#allocation193_spill] sm:$0xff]  ;;  %v13449_v56 = vld [vmem:[#allocation207_spill] sm:$0xff]  ;;  %v13461_v38 = vld [vmem:[#allocation214_spill] sm:$0xff] }
 0x8a4   : > { %v5594_v40 = vpop.f32.mrf.mxu1  ;;  %v5307_v5 = vpop.f32.mrf.mxu0  ;;  %v4114_v15 = vadd.f32 %v3890_v35, %v3730_v10 }
 0x8a5   : > { %5748 = vst [vmem:[#allocation4 + $0x68] sm:$0xff] %v5684_v43  ;;  %v5595_v63 = vadd.f32 %v5594_v40, %v5305_v9  ;;  %4034 = vadd.xlane.f32.xlu0 %v11478_v60  ;;  %v3917_v9 = vadd.f32 %v13449_v56, %v3916_v50  ;;  %v3668_v56 = vld [vmem:[#allocation3 + $0xc8] sm:$0xff] }
 0x8a6   : > { %v5596_v18 = vpop.f32.mrf.mxu1  ;;  %4179 = vst.msk [vmem:[#allocation3 + $0xb8] sm:$0xff] %vm4155_vm2, %v4114_v15 }
 0x8a7   : > { %v5685_v8 = vadd.f32 %v5595_v63, %v4659_v46  ;;  %v11708_v51 = vpop.permute.xlu1 %4566  ;;  %v3918_v43 = vadd.f32 %v13451_v54, %v3917_v9 }
 0x8a9   : > { %5749 = vst [vmem:[#allocation4 + $0x190] sm:$0xff] %v5685_v8  ;;  %4044 = vadd.xlane.f32.xlu0 %v11530_v55  ;;  %v4073_v55 = vadd.f32 %v11684_v27, %v4072_v2  ;;  %v13452_v27 = vld [vmem:[#allocation87_spill] sm:$0xff]  ;;  %v13460_v2 = vld [vmem:[#allocation61_spill] sm:$0xff] }
 0x8ab   : > { %v2868_v7 = vpop.permute.xlu1 %2867 }
 0x8ac   : > { %v3123_v3 = vsub.f32 %v13441_v24, %v2868_v7  ;;  %v3124_v26 = vsub.f32 %v13442_v57, %v2868_v7  ;;  %v3125_v42 = vsub.f32 %v13443_v39, %v2868_v7  ;;  %v3126_v47 = vsub.f32 %v13444_v12, %v2868_v7  ;;  %v13455_v39 = vld [vmem:[#allocation75_spill] sm:$0xff] }
 0x8ad   : > { %4054 = vadd.xlane.f32.xlu0 %v11582_v36  ;;  %v13448_v36 = vld [vmem:[#allocation86_spill] sm:$0xff]  ;;  %v3946_v7 = vadd.f32 %v10997_v33, %v10993_v58  ;;  %v13457_v58 = vld [vmem:[#allocation69_spill] sm:$0xff]  ;;  %v13459_v12 = vld [vmem:[#allocation215_spill] sm:$0xff] }
 0x8ae   : > { %v3627_v60 = vmul.f32 1.442695, %v3123_v3  ;;  %v3629_v30 = vmul.f32 1.442695, %v3124_v26  ;;  %v3631_v29 = vmul.f32 1.442695, %v3125_v42  ;;  %v3926_v19 = vadd.f32 %v13448_v36, %v13447_v1 }
 0x8af   : > { %v3633_v52 = vmul.f32 1.442695, %v3126_v47  ;;  %v13453_v3 = vld [vmem:[#allocation89_spill] sm:$0xff]  ;;  %v2426_v33 = vsub.f32 %v13457_v58, %v13391_v48  ;;  %v3679_v58 = vld [vmem:[#allocation3 + $0x120] sm:$0xff] }
 0x8b0   : > { %7999 = vpow2.f32 %v3627_v60  ;;  %v3927_v10 = vadd.f32 %v13450_v13, %v3926_v19  ;;  %v3966_v60 = vadd.f32 %v11121_v25, %v11119_v11  ;;  %v13462_v11 = vld [vmem:[#allocation222_spill] sm:$0xff]  ;;  %v4276_v25 = vld [vmem:[#allocation4 + $0x198] sm:$0xff] }
 0x8b1   : > { %8001 = vpow2.f32 %v3629_v30  ;;  %4064 = vadd.xlane.f32.xlu0 %v11633_v21  ;;  %v3936_v21 = vadd.f32 %v10969_v20, %v10967_v62  ;;  %v11746_v30 = vpop.permute.xlu0 %4581 }
 0x8b2   : > { %8003 = vpow2.f32 %v3631_v29  ;;  %v3928_v5 = vadd.f32 %v13452_v27, %v3927_v10  ;;  %v3671_v29 = vld [vmem:[#allocation3 + $0xe0] sm:$0xff]  ;;  %v3967_v48 = vadd.f32 %v11123_v0, %v3966_v60  ;;  %v13463_v10 = vld [vmem:[#allocation200_spill] sm:$0xff]  ;;  %v4660_v0 = vmul.f32 %v11708_v51, %v4276_v25 }
 0x8b3   : > { %8005 = vpow2.f32 %v3633_v52  ;;  %v3937_v8 = vadd.f32 %v10971_v6, %v3936_v21  ;;  %v13456_v6 = vld [vmem:[#allocation77_spill] sm:$0xff]  ;;  %v2553_v52 = vmul.f32 1.442695, %v2426_v33 }
 0x8b4   : > { %v3956_v42 = vadd.f32 %v13456_v6, %v13455_v39  ;;  %v3968_v36 = vadd.f32 %v11126_v14, %v3967_v48  ;;  %v4277_v21 = vld [vmem:[#allocation4 + $0x38] sm:$0xff]  ;;  %v13464_v14 = vld [vmem:[#allocation159_spill] sm:$0xff]  ;;  %v13473_v48 = vld [vmem:[#allocation182_spill] sm:$0xff] }
 0x8b5   : > { %4074 = vadd.xlane.f32.xlu0 %v4073_v55  ;;  %v3938_v57 = vadd.f32 %v13453_v3, %v3937_v8  ;;  %v3735_v55 = vmul.f32 %v13460_v2, %v3671_v29  ;;  %8007 = vpow2.f32 %v2553_v52  ;;  %v3732_v27 = vmul.f32 %v13464_v14, %v3668_v56  ;;  %v3681_v29 = vld [vmem:[#allocation3 + $0x130] sm:$0xff]  ;;  %v4278_v52 = vld [vmem:[#allocation4 + $0xc0] sm:$0xff] }
 0x8b6   : > { %v3957_v47 = vadd.f32 %v13459_v12, %v3956_v42  ;;  %v4661_v8 = vmul.f32 %v11644_v22, %v4277_v21  ;;  %v13466_v22 = vld [vmem:[#allocation71_spill] sm:$0xff] }
 0x8b8   : > { %v3958_v32 = vadd.f32 %v13461_v38, %v3957_v47  ;;  %v3670_v47 = vld [vmem:[#allocation3 + $0xd8] sm:$0xff] }
 0x8bd   : > { %v8000_v35 = vpop.eup %7999  ;;  %3919 = vadd.xlane.f32.xlu1 %v3918_v43 }
 0x8be   : > { %v8002_v40 = vpop.eup %8001  ;;  %v4792_v15 = vpack.c.bf16 %v11661_v61, %v8000_v35 }
 0x8bf   : > { %v8004_v46 = vpop.eup %8003  ;;  %v4793_v63 = vpack.c.bf16 %v11664_v41, %v8002_v40  ;;  %v4081_v18 = vadd.f32 %v8002_v40, %v8000_v35  ;;  %v13454_v41 = vld [vmem:[#allocation210_spill] sm:$0xff] }
 0x8c0   : > { %v8006_v17 = vpop.eup %8005  ;;  %v4794_v24 = vpack.c.bf16 %v11668_v23, %v8004_v46  ;;  %v3947_v26 = vadd.f32 %v13454_v41, %v3946_v7  ;;  %v13458_v23 = vld [vmem:[#allocation74_spill] sm:$0xff] }
 0x8c1   : > { %5332 = vmatprep.mubr.bf16.mxu0 %v4793_v63  ;;  %v4795_v62 = vpack.c.bf16 %v11672_v34, %v8006_v17  ;;  %3929 = vadd.xlane.f32.xlu1 %v3928_v5  ;;  %v4082_v20 = vadd.f32 %v8004_v46, %v4081_v18 }
 0x8c2   : > { %5333 = vmatmul.mubr.bf16.gmra.mxu0 %v4792_v15  ;;  %v3948_v34 = vadd.f32 %v13458_v23, %v3947_v26  ;;  %v11755_v54 = vpop.eup %8007  ;;  %v3677_v26 = vld [vmem:[#allocation3 + $0x110] sm:$0xff] }
 0x8c3   : > { %5621 = vmatprep.mubr.bf16.mxu1 %v4795_v62  ;;  %v4083_v61 = vadd.f32 %v8006_v17, %v4082_v20 }
 0x8c4   : > { %5622 = vmatmul.mubr.bf16.gmra.mxu1 %v4794_v24  ;;  %v13467_v24 = vld [vmem:[#allocation72_spill] sm:$0xff] }
 0x8c5   : > { %4084 = vadd.xlane.f32.xlu0 %v4083_v61  ;;  %3939 = vadd.xlane.f32.xlu1 %v3938_v57  ;;  %v2425_v62 = vsub.f32 %v13467_v24, %v13466_v22  ;;  %v3687_v24 = vld [vmem:[#allocation3 + $0x160] sm:$0xff] }
 0x8c7   : > { %v2551_v61 = vmul.f32 1.442695, %v2425_v62 }
 0x8c9   : > { %3949 = vadd.xlane.f32.xlu1 %v3948_v34  ;;  %8009 = vpow2.f32 %v2551_v61 }
 0x8cc   : > { %v3915_v50 = vpop.xlane.xlu0 %3914 }
 0x8cd   : > { %v4119_v1 = vadd.f32 %v3915_v50, %v3735_v55  ;;  %3959 = vadd.xlane.f32.xlu1 %v3958_v32  ;;  %v13472_v55 = vld [vmem:[#allocation62_spill] sm:$0xff]  ;;  %v3745_v50 = vmul.f32 %v13473_v48, %v3681_v29 }
 0x8ce   : > { %v3734_v38 = vmul.f32 %v13472_v55, %v3670_v47 }
 0x8cf   : > { %4184 = vst.msk [vmem:[#allocation3 + $0xe0] sm:$0xff] %vm4155_vm2, %v4119_v1 }
 0x8d1   : > { %3969 = vadd.xlane.f32.xlu1 %v3968_v36 }
 0x8d4   : > { %v11772_v20 = vpop.permute.xlu0 %4591 }
 0x8d5   : > { %3979 = vadd.xlane.f32.xlu1 %v13462_v11 }
 0x8d6   : > { %v11785_v32 = vpop.eup %8009 }
 0x8d7   : > { %v5310_v19 = vpop.f32.mrf.mxu0 }
 0x8d9   : > { %v5599_v9 = vpop.f32.mrf.mxu1  ;;  %v5312_v13 = vpop.f32.mrf.mxu0  ;;  %3989 = vadd.xlane.f32.xlu1 %v13463_v10 }
 0x8da   : > { %v5600_v43 = vadd.f32 %v5599_v9, %v5310_v19  ;;  %v3683_v19 = vld [vmem:[#allocation3 + $0x140] sm:$0xff] }
 0x8db   : > { %v5601_v35 = vpop.f32.mrf.mxu1  ;;  %v5313_v40 = vpop.f32.mrf.mxu0  ;;  %4601 = vperm.xlu0 %7273, %v11755_v54  }
 0x8dc   : > { %v5686_v5 = vadd.f32 %v5600_v43, %v4660_v0  ;;  %v3900_v15 = vpop.xlane.xlu1 %3899  ;;  %v4279_v0 = vld [vmem:[#allocation4 + $0x1c0] sm:$0xff] }
 0x8dd   : > { %v5602_v46 = vpop.f32.mrf.mxu1  ;;  %v5315_v63 = vpop.f32.mrf.mxu0  ;;  %v4116_v18 = vadd.f32 %v3900_v15, %v3732_v27  ;;  %3999 = vadd.xlane.f32.xlu1 %v11202_v45  ;;  %v13465_v45 = vld [vmem:[#allocation102_spill] sm:$0xff]  ;;  %v3685_v15 = vld [vmem:[#allocation3 + $0x150] sm:$0xff] }
 0x8de   : > { %5750 = vst [vmem:[#allocation4 + $0x198] sm:$0xff] %v5686_v5  ;;  %v5603_v7 = vadd.f32 %v5602_v46, %v5313_v40  ;;  %v13474_v40 = vld [vmem:[#allocation96_spill] sm:$0xff]  ;;  %v4663_v46 = vmul.f32 %v11746_v30, %v4279_v0 }
 0x8df   : > { %v5604_v51 = vpop.f32.mrf.mxu1  ;;  %4181 = vst.msk [vmem:[#allocation3 + $0xc8] sm:$0xff] %vm4155_vm2, %v4116_v18  ;;  %v3747_v14 = vmul.f32 %v13474_v40, %v3683_v19  ;;  %v3689_v30 = vld [vmem:[#allocation3 + $0x170] sm:$0xff]  ;;  %v3672_v40 = vld [vmem:[#allocation3 + $0xe8] sm:$0xff] }
 0x8e0   : > { %v5687_v17 = vadd.f32 %v5603_v7, %v4661_v8  ;;  %v4577_v34 = vpop.permute.xlu1 %4576  ;;  %v13483_v19 = vld [vmem:[#allocation220_spill] sm:$0xff] }
 0x8e1   : > { %4009 = vadd.xlane.f32.xlu1 %v11255_v31  ;;  %v3673_v31 = vld [vmem:[#allocation3 + $0xf0] sm:$0xff]  ;;  %v4662_v56 = vmul.f32 %v4577_v34, %v4278_v52  ;;  %v13481_v52 = vld [vmem:[#allocation103_spill] sm:$0xff] }
 0x8e2   : > { %5751 = vst [vmem:[#allocation4 + $0x38] sm:$0xff] %v5687_v17  ;;  %v13475_v17 = vld [vmem:[#allocation97_spill] sm:$0xff]  ;;  %v13480_v34 = vld [vmem:[#allocation204_spill] sm:$0xff] }
 0x8e5   : > { %4019 = vadd.xlane.f32.xlu1 %v11312_v4  ;;  %v13468_v4 = vld [vmem:[#allocation178_spill] sm:$0xff] }
 0x8e6   : > { %v3737_v3 = vmul.f32 %v13468_v4, %v3673_v31  ;;  %v13476_v31 = vld [vmem:[#allocation84_spill] sm:$0xff] }
 0x8e7   : > { %v3751_v61 = vmul.f32 %v13476_v31, %v3687_v24 }
 0x8e9   : > { %4029 = vadd.xlane.f32.xlu1 %v11366_v53 }
 0x8ed   : > { %4039 = vadd.xlane.f32.xlu1 %v11418_v44  ;;  %v3675_v44 = vld [vmem:[#allocation3 + $0x100] sm:$0xff] }
 0x8f1   : > { %4049 = vadd.xlane.f32.xlu1 %v11470_v49 }
 0x8f5   : > { %4059 = vadd.xlane.f32.xlu1 %v13465_v45  ;;  %v3749_v45 = vmul.f32 %v13475_v17, %v3685_v15  ;;  %v3674_v15 = vld [vmem:[#allocation3 + $0xf8] sm:$0xff]  ;;  %v3705_v17 = vld [vmem:[#allocation3 + $0x1f0] sm:$0xff] }
 0x8f9   : > { %4069 = vadd.xlane.f32.xlu1 %v11574_v59  ;;  %v13469_v59 = vld [vmem:[#allocation78_spill] sm:$0xff] }
 0x8fa   : > { %v3739_v57 = vmul.f32 %v13469_v59, %v3675_v44  ;;  %v3691_v59 = vld [vmem:[#allocation3 + $0x180] sm:$0xff] }
 0x8fd   : > { %4079 = vadd.xlane.f32.xlu1 %v11625_v28  ;;  %v13470_v28 = vld [vmem:[#allocation67_spill] sm:$0xff] }
 0x8fe   : > { %v3741_v6 = vmul.f32 %v13470_v28, %v3677_v26  ;;  %v3693_v28 = vld [vmem:[#allocation3 + $0x190] sm:$0xff] }
 0x901   : > { %v3925_v53 = vpop.xlane.xlu0 %3924  ;;  %4089 = vadd.xlane.f32.xlu1 %v11675_v37  ;;  %v13471_v37 = vld [vmem:[#allocation174_spill] sm:$0xff] }
 0x902   : > { %v4121_v49 = vadd.f32 %v3925_v53, %v3737_v3  ;;  %v3743_v23 = vmul.f32 %v13471_v37, %v3679_v58  ;;  %v13477_v53 = vld [vmem:[#allocation231_spill] sm:$0xff]  ;;  %v3695_v37 = vld [vmem:[#allocation3 + $0x1a0] sm:$0xff] }
 0x903   : > { %v3753_v44 = vmul.f32 %v13477_v53, %v3689_v30  ;;  %v13486_v53 = vld [vmem:[#allocation52_spill] sm:$0xff] }
 0x904   : > { %4186 = vst.msk [vmem:[#allocation3 + $0xf0] sm:$0xff] %vm4155_vm2, %v4121_v49 }
 0x905   : > { %v3935_v41 = vpop.xlane.xlu0 %3934 }
 0x906   : > { %v4123_v39 = vadd.f32 %v3935_v41, %v3739_v57  ;;  %v13478_v41 = vld [vmem:[#allocation268_spill] sm:$0xff] }
 0x907   : > { %v3755_v26 = vmul.f32 %v13478_v41, %v3691_v59  ;;  %v3678_v41 = vld [vmem:[#allocation3 + $0x118] sm:$0xff] }
 0x908   : > { %4188 = vst.msk [vmem:[#allocation3 + $0x100] sm:$0xff] %vm4155_vm2, %v4123_v39 }
 0x909   : > { %v3945_v42 = vpop.xlane.xlu0 %3944 }
 0x90a   : > { %v4125_v33 = vadd.f32 %v3945_v42, %v3741_v6  ;;  %v13479_v42 = vld [vmem:[#allocation198_spill] sm:$0xff] }
 0x90b   : > { %v3757_v58 = vmul.f32 %v13479_v42, %v3693_v28 }
 0x90c   : > { %4190 = vst.msk [vmem:[#allocation3 + $0x110] sm:$0xff] %vm4155_vm2, %v4125_v33 }
 0x90d   : > { %v3955_v12 = vpop.xlane.xlu0 %3954 }
 0x90e   : > { %v4127_v60 = vadd.f32 %v3955_v12, %v3743_v23  ;;  %v3759_v12 = vmul.f32 %v13480_v34, %v3695_v37 }
 0x910   : > { %4192 = vst.msk [vmem:[#allocation3 + $0x120] sm:$0xff] %vm4155_vm2, %v4127_v60  ;;  %v5318_v2 = vpop.f32.mrf.mxu0  ;;  %v3697_v60 = vld [vmem:[#allocation3 + $0x1b0] sm:$0xff] }
 0x911   : > { %v3910_v1 = vpop.xlane.xlu1 %3909 }
 0x912   : > { %v5607_v36 = vpop.f32.mrf.mxu1  ;;  %v3965_v11 = vpop.xlane.xlu0 %3964  ;;  %v4118_v25 = vadd.f32 %v3910_v1, %v3734_v38  ;;  %4596 = vperm.xlu1 %7274, %v11785_v32   ;;  %v3699_v38 = vld [vmem:[#allocation3 + $0x1c0] sm:$0xff] }
 0x913   : > { %v5608_v9 = vadd.f32 %v5607_v36, %v5318_v2  ;;  %v4129_v13 = vadd.f32 %v3965_v11, %v3745_v50  ;;  %v5320_v10 = vpop.f32.mrf.mxu0  ;;  %v3761_v2 = vmul.f32 %v13481_v52, %v3697_v60  ;;  %v13482_v50 = vld [vmem:[#allocation209_spill] sm:$0xff]  ;;  %v3701_v11 = vld [vmem:[#allocation3 + $0x1d0] sm:$0xff] }
 0x914   : > { %v5609_v43 = vpop.f32.mrf.mxu1  ;;  %4183 = vst.msk [vmem:[#allocation3 + $0xd8] sm:$0xff] %vm4155_vm2, %v4118_v25  ;;  %v3763_v1 = vmul.f32 %v13482_v50, %v3699_v38  ;;  %v13488_v60 = vld [vmem:[#allocation81_spill] sm:$0xff]  ;;  %v3684_v50 = vld [vmem:[#allocation3 + $0x148] sm:$0xff] }
 0x915   : > { %v5688_v21 = vadd.f32 %v5608_v9, %v4662_v56  ;;  %4194 = vst.msk [vmem:[#allocation3 + $0x130] sm:$0xff] %vm4155_vm2, %v4129_v13  ;;  %v5321_v35 = vpop.f32.mrf.mxu0  ;;  %v3765_v56 = vmul.f32 %v13483_v19, %v3701_v11  ;;  %v3703_v13 = vld [vmem:[#allocation3 + $0x1e0] sm:$0xff]  ;;  %v3686_v19 = vld [vmem:[#allocation3 + $0x158] sm:$0xff] }
 0x916   : > { %v5610_v27 = vpop.f32.mrf.mxu1  ;;  %v3975_v5 = vpop.xlane.xlu0 %3974  ;;  %v3767_v0 = vmul.f32 %v11696_v16, %v3703_v13  ;;  %v3676_v16 = vld [vmem:[#allocation3 + $0x108] sm:$0xff] }
 0x917   : > { %5752 = vst [vmem:[#allocation4 + $0xc0] sm:$0xff] %v5688_v21  ;;  %v5611_v63 = vadd.f32 %v5610_v27, %v5321_v35  ;;  %v4131_v18 = vadd.f32 %v3975_v5, %v3747_v14  ;;  %v5323_v8 = vpop.f32.mrf.mxu0  ;;  %v4587_v35 = vpop.permute.xlu1 %4586  ;;  %v13484_v14 = vld [vmem:[#allocation64_spill] sm:$0xff] }
 0x918   : > { %v5612_v7 = vpop.f32.mrf.mxu1  ;;  %v3736_v27 = vmul.f32 %v13484_v14, %v3672_v40  ;;  %v13485_v8 = vld [vmem:[#allocation65_spill] sm:$0xff] }
 0x919   : > { %v5689_v51 = vadd.f32 %v5611_v63, %v4663_v46  ;;  %4196 = vst.msk [vmem:[#allocation3 + $0x140] sm:$0xff] %vm4155_vm2, %v4131_v18  ;;  %v4280_v63 = vld [vmem:[#allocation4 + $0x158] sm:$0xff]  ;;  %v3738_v7 = vmul.f32 %v13485_v8, %v3674_v15  ;;  %v13494_v8 = vld [vmem:[#allocation83_spill] sm:$0xff] }
 0x91a   : > { %v3985_v22 = vpop.xlane.xlu0 %3984  ;;  %v3690_v14 = vld [vmem:[#allocation3 + $0x178] sm:$0xff] }
 0x91b   : > { %5753 = vst [vmem:[#allocation4 + $0x1c0] sm:$0xff] %v5689_v51  ;;  %v4133_v62 = vadd.f32 %v3985_v22, %v3749_v45 }
 0x91d   : > { %4198 = vst.msk [vmem:[#allocation3 + $0x150] sm:$0xff] %vm4155_vm2, %v4133_v62  ;;  %v4664_v62 = vmul.f32 %v4587_v35, %v4280_v63  ;;  %v3692_v63 = vld [vmem:[#allocation3 + $0x188] sm:$0xff] }
 0x91e   : > { %v3995_v4 = vpop.xlane.xlu0 %3994 }
 0x91f   : > { %v4135_v3 = vadd.f32 %v3995_v4, %v3751_v61  ;;  %v4281_v61 = vld [vmem:[#allocation4 + $0x10] sm:$0xff] }
 0x920   : > { %v4665_v42 = vmul.f32 %v11772_v20, %v4281_v61  ;;  %v3682_v20 = vld [vmem:[#allocation3 + $0x138] sm:$0xff]  ;;  %v13496_v61 = vld [vmem:[#allocation190_spill] sm:$0xff] }
 0x921   : > { %4200 = vst.msk [vmem:[#allocation3 + $0x160] sm:$0xff] %vm4155_vm2, %v4135_v3  ;;  %v3769_v3 = vmul.f32 %v11785_v32, %v3705_v17  ;;  %v13487_v32 = vld [vmem:[#allocation197_spill] sm:$0xff] }
 0x922   : > { %v4005_v49 = vpop.xlane.xlu0 %4004  ;;  %v3742_v37 = vmul.f32 %v13487_v32, %v3678_v41  ;;  %v3694_v17 = vld [vmem:[#allocation3 + $0x198] sm:$0xff] }
 0x923   : > { %v4137_v57 = vadd.f32 %v4005_v49, %v3753_v44  ;;  %v3740_v44 = vmul.f32 %v13486_v53, %v3676_v16 }
 0x925   : > { %4202 = vst.msk [vmem:[#allocation3 + $0x170] sm:$0xff] %vm4155_vm2, %v4137_v57 }
 0x926   : > { %v4015_v39 = vpop.xlane.xlu0 %4014 }
 0x927   : > { %v4139_v6 = vadd.f32 %v4015_v39, %v3755_v26 }
 0x929   : > { %4204 = vst.msk [vmem:[#allocation3 + $0x180] sm:$0xff] %vm4155_vm2, %v4139_v6 }
 0x92a   : > { %v4025_v33 = vpop.xlane.xlu0 %4024 }
 0x92b   : > { %v4141_v23 = vadd.f32 %v4025_v33, %v3757_v58 }
 0x92d   : > { %4206 = vst.msk [vmem:[#allocation3 + $0x190] sm:$0xff] %vm4155_vm2, %v4141_v23 }
 0x92e   : > { %v4035_v47 = vpop.xlane.xlu0 %4034 }
 0x92f   : > { %v4143_v29 = vadd.f32 %v4035_v47, %v3759_v12  ;;  %v3680_v12 = vld [vmem:[#allocation3 + $0x128] sm:$0xff] }
 0x931   : > { %4208 = vst.msk [vmem:[#allocation3 + $0x1a0] sm:$0xff] %vm4155_vm2, %v4143_v29  ;;  %v3744_v29 = vmul.f32 %v13488_v60, %v3680_v12 }
 0x932   : > { %v4045_v55 = vpop.xlane.xlu0 %4044 }
 0x933   : > { %v4145_v48 = vadd.f32 %v4045_v55, %v3761_v2  ;;  %v13489_v55 = vld [vmem:[#allocation194_spill] sm:$0xff] }
 0x934   : > { %v3746_v38 = vmul.f32 %v13489_v55, %v3682_v20 }
 0x935   : > { %4210 = vst.msk [vmem:[#allocation3 + $0x1b0] sm:$0xff] %vm4155_vm2, %v4145_v48 }
 0x936   : > { %v4055_v36 = vpop.xlane.xlu0 %4054 }
 0x937   : > { %v4147_v25 = vadd.f32 %v4055_v36, %v3763_v1  ;;  %v13490_v36 = vld [vmem:[#allocation238_spill] sm:$0xff] }
 0x938   : > { %v3748_v11 = vmul.f32 %v13490_v36, %v3684_v50 }
 0x939   : > { %4212 = vst.msk [vmem:[#allocation3 + $0x1c0] sm:$0xff] %vm4155_vm2, %v4147_v25 }
 0x93a   : > { %v4065_v9 = vpop.xlane.xlu0 %4064 }
 0x93b   : > { %v4149_v10 = vadd.f32 %v4065_v9, %v3765_v56  ;;  %v13491_v9 = vld [vmem:[#allocation94_spill] sm:$0xff] }
 0x93c   : > { %v3750_v13 = vmul.f32 %v13491_v9, %v3686_v19 }
 0x93d   : > { %4214 = vst.msk [vmem:[#allocation3 + $0x1d0] sm:$0xff] %vm4155_vm2, %v4149_v10 }
 0x93e   : > { %v4075_v43 = vpop.xlane.xlu0 %4074 }
 0x93f   : > { %v4151_v21 = vadd.f32 %v4075_v43, %v3767_v0  ;;  %v3688_v0 = vld [vmem:[#allocation3 + $0x168] sm:$0xff] }
 0x941   : > { %4216 = vst.msk [vmem:[#allocation3 + $0x1e0] sm:$0xff] %vm4155_vm2, %v4151_v21  ;;  %v13492_v21 = vld [vmem:[#allocation95_spill] sm:$0xff] }
 0x942   : > { %v3752_v35 = vmul.f32 %v13492_v21, %v3688_v0  ;;  %v4282_v0 = vld [vmem:[#allocation4 + $0x58] sm:$0xff] }
 0x946   : > { %v3920_v5 = vpop.xlane.xlu1 %3919 }
 0x947   : > { %v4120_v46 = vadd.f32 %v3920_v5, %v3736_v27  ;;  %v13493_v5 = vld [vmem:[#allocation82_spill] sm:$0xff] }
 0x948   : > { %v3754_v15 = vmul.f32 %v13493_v5, %v3690_v14 }
 0x949   : > { %4185 = vst.msk [vmem:[#allocation3 + $0xe8] sm:$0xff] %vm4155_vm2, %v4120_v46  ;;  %v5326_v18 = vpop.f32.mrf.mxu0 }
 0x94a   : > { %v3930_v51 = vpop.xlane.xlu1 %3929 }
 0x94b   : > { %v5615_v45 = vpop.f32.mrf.mxu1  ;;  %v5328_v22 = vpop.f32.mrf.mxu0  ;;  %v4122_v24 = vadd.f32 %v3930_v51, %v3738_v7  ;;  %v3756_v7 = vmul.f32 %v13494_v8, %v3692_v63 }
 0x94c   : > { %v5616_v31 = vadd.f32 %v5615_v45, %v5326_v18  ;;  %v13495_v45 = vld [vmem:[#allocation85_spill] sm:$0xff] }
 0x94d   : > { %v5617_v4 = vpop.f32.mrf.mxu1  ;;  %4187 = vst.msk [vmem:[#allocation3 + $0xf8] sm:$0xff] %vm4155_vm2, %v4122_v24  ;;  %v5329_v30 = vpop.f32.mrf.mxu0  ;;  %v3758_v22 = vmul.f32 %v13495_v45, %v3694_v17 }
 0x94e   : > { %v5690_v49 = vadd.f32 %v5616_v31, %v4664_v62  ;;  %v4085_v59 = vpop.xlane.xlu0 %4084  ;;  %v3940_v57 = vpop.xlane.xlu1 %3939  ;;  %v3696_v62 = vld [vmem:[#allocation3 + $0x1a8] sm:$0xff] }
 0x94f   : > { %v5618_v26 = vpop.f32.mrf.mxu1  ;;  %v4153_v39 = vadd.f32 %v4085_v59, %v3769_v3  ;;  %v5331_v28 = vpop.f32.mrf.mxu0  ;;  %v4124_v6 = vadd.f32 %v3940_v57, %v3740_v44  ;;  %v3760_v4 = vmul.f32 %v13496_v61, %v3696_v62  ;;  %v3698_v3 = vld [vmem:[#allocation3 + $0x1b8] sm:$0xff]  ;;  %v3700_v57 = vld [vmem:[#allocation3 + $0x1c8] sm:$0xff] }
 0x950   : > { %5754 = vst [vmem:[#allocation4 + $0x158] sm:$0xff] %v5690_v49  ;;  %v5619_v58 = vadd.f32 %v5618_v26, %v5329_v30  ;;  %v13497_v44 = vld [vmem:[#allocation205_spill] sm:$0xff]  ;;  %v13498_v26 = vld [vmem:[#allocation104_spill] sm:$0xff] }
 0x951   : > { %4218 = vst.msk [vmem:[#allocation3 + $0x1f0] sm:$0xff] %vm4155_vm2, %v4153_v39  ;;  %v5620_v33 = vpop.f32.mrf.mxu1  ;;  %4189 = vst.msk [vmem:[#allocation3 + $0x108] sm:$0xff] %vm4155_vm2, %v4124_v6  ;;  %v3762_v49 = vmul.f32 %v13497_v44, %v3698_v3  ;;  %v3764_v39 = vmul.f32 %v13498_v26, %v3700_v57  ;;  %v3702_v6 = vld [vmem:[#allocation3 + $0x1d8] sm:$0xff] }
 0x952   : > { %v5691_v23 = vadd.f32 %v5619_v58, %v4665_v42  ;;  %v3950_v34 = vpop.xlane.xlu1 %3949  ;;  %v13499_v58 = vld [vmem:[#allocation105_spill] sm:$0xff] }
 0x953   : > { %v4126_v47 = vadd.f32 %v3950_v34, %v3742_v37  ;;  %v3766_v33 = vmul.f32 %v13499_v58, %v3702_v6  ;;  %v3704_v34 = vld [vmem:[#allocation3 + $0x1e8] sm:$0xff] }
 0x954   : > { %5755 = vst [vmem:[#allocation4 + $0x10] sm:$0xff] %v5691_v23 }
 0x955   : > { %4191 = vst.msk [vmem:[#allocation3 + $0x118] sm:$0xff] %vm4155_vm2, %v4126_v47 }
 0x956   : > { %v3960_v52 = vpop.xlane.xlu1 %3959  ;;  %v4602_v60 = vpop.permute.xlu0 %4601 }
 0x957   : > { %v4128_v2 = vadd.f32 %v3960_v52, %v3744_v29  ;;  %v4283_v29 = vld [vmem:[#allocation4 + $0xa0] sm:$0xff] }
 0x959   : > { %4193 = vst.msk [vmem:[#allocation3 + $0x128] sm:$0xff] %vm4155_vm2, %v4128_v2  ;;  %v13500_v2 = vld [vmem:[#allocation208_spill] sm:$0xff] }
 0x95a   : > { %v3970_v48 = vpop.xlane.xlu1 %3969  ;;  %v3768_v55 = vmul.f32 %v13500_v2, %v3704_v34 }
 0x95b   : > { %v4130_v1 = vadd.f32 %v3970_v48, %v3746_v38  ;;  %v3706_v48 = vld [vmem:[#allocation3 + $0x1f8] sm:$0xff] }
 0x95d   : > { %4195 = vst.msk [vmem:[#allocation3 + $0x138] sm:$0xff] %vm4155_vm2, %v4130_v1 }
 0x95e   : > { %v3980_v25 = vpop.xlane.xlu1 %3979 }
 0x95f   : > { %v4132_v56 = vadd.f32 %v3980_v25, %v3748_v11  ;;  %v4667_v11 = vmul.f32 %v4602_v60, %v4283_v29 }
 0x961   : > { %4197 = vst.msk [vmem:[#allocation3 + $0x148] sm:$0xff] %vm4155_vm2, %v4132_v56  ;;  %v3770_v56 = vmul.f32 %v11755_v54, %v3706_v48 }
 0x962   : > { %v3990_v10 = vpop.xlane.xlu1 %3989 }
 0x963   : > { %v4134_v43 = vadd.f32 %v3990_v10, %v3750_v13 }
 0x965   : > { %4199 = vst.msk [vmem:[#allocation3 + $0x158] sm:$0xff] %vm4155_vm2, %v4134_v43 }
 0x966   : > { %v4000_v40 = vpop.xlane.xlu1 %3999 }
 0x967   : > { %v4136_v27 = vadd.f32 %v4000_v40, %v3752_v35 }
 0x969   : > { %4201 = vst.msk [vmem:[#allocation3 + $0x168] sm:$0xff] %vm4155_vm2, %v4136_v27 }
 0x96a   : > { %v4010_v46 = vpop.xlane.xlu1 %4009 }
 0x96b   : > { %v4138_v18 = vadd.f32 %v4010_v46, %v3754_v15 }
 0x96d   : > { %4203 = vst.msk [vmem:[#allocation3 + $0x178] sm:$0xff] %vm4155_vm2, %v4138_v18 }
 0x96e   : > { %v4020_v51 = vpop.xlane.xlu1 %4019 }
 0x96f   : > { %v4140_v16 = vadd.f32 %v4020_v51, %v3756_v7 }
 0x971   : > { %4205 = vst.msk [vmem:[#allocation3 + $0x188] sm:$0xff] %vm4155_vm2, %v4140_v16 }
 0x972   : > { %v4030_v24 = vpop.xlane.xlu1 %4029 }
 0x973   : > { %v4142_v31 = vadd.f32 %v4030_v24, %v3758_v22 }
 0x975   : > { %4207 = vst.msk [vmem:[#allocation3 + $0x198] sm:$0xff] %vm4155_vm2, %v4142_v31 }
 0x976   : > { %v4040_v30 = vpop.xlane.xlu1 %4039 }
 0x977   : > { %v4144_v53 = vadd.f32 %v4040_v30, %v3760_v4 }
 0x979   : > { %4209 = vst.msk [vmem:[#allocation3 + $0x1a8] sm:$0xff] %vm4155_vm2, %v4144_v53 }
 0x97a   : > { %v4050_v59 = vpop.xlane.xlu1 %4049 }
 0x97b   : > { %v4146_v41 = vadd.f32 %v4050_v59, %v3762_v49 }
 0x97d   : > { %4211 = vst.msk [vmem:[#allocation3 + $0x1b8] sm:$0xff] %vm4155_vm2, %v4146_v41 }
 0x97e   : > { %v4060_v28 = vpop.xlane.xlu1 %4059 }
 0x97f   : > { %v4148_v42 = vadd.f32 %v4060_v28, %v3764_v39 }
 0x981   : > { %4213 = vst.msk [vmem:[#allocation3 + $0x1c8] sm:$0xff] %vm4155_vm2, %v4148_v42 }
 0x982   : > { %v5334_v32 = vpop.f32.mrf.mxu0  ;;  %v4070_v37 = vpop.xlane.xlu1 %4069 }
 0x983   : > { %v4150_v23 = vadd.f32 %v4070_v37, %v3766_v33 }
 0x984   : > { %v5623_v12 = vpop.f32.mrf.mxu1  ;;  %v5336_v47 = vpop.f32.mrf.mxu0 }
 0x985   : > { %4215 = vst.msk [vmem:[#allocation3 + $0x1d8] sm:$0xff] %vm4155_vm2, %v4150_v23  ;;  %v5624_v21 = vadd.f32 %v5623_v12, %v5334_v32 }
 0x986   : > { %v5625_v52 = vpop.f32.mrf.mxu1  ;;  %v5337_v20 = vpop.f32.mrf.mxu0 }
 0x987   : > { %v4080_v38 = vpop.xlane.xlu1 %4079 }
 0x988   : > { %v5626_v50 = vpop.f32.mrf.mxu1  ;;  %v4152_v1 = vadd.f32 %v4080_v38, %v3768_v55  ;;  %v5339_v36 = vpop.f32.mrf.mxu0 }
 0x989   : > { %v5627_v25 = vadd.f32 %v5626_v50, %v5337_v20 }
 0x98a   : > { %4217 = vst.msk [vmem:[#allocation3 + $0x1e8] sm:$0xff] %vm4155_vm2, %v4152_v1  ;;  %v5628_v19 = vpop.f32.mrf.mxu1 }
 0x98b   : > { %v5693_v9 = vadd.f32 %v5627_v25, %v4667_v11  ;;  %v4090_v13 = vpop.xlane.xlu1 %4089 }
 0x98c   : > { %v4154_v10 = vadd.f32 %v4090_v13, %v3770_v56 }
 0x98d   : > { %5757 = vst [vmem:[#allocation4 + $0xa0] sm:$0xff] %v5693_v9 }
 0x98e   : > { %4219 = vst.msk [vmem:[#allocation3 + $0x1f8] sm:$0xff] %vm4155_vm2, %v4154_v10 }
 0x98f   : > { %v4597_v43 = vpop.permute.xlu1 %4596 }
 0x990   : > { %v4666_v35 = vmul.f32 %v4597_v43, %v4282_v0  ;;  %5825 = sbr.rel (%p6997_p3) target bundleno = 2724 (0xaa4), region = 48 }
 0x992   : > { %v5692_v40 = vadd.f32 %v5624_v21, %v4666_v35 }
 0x994   : > { %5756 = vst [vmem:[#allocation4 + $0x58] sm:$0xff] %v5692_v40 }
 0x995   : > { %v5892_v14 = vld [vmem:[#allocation3 + $0x10] sm:$0xff]  ;;  %v5890_v27 = vld [vmem:[#allocation3] sm:$0xff]  ;;  %v5893_v5 = vld [vmem:[#allocation3 + $0x18] sm:$0xff]  ;;  %v8254_v15 = vmov 0  }
 0x996   : > { %8012 = vset.pattern.permute.xlu1 %v8254_v15  ;;  %8011 = vset.pattern.permute.xlu0 %v8254_v15  ;;  %8013 = vrcp.f32 %v5892_v14  ;;  %v5891_v54 = vld [vmem:[#allocation3 + $0x8] sm:$0xff]  ;;  %v5894_v63 = vld [vmem:[#allocation3 + $0x20] sm:$0xff]  ;;  %v5897_v18 = vld [vmem:[#allocation3 + $0x38] sm:$0xff] }
 0x997   : > { %8015 = vrcp.f32 %v5890_v27  ;;  %v5895_v46 = vld [vmem:[#allocation3 + $0x28] sm:$0xff]  ;;  %v5896_v8 = vld [vmem:[#allocation3 + $0x30] sm:$0xff]  ;;  %v5898_v51 = vld [vmem:[#allocation3 + $0x40] sm:$0xff] }
 0x998   : > { %8017 = vrcp.f32 %v5893_v5  ;;  %v5899_v7 = vld [vmem:[#allocation3 + $0x48] sm:$0xff]  ;;  %v5901_v22 = vld [vmem:[#allocation3 + $0x58] sm:$0xff]  ;;  %v5900_v62 = vld [vmem:[#allocation3 + $0x50] sm:$0xff] }
 0x999   : > { %8019 = vrcp.f32 %v5891_v54  ;;  %v5903_v61 = vld [vmem:[#allocation3 + $0x68] sm:$0xff]  ;;  %v5902_v30 = vld [vmem:[#allocation3 + $0x60] sm:$0xff]  ;;  %v5905_v53 = vld [vmem:[#allocation3 + $0x78] sm:$0xff] }
 0x99a   : > { %8021 = vrcp.f32 %v5895_v46  ;;  %v5904_v49 = vld [vmem:[#allocation3 + $0x70] sm:$0xff]  ;;  %v5907_v57 = vld [vmem:[#allocation3 + $0x88] sm:$0xff]  ;;  %v5906_v26 = vld [vmem:[#allocation3 + $0x80] sm:$0xff] }
 0x99b   : > { %8023 = vrcp.f32 %v5894_v63  ;;  %v5909_v28 = vld [vmem:[#allocation3 + $0x98] sm:$0xff]  ;;  %v5908_v42 = vld [vmem:[#allocation3 + $0x90] sm:$0xff]  ;;  %v5911_v33 = vld [vmem:[#allocation3 + $0xa8] sm:$0xff] }
 0x99c   : > { %8025 = vrcp.f32 %v5897_v18  ;;  %v5910_v37 = vld [vmem:[#allocation3 + $0xa0] sm:$0xff]  ;;  %v5913_v34 = vld [vmem:[#allocation3 + $0xb8] sm:$0xff]  ;;  %v5912_v47 = vld [vmem:[#allocation3 + $0xb0] sm:$0xff] }
 0x99d   : > { %8027 = vrcp.f32 %v5896_v8  ;;  %v5915_v29 = vld [vmem:[#allocation3 + $0xc8] sm:$0xff]  ;;  %v5914_v20 = vld [vmem:[#allocation3 + $0xc0] sm:$0xff]  ;;  %v5917_v55 = vld [vmem:[#allocation3 + $0xd8] sm:$0xff] }
 0x99e   : > { %8029 = vrcp.f32 %v5899_v7  ;;  %v5916_v48 = vld [vmem:[#allocation3 + $0xd0] sm:$0xff]  ;;  %v5919_v1 = vld [vmem:[#allocation3 + $0xe8] sm:$0xff]  ;;  %v5918_v11 = vld [vmem:[#allocation3 + $0xe0] sm:$0xff] }
 0x99f   : > { %8031 = vrcp.f32 %v5898_v51  ;;  %v5921_v19 = vld [vmem:[#allocation3 + $0xf8] sm:$0xff]  ;;  %v5920_v9 = vld [vmem:[#allocation3 + $0xf0] sm:$0xff]  ;;  %v5923_v10 = vld [vmem:[#allocation3 + $0x108] sm:$0xff] }
 0x9a0   : > { %8033 = vrcp.f32 %v5901_v22  ;;  %v5922_v43 = vld [vmem:[#allocation3 + $0x100] sm:$0xff]  ;;  %v5925_v35 = vld [vmem:[#allocation3 + $0x118] sm:$0xff]  ;;  %v5924_v14 = vld [vmem:[#allocation3 + $0x110] sm:$0xff] }
 0x9a1   : > { %8035 = vrcp.f32 %v5900_v62  ;;  %v5927_v5 = vld [vmem:[#allocation3 + $0x128] sm:$0xff]  ;;  %v5926_v54 = vld [vmem:[#allocation3 + $0x120] sm:$0xff]  ;;  %v5929_v63 = vld [vmem:[#allocation3 + $0x138] sm:$0xff] }
 0x9a2   : > { %8037 = vrcp.f32 %v5903_v61  ;;  %v5928_v8 = vld [vmem:[#allocation3 + $0x130] sm:$0xff]  ;;  %v5931_v51 = vld [vmem:[#allocation3 + $0x148] sm:$0xff]  ;;  %v5933_v22 = vld [vmem:[#allocation3 + $0x158] sm:$0xff] }
 0x9a3   : > { %v8014_v17 = vpop.eup %8013  ;;  %8039 = vrcp.f32 %v5902_v30  ;;  %v5932_v62 = vld [vmem:[#allocation3 + $0x150] sm:$0xff]  ;;  %v5935_v61 = vld [vmem:[#allocation3 + $0x168] sm:$0xff]  ;;  %v5934_v30 = vld [vmem:[#allocation3 + $0x160] sm:$0xff] }
 0x9a4   : > { %v8016_v16 = vpop.eup %8015  ;;  %6030 = vperm.xlu1 %8012, %v8014_v17   ;;  %8041 = vrcp.f32 %v5905_v53  ;;  %v5937_v53 = vld [vmem:[#allocation3 + $0x178] sm:$0xff] }
 0x9a5   : > { %v8018_v45 = vpop.eup %8017  ;;  %6020 = vperm.xlu0 %8011, %v8016_v16   ;;  %8043 = vrcp.f32 %v5904_v49  ;;  %v5930_v16 = vld [vmem:[#allocation3 + $0x140] sm:$0xff]  ;;  %v5936_v49 = vld [vmem:[#allocation3 + $0x170] sm:$0xff] }
 0x9a6   : > { %v8020_v24 = vpop.eup %8019  ;;  %8045 = vrcp.f32 %v5907_v57  ;;  %v5939_v57 = vld [vmem:[#allocation3 + $0x188] sm:$0xff] }
 0x9a7   : > { %v8022_v31 = vpop.eup %8021  ;;  %8047 = vrcp.f32 %v5906_v26  ;;  %v5938_v26 = vld [vmem:[#allocation3 + $0x180] sm:$0xff] }
 0x9a8   : > { %6035 = vperm.xlu1 %8012, %v8018_v45   ;;  %v8024_v4 = vpop.eup %8023  ;;  %8049 = vrcp.f32 %v5909_v28  ;;  %v5941_v28 = vld [vmem:[#allocation3 + $0x198] sm:$0xff] }
 0x9a9   : > { %6025 = vperm.xlu0 %8011, %v8020_v24   ;;  %v8026_v3 = vpop.eup %8025  ;;  %8051 = vrcp.f32 %v5908_v42  ;;  %v5940_v42 = vld [vmem:[#allocation3 + $0x190] sm:$0xff] }
 0x9aa   : > { %v8028_v44 = vpop.eup %8027  ;;  %8053 = vrcp.f32 %v5911_v33  ;;  %v5943_v33 = vld [vmem:[#allocation3 + $0x1a8] sm:$0xff] }
 0x9ab   : > { %v8030_v59 = vpop.eup %8029  ;;  %8055 = vrcp.f32 %v5910_v37  ;;  %v5942_v37 = vld [vmem:[#allocation3 + $0x1a0] sm:$0xff] }
 0x9ac   : > { %6045 = vperm.xlu1 %8012, %v8022_v31   ;;  %v8032_v41 = vpop.eup %8031  ;;  %8057 = vrcp.f32 %v5913_v34  ;;  %v5945_v34 = vld [vmem:[#allocation3 + $0x1b8] sm:$0xff] }
 0x9ad   : > { %6040 = vperm.xlu0 %8011, %v8024_v4   ;;  %v8034_v39 = vpop.eup %8033  ;;  %8059 = vrcp.f32 %v5912_v47  ;;  %v5944_v47 = vld [vmem:[#allocation3 + $0x1b0] sm:$0xff] }
 0x9ae   : > { %v8036_v6 = vpop.eup %8035  ;;  %8061 = vrcp.f32 %v5915_v29  ;;  %v5947_v29 = vld [vmem:[#allocation3 + $0x1c8] sm:$0xff] }
 0x9af   : > { %v8038_v58 = vpop.eup %8037  ;;  %8063 = vrcp.f32 %v5914_v20  ;;  %v5946_v20 = vld [vmem:[#allocation3 + $0x1c0] sm:$0xff] }
 0x9b0   : > { %6055 = vperm.xlu1 %8012, %v8026_v3   ;;  %v8040_v32 = vpop.eup %8039  ;;  %8065 = vrcp.f32 %v5917_v55  ;;  %v5949_v55 = vld [vmem:[#allocation3 + $0x1d8] sm:$0xff] }
 0x9b1   : > { %6050 = vperm.xlu0 %8011, %v8028_v44   ;;  %v8042_v23 = vpop.eup %8041  ;;  %8067 = vrcp.f32 %v5916_v48  ;;  %v5948_v48 = vld [vmem:[#allocation3 + $0x1d0] sm:$0xff] }
 0x9b2   : > { %v8044_v12 = vpop.eup %8043  ;;  %8069 = vrcp.f32 %v5919_v1  ;;  %v5951_v1 = vld [vmem:[#allocation3 + $0x1e8] sm:$0xff] }
 0x9b3   : > { %v8046_v60 = vpop.eup %8045  ;;  %8071 = vrcp.f32 %v5918_v11  ;;  %v5950_v11 = vld [vmem:[#allocation3 + $0x1e0] sm:$0xff] }
 0x9b4   : > { %6065 = vperm.xlu1 %8012, %v8030_v59   ;;  %v8048_v52 = vpop.eup %8047  ;;  %8073 = vrcp.f32 %v5921_v19  ;;  %v5953_v19 = vld [vmem:[#allocation3 + $0x1f8] sm:$0xff] }
 0x9b5   : > { %6060 = vperm.xlu0 %8011, %v8032_v41   ;;  %v8050_v2 = vpop.eup %8049  ;;  %8075 = vrcp.f32 %v5920_v9  ;;  %v5952_v9 = vld [vmem:[#allocation3 + $0x1f0] sm:$0xff] }
 0x9b6   : > { %v8052_v38 = vpop.eup %8051  ;;  %8077 = vrcp.f32 %v5923_v10 }
 0x9b7   : > { %v8054_v50 = vpop.eup %8053  ;;  %8079 = vrcp.f32 %v5922_v43 }
 0x9b8   : > { %6075 = vperm.xlu1 %8012, %v8034_v39   ;;  %v8056_v36 = vpop.eup %8055  ;;  %8081 = vrcp.f32 %v5925_v35 }
 0x9b9   : > { %6070 = vperm.xlu0 %8011, %v8036_v6   ;;  %v8058_v25 = vpop.eup %8057  ;;  %8083 = vrcp.f32 %v5924_v14  ;;  %v5828_v14 = vld [vmem:[#allocation4 + $0xd8] sm:$0xff] }
 0x9ba   : > { %v8060_v56 = vpop.eup %8059  ;;  %8085 = vrcp.f32 %v5927_v5  ;;  %v5826_v5 = vld [vmem:[#allocation4 + $0xb0] sm:$0xff] }
 0x9bb   : > { %v8062_v13 = vpop.eup %8061  ;;  %8087 = vrcp.f32 %v5926_v54 }
 0x9bc   : > { %6085 = vperm.xlu1 %8012, %v8038_v58   ;;  %v8064_v0 = vpop.eup %8063  ;;  %8089 = vrcp.f32 %v5929_v63 }
 0x9bd   : > { %6080 = vperm.xlu0 %8011, %v8040_v32   ;;  %v8066_v21 = vpop.eup %8065  ;;  %8091 = vrcp.f32 %v5928_v8 }
 0x9be   : > { %v8068_v40 = vpop.eup %8067  ;;  %8093 = vrcp.f32 %v5931_v51 }
 0x9bf   : > { %v8070_v27 = vpop.eup %8069  ;;  %8095 = vrcp.f32 %v5930_v16  ;;  %v5827_v16 = vld [vmem:[#allocation4 + $0x1b0] sm:$0xff] }
 0x9c0   : > { %6095 = vperm.xlu1 %8012, %v8042_v23   ;;  %v8072_v15 = vpop.eup %8071  ;;  %8097 = vrcp.f32 %v5933_v22 }
 0x9c1   : > { %6090 = vperm.xlu0 %8011, %v8044_v12   ;;  %v8074_v46 = vpop.eup %8073  ;;  %8099 = vrcp.f32 %v5932_v62 }
 0x9c2   : > { %v8076_v18 = vpop.eup %8075  ;;  %8101 = vrcp.f32 %v5935_v61 }
 0x9c3   : > { %v8078_v7 = vpop.eup %8077  ;;  %8103 = vrcp.f32 %v5934_v30 }
 0x9c4   : > { %6105 = vperm.xlu1 %8012, %v8046_v60   ;;  %v8080_v17 = vpop.eup %8079  ;;  %8105 = vrcp.f32 %v5937_v53 }
 0x9c5   : > { %6100 = vperm.xlu0 %8011, %v8048_v52   ;;  %v8082_v45 = vpop.eup %8081  ;;  %8107 = vrcp.f32 %v5936_v49  ;;  %v5830_v49 = vld [vmem:[#allocation4 + $0x50] sm:$0xff] }
 0x9c6   : > { %v8084_v24 = vpop.eup %8083  ;;  %8109 = vrcp.f32 %v5939_v57 }
 0x9c7   : > { %v8086_v31 = vpop.eup %8085  ;;  %8111 = vrcp.f32 %v5938_v26 }
 0x9c8   : > { %6115 = vperm.xlu1 %8012, %v8050_v2   ;;  %v8088_v4 = vpop.eup %8087  ;;  %8113 = vrcp.f32 %v5941_v28 }
 0x9c9   : > { %6110 = vperm.xlu0 %8011, %v8052_v38   ;;  %v8090_v3 = vpop.eup %8089  ;;  %8115 = vrcp.f32 %v5940_v42 }
 0x9ca   : > { %v8092_v44 = vpop.eup %8091  ;;  %8117 = vrcp.f32 %v5943_v33 }
 0x9cb   : > { %v8094_v59 = vpop.eup %8093  ;;  %8119 = vrcp.f32 %v5942_v37  ;;  %v5832_v37 = vld [vmem:[#allocation4 + $0x130] sm:$0xff] }
 0x9cc   : > { %6125 = vperm.xlu1 %8012, %v8054_v50   ;;  %v8096_v41 = vpop.eup %8095  ;;  %8121 = vrcp.f32 %v5945_v34 }
 0x9cd   : > { %6120 = vperm.xlu0 %8011, %v8056_v36   ;;  %v8098_v39 = vpop.eup %8097  ;;  %8123 = vrcp.f32 %v5944_v47 }
 0x9ce   : > { %v8100_v6 = vpop.eup %8099  ;;  %8125 = vrcp.f32 %v5947_v29 }
 0x9cf   : > { %v8102_v58 = vpop.eup %8101  ;;  %8127 = vrcp.f32 %v5946_v20 }
 0x9d0   : > { %6135 = vperm.xlu1 %8012, %v8058_v25   ;;  %v8104_v32 = vpop.eup %8103  ;;  %8129 = vrcp.f32 %v5949_v55 }
 0x9d1   : > { %6130 = vperm.xlu0 %8011, %v8060_v56   ;;  %v8106_v23 = vpop.eup %8105  ;;  %8131 = vrcp.f32 %v5948_v48  ;;  %v5834_v48 = vld [vmem:[#allocation4 + $0x180] sm:$0xff] }
 0x9d2   : > { %v8108_v12 = vpop.eup %8107  ;;  %8133 = vrcp.f32 %v5951_v1 }
 0x9d3   : > { %v8110_v60 = vpop.eup %8109  ;;  %8135 = vrcp.f32 %v5950_v11 }
 0x9d4   : > { %6145 = vperm.xlu1 %8012, %v8062_v13   ;;  %v8112_v52 = vpop.eup %8111  ;;  %8137 = vrcp.f32 %v5953_v19 }
 0x9d5   : > { %6140 = vperm.xlu0 %8011, %v8064_v0   ;;  %v8114_v2 = vpop.eup %8113  ;;  %8139 = vrcp.f32 %v5952_v9 }
 0x9d6   : > { %v8116_v38 = vpop.eup %8115 }
 0x9d7   : > { %v8118_v50 = vpop.eup %8117 }
 0x9d8   : > { %6155 = vperm.xlu1 %8012, %v8066_v21   ;;  %v8120_v36 = vpop.eup %8119 }
 0x9d9   : > { %6150 = vperm.xlu0 %8011, %v8068_v40   ;;  %v8122_v25 = vpop.eup %8121 }
 0x9da   : > { %v8124_v56 = vpop.eup %8123 }
 0x9db   : > { %v8126_v13 = vpop.eup %8125 }
 0x9dc   : > { %6165 = vperm.xlu1 %8012, %v8070_v27   ;;  %v8128_v10 = vpop.eup %8127 }
 0x9dd   : > { %6160 = vperm.xlu0 %8011, %v8072_v15   ;;  %v8130_v0 = vpop.eup %8129  ;;  %v11854_v15 = vstv %s6402_s22 }
 0x9de   : > { %v8132_v43 = vpop.eup %8131 }
 0x9df   : > { %v8134_v21 = vpop.eup %8133 }
 0x9e0   : > { %6175 = vperm.xlu1 %8012, %v8074_v46   ;;  %v8136_v35 = vpop.eup %8135 }
 0x9e1   : > { %6170 = vperm.xlu0 %8011, %v8076_v18   ;;  %v8138_v40 = vpop.eup %8137  ;;  %v6470_v18 = vld [vmem:[%s8390_s6 + $0x10] sm:$0xff] }
 0x9e2   : > { %v8140_v27 = vpop.eup %8139 }
 0x9e4   : > { %6185 = vperm.xlu1 %8012, %v8078_v7   ;;  %v5829_v7 = vld [vmem:[#allocation4 + $0x18] sm:$0xff] }
 0x9e5   : > { %6180 = vperm.xlu0 %8011, %v8080_v17   ;;  %v6468_v17 = vld [vmem:[%s8390_s6] sm:$0xff] }
 0x9e8   : > { %6195 = vperm.xlu1 %8012, %v8082_v45  }
 0x9e9   : > { %6190 = vperm.xlu0 %8011, %v8084_v24  }
 0x9ec   : > { %6205 = vperm.xlu1 %8012, %v8086_v31  }
 0x9ed   : > { %6200 = vperm.xlu0 %8011, %v8088_v4   ;;  %v6471_v4 = vld [vmem:[%s8390_s6 + $0x18] sm:$0xff] }
 0x9f0   : > { %6215 = vperm.xlu1 %8012, %v8090_v3   ;;  %v5831_v3 = vld [vmem:[#allocation4 + $0x168] sm:$0xff] }
 0x9f1   : > { %6210 = vperm.xlu0 %8011, %v8092_v44   ;;  %v6469_v44 = vld [vmem:[%s8390_s6 + $0x8] sm:$0xff] }
 0x9f4   : > { %6225 = vperm.xlu1 %8012, %v8094_v59  }
 0x9f5   : > { %6220 = vperm.xlu0 %8011, %v8096_v41  }
 0x9f8   : > { %6235 = vperm.xlu1 %8012, %v8098_v39  }
 0x9f9   : > { %6230 = vperm.xlu0 %8011, %v8100_v6   ;;  %v6473_v6 = vld [vmem:[%s8390_s6 + $0x28] sm:$0xff] }
 0x9fc   : > { %6245 = vperm.xlu1 %8012, %v8102_v58   ;;  %v5833_v58 = vld [vmem:[#allocation4 + $0x48] sm:$0xff] }
 0x9fd   : > { %6240 = vperm.xlu0 %8011, %v8104_v32   ;;  %v6472_v32 = vld [vmem:[%s8390_s6 + $0x20] sm:$0xff] }
 0xa00   : > { %6255 = vperm.xlu1 %8012, %v8106_v23  }
 0xa01   : > { %6250 = vperm.xlu0 %8011, %v8108_v12  }
 0xa04   : > { %6265 = vperm.xlu1 %8012, %v8110_v60  }
 0xa05   : > { %6260 = vperm.xlu0 %8011, %v8112_v52   ;;  %v6475_v52 = vld [vmem:[%s8390_s6 + $0x38] sm:$0xff] }
 0xa08   : > { %6275 = vperm.xlu1 %8012, %v8114_v2   ;;  %v5835_v2 = vld [vmem:[#allocation4 + $0x110] sm:$0xff] }
 0xa09   : > { %6270 = vperm.xlu0 %8011, %v8116_v38   ;;  %v6474_v38 = vld [vmem:[%s8390_s6 + $0x30] sm:$0xff] }
 0xa0c   : > { %6285 = vperm.xlu1 %8012, %v8118_v50  }
 0xa0d   : > { %6280 = vperm.xlu0 %8011, %v8120_v36  }
 0xa10   : > { %6295 = vperm.xlu1 %8012, %v8122_v25  }
 0xa11   : > { %6290 = vperm.xlu0 %8011, %v8124_v56   ;;  %v6477_v56 = vld [vmem:[%s8390_s6 + $0x48] sm:$0xff] }
 0xa14   : > { %6305 = vperm.xlu1 %8012, %v8126_v13   ;;  %v5837_v13 = vld [vmem:[#allocation4 + $0x98] sm:$0xff] }
 0xa15   : > { %6300 = vperm.xlu0 %8011, %v8128_v10  }
 0xa18   : > { %6315 = vperm.xlu1 %8012, %v8130_v0   ;;  %v6476_v0 = vld [vmem:[%s8390_s6 + $0x40] sm:$0xff] }
 0xa19   : > { %6310 = vperm.xlu0 %8011, %v8132_v43   ;;  %v5836_v43 = vld [vmem:[#allocation4 + $0x118] sm:$0xff] }
 0xa1c   : > { %6325 = vperm.xlu1 %8012, %v8134_v21  }
 0xa1d   : > { %6320 = vperm.xlu0 %8011, %v8136_v35  }
 0xa1f   : > { %v6031_v54 = vpop.permute.xlu1 %6030 }
 0xa20   : > { %v6340_v46 = vmul.f32 %v6031_v54, %v5828_v14  ;;  %v6021_v63 = vpop.permute.xlu0 %6020  ;;  %6335 = vperm.xlu1 %8012, %v8138_v40   ;;  %v6479_v54 = vld [vmem:[%s8390_s6 + $0x58] sm:$0xff] }
 0xa21   : > { %v6338_v8 = vmul.f32 %v6021_v63, %v5826_v5  ;;  %6330 = vperm.xlu0 %8011, %v8140_v27   ;;  %v5839_v63 = vld [vmem:[#allocation4 + $0x150] sm:$0xff] }
 0xa22   : > { %v6406_v51 = vmul.f32 %v11854_v15, %v6340_v46 }
 0xa23   : > { %v6404_v45 = vmul.f32 %v11854_v15, %v6338_v8  ;;  %v6036_v22 = vpop.permute.xlu1 %6035  ;;  %v6478_v8 = vld [vmem:[%s8390_s6 + $0x50] sm:$0xff] }
 0xa24   : > { %v6534_v24 = vadd.f32 %v6470_v18, %v6406_v51  ;;  %v6341_v62 = vmul.f32 %v6036_v22, %v5829_v7  ;;  %v6026_v31 = vpop.permute.xlu0 %6025  ;;  %v5838_v7 = vld [vmem:[#allocation4 + $0x120] sm:$0xff] }
 0xa25   : > { %v6532_v61 = vadd.f32 %v6468_v17, %v6404_v45  ;;  %v6339_v30 = vmul.f32 %v6026_v31, %v5827_v16 }
 0xa26   : > { %6598 = vst [vmem:[%s8407_s7 + $0x10] sm:$0xff] %v6534_v24  ;;  %v6407_v53 = vmul.f32 %v11854_v15, %v6341_v62  ;;  %v6481_v62 = vld [vmem:[%s8390_s6 + $0x68] sm:$0xff] }
 0xa27   : > { %6596 = vst [vmem:[%s8407_s7] sm:$0xff] %v6532_v61  ;;  %v6405_v59 = vmul.f32 %v11854_v15, %v6339_v30  ;;  %v6046_v57 = vpop.permute.xlu1 %6045  ;;  %v5841_v61 = vld [vmem:[#allocation4 + $0x60] sm:$0xff] }
 0xa28   : > { %v6535_v41 = vadd.f32 %v6471_v4, %v6407_v53  ;;  %v6343_v26 = vmul.f32 %v6046_v57, %v5831_v3  ;;  %v6041_v39 = vpop.permute.xlu0 %6040  ;;  %v6480_v30 = vld [vmem:[%s8390_s6 + $0x60] sm:$0xff]  ;;  %v5840_v3 = vld [vmem:[#allocation4 + $0x108] sm:$0xff] }
 0xa29   : > { %v6533_v28 = vadd.f32 %v6469_v44, %v6405_v59  ;;  %v6342_v42 = vmul.f32 %v6041_v39, %v5830_v49 }
 0xa2a   : > { %6599 = vst [vmem:[%s8407_s7 + $0x18] sm:$0xff] %v6535_v41  ;;  %v6409_v33 = vmul.f32 %v11854_v15, %v6343_v26  ;;  %v6483_v26 = vld [vmem:[%s8390_s6 + $0x78] sm:$0xff] }
 0xa2b   : > { %6597 = vst [vmem:[%s8407_s7 + $0x8] sm:$0xff] %v6533_v28  ;;  %v6408_v23 = vmul.f32 %v11854_v15, %v6342_v42  ;;  %v6056_v34 = vpop.permute.xlu1 %6055  ;;  %v5843_v28 = vld [vmem:[#allocation4 + $0x188] sm:$0xff]  ;;  %v6482_v42 = vld [vmem:[%s8390_s6 + $0x70] sm:$0xff] }
 0xa2c   : > { %v6537_v12 = vadd.f32 %v6473_v6, %v6409_v33  ;;  %v6345_v47 = vmul.f32 %v6056_v34, %v5833_v58  ;;  %v6051_v60 = vpop.permute.xlu0 %6050  ;;  %v5842_v58 = vld [vmem:[#allocation4 + $0xe0] sm:$0xff] }
 0xa2d   : > { %v6536_v29 = vadd.f32 %v6472_v32, %v6408_v23  ;;  %v6344_v20 = vmul.f32 %v6051_v60, %v5832_v37 }
 0xa2e   : > { %6601 = vst [vmem:[%s8407_s7 + $0x28] sm:$0xff] %v6537_v12  ;;  %v6411_v55 = vmul.f32 %v11854_v15, %v6345_v47  ;;  %v6485_v47 = vld [vmem:[%s8390_s6 + $0x88] sm:$0xff] }
 0xa2f   : > { %6600 = vst [vmem:[%s8407_s7 + $0x20] sm:$0xff] %v6536_v29  ;;  %v6410_v50 = vmul.f32 %v11854_v15, %v6344_v20  ;;  %v6066_v1 = vpop.permute.xlu1 %6065  ;;  %v5845_v29 = vld [vmem:[#allocation4 + $0x140] sm:$0xff] }
 0xa30   : > { %v6539_v36 = vadd.f32 %v6475_v52, %v6411_v55  ;;  %v6347_v11 = vmul.f32 %v6066_v1, %v5835_v2  ;;  %v6061_v25 = vpop.permute.xlu0 %6060  ;;  %v6484_v20 = vld [vmem:[%s8390_s6 + $0x80] sm:$0xff]  ;;  %v5844_v2 = vld [vmem:[#allocation4 + $0x138] sm:$0xff] }
 0xa31   : > { %v6538_v19 = vadd.f32 %v6474_v38, %v6410_v50  ;;  %v6346_v9 = vmul.f32 %v6061_v25, %v5834_v48 }
 0xa32   : > { %6603 = vst [vmem:[%s8407_s7 + $0x38] sm:$0xff] %v6539_v36  ;;  %v6413_v10 = vmul.f32 %v11854_v15, %v6347_v11  ;;  %v6487_v11 = vld [vmem:[%s8390_s6 + $0x98] sm:$0xff] }
 0xa33   : > { %6602 = vst [vmem:[%s8407_s7 + $0x30] sm:$0xff] %v6538_v19  ;;  %v6412_v21 = vmul.f32 %v11854_v15, %v6346_v9  ;;  %v6076_v35 = vpop.permute.xlu1 %6075  ;;  %v5847_v19 = vld [vmem:[#allocation4 + $0x1a8] sm:$0xff]  ;;  %v6486_v9 = vld [vmem:[%s8390_s6 + $0x90] sm:$0xff] }
 0xa34   : > { %v6541_v40 = vadd.f32 %v6477_v56, %v6413_v10  ;;  %v6349_v14 = vmul.f32 %v6076_v35, %v5837_v13  ;;  %v6071_v27 = vpop.permute.xlu0 %6070  ;;  %v5846_v13 = vld [vmem:[#allocation4 + $0x80] sm:$0xff] }
 0xa35   : > { %v6540_v5 = vadd.f32 %v6476_v0, %v6412_v21  ;;  %v6348_v46 = vmul.f32 %v6071_v27, %v5836_v43 }
 0xa36   : > { %6605 = vst [vmem:[%s8407_s7 + $0x48] sm:$0xff] %v6541_v40  ;;  %v6415_v18 = vmul.f32 %v11854_v15, %v6349_v14  ;;  %v6489_v14 = vld [vmem:[%s8390_s6 + $0xa8] sm:$0xff] }
 0xa37   : > { %6604 = vst [vmem:[%s8407_s7 + $0x40] sm:$0xff] %v6540_v5  ;;  %v6414_v51 = vmul.f32 %v11854_v15, %v6348_v46  ;;  %v6086_v17 = vpop.permute.xlu1 %6085  ;;  %v5849_v5 = vld [vmem:[#allocation4 + $0x28] sm:$0xff]  ;;  %v6488_v46 = vld [vmem:[%s8390_s6 + $0xa0] sm:$0xff] }
 0xa38   : > { %v6543_v16 = vadd.f32 %v6479_v54, %v6415_v18  ;;  %v6351_v45 = vmul.f32 %v6086_v17, %v5839_v63  ;;  %v6081_v22 = vpop.permute.xlu0 %6080  ;;  %v5848_v63 = vld [vmem:[#allocation4 + $0x1b8] sm:$0xff] }
 0xa39   : > { %v6542_v24 = vadd.f32 %v6478_v8, %v6414_v51  ;;  %v6350_v31 = vmul.f32 %v6081_v22, %v5838_v7 }
 0xa3a   : > { %6607 = vst [vmem:[%s8407_s7 + $0x58] sm:$0xff] %v6543_v16  ;;  %v6417_v4 = vmul.f32 %v11854_v15, %v6351_v45  ;;  %v6491_v45 = vld [vmem:[%s8390_s6 + $0xb8] sm:$0xff] }
 0xa3b   : > { %6606 = vst [vmem:[%s8407_s7 + $0x50] sm:$0xff] %v6542_v24  ;;  %v6416_v53 = vmul.f32 %v11854_v15, %v6350_v31  ;;  %v6096_v44 = vpop.permute.xlu1 %6095  ;;  %v5851_v24 = vld [vmem:[#allocation4 + $0xf8] sm:$0xff]  ;;  %v6490_v31 = vld [vmem:[%s8390_s6 + $0xb0] sm:$0xff] }
 0xa3c   : > { %v6545_v49 = vadd.f32 %v6481_v62, %v6417_v4  ;;  %v6353_v59 = vmul.f32 %v6096_v44, %v5841_v61  ;;  %v6091_v57 = vpop.permute.xlu0 %6090  ;;  %v5850_v61 = vld [vmem:[#allocation4 + $0x1e8] sm:$0xff] }
 0xa3d   : > { %v6544_v41 = vadd.f32 %v6480_v30, %v6416_v53  ;;  %v6352_v39 = vmul.f32 %v6091_v57, %v5840_v3 }
 0xa3e   : > { %6609 = vst [vmem:[%s8407_s7 + $0x68] sm:$0xff] %v6545_v49  ;;  %v6419_v6 = vmul.f32 %v11854_v15, %v6353_v59  ;;  %v6493_v59 = vld [vmem:[%s8390_s6 + $0xc8] sm:$0xff] }
 0xa3f   : > { %6608 = vst [vmem:[%s8407_s7 + $0x60] sm:$0xff] %v6544_v41  ;;  %v6418_v33 = vmul.f32 %v11854_v15, %v6352_v39  ;;  %v6106_v32 = vpop.permute.xlu1 %6105  ;;  %v5853_v41 = vld [vmem:[#allocation4 + $0x30] sm:$0xff]  ;;  %v6492_v39 = vld [vmem:[%s8390_s6 + $0xc0] sm:$0xff] }
 0xa40   : > { %v6547_v37 = vadd.f32 %v6483_v26, %v6419_v6  ;;  %v6355_v23 = vmul.f32 %v6106_v32, %v5843_v28  ;;  %v6101_v34 = vpop.permute.xlu0 %6100  ;;  %v5852_v28 = vld [vmem:[#allocation4 + $0x160] sm:$0xff] }
 0xa41   : > { %v6546_v12 = vadd.f32 %v6482_v42, %v6418_v33  ;;  %v6354_v60 = vmul.f32 %v6101_v34, %v5842_v58 }
 0xa42   : > { %6611 = vst [vmem:[%s8407_s7 + $0x78] sm:$0xff] %v6547_v37  ;;  %v6421_v52 = vmul.f32 %v11854_v15, %v6355_v23  ;;  %v6495_v23 = vld [vmem:[%s8390_s6 + $0xd8] sm:$0xff] }
 0xa43   : > { %6610 = vst [vmem:[%s8407_s7 + $0x70] sm:$0xff] %v6546_v12  ;;  %v6420_v55 = vmul.f32 %v11854_v15, %v6354_v60  ;;  %v6116_v38 = vpop.permute.xlu1 %6115  ;;  %v5855_v12 = vld [vmem:[#allocation4] sm:$0xff]  ;;  %v6494_v60 = vld [vmem:[%s8390_s6 + $0xd0] sm:$0xff] }
 0xa44   : > { %v6549_v48 = vadd.f32 %v6485_v47, %v6421_v52  ;;  %v6357_v50 = vmul.f32 %v6116_v38, %v5845_v29  ;;  %v6111_v1 = vpop.permute.xlu0 %6110  ;;  %v5854_v29 = vld [vmem:[#allocation4 + $0x1e0] sm:$0xff] }
 0xa45   : > { %v6548_v36 = vadd.f32 %v6484_v20, %v6420_v55  ;;  %v6356_v25 = vmul.f32 %v6111_v1, %v5844_v2 }
 0xa46   : > { %6613 = vst [vmem:[%s8407_s7 + $0x88] sm:$0xff] %v6549_v48  ;;  %v6423_v56 = vmul.f32 %v11854_v15, %v6357_v50  ;;  %v6497_v50 = vld [vmem:[%s8390_s6 + $0xe8] sm:$0xff] }
 0xa47   : > { %6612 = vst [vmem:[%s8407_s7 + $0x80] sm:$0xff] %v6548_v36  ;;  %v6422_v10 = vmul.f32 %v11854_v15, %v6356_v25  ;;  %v6126_v0 = vpop.permute.xlu1 %6125  ;;  %v5857_v36 = vld [vmem:[#allocation4 + $0x8] sm:$0xff]  ;;  %v6496_v25 = vld [vmem:[%s8390_s6 + $0xe0] sm:$0xff] }
 0xa48   : > { %v6551_v43 = vadd.f32 %v6487_v11, %v6423_v56  ;;  %v6359_v21 = vmul.f32 %v6126_v0, %v5847_v19  ;;  %v6121_v35 = vpop.permute.xlu0 %6120  ;;  %v5856_v19 = vld [vmem:[#allocation4 + $0xf0] sm:$0xff] }
 0xa49   : > { %v6550_v40 = vadd.f32 %v6486_v9, %v6422_v10  ;;  %v6358_v27 = vmul.f32 %v6121_v35, %v5846_v13 }
 0xa4a   : > { %6615 = vst [vmem:[%s8407_s7 + $0x98] sm:$0xff] %v6551_v43  ;;  %v6425_v54 = vmul.f32 %v11854_v15, %v6359_v21  ;;  %v6499_v21 = vld [vmem:[%s8390_s6 + $0xf8] sm:$0xff] }
 0xa4b   : > { %6614 = vst [vmem:[%s8407_s7 + $0x90] sm:$0xff] %v6550_v40  ;;  %v6424_v18 = vmul.f32 %v11854_v15, %v6358_v27  ;;  %v6136_v8 = vpop.permute.xlu1 %6135  ;;  %v5859_v40 = vld [vmem:[#allocation4 + $0x1d0] sm:$0xff] }
 0xa4c   : > { %v6553_v7 = vadd.f32 %v6489_v14, %v6425_v54  ;;  %v6361_v51 = vmul.f32 %v6136_v8, %v5849_v5  ;;  %v6131_v17 = vpop.permute.xlu0 %6130  ;;  %v6498_v27 = vld [vmem:[%s8390_s6 + $0xf0] sm:$0xff]  ;;  %v5858_v5 = vld [vmem:[#allocation4 + $0x148] sm:$0xff] }
 0xa4d   : > { %v6552_v16 = vadd.f32 %v6488_v46, %v6424_v18  ;;  %v6360_v22 = vmul.f32 %v6131_v17, %v5848_v63 }
 0xa4e   : > { %6617 = vst [vmem:[%s8407_s7 + $0xa8] sm:$0xff] %v6553_v7  ;;  %v6427_v62 = vmul.f32 %v11854_v15, %v6361_v51  ;;  %v6501_v51 = vld [vmem:[%s8390_s6 + $0x108] sm:$0xff] }
 0xa4f   : > { %6616 = vst [vmem:[%s8407_s7 + $0xa0] sm:$0xff] %v6552_v16  ;;  %v6426_v4 = vmul.f32 %v11854_v15, %v6360_v22  ;;  %v6146_v30 = vpop.permute.xlu1 %6145  ;;  %v5861_v16 = vld [vmem:[#allocation4 + $0xc8] sm:$0xff]  ;;  %v6500_v22 = vld [vmem:[%s8390_s6 + $0x100] sm:$0xff] }
 0xa50   : > { %v6555_v3 = vadd.f32 %v6491_v45, %v6427_v62  ;;  %v6363_v53 = vmul.f32 %v6146_v30, %v5851_v24  ;;  %v6141_v44 = vpop.permute.xlu0 %6140  ;;  %v5860_v24 = vld [vmem:[#allocation4 + $0x100] sm:$0xff] }
 0xa51   : > { %v6554_v49 = vadd.f32 %v6490_v31, %v6426_v4  ;;  %v6362_v57 = vmul.f32 %v6141_v44, %v5850_v61 }
 0xa52   : > { %6619 = vst [vmem:[%s8407_s7 + $0xb8] sm:$0xff] %v6555_v3  ;;  %v6429_v26 = vmul.f32 %v11854_v15, %v6363_v53  ;;  %v6503_v53 = vld [vmem:[%s8390_s6 + $0x118] sm:$0xff] }
 0xa53   : > { %6618 = vst [vmem:[%s8407_s7 + $0xb0] sm:$0xff] %v6554_v49  ;;  %v6428_v6 = vmul.f32 %v11854_v15, %v6362_v57  ;;  %v6156_v42 = vpop.permute.xlu1 %6155  ;;  %v5863_v49 = vld [vmem:[#allocation4 + $0x1f8] sm:$0xff]  ;;  %v6502_v57 = vld [vmem:[%s8390_s6 + $0x110] sm:$0xff] }
 0xa54   : > { %v6557_v58 = vadd.f32 %v6493_v59, %v6429_v26  ;;  %v6365_v33 = vmul.f32 %v6156_v42, %v5853_v41  ;;  %v6151_v32 = vpop.permute.xlu0 %6150  ;;  %v5862_v41 = vld [vmem:[#allocation4 + $0x40] sm:$0xff] }
 0xa55   : > { %v6556_v37 = vadd.f32 %v6492_v39, %v6428_v6  ;;  %v6364_v34 = vmul.f32 %v6151_v32, %v5852_v28 }
 0xa56   : > { %6621 = vst [vmem:[%s8407_s7 + $0xc8] sm:$0xff] %v6557_v58  ;;  %v6431_v47 = vmul.f32 %v11854_v15, %v6365_v33  ;;  %v6505_v33 = vld [vmem:[%s8390_s6 + $0x128] sm:$0xff] }
 0xa57   : > { %6620 = vst [vmem:[%s8407_s7 + $0xc0] sm:$0xff] %v6556_v37  ;;  %v6430_v52 = vmul.f32 %v11854_v15, %v6364_v34  ;;  %v6166_v20 = vpop.permute.xlu1 %6165  ;;  %v5865_v37 = vld [vmem:[#allocation4 + $0x128] sm:$0xff]  ;;  %v6504_v34 = vld [vmem:[%s8390_s6 + $0x120] sm:$0xff] }
 0xa58   : > { %v6559_v2 = vadd.f32 %v6495_v23, %v6431_v47  ;;  %v6367_v55 = vmul.f32 %v6166_v20, %v5855_v12  ;;  %v6161_v38 = vpop.permute.xlu0 %6160  ;;  %v5864_v12 = vld [vmem:[#allocation4 + $0x20] sm:$0xff] }
 0xa59   : > { %v6558_v48 = vadd.f32 %v6494_v60, %v6430_v52  ;;  %v6366_v1 = vmul.f32 %v6161_v38, %v5854_v29 }
 0xa5a   : > { %6623 = vst [vmem:[%s8407_s7 + $0xd8] sm:$0xff] %v6559_v2  ;;  %v6433_v11 = vmul.f32 %v11854_v15, %v6367_v55  ;;  %v6507_v55 = vld [vmem:[%s8390_s6 + $0x138] sm:$0xff] }
 0xa5b   : > { %6622 = vst [vmem:[%s8407_s7 + $0xd0] sm:$0xff] %v6558_v48  ;;  %v6432_v56 = vmul.f32 %v11854_v15, %v6366_v1  ;;  %v6176_v9 = vpop.permute.xlu1 %6175  ;;  %v5867_v48 = vld [vmem:[#allocation4 + $0x1f0] sm:$0xff] }
 0xa5c   : > { %v6561_v13 = vadd.f32 %v6497_v50, %v6433_v11  ;;  %v6369_v10 = vmul.f32 %v6176_v9, %v5857_v36  ;;  %v6171_v0 = vpop.permute.xlu0 %6170  ;;  %v6506_v1 = vld [vmem:[%s8390_s6 + $0x130] sm:$0xff]  ;;  %v5866_v36 = vld [vmem:[#allocation4 + $0x1a0] sm:$0xff] }
 0xa5d   : > { %v6560_v43 = vadd.f32 %v6496_v25, %v6432_v56  ;;  %v6368_v35 = vmul.f32 %v6171_v0, %v5856_v19 }
 0xa5e   : > { %6625 = vst [vmem:[%s8407_s7 + $0xe8] sm:$0xff] %v6561_v13  ;;  %v6435_v14 = vmul.f32 %v11854_v15, %v6369_v10  ;;  %v6509_v10 = vld [vmem:[%s8390_s6 + $0x148] sm:$0xff] }
 0xa5f   : > { %6624 = vst [vmem:[%s8407_s7 + $0xe0] sm:$0xff] %v6560_v43  ;;  %v6434_v54 = vmul.f32 %v11854_v15, %v6368_v35  ;;  %v6186_v46 = vpop.permute.xlu1 %6185  ;;  %v5869_v43 = vld [vmem:[#allocation4 + $0x78] sm:$0xff]  ;;  %v6508_v35 = vld [vmem:[%s8390_s6 + $0x140] sm:$0xff] }
 0xa60   : > { %v6563_v63 = vadd.f32 %v6499_v21, %v6435_v14  ;;  %v6371_v18 = vmul.f32 %v6186_v46, %v5859_v40  ;;  %v6181_v8 = vpop.permute.xlu0 %6180  ;;  %v5868_v40 = vld [vmem:[#allocation4 + $0xe8] sm:$0xff] }
 0xa61   : > { %v6562_v7 = vadd.f32 %v6498_v27, %v6434_v54  ;;  %v6370_v17 = vmul.f32 %v6181_v8, %v5858_v5 }
 0xa62   : > { %6627 = vst [vmem:[%s8407_s7 + $0xf8] sm:$0xff] %v6563_v63  ;;  %v6437_v45 = vmul.f32 %v11854_v15, %v6371_v18  ;;  %v6511_v18 = vld [vmem:[%s8390_s6 + $0x158] sm:$0xff] }
 0xa63   : > { %6626 = vst [vmem:[%s8407_s7 + $0xf0] sm:$0xff] %v6562_v7  ;;  %v6436_v62 = vmul.f32 %v11854_v15, %v6370_v17  ;;  %v6196_v31 = vpop.permute.xlu1 %6195  ;;  %v5871_v7 = vld [vmem:[#allocation4 + $0x90] sm:$0xff] }
 0xa64   : > { %v6565_v61 = vadd.f32 %v6501_v51, %v6437_v45  ;;  %v6373_v4 = vmul.f32 %v6196_v31, %v5861_v16  ;;  %v6191_v30 = vpop.permute.xlu0 %6190  ;;  %v6510_v17 = vld [vmem:[%s8390_s6 + $0x150] sm:$0xff] }
 0xa65   : > { %v6564_v3 = vadd.f32 %v6500_v22, %v6436_v62  ;;  %v6372_v44 = vmul.f32 %v6191_v30, %v5860_v24  ;;  %v5870_v16 = vld [vmem:[#allocation4 + $0x70] sm:$0xff] }
 0xa66   : > { %6629 = vst [vmem:[%s8407_s7 + $0x108] sm:$0xff] %v6565_v61  ;;  %v6439_v59 = vmul.f32 %v11854_v15, %v6373_v4  ;;  %v6513_v4 = vld [vmem:[%s8390_s6 + $0x168] sm:$0xff] }
 0xa67   : > { %6628 = vst [vmem:[%s8407_s7 + $0x100] sm:$0xff] %v6564_v3  ;;  %v6438_v26 = vmul.f32 %v11854_v15, %v6372_v44  ;;  %v6206_v39 = vpop.permute.xlu1 %6205  ;;  %v5873_v3 = vld [vmem:[#allocation4 + $0xd0] sm:$0xff]  ;;  %v6512_v44 = vld [vmem:[%s8390_s6 + $0x160] sm:$0xff] }
 0xa68   : > { %v6567_v28 = vadd.f32 %v6503_v53, %v6439_v59  ;;  %v6375_v6 = vmul.f32 %v6206_v39, %v5863_v49  ;;  %v6201_v42 = vpop.permute.xlu0 %6200  ;;  %v5872_v49 = vld [vmem:[#allocation4 + $0x1d8] sm:$0xff] }
 0xa69   : > { %v6566_v58 = vadd.f32 %v6502_v57, %v6438_v26  ;;  %v6374_v32 = vmul.f32 %v6201_v42, %v5862_v41 }
 0xa6a   : > { %6631 = vst [vmem:[%s8407_s7 + $0x118] sm:$0xff] %v6567_v28  ;;  %v6441_v23 = vmul.f32 %v11854_v15, %v6375_v6  ;;  %v6515_v6 = vld [vmem:[%s8390_s6 + $0x178] sm:$0xff] }
 0xa6b   : > { %6630 = vst [vmem:[%s8407_s7 + $0x110] sm:$0xff] %v6566_v58  ;;  %v6440_v47 = vmul.f32 %v11854_v15, %v6374_v32  ;;  %v6216_v60 = vpop.permute.xlu1 %6215  ;;  %v5875_v58 = vld [vmem:[#allocation4 + $0x88] sm:$0xff]  ;;  %v6514_v32 = vld [vmem:[%s8390_s6 + $0x170] sm:$0xff] }
 0xa6c   : > { %v6569_v29 = vadd.f32 %v6505_v33, %v6441_v23  ;;  %v6377_v52 = vmul.f32 %v6216_v60, %v5865_v37  ;;  %v6211_v20 = vpop.permute.xlu0 %6210  ;;  %v5874_v37 = vld [vmem:[#allocation4 + $0xb8] sm:$0xff] }
 0xa6d   : > { %v6568_v2 = vadd.f32 %v6504_v34, %v6440_v47  ;;  %v6376_v38 = vmul.f32 %v6211_v20, %v5864_v12 }
 0xa6e   : > { %6633 = vst [vmem:[%s8407_s7 + $0x128] sm:$0xff] %v6569_v29  ;;  %v6443_v50 = vmul.f32 %v11854_v15, %v6377_v52  ;;  %v6517_v52 = vld [vmem:[%s8390_s6 + $0x188] sm:$0xff] }
 0xa6f   : > { %6632 = vst [vmem:[%s8407_s7 + $0x120] sm:$0xff] %v6568_v2  ;;  %v6442_v11 = vmul.f32 %v11854_v15, %v6376_v38  ;;  %v6226_v25 = vpop.permute.xlu1 %6225  ;;  %v5877_v2 = vld [vmem:[#allocation4 + $0x1c8] sm:$0xff]  ;;  %v6516_v38 = vld [vmem:[%s8390_s6 + $0x180] sm:$0xff] }
 0xa70   : > { %v6571_v19 = vadd.f32 %v6507_v55, %v6443_v50  ;;  %v6379_v56 = vmul.f32 %v6226_v25, %v5867_v48  ;;  %v6221_v9 = vpop.permute.xlu0 %6220  ;;  %v5876_v48 = vld [vmem:[#allocation4 + $0xa8] sm:$0xff] }
 0xa71   : > { %v6570_v13 = vadd.f32 %v6506_v1, %v6442_v11  ;;  %v6378_v0 = vmul.f32 %v6221_v9, %v5866_v36 }
 0xa72   : > { %6635 = vst [vmem:[%s8407_s7 + $0x138] sm:$0xff] %v6571_v19  ;;  %v6445_v21 = vmul.f32 %v11854_v15, %v6379_v56  ;;  %v6519_v56 = vld [vmem:[%s8390_s6 + $0x198] sm:$0xff] }
 0xa73   : > { %6634 = vst [vmem:[%s8407_s7 + $0x130] sm:$0xff] %v6570_v13  ;;  %v6444_v14 = vmul.f32 %v11854_v15, %v6378_v0  ;;  %v6236_v27 = vpop.permute.xlu1 %6235  ;;  %v5879_v13 = vld [vmem:[#allocation4 + $0x178] sm:$0xff]  ;;  %v6518_v0 = vld [vmem:[%s8390_s6 + $0x190] sm:$0xff] }
 0xa74   : > { %v6573_v5 = vadd.f32 %v6509_v10, %v6445_v21  ;;  %v6381_v54 = vmul.f32 %v6236_v27, %v5869_v43  ;;  %v6231_v46 = vpop.permute.xlu0 %6230  ;;  %v5878_v43 = vld [vmem:[#allocation4 + $0x170] sm:$0xff] }
 0xa75   : > { %v6572_v63 = vadd.f32 %v6508_v35, %v6444_v14  ;;  %v6380_v8 = vmul.f32 %v6231_v46, %v5868_v40 }
 0xa76   : > { %6637 = vst [vmem:[%s8407_s7 + $0x148] sm:$0xff] %v6573_v5  ;;  %v6447_v51 = vmul.f32 %v11854_v15, %v6381_v54  ;;  %v6521_v54 = vld [vmem:[%s8390_s6 + $0x1a8] sm:$0xff] }
 0xa77   : > { %6636 = vst [vmem:[%s8407_s7 + $0x140] sm:$0xff] %v6572_v63  ;;  %v6446_v45 = vmul.f32 %v11854_v15, %v6380_v8  ;;  %v6246_v22 = vpop.permute.xlu1 %6245  ;;  %v5881_v63 = vld [vmem:[#allocation4 + $0x190] sm:$0xff]  ;;  %v6520_v8 = vld [vmem:[%s8390_s6 + $0x1a0] sm:$0xff] }
 0xa78   : > { %v6575_v24 = vadd.f32 %v6511_v18, %v6447_v51  ;;  %v6383_v62 = vmul.f32 %v6246_v22, %v5871_v7  ;;  %v6241_v31 = vpop.permute.xlu0 %6240  ;;  %v5880_v7 = vld [vmem:[#allocation4 + $0x68] sm:$0xff] }
 0xa79   : > { %v6574_v61 = vadd.f32 %v6510_v17, %v6446_v45  ;;  %v6382_v30 = vmul.f32 %v6241_v31, %v5870_v16 }
 0xa7a   : > { %6639 = vst [vmem:[%s8407_s7 + $0x158] sm:$0xff] %v6575_v24  ;;  %v6449_v53 = vmul.f32 %v11854_v15, %v6383_v62  ;;  %v6523_v62 = vld [vmem:[%s8390_s6 + $0x1b8] sm:$0xff] }
 0xa7b   : > { %6638 = vst [vmem:[%s8407_s7 + $0x150] sm:$0xff] %v6574_v61  ;;  %v6448_v59 = vmul.f32 %v11854_v15, %v6382_v30  ;;  %v6256_v57 = vpop.permute.xlu1 %6255  ;;  %v5883_v61 = vld [vmem:[#allocation4 + $0x38] sm:$0xff]  ;;  %v6522_v30 = vld [vmem:[%s8390_s6 + $0x1b0] sm:$0xff] }
 0xa7c   : > { %v6577_v41 = vadd.f32 %v6513_v4, %v6449_v53  ;;  %v6385_v26 = vmul.f32 %v6256_v57, %v5873_v3  ;;  %v6251_v39 = vpop.permute.xlu0 %6250  ;;  %v5882_v3 = vld [vmem:[#allocation4 + $0x198] sm:$0xff] }
 0xa7d   : > { %v6576_v28 = vadd.f32 %v6512_v44, %v6448_v59  ;;  %v6384_v42 = vmul.f32 %v6251_v39, %v5872_v49 }
 0xa7e   : > { %6641 = vst [vmem:[%s8407_s7 + $0x168] sm:$0xff] %v6577_v41  ;;  %v6451_v33 = vmul.f32 %v11854_v15, %v6385_v26  ;;  %v6525_v26 = vld [vmem:[%s8390_s6 + $0x1c8] sm:$0xff] }
 0xa7f   : > { %6640 = vst [vmem:[%s8407_s7 + $0x160] sm:$0xff] %v6576_v28  ;;  %v6450_v23 = vmul.f32 %v11854_v15, %v6384_v42  ;;  %v6266_v34 = vpop.permute.xlu1 %6265  ;;  %v5885_v28 = vld [vmem:[#allocation4 + $0x1c0] sm:$0xff] }
 0xa80   : > { %v6579_v12 = vadd.f32 %v6515_v6, %v6451_v33  ;;  %v6387_v47 = vmul.f32 %v6266_v34, %v5875_v58  ;;  %v6261_v60 = vpop.permute.xlu0 %6260  ;;  %v6524_v42 = vld [vmem:[%s8390_s6 + $0x1c0] sm:$0xff] }
 0xa81   : > { %v6578_v29 = vadd.f32 %v6514_v32, %v6450_v23  ;;  %v6386_v20 = vmul.f32 %v6261_v60, %v5874_v37  ;;  %v5884_v58 = vld [vmem:[#allocation4 + $0xc0] sm:$0xff] }
 0xa82   : > { %6643 = vst [vmem:[%s8407_s7 + $0x178] sm:$0xff] %v6579_v12  ;;  %v6453_v55 = vmul.f32 %v11854_v15, %v6387_v47  ;;  %v6527_v47 = vld [vmem:[%s8390_s6 + $0x1d8] sm:$0xff] }
 0xa83   : > { %6642 = vst [vmem:[%s8407_s7 + $0x170] sm:$0xff] %v6578_v29  ;;  %v6452_v50 = vmul.f32 %v11854_v15, %v6386_v20  ;;  %v6276_v1 = vpop.permute.xlu1 %6275  ;;  %v5887_v29 = vld [vmem:[#allocation4 + $0x10] sm:$0xff] }
 0xa84   : > { %v6581_v36 = vadd.f32 %v6517_v52, %v6453_v55  ;;  %v6389_v11 = vmul.f32 %v6276_v1, %v5877_v2  ;;  %v6271_v25 = vpop.permute.xlu0 %6270  ;;  %v6526_v20 = vld [vmem:[%s8390_s6 + $0x1d0] sm:$0xff]  ;;  %v5886_v2 = vld [vmem:[#allocation4 + $0x158] sm:$0xff] }
 0xa85   : > { %v6580_v19 = vadd.f32 %v6516_v38, %v6452_v50  ;;  %v6388_v9 = vmul.f32 %v6271_v25, %v5876_v48 }
 0xa86   : > { %6645 = vst [vmem:[%s8407_s7 + $0x188] sm:$0xff] %v6581_v36  ;;  %v6455_v10 = vmul.f32 %v11854_v15, %v6389_v11  ;;  %v6529_v11 = vld [vmem:[%s8390_s6 + $0x1e8] sm:$0xff] }
 0xa87   : > { %6644 = vst [vmem:[%s8407_s7 + $0x180] sm:$0xff] %v6580_v19  ;;  %v6454_v21 = vmul.f32 %v11854_v15, %v6388_v9  ;;  %v6286_v35 = vpop.permute.xlu1 %6285  ;;  %v5889_v19 = vld [vmem:[#allocation4 + $0xa0] sm:$0xff] }
 0xa88   : > { %v6583_v40 = vadd.f32 %v6519_v56, %v6455_v10  ;;  %v6391_v14 = vmul.f32 %v6286_v35, %v5879_v13  ;;  %v6281_v27 = vpop.permute.xlu0 %6280  ;;  %v6528_v9 = vld [vmem:[%s8390_s6 + $0x1e0] sm:$0xff]  ;;  %v5888_v13 = vld [vmem:[#allocation4 + $0x58] sm:$0xff] }
 0xa89   : > { %v6582_v5 = vadd.f32 %v6518_v0, %v6454_v21  ;;  %v6390_v46 = vmul.f32 %v6281_v27, %v5878_v43 }
 0xa8a   : > { %6647 = vst [vmem:[%s8407_s7 + $0x198] sm:$0xff] %v6583_v40  ;;  %v6457_v18 = vmul.f32 %v11854_v15, %v6391_v14  ;;  %v6531_v14 = vld [vmem:[%s8390_s6 + $0x1f8] sm:$0xff] }
 0xa8b   : > { %6646 = vst [vmem:[%s8407_s7 + $0x190] sm:$0xff] %v6582_v5  ;;  %v6456_v51 = vmul.f32 %v11854_v15, %v6390_v46  ;;  %v6296_v17 = vpop.permute.xlu1 %6295 }
 0xa8c   : > { %v6585_v16 = vadd.f32 %v6521_v54, %v6457_v18  ;;  %v6393_v45 = vmul.f32 %v6296_v17, %v5881_v63  ;;  %v6291_v22 = vpop.permute.xlu0 %6290  ;;  %v6530_v54 = vld [vmem:[%s8390_s6 + $0x1f0] sm:$0xff] }
 0xa8d   : > { %v6584_v24 = vadd.f32 %v6520_v8, %v6456_v51  ;;  %v6392_v31 = vmul.f32 %v6291_v22, %v5880_v7 }
 0xa8e   : > { %6649 = vst [vmem:[%s8407_s7 + $0x1a8] sm:$0xff] %v6585_v16  ;;  %v6459_v4 = vmul.f32 %v11854_v15, %v6393_v45 }
 0xa8f   : > { %6648 = vst [vmem:[%s8407_s7 + $0x1a0] sm:$0xff] %v6584_v24  ;;  %v6458_v53 = vmul.f32 %v11854_v15, %v6392_v31  ;;  %v6306_v44 = vpop.permute.xlu1 %6305 }
 0xa90   : > { %v6587_v49 = vadd.f32 %v6523_v62, %v6459_v4  ;;  %v6395_v59 = vmul.f32 %v6306_v44, %v5883_v61  ;;  %v6301_v57 = vpop.permute.xlu0 %6300 }
 0xa91   : > { %v6586_v41 = vadd.f32 %v6522_v30, %v6458_v53  ;;  %v6394_v39 = vmul.f32 %v6301_v57, %v5882_v3 }
 0xa92   : > { %6651 = vst [vmem:[%s8407_s7 + $0x1b8] sm:$0xff] %v6587_v49  ;;  %v6461_v6 = vmul.f32 %v11854_v15, %v6395_v59 }
 0xa93   : > { %6650 = vst [vmem:[%s8407_s7 + $0x1b0] sm:$0xff] %v6586_v41  ;;  %v6460_v33 = vmul.f32 %v11854_v15, %v6394_v39  ;;  %v6316_v32 = vpop.permute.xlu1 %6315 }
 0xa94   : > { %v6589_v37 = vadd.f32 %v6525_v26, %v6461_v6  ;;  %v6397_v23 = vmul.f32 %v6316_v32, %v5885_v28  ;;  %v6311_v34 = vpop.permute.xlu0 %6310 }
 0xa95   : > { %v6588_v12 = vadd.f32 %v6524_v42, %v6460_v33  ;;  %v6396_v60 = vmul.f32 %v6311_v34, %v5884_v58 }
 0xa96   : > { %6653 = vst [vmem:[%s8407_s7 + $0x1c8] sm:$0xff] %v6589_v37  ;;  %v6463_v52 = vmul.f32 %v11854_v15, %v6397_v23 }
 0xa97   : > { %6652 = vst [vmem:[%s8407_s7 + $0x1c0] sm:$0xff] %v6588_v12  ;;  %v6462_v55 = vmul.f32 %v11854_v15, %v6396_v60  ;;  %v6326_v38 = vpop.permute.xlu1 %6325 }
 0xa98   : > { %v6591_v48 = vadd.f32 %v6527_v47, %v6463_v52  ;;  %v6399_v50 = vmul.f32 %v6326_v38, %v5887_v29  ;;  %v6321_v1 = vpop.permute.xlu0 %6320 }
 0xa99   : > { %v6590_v36 = vadd.f32 %v6526_v20, %v6462_v55  ;;  %v6398_v25 = vmul.f32 %v6321_v1, %v5886_v2 }
 0xa9a   : > { %6655 = vst [vmem:[%s8407_s7 + $0x1d8] sm:$0xff] %v6591_v48  ;;  %v6465_v56 = vmul.f32 %v11854_v15, %v6399_v50 }
 0xa9b   : > { %6654 = vst [vmem:[%s8407_s7 + $0x1d0] sm:$0xff] %v6590_v36  ;;  %v6464_v10 = vmul.f32 %v11854_v15, %v6398_v25  ;;  %v6336_v0 = vpop.permute.xlu1 %6335 }
 0xa9c   : > { %v6593_v43 = vadd.f32 %v6529_v11, %v6465_v56  ;;  %v6401_v21 = vmul.f32 %v6336_v0, %v5889_v19  ;;  %v6331_v35 = vpop.permute.xlu0 %6330 }
 0xa9d   : > { %v6592_v40 = vadd.f32 %v6528_v9, %v6464_v10  ;;  %v6400_v27 = vmul.f32 %v6331_v35, %v5888_v13 }
 0xa9e   : > { %6657 = vst [vmem:[%s8407_s7 + $0x1e8] sm:$0xff] %v6593_v43  ;;  %v6467_v5 = vmul.f32 %v11854_v15, %v6401_v21 }
 0xa9f   : > { %6656 = vst [vmem:[%s8407_s7 + $0x1e0] sm:$0xff] %v6592_v40  ;;  %v6466_v46 = vmul.f32 %v11854_v15, %v6400_v27 }
 0xaa0   : > { %v6595_v63 = vadd.f32 %v6531_v14, %v6467_v5 }
 0xaa1   : > { %v6594_v18 = vadd.f32 %v6530_v54, %v6466_v46 }
 0xaa2   : > { %6659 = vst [vmem:[%s8407_s7 + $0x1f8] sm:$0xff] %v6595_v63 }
 0xaa3   : > { %6658 = vst [vmem:[%s8407_s7 + $0x1f0] sm:$0xff] %v6594_v18 }
 0xaa4 PF: > { %s7000_s23 = sshll.u32 %s8233_s25, 7  ;;  %s6676_s27 = sshll.u32 %s8407_s7, 4  ;;  %s12051_s27 = int_to_ptr.vmem [resolvable:$true] %s6676_s27 }
 0xaa5   : > { %s6673_s26 = sadd.s32 %s7000_s23, %s8378_s17  ;;  %s13501_s15 = sand.u32 1, %s8217_s21  }
 0xaa6   : > { %s7001_s28 = sshll.u32 %s6673_s26, 7  ;;  %s12060_s16 = scalar_lea.sflag [#allocation7], %s13501_s15 }
 0xaa7   : > { %s12056_s10 = scalar_lea.hbm %s12122_s5, %s7001_s28  ;;  %s8141_s18 = scalar_lea.vmem %s12051_s27, 8192 }
 0xaa8   : > { %p8142_p4 = scmp.ne.s32.totalorder %s12051_s27, %s8141_s18  ;;  %s8255_s25 = smov [#allocation6]  }
 0xaa9   : > { %s8145_s17 = sshll.u32 %s8255_s25, 4  ;;  %s8146_s17 = int_to_ptr.vmem [resolvable:$false] %s8145_s17 }
 0xaaa   : > { %p8143_p5 = pnand %p8142_p4, %p8353_p6  ;;  %s8147_s30 = scalar_lea.vmem %s8146_s17, 16384 }
 0xaab   : > { %p8148_p9 = scmp.lt.s32.totalorder %s12051_s27, %s8146_s17  ;;  %p8149_p10 = scmp.lt.s32.totalorder %s8147_s30, %s8141_s18 }
 0xaac   : > { %p8144_p8 = pneg %p8143_p5 }
 0xaad   : > { %p8150_p11 = por %p8149_p10, %p8148_p9 }
 0xaaf   : > { %p8151_p12 = pnand %p8150_p11, %p8144_p8 }
 0xab1   : > { %8154 = shalt.err (!%p8151_p12)
}
 0xab2   : > { %s8155_s11 = scalar_lea.hbm %s12056_s10, 8192  ;;  %s8159_s24 = scalar_lea.hbm %s12122_s5, 32768 }
 0xab3   : > { %p8156_p13 = scmp.ne.s32.totalorder %s12056_s10, %s8155_s11  ;;  %p8160_p2 = scmp.lt.s32.totalorder %s12056_s10, %s12122_s5 }
 0xab4   : > { %p8161_p3 = scmp.lt.s32.totalorder %s8159_s24, %s8155_s11 }
 0xab5   : > { %p8157_p0 = pnand %p8156_p13, %p8353_p6 }
 0xab6   : > { %p8162_p4 = por %p8161_p3, %p8160_p2 }
 0xab7   : > { %p8158_p1 = pneg %p8157_p0 }
 0xab9   : > { %p8163_p5 = pnand %p8162_p4, %p8158_p1 }
 0xabb   : > { %8166 = shalt.err (!%p8163_p5)
}
 0xabc   : > { %s8256_s12 = smov 128   ;;  %s8257_s7 = smov 8  }
 0xabd   : > { %7180 = dma.vmem_to_hbm [thread:$0]  (%p8353_p6), %s12051_s27, 8192, %s12056_s10, %s12060_s16, %s8256_s12, %s8256_s12, %s8257_s7  }
 0xabe PF: > { %p7186_p8 = scmp.ge.s32.totalorder %s8249_s4, 2  ;;  %s6691_s23 = sand.u32 1, %s8213_s20  }
 0xabf   : > { %s6692_s26 = scalar_lea.sflag [#allocation7], %s6691_s23 }
 0xac0   : > { %p7183_p9 = pnand %p7186_p8, %p8360_p7 }
 0xac2   : > { %p7184_p10 = pneg %p7183_p9 }
 0xac4   : > { %8208 = dma.done.wait (%p7184_p10), %s6692_s26, 8192  }
 0xac5   : > { %8210 = vsyncadd (%p7184_p10), %s6692_s26, 4294959104  ;;  %s19_s4 = sadd.s32 1, %s8249_s4   ;;  %s13503_s28 = sld [smem:[#allocation9_spill]] }
 0xac6   : > { %p16_p11 = scmp.ge.s32.totalorder %s19_s4, 10   ;;  %s13504_s22 = sld [smem:[#allocation17_spill]] }
 0xac7   : > { %s13505_s23 = sld [smem:[#allocation10_spill]]  ;;  %s13511_s20 = smov %s8217_s21 }
 0xac8   : > { %s13506_s24 = sld [smem:[#allocation11_spill]] }
 0xac9   : > { %s13507_s25 = sld [smem:[#allocation12_spill]] }
 0xaca   : > { %s13508_s26 = sld [smem:[#allocation13_spill]] }
 0xacb   : > { %s13509_s27 = sld [smem:[#allocation14_spill]]  ;;  %s13512_s21 = smov %s13503_s28 }
 0xacc   : > { %s13510_s9 = sld [smem:[#allocation16_spill]] }
 0xace   :  { %18 = sbr.rel (!%p16_p11) target bundleno = 8 (0x8), region = 92 }
 0xad2   : > { %s13513_s28 = smov %s13510_s9 }
 0xad3   :  { %6697 = vsyncpa [#allocation7], 1 }
 0xad4   :  { %6699 = vsyncpa [#allocation7 + $0x1], 1 }

</bundles_post_ra>
